<compile_context>
chip_gen: v7x
topology: tpu7x:2x2x1
jax: 0.10.0
libtpu: 0.0.40
codegen_flags: <defaults>
</compile_context>

<pallas_src>
import functools

import jax
import jax.numpy as jnp
from jax.experimental import pallas as pl
from jax.experimental.pallas import tpu as pltpu


def ips_classify_kernel(
    # graph data / structure matrices
    x_ref, ea_ref, s_src_ref, scat_ref, inv_deg_ref, pool_ref, inv_cnt_ref,
    # lin0
    w0_ref, b0_ref,
    # edge network (nn inside NNConv): Linear(e,h) -> ReLU -> Linear(h, h*h)
    we1_ref, be1_ref, we2_ref, be2_ref,
    # NNConv root weight + bias
    wroot_ref, bconv_ref,
    # GRU fused weights [h,3h] (gate order r|z|n) and biases [1,3h]
    wih_ref, bih_ref, whh_ref, bhh_ref,
    # head
    wl1_ref, bl1_ref, wl2_ref, bl2_ref,
    # output [num_graphs, 2]
    out_ref,
    # VMEM scratch for Theta [E, h*h] f32
    theta_ref,
    *, times):
  f32 = jnp.float32
  bf16 = jnp.bfloat16
  h = wroot_ref.shape[0]

  def dot(a, b):
    return jnp.dot(a, b, preferred_element_type=f32)

  # ---- lin0: Linear(i_dim, h) + ReLU ----
  out0 = jnp.maximum(dot(x_ref[...], w0_ref[...]) + b0_ref[...], 0.0)    # [N,h] f32

  # ---- edge network Theta(e): loop-invariant, stash in VMEM scratch ----
  t1 = jnp.maximum(dot(ea_ref[...], we1_ref[...]) + be1_ref[...], 0.0)   # [E,h] f32
  theta_ref[...] = dot(t1.astype(bf16), we2_ref[...]) + be2_ref[...]     # [E,h*h] f32

  # ---- hoist only the SMALL loop-invariant weights ----
  w_root, b_conv = wroot_ref[...], bconv_ref[...]
  w_ih, b_ih = wih_ref[...], bih_ref[...]
  w_hh, b_hh = whh_ref[...], bhh_ref[...]
  inv_deg = inv_deg_ref[...]                                             # [N,1] f32

  def body(_, out):
    # out == GRU hidden state (they are identical with seq_len == 1)
    out_b = out.astype(bf16)

    # Three independent matmuls on `out` kept adjacent (MXU interleave):
    x_src = dot(s_src_ref[...], out_b)          # [E,h] f32  gather source feats
    root = dot(out_b, w_root)                   # [N,h] f32  NNConv root term
    gh = dot(out_b, w_hh) + b_hh                # [N,3h] f32 GRU hidden gates

    # ---- per-edge contraction, VPU only (no expand/reduce matmuls) ----
    theta = theta_ref[...]                      # reload per iteration
    msg = x_src[:, 0:1] * theta[:, 0:h]
    for i in range(1, h):
      msg = msg + x_src[:, i:i + 1] * theta[:, i * h:(i + 1) * h]        # [E,h] f32

    # ---- mean aggregation: exact 0/1 scatter matmul, f32 1/deg scale ----
    aggr = dot(scat_ref[...], msg.astype(bf16)) * inv_deg                # [N,h] f32
    m = jnp.maximum(aggr + root + b_conv, 0.0)

    # ---- GRU cell, fused gates, PyTorch order (r, z, n) ----
    gi = dot(m.astype(bf16), w_ih) + b_ih       # [N,3h] f32
    r = jax.nn.sigmoid(gi[:, 0:h] + gh[:, 0:h])
    z = jax.nn.sigmoid(gi[:, h:2 * h] + gh[:, h:2 * h])
    n = jnp.tanh(gi[:, 2 * h:3 * h] + r * gh[:, 2 * h:3 * h])
    return (1.0 - z) * n + z * out

  out = jax.lax.fori_loop(0, times, body, out0, unroll=True)

  # ---- global_mean_pool: exact 0/1 pool matmul, f32 1/count scale ----
  pooled = dot(pool_ref[...], out.astype(bf16)) * inv_cnt_ref[...]       # [G,h] f32

  # ---- lin1: Linear(h,h) -> ReLU -> Linear(h,2) ----
  hdn = jnp.maximum(dot(pooled.astype(bf16), wl1_ref[...]) + bl1_ref[...], 0.0)
  logits = dot(hdn.astype(bf16), wl2_ref[...]) + bl2_ref[...]

  # ---- log_softmax over dim=1 ----
  mx = jnp.max(logits, axis=1, keepdims=True)
  shifted = logits - mx
  out_ref[...] = shifted - jnp.log(jnp.sum(jnp.exp(shifted), axis=1, keepdims=True))


def init_params(key, i_dim, h_dim, e_dim):
  ks = jax.random.split(key, 16)
  sc = 0.1

  def w(k, shp):
    return sc * jax.random.normal(k, shp, jnp.float32)

  return dict(
      w0=w(ks[0], (i_dim, h_dim)), b0=w(ks[1], (1, h_dim)),
      we1=w(ks[2], (e_dim, h_dim)), be1=w(ks[3], (1, h_dim)),
      we2=w(ks[4], (h_dim, h_dim * h_dim)), be2=w(ks[5], (1, h_dim * h_dim)),
      w_root=w(ks[6], (h_dim, h_dim)), b_conv=w(ks[7], (1, h_dim)),
      w_ih=w(ks[8], (h_dim, 3 * h_dim)), b_ih=w(ks[9], (1, 3 * h_dim)),
      w_hh=w(ks[10], (h_dim, 3 * h_dim)), b_hh=w(ks[11], (1, 3 * h_dim)),
      wl1=w(ks[12], (h_dim, h_dim)), bl1=w(ks[13], (1, h_dim)),
      wl2=w(ks[14], (h_dim, 2)), bl2=w(ks[15], (1, 2)),
  )


def _vmem_capacity_bytes():
  try:
    return int(pltpu.get_tpu_info().vmem_capacity_bytes)
  except Exception:
    return 64 * 1024 * 1024   # conservative fallback (v7x per-TC VMEM)


def ips_classify_net(x, edge_index, edge_attr, batch_vec, params,
                     *, num_graphs, times):
  f32, bf16 = jnp.float32, jnp.bfloat16
  N, i_dim = x.shape
  E, e_dim = edge_attr.shape
  h = params["w_root"].shape[0]
  G = num_graphs

  # ---- glue: exact 0/1 gather / scatter / pool matrices + f32 scales ----
  src, dst = edge_index[0], edge_index[1]           # PyG flow: source -> target
  s_src = jax.nn.one_hot(src, N, dtype=bf16)                      # [E, N] 0/1
  t_dst = jax.nn.one_hot(dst, N, dtype=f32)                       # [E, N]
  scat01 = t_dst.T.astype(bf16)                                   # [N, E] 0/1
  deg = jnp.sum(t_dst, axis=0)                                    # [N]
  inv_deg = (1.0 / jnp.maximum(deg, 1.0))[:, None].astype(f32)    # [N, 1]
  g_onehot = jax.nn.one_hot(batch_vec, G, dtype=f32)              # [N, G]
  pool01 = g_onehot.T.astype(bf16)                                # [G, N] 0/1
  cnt = jnp.sum(g_onehot, axis=0)                                 # [G]
  inv_cnt = (1.0 / jnp.maximum(cnt, 1.0))[:, None].astype(f32)    # [G, 1]

  def b(v):  # bf16 only for tensors feeding the MXU (f32 accumulation in-kernel)
    return v.astype(bf16)

  args = (b(x), b(edge_attr), s_src, scat01, inv_deg, pool01, inv_cnt,
          b(params["w0"]), params["b0"],
          b(params["we1"]), params["be1"], b(params["we2"]), params["be2"],
          b(params["w_root"]), params["b_conv"],
          b(params["w_ih"]), params["b_ih"], b(params["w_hh"]), params["b_hh"],
          b(params["wl1"]), params["bl1"], b(params["wl2"]), params["bl2"])

  # ---- updated advisory cost estimate (expand matmul removed) ----
  per_iter_flops = (2 * E * N * h          # dense source gather
                    + 2 * E * h * h        # per-edge contraction (VPU)
                    + 2 * N * E * h        # mean aggregation (scatter matmul)
                    + 2 * N * h * h        # root weight
                    + 12 * N * h * h)      # 2 fused GRU gate matmuls ([h,3h])
  flops = (2 * N * i_dim * h + 2 * E * e_dim * h + 2 * E * h * (h * h)
           + times * per_iter_flops + 2 * G * N * h + 2 * G * h * h + 2 * G * h * 2)
  transcendentals = times * N * 3 * h + G * 2
  bytes_accessed = sum(int(a.size) * a.dtype.itemsize for a in args) + G * 2 * 4
  cost = pl.CostEstimate(flops=int(flops), transcendentals=int(transcendentals),
                         bytes_accessed=int(bytes_accessed))

  # ---- VMEM limit sized from the real footprint, gated per generation ----
  footprint = (sum(int(a.size) * a.dtype.itemsize for a in args)
               + E * h * h * 4        # theta scratch
               + G * 2 * 4)           # output
  cap = _vmem_capacity_bytes()
  vmem_limit = int(min(cap * 3 // 4, max(32 * 1024 * 1024, 4 * footprint)))

  kernel = functools.partial(ips_classify_kernel, times=times)
  return pl.pallas_call(
      kernel,
      out_shape=jax.ShapeDtypeStruct((G, 2), f32),
      in_specs=[pl.BlockSpec(memory_space=pltpu.MemorySpace.VMEM)] * len(args),
      out_specs=pl.BlockSpec(memory_space=pltpu.MemorySpace.VMEM),
      scratch_shapes=[pltpu.VMEM((E, h * h), jnp.float32)],
      compiler_params=pltpu.CompilerParams(vmem_limit_bytes=vmem_limit),
      cost_estimate=cost,
  )(*args)


if __name__ == "__main__":
  i_dim, h_dim, e_dim, times = 8, 32, 4, 3
  nodes_per_graph, num_graphs = 8, 2
  N = nodes_per_graph * num_graphs

  key = jax.random.PRNGKey(0)
  kx, ke, kp = jax.random.split(key, 3)

  x = jax.random.normal(kx, (N, i_dim), jnp.float32)

  # two disjoint graphs: each node sends edges to (n+1) and (n+3) within its graph
  src, dst = [], []
  for g in range(num_graphs):
    base = g * nodes_per_graph
    for n in range(nodes_per_graph):
      for off in (1, 3):
        src.append(base + n)
        dst.append(base + (n + off) % nodes_per_graph)
  edge_index = jnp.array([src, dst], dtype=jnp.int32)           # [2, E]
  E = edge_index.shape[1]
  edge_attr = jax.random.normal(ke, (E, e_dim), jnp.float32)    # [E, e_dim]
  batch_vec = jnp.repeat(jnp.arange(num_graphs, dtype=jnp.int32), nodes_per_graph)

  params = init_params(kp, i_dim, h_dim, e_dim)

  out = ips_classify_net(x, edge_index, edge_attr, batch_vec, params,
                         num_graphs=num_graphs, times=times)
  out = jax.block_until_ready(out)
  assert out.shape == (num_graphs, 2) and out.dtype == jnp.float32
  assert bool(jnp.all(jnp.isfinite(out)))
  print("KERNEL_OK")
</pallas_src>

<mosaic_0001>
module attributes {stable_mosaic.version = 11 : i64} {
  func.func @ips_classify_kernel(%arg0: memref<16x8xbf16, #tpu.memory_space<vmem>>, %arg1: memref<32x4xbf16, #tpu.memory_space<vmem>>, %arg2: memref<32x16xbf16, #tpu.memory_space<vmem>>, %arg3: memref<16x32xbf16, #tpu.memory_space<vmem>>, %arg4: memref<16x1xf32, #tpu.memory_space<vmem>>, %arg5: memref<2x16xbf16, #tpu.memory_space<vmem>>, %arg6: memref<2x1xf32, #tpu.memory_space<vmem>>, %arg7: memref<8x32xbf16, #tpu.memory_space<vmem>>, %arg8: memref<1x32xf32, #tpu.memory_space<vmem>>, %arg9: memref<4x32xbf16, #tpu.memory_space<vmem>>, %arg10: memref<1x32xf32, #tpu.memory_space<vmem>>, %arg11: memref<32x1024xbf16, #tpu.memory_space<vmem>>, %arg12: memref<1x1024xf32, #tpu.memory_space<vmem>>, %arg13: memref<32x32xbf16, #tpu.memory_space<vmem>>, %arg14: memref<1x32xf32, #tpu.memory_space<vmem>>, %arg15: memref<32x96xbf16, #tpu.memory_space<vmem>>, %arg16: memref<1x96xf32, #tpu.memory_space<vmem>>, %arg17: memref<32x96xbf16, #tpu.memory_space<vmem>>, %arg18: memref<1x96xf32, #tpu.memory_space<vmem>>, %arg19: memref<32x32xbf16, #tpu.memory_space<vmem>>, %arg20: memref<1x32xf32, #tpu.memory_space<vmem>>, %arg21: memref<32x2xbf16, #tpu.memory_space<vmem>>, %arg22: memref<1x2xf32, #tpu.memory_space<vmem>>, %arg23: memref<2x2xf32, #tpu.memory_space<vmem>>, %arg24: memref<32x1024xf32, #tpu.memory_space<vmem>>) attributes {dimension_semantics = [], scalar_prefetch = 0 : i64, scratch_operands = 1 : i64, tpu.core_type = #tpu.core_type<tc>} {
    %c0 = arith.constant 0 : index
    %c0_0 = arith.constant 0 : index
    %0 = vector.load %arg0[%c0, %c0_0] : memref<16x8xbf16, #tpu.memory_space<vmem>>, vector<16x8xbf16>
    %c0_1 = arith.constant 0 : index
    %c0_2 = arith.constant 0 : index
    %1 = vector.load %arg7[%c0_1, %c0_2] : memref<8x32xbf16, #tpu.memory_space<vmem>>, vector<8x32xbf16>
    %cst = arith.constant dense<0.000000e+00> : vector<16x32xf32>
    %2 = tpu.matmul %0, %1, %cst {dimension_numbers = #tpu.dot_dimension_numbers<[1], [0], [0], [1], [0, 0, 1, 1], [], []>} : vector<16x8xbf16>, vector<8x32xbf16>, vector<16x32xf32> -> vector<16x32xf32>
    %c0_3 = arith.constant 0 : index
    %c0_4 = arith.constant 0 : index
    %3 = vector.load %arg8[%c0_3, %c0_4] : memref<1x32xf32, #tpu.memory_space<vmem>>, vector<1x32xf32>
    %4 = vector.broadcast %3 : vector<1x32xf32> to vector<16x32xf32>
    %5 = arith.addf %2, %4 : vector<16x32xf32>
    %cst_5 = arith.constant 0.000000e+00 : f32
    %6 = vector.broadcast %cst_5 : f32 to vector<16x32xf32>
    %7 = arith.maximumf %5, %6 : vector<16x32xf32>
    %c0_6 = arith.constant 0 : index
    %c0_7 = arith.constant 0 : index
    %8 = vector.load %arg1[%c0_6, %c0_7] : memref<32x4xbf16, #tpu.memory_space<vmem>>, vector<32x4xbf16>
    %c0_8 = arith.constant 0 : index
    %c0_9 = arith.constant 0 : index
    %9 = vector.load %arg9[%c0_8, %c0_9] : memref<4x32xbf16, #tpu.memory_space<vmem>>, vector<4x32xbf16>
    %cst_10 = arith.constant dense<0.000000e+00> : vector<32x32xf32>
    %10 = tpu.matmul %8, %9, %cst_10 {dimension_numbers = #tpu.dot_dimension_numbers<[1], [0], [0], [1], [0, 0, 1, 1], [], []>} : vector<32x4xbf16>, vector<4x32xbf16>, vector<32x32xf32> -> vector<32x32xf32>
    %c0_11 = arith.constant 0 : index
    %c0_12 = arith.constant 0 : index
    %11 = vector.load %arg10[%c0_11, %c0_12] : memref<1x32xf32, #tpu.memory_space<vmem>>, vector<1x32xf32>
    %12 = vector.broadcast %11 : vector<1x32xf32> to vector<32x32xf32>
    %13 = arith.addf %10, %12 : vector<32x32xf32>
    %cst_13 = arith.constant 0.000000e+00 : f32
    %14 = vector.broadcast %cst_13 : f32 to vector<32x32xf32>
    %15 = arith.maximumf %13, %14 : vector<32x32xf32>
    %16 = arith.truncf %15 : vector<32x32xf32> to vector<32x32xbf16>
    %c0_14 = arith.constant 0 : index
    %c0_15 = arith.constant 0 : index
    %17 = vector.load %arg11[%c0_14, %c0_15] : memref<32x1024xbf16, #tpu.memory_space<vmem>>, vector<32x1024xbf16>
    %cst_16 = arith.constant dense<0.000000e+00> : vector<32x1024xf32>
    %18 = tpu.matmul %16, %17, %cst_16 {dimension_numbers = #tpu.dot_dimension_numbers<[1], [0], [0], [1], [0, 0, 1, 1], [], []>} : vector<32x32xbf16>, vector<32x1024xbf16>, vector<32x1024xf32> -> vector<32x1024xf32>
    %c0_17 = arith.constant 0 : index
    %c0_18 = arith.constant 0 : index
    %19 = vector.load %arg12[%c0_17, %c0_18] : memref<1x1024xf32, #tpu.memory_space<vmem>>, vector<1x1024xf32>
    %20 = vector.broadcast %19 : vector<1x1024xf32> to vector<32x1024xf32>
    %21 = arith.addf %18, %20 : vector<32x1024xf32>
    %c0_19 = arith.constant 0 : index
    %c0_20 = arith.constant 0 : index
    %22 = vector.load %arg24[%c0_19, %c0_20] : memref<32x1024xf32, #tpu.memory_space<vmem>>, vector<32x1024xf32>
    tpu.vector_store %arg24[%c0_19, %c0_20], %21 {strides = array<i32>} : memref<32x1024xf32, #tpu.memory_space<vmem>>, vector<32x1024xf32>,
    %c0_21 = arith.constant 0 : index
    %c0_22 = arith.constant 0 : index
    %23 = vector.load %arg13[%c0_21, %c0_22] : memref<32x32xbf16, #tpu.memory_space<vmem>>, vector<32x32xbf16>
    %c0_23 = arith.constant 0 : index
    %c0_24 = arith.constant 0 : index
    %24 = vector.load %arg14[%c0_23, %c0_24] : memref<1x32xf32, #tpu.memory_space<vmem>>, vector<1x32xf32>
    %c0_25 = arith.constant 0 : index
    %c0_26 = arith.constant 0 : index
    %25 = vector.load %arg15[%c0_25, %c0_26] : memref<32x96xbf16, #tpu.memory_space<vmem>>, vector<32x96xbf16>
    %c0_27 = arith.constant 0 : index
    %c0_28 = arith.constant 0 : index
    %26 = vector.load %arg16[%c0_27, %c0_28] : memref<1x96xf32, #tpu.memory_space<vmem>>, vector<1x96xf32>
    %c0_29 = arith.constant 0 : index
    %c0_30 = arith.constant 0 : index
    %27 = vector.load %arg17[%c0_29, %c0_30] : memref<32x96xbf16, #tpu.memory_space<vmem>>, vector<32x96xbf16>
    %c0_31 = arith.constant 0 : index
    %c0_32 = arith.constant 0 : index
    %28 = vector.load %arg18[%c0_31, %c0_32] : memref<1x96xf32, #tpu.memory_space<vmem>>, vector<1x96xf32>
    %c0_33 = arith.constant 0 : index
    %c0_34 = arith.constant 0 : index
    %29 = vector.load %arg4[%c0_33, %c0_34] : memref<16x1xf32, #tpu.memory_space<vmem>>, vector<16x1xf32>
    %c0_i32 = arith.constant 0 : i32
    %30 = arith.truncf %7 : vector<16x32xf32> to vector<16x32xbf16>
    %c0_35 = arith.constant 0 : index
    %c0_36 = arith.constant 0 : index
    %31 = vector.load %arg2[%c0_35, %c0_36] : memref<32x16xbf16, #tpu.memory_space<vmem>>, vector<32x16xbf16>
    %cst_37 = arith.constant dense<0.000000e+00> : vector<32x32xf32>
    %32 = tpu.matmul %31, %30, %cst_37 {dimension_numbers = #tpu.dot_dimension_numbers<[1], [0], [0], [1], [0, 0, 1, 1], [], []>} : vector<32x16xbf16>, vector<16x32xbf16>, vector<32x32xf32> -> vector<32x32xf32>
    %cst_38 = arith.constant dense<0.000000e+00> : vector<16x32xf32>
    %33 = tpu.matmul %30, %23, %cst_38 {dimension_numbers = #tpu.dot_dimension_numbers<[1], [0], [0], [1], [0, 0, 1, 1], [], []>} : vector<16x32xbf16>, vector<32x32xbf16>, vector<16x32xf32> -> vector<16x32xf32>
    %cst_39 = arith.constant dense<0.000000e+00> : vector<16x96xf32>
    %34 = tpu.matmul %30, %27, %cst_39 {dimension_numbers = #tpu.dot_dimension_numbers<[1], [0], [0], [1], [0, 0, 1, 1], [], []>} : vector<16x32xbf16>, vector<32x96xbf16>, vector<16x96xf32> -> vector<16x96xf32>
    %35 = vector.broadcast %28 : vector<1x96xf32> to vector<16x96xf32>
    %36 = arith.addf %34, %35 : vector<16x96xf32>
    %c0_40 = arith.constant 0 : index
    %c0_41 = arith.constant 0 : index
    %37 = vector.load %arg24[%c0_40, %c0_41] : memref<32x1024xf32, #tpu.memory_space<vmem>>, vector<32x1024xf32>
    %38 = vector.extract_strided_slice %32 {offsets = [0, 0], sizes = [32, 1], strides = [1, 1]} : vector<32x32xf32> to vector<32x1xf32>
    %39 = vector.extract_strided_slice %37 {offsets = [0, 0], sizes = [32, 32], strides = [1, 1]} : vector<32x1024xf32> to vector<32x32xf32>
    %40 = vector.broadcast %38 : vector<32x1xf32> to vector<32x32xf32>
    %41 = arith.mulf %40, %39 : vector<32x32xf32>
    %42 = vector.extract_strided_slice %32 {offsets = [0, 1], sizes = [32, 1], strides = [1, 1]} : vector<32x32xf32> to vector<32x1xf32>
    %43 = vector.extract_strided_slice %37 {offsets = [0, 32], sizes = [32, 32], strides = [1, 1]} : vector<32x1024xf32> to vector<32x32xf32>
    %44 = vector.broadcast %42 : vector<32x1xf32> to vector<32x32xf32>
    %45 = arith.mulf %44, %43 : vector<32x32xf32>
    %46 = arith.addf %41, %45 : vector<32x32xf32>
    %47 = vector.extract_strided_slice %32 {offsets = [0, 2], sizes = [32, 1], strides = [1, 1]} : vector<32x32xf32> to vector<32x1xf32>
    %48 = vector.extract_strided_slice %37 {offsets = [0, 64], sizes = [32, 32], strides = [1, 1]} : vector<32x1024xf32> to vector<32x32xf32>
    %49 = vector.broadcast %47 : vector<32x1xf32> to vector<32x32xf32>
    %50 = arith.mulf %49, %48 : vector<32x32xf32>
    %51 = arith.addf %46, %50 : vector<32x32xf32>
    %52 = vector.extract_strided_slice %32 {offsets = [0, 3], sizes = [32, 1], strides = [1, 1]} : vector<32x32xf32> to vector<32x1xf32>
    %53 = vector.extract_strided_slice %37 {offsets = [0, 96], sizes = [32, 32], strides = [1, 1]} : vector<32x1024xf32> to vector<32x32xf32>
    %54 = vector.broadcast %52 : vector<32x1xf32> to vector<32x32xf32>
    %55 = arith.mulf %54, %53 : vector<32x32xf32>
    %56 = arith.addf %51, %55 : vector<32x32xf32>
    %57 = vector.extract_strided_slice %32 {offsets = [0, 4], sizes = [32, 1], strides = [1, 1]} : vector<32x32xf32> to vector<32x1xf32>
    %58 = vector.extract_strided_slice %37 {offsets = [0, 128], sizes = [32, 32], strides = [1, 1]} : vector<32x1024xf32> to vector<32x32xf32>
    %59 = vector.broadcast %57 : vector<32x1xf32> to vector<32x32xf32>
    %60 = arith.mulf %59, %58 : vector<32x32xf32>
    %61 = arith.addf %56, %60 : vector<32x32xf32>
    %62 = vector.extract_strided_slice %32 {offsets = [0, 5], sizes = [32, 1], strides = [1, 1]} : vector<32x32xf32> to vector<32x1xf32>
    %63 = vector.extract_strided_slice %37 {offsets = [0, 160], sizes = [32, 32], strides = [1, 1]} : vector<32x1024xf32> to vector<32x32xf32>
    %64 = vector.broadcast %62 : vector<32x1xf32> to vector<32x32xf32>
    %65 = arith.mulf %64, %63 : vector<32x32xf32>
    %66 = arith.addf %61, %65 : vector<32x32xf32>
    %67 = vector.extract_strided_slice %32 {offsets = [0, 6], sizes = [32, 1], strides = [1, 1]} : vector<32x32xf32> to vector<32x1xf32>
    %68 = vector.extract_strided_slice %37 {offsets = [0, 192], sizes = [32, 32], strides = [1, 1]} : vector<32x1024xf32> to vector<32x32xf32>
    %69 = vector.broadcast %67 : vector<32x1xf32> to vector<32x32xf32>
    %70 = arith.mulf %69, %68 : vector<32x32xf32>
    %71 = arith.addf %66, %70 : vector<32x32xf32>
    %72 = vector.extract_strided_slice %32 {offsets = [0, 7], sizes = [32, 1], strides = [1, 1]} : vector<32x32xf32> to vector<32x1xf32>
    %73 = vector.extract_strided_slice %37 {offsets = [0, 224], sizes = [32, 32], strides = [1, 1]} : vector<32x1024xf32> to vector<32x32xf32>
    %74 = vector.broadcast %72 : vector<32x1xf32> to vector<32x32xf32>
    %75 = arith.mulf %74, %73 : vector<32x32xf32>
    %76 = arith.addf %71, %75 : vector<32x32xf32>
    %77 = vector.extract_strided_slice %32 {offsets = [0, 8], sizes = [32, 1], strides = [1, 1]} : vector<32x32xf32> to vector<32x1xf32>
    %78 = vector.extract_strided_slice %37 {offsets = [0, 256], sizes = [32, 32], strides = [1, 1]} : vector<32x1024xf32> to vector<32x32xf32>
    %79 = vector.broadcast %77 : vector<32x1xf32> to vector<32x32xf32>
    %80 = arith.mulf %79, %78 : vector<32x32xf32>
    %81 = arith.addf %76, %80 : vector<32x32xf32>
    %82 = vector.extract_strided_slice %32 {offsets = [0, 9], sizes = [32, 1], strides = [1, 1]} : vector<32x32xf32> to vector<32x1xf32>
    %83 = vector.extract_strided_slice %37 {offsets = [0, 288], sizes = [32, 32], strides = [1, 1]} : vector<32x1024xf32> to vector<32x32xf32>
    %84 = vector.broadcast %82 : vector<32x1xf32> to vector<32x32xf32>
    %85 = arith.mulf %84, %83 : vector<32x32xf32>
    %86 = arith.addf %81, %85 : vector<32x32xf32>
    %87 = vector.extract_strided_slice %32 {offsets = [0, 10], sizes = [32, 1], strides = [1, 1]} : vector<32x32xf32> to vector<32x1xf32>
    %88 = vector.extract_strided_slice %37 {offsets = [0, 320], sizes = [32, 32], strides = [1, 1]} : vector<32x1024xf32> to vector<32x32xf32>
    %89 = vector.broadcast %87 : vector<32x1xf32> to vector<32x32xf32>
    %90 = arith.mulf %89, %88 : vector<32x32xf32>
    %91 = arith.addf %86, %90 : vector<32x32xf32>
    %92 = vector.extract_strided_slice %32 {offsets = [0, 11], sizes = [32, 1], strides = [1, 1]} : vector<32x32xf32> to vector<32x1xf32>
    %93 = vector.extract_strided_slice %37 {offsets = [0, 352], sizes = [32, 32], strides = [1, 1]} : vector<32x1024xf32> to vector<32x32xf32>
    %94 = vector.broadcast %92 : vector<32x1xf32> to vector<32x32xf32>
    %95 = arith.mulf %94, %93 : vector<32x32xf32>
    %96 = arith.addf %91, %95 : vector<32x32xf32>
    %97 = vector.extract_strided_slice %32 {offsets = [0, 12], sizes = [32, 1], strides = [1, 1]} : vector<32x32xf32> to vector<32x1xf32>
    %98 = vector.extract_strided_slice %37 {offsets = [0, 384], sizes = [32, 32], strides = [1, 1]} : vector<32x1024xf32> to vector<32x32xf32>
    %99 = vector.broadcast %97 : vector<32x1xf32> to vector<32x32xf32>
    %100 = arith.mulf %99, %98 : vector<32x32xf32>
    %101 = arith.addf %96, %100 : vector<32x32xf32>
    %102 = vector.extract_strided_slice %32 {offsets = [0, 13], sizes = [32, 1], strides = [1, 1]} : vector<32x32xf32> to vector<32x1xf32>
    %103 = vector.extract_strided_slice %37 {offsets = [0, 416], sizes = [32, 32], strides = [1, 1]} : vector<32x1024xf32> to vector<32x32xf32>
    %104 = vector.broadcast %102 : vector<32x1xf32> to vector<32x32xf32>
    %105 = arith.mulf %104, %103 : vector<32x32xf32>
    %106 = arith.addf %101, %105 : vector<32x32xf32>
    %107 = vector.extract_strided_slice %32 {offsets = [0, 14], sizes = [32, 1], strides = [1, 1]} : vector<32x32xf32> to vector<32x1xf32>
    %108 = vector.extract_strided_slice %37 {offsets = [0, 448], sizes = [32, 32], strides = [1, 1]} : vector<32x1024xf32> to vector<32x32xf32>
    %109 = vector.broadcast %107 : vector<32x1xf32> to vector<32x32xf32>
    %110 = arith.mulf %109, %108 : vector<32x32xf32>
    %111 = arith.addf %106, %110 : vector<32x32xf32>
    %112 = vector.extract_strided_slice %32 {offsets = [0, 15], sizes = [32, 1], strides = [1, 1]} : vector<32x32xf32> to vector<32x1xf32>
    %113 = vector.extract_strided_slice %37 {offsets = [0, 480], sizes = [32, 32], strides = [1, 1]} : vector<32x1024xf32> to vector<32x32xf32>
    %114 = vector.broadcast %112 : vector<32x1xf32> to vector<32x32xf32>
    %115 = arith.mulf %114, %113 : vector<32x32xf32>
    %116 = arith.addf %111, %115 : vector<32x32xf32>
    %117 = vector.extract_strided_slice %32 {offsets = [0, 16], sizes = [32, 1], strides = [1, 1]} : vector<32x32xf32> to vector<32x1xf32>
    %118 = vector.extract_strided_slice %37 {offsets = [0, 512], sizes = [32, 32], strides = [1, 1]} : vector<32x1024xf32> to vector<32x32xf32>
    %119 = vector.broadcast %117 : vector<32x1xf32> to vector<32x32xf32>
    %120 = arith.mulf %119, %118 : vector<32x32xf32>
    %121 = arith.addf %116, %120 : vector<32x32xf32>
    %122 = vector.extract_strided_slice %32 {offsets = [0, 17], sizes = [32, 1], strides = [1, 1]} : vector<32x32xf32> to vector<32x1xf32>
    %123 = vector.extract_strided_slice %37 {offsets = [0, 544], sizes = [32, 32], strides = [1, 1]} : vector<32x1024xf32> to vector<32x32xf32>
    %124 = vector.broadcast %122 : vector<32x1xf32> to vector<32x32xf32>
    %125 = arith.mulf %124, %123 : vector<32x32xf32>
    %126 = arith.addf %121, %125 : vector<32x32xf32>
    %127 = vector.extract_strided_slice %32 {offsets = [0, 18], sizes = [32, 1], strides = [1, 1]} : vector<32x32xf32> to vector<32x1xf32>
    %128 = vector.extract_strided_slice %37 {offsets = [0, 576], sizes = [32, 32], strides = [1, 1]} : vector<32x1024xf32> to vector<32x32xf32>
    %129 = vector.broadcast %127 : vector<32x1xf32> to vector<32x32xf32>
    %130 = arith.mulf %129, %128 : vector<32x32xf32>
    %131 = arith.addf %126, %130 : vector<32x32xf32>
    %132 = vector.extract_strided_slice %32 {offsets = [0, 19], sizes = [32, 1], strides = [1, 1]} : vector<32x32xf32> to vector<32x1xf32>
    %133 = vector.extract_strided_slice %37 {offsets = [0, 608], sizes = [32, 32], strides = [1, 1]} : vector<32x1024xf32> to vector<32x32xf32>
    %134 = vector.broadcast %132 : vector<32x1xf32> to vector<32x32xf32>
    %135 = arith.mulf %134, %133 : vector<32x32xf32>
    %136 = arith.addf %131, %135 : vector<32x32xf32>
    %137 = vector.extract_strided_slice %32 {offsets = [0, 20], sizes = [32, 1], strides = [1, 1]} : vector<32x32xf32> to vector<32x1xf32>
    %138 = vector.extract_strided_slice %37 {offsets = [0, 640], sizes = [32, 32], strides = [1, 1]} : vector<32x1024xf32> to vector<32x32xf32>
    %139 = vector.broadcast %137 : vector<32x1xf32> to vector<32x32xf32>
    %140 = arith.mulf %139, %138 : vector<32x32xf32>
    %141 = arith.addf %136, %140 : vector<32x32xf32>
    %142 = vector.extract_strided_slice %32 {offsets = [0, 21], sizes = [32, 1], strides = [1, 1]} : vector<32x32xf32> to vector<32x1xf32>
    %143 = vector.extract_strided_slice %37 {offsets = [0, 672], sizes = [32, 32], strides = [1, 1]} : vector<32x1024xf32> to vector<32x32xf32>
    %144 = vector.broadcast %142 : vector<32x1xf32> to vector<32x32xf32>
    %145 = arith.mulf %144, %143 : vector<32x32xf32>
    %146 = arith.addf %141, %145 : vector<32x32xf32>
    %147 = vector.extract_strided_slice %32 {offsets = [0, 22], sizes = [32, 1], strides = [1, 1]} : vector<32x32xf32> to vector<32x1xf32>
    %148 = vector.extract_strided_slice %37 {offsets = [0, 704], sizes = [32, 32], strides = [1, 1]} : vector<32x1024xf32> to vector<32x32xf32>
    %149 = vector.broadcast %147 : vector<32x1xf32> to vector<32x32xf32>
    %150 = arith.mulf %149, %148 : vector<32x32xf32>
    %151 = arith.addf %146, %150 : vector<32x32xf32>
    %152 = vector.extract_strided_slice %32 {offsets = [0, 23], sizes = [32, 1], strides = [1, 1]} : vector<32x32xf32> to vector<32x1xf32>
    %153 = vector.extract_strided_slice %37 {offsets = [0, 736], sizes = [32, 32], strides = [1, 1]} : vector<32x1024xf32> to vector<32x32xf32>
    %154 = vector.broadcast %152 : vector<32x1xf32> to vector<32x32xf32>
    %155 = arith.mulf %154, %153 : vector<32x32xf32>
    %156 = arith.addf %151, %155 : vector<32x32xf32>
    %157 = vector.extract_strided_slice %32 {offsets = [0, 24], sizes = [32, 1], strides = [1, 1]} : vector<32x32xf32> to vector<32x1xf32>
    %158 = vector.extract_strided_slice %37 {offsets = [0, 768], sizes = [32, 32], strides = [1, 1]} : vector<32x1024xf32> to vector<32x32xf32>
    %159 = vector.broadcast %157 : vector<32x1xf32> to vector<32x32xf32>
    %160 = arith.mulf %159, %158 : vector<32x32xf32>
    %161 = arith.addf %156, %160 : vector<32x32xf32>
    %162 = vector.extract_strided_slice %32 {offsets = [0, 25], sizes = [32, 1], strides = [1, 1]} : vector<32x32xf32> to vector<32x1xf32>
    %163 = vector.extract_strided_slice %37 {offsets = [0, 800], sizes = [32, 32], strides = [1, 1]} : vector<32x1024xf32> to vector<32x32xf32>
    %164 = vector.broadcast %162 : vector<32x1xf32> to vector<32x32xf32>
    %165 = arith.mulf %164, %163 : vector<32x32xf32>
    %166 = arith.addf %161, %165 : vector<32x32xf32>
    %167 = vector.extract_strided_slice %32 {offsets = [0, 26], sizes = [32, 1], strides = [1, 1]} : vector<32x32xf32> to vector<32x1xf32>
    %168 = vector.extract_strided_slice %37 {offsets = [0, 832], sizes = [32, 32], strides = [1, 1]} : vector<32x1024xf32> to vector<32x32xf32>
    %169 = vector.broadcast %167 : vector<32x1xf32> to vector<32x32xf32>
    %170 = arith.mulf %169, %168 : vector<32x32xf32>
    %171 = arith.addf %166, %170 : vector<32x32xf32>
    %172 = vector.extract_strided_slice %32 {offsets = [0, 27], sizes = [32, 1], strides = [1, 1]} : vector<32x32xf32> to vector<32x1xf32>
    %173 = vector.extract_strided_slice %37 {offsets = [0, 864], sizes = [32, 32], strides = [1, 1]} : vector<32x1024xf32> to vector<32x32xf32>
    %174 = vector.broadcast %172 : vector<32x1xf32> to vector<32x32xf32>
    %175 = arith.mulf %174, %173 : vector<32x32xf32>
    %176 = arith.addf %171, %175 : vector<32x32xf32>
    %177 = vector.extract_strided_slice %32 {offsets = [0, 28], sizes = [32, 1], strides = [1, 1]} : vector<32x32xf32> to vector<32x1xf32>
    %178 = vector.extract_strided_slice %37 {offsets = [0, 896], sizes = [32, 32], strides = [1, 1]} : vector<32x1024xf32> to vector<32x32xf32>
    %179 = vector.broadcast %177 : vector<32x1xf32> to vector<32x32xf32>
    %180 = arith.mulf %179, %178 : vector<32x32xf32>
    %181 = arith.addf %176, %180 : vector<32x32xf32>
    %182 = vector.extract_strided_slice %32 {offsets = [0, 29], sizes = [32, 1], strides = [1, 1]} : vector<32x32xf32> to vector<32x1xf32>
    %183 = vector.extract_strided_slice %37 {offsets = [0, 928], sizes = [32, 32], strides = [1, 1]} : vector<32x1024xf32> to vector<32x32xf32>
    %184 = vector.broadcast %182 : vector<32x1xf32> to vector<32x32xf32>
    %185 = arith.mulf %184, %183 : vector<32x32xf32>
    %186 = arith.addf %181, %185 : vector<32x32xf32>
    %187 = vector.extract_strided_slice %32 {offsets = [0, 30], sizes = [32, 1], strides = [1, 1]} : vector<32x32xf32> to vector<32x1xf32>
    %188 = vector.extract_strided_slice %37 {offsets = [0, 960], sizes = [32, 32], strides = [1, 1]} : vector<32x1024xf32> to vector<32x32xf32>
    %189 = vector.broadcast %187 : vector<32x1xf32> to vector<32x32xf32>
    %190 = arith.mulf %189, %188 : vector<32x32xf32>
    %191 = arith.addf %186, %190 : vector<32x32xf32>
    %192 = vector.extract_strided_slice %32 {offsets = [0, 31], sizes = [32, 1], strides = [1, 1]} : vector<32x32xf32> to vector<32x1xf32>
    %193 = vector.extract_strided_slice %37 {offsets = [0, 992], sizes = [32, 32], strides = [1, 1]} : vector<32x1024xf32> to vector<32x32xf32>
    %194 = vector.broadcast %192 : vector<32x1xf32> to vector<32x32xf32>
    %195 = arith.mulf %194, %193 : vector<32x32xf32>
    %196 = arith.addf %191, %195 : vector<32x32xf32>
    %c0_42 = arith.constant 0 : index
    %c0_43 = arith.constant 0 : index
    %197 = vector.load %arg3[%c0_42, %c0_43] : memref<16x32xbf16, #tpu.memory_space<vmem>>, vector<16x32xbf16>
    %198 = arith.truncf %196 : vector<32x32xf32> to vector<32x32xbf16>
    %cst_44 = arith.constant dense<0.000000e+00> : vector<16x32xf32>
    %199 = tpu.matmul %197, %198, %cst_44 {dimension_numbers = #tpu.dot_dimension_numbers<[1], [0], [0], [1], [0, 0, 1, 1], [], []>} : vector<16x32xbf16>, vector<32x32xbf16>, vector<16x32xf32> -> vector<16x32xf32>
    %200 = vector.broadcast %29 : vector<16x1xf32> to vector<16x32xf32>
    %201 = arith.mulf %199, %200 : vector<16x32xf32>
    %202 = arith.addf %201, %33 : vector<16x32xf32>
    %203 = vector.broadcast %24 : vector<1x32xf32> to vector<16x32xf32>
    %204 = arith.addf %202, %203 : vector<16x32xf32>
    %cst_45 = arith.constant 0.000000e+00 : f32
    %205 = vector.broadcast %cst_45 : f32 to vector<16x32xf32>
    %206 = arith.maximumf %204, %205 : vector<16x32xf32>
    %207 = arith.truncf %206 : vector<16x32xf32> to vector<16x32xbf16>
    %cst_46 = arith.constant dense<0.000000e+00> : vector<16x96xf32>
    %208 = tpu.matmul %207, %25, %cst_46 {dimension_numbers = #tpu.dot_dimension_numbers<[1], [0], [0], [1], [0, 0, 1, 1], [], []>} : vector<16x32xbf16>, vector<32x96xbf16>, vector<16x96xf32> -> vector<16x96xf32>
    %209 = vector.broadcast %26 : vector<1x96xf32> to vector<16x96xf32>
    %210 = arith.addf %208, %209 : vector<16x96xf32>
    %211 = vector.extract_strided_slice %210 {offsets = [0, 0], sizes = [16, 32], strides = [1, 1]} : vector<16x96xf32> to vector<16x32xf32>
    %212 = vector.extract_strided_slice %36 {offsets = [0, 0], sizes = [16, 32], strides = [1, 1]} : vector<16x96xf32> to vector<16x32xf32>
    %213 = arith.addf %211, %212 : vector<16x32xf32>
    %214 = arith.negf %213 : vector<16x32xf32>
    %215 = math.exp %214 : vector<16x32xf32>
    %cst_47 = arith.constant 1.000000e+00 : f32
    %216 = vector.broadcast %cst_47 : f32 to vector<16x32xf32>
    %217 = arith.addf %216, %215 : vector<16x32xf32>
    %218 = arith.divf %216, %217 : vector<16x32xf32>
    %219 = vector.extract_strided_slice %210 {offsets = [0, 32], sizes = [16, 32], strides = [1, 1]} : vector<16x96xf32> to vector<16x32xf32>
    %220 = vector.extract_strided_slice %36 {offsets = [0, 32], sizes = [16, 32], strides = [1, 1]} : vector<16x96xf32> to vector<16x32xf32>
    %221 = arith.addf %219, %220 : vector<16x32xf32>
    %222 = arith.negf %221 : vector<16x32xf32>
    %223 = math.exp %222 : vector<16x32xf32>
    %cst_48 = arith.constant 1.000000e+00 : f32
    %224 = vector.broadcast %cst_48 : f32 to vector<16x32xf32>
    %225 = arith.addf %224, %223 : vector<16x32xf32>
    %226 = arith.divf %224, %225 : vector<16x32xf32>
    %227 = vector.extract_strided_slice %210 {offsets = [0, 64], sizes = [16, 32], strides = [1, 1]} : vector<16x96xf32> to vector<16x32xf32>
    %228 = vector.extract_strided_slice %36 {offsets = [0, 64], sizes = [16, 32], strides = [1, 1]} : vector<16x96xf32> to vector<16x32xf32>
    %229 = arith.mulf %218, %228 : vector<16x32xf32>
    %230 = arith.addf %227, %229 : vector<16x32xf32>
    %231 = math.tanh %230 : vector<16x32xf32>
    %cst_49 = arith.constant 1.000000e+00 : f32
    %232 = vector.broadcast %cst_49 : f32 to vector<16x32xf32>
    %233 = arith.subf %232, %226 : vector<16x32xf32>
    %234 = arith.mulf %233, %231 : vector<16x32xf32>
    %235 = arith.mulf %226, %7 : vector<16x32xf32>
    %236 = arith.addf %234, %235 : vector<16x32xf32>
    %c1_i32 = arith.constant 1 : i32
    %237 = arith.truncf %236 : vector<16x32xf32> to vector<16x32xbf16>
    %c0_50 = arith.constant 0 : index
    %c0_51 = arith.constant 0 : index
    %238 = vector.load %arg2[%c0_50, %c0_51] : memref<32x16xbf16, #tpu.memory_space<vmem>>, vector<32x16xbf16>
    %cst_52 = arith.constant dense<0.000000e+00> : vector<32x32xf32>
    %239 = tpu.matmul %238, %237, %cst_52 {dimension_numbers = #tpu.dot_dimension_numbers<[1], [0], [0], [1], [0, 0, 1, 1], [], []>} : vector<32x16xbf16>, vector<16x32xbf16>, vector<32x32xf32> -> vector<32x32xf32>
    %cst_53 = arith.constant dense<0.000000e+00> : vector<16x32xf32>
    %240 = tpu.matmul %237, %23, %cst_53 {dimension_numbers = #tpu.dot_dimension_numbers<[1], [0], [0], [1], [0, 0, 1, 1], [], []>} : vector<16x32xbf16>, vector<32x32xbf16>, vector<16x32xf32> -> vector<16x32xf32>
    %cst_54 = arith.constant dense<0.000000e+00> : vector<16x96xf32>
    %241 = tpu.matmul %237, %27, %cst_54 {dimension_numbers = #tpu.dot_dimension_numbers<[1], [0], [0], [1], [0, 0, 1, 1], [], []>} : vector<16x32xbf16>, vector<32x96xbf16>, vector<16x96xf32> -> vector<16x96xf32>
    %242 = vector.broadcast %28 : vector<1x96xf32> to vector<16x96xf32>
    %243 = arith.addf %241, %242 : vector<16x96xf32>
    %c0_55 = arith.constant 0 : index
    %c0_56 = arith.constant 0 : index
    %244 = vector.load %arg24[%c0_55, %c0_56] : memref<32x1024xf32, #tpu.memory_space<vmem>>, vector<32x1024xf32>
    %245 = vector.extract_strided_slice %239 {offsets = [0, 0], sizes = [32, 1], strides = [1, 1]} : vector<32x32xf32> to vector<32x1xf32>
    %246 = vector.extract_strided_slice %244 {offsets = [0, 0], sizes = [32, 32], strides = [1, 1]} : vector<32x1024xf32> to vector<32x32xf32>
    %247 = vector.broadcast %245 : vector<32x1xf32> to vector<32x32xf32>
    %248 = arith.mulf %247, %246 : vector<32x32xf32>
    %249 = vector.extract_strided_slice %239 {offsets = [0, 1], sizes = [32, 1], strides = [1, 1]} : vector<32x32xf32> to vector<32x1xf32>
    %250 = vector.extract_strided_slice %244 {offsets = [0, 32], sizes = [32, 32], strides = [1, 1]} : vector<32x1024xf32> to vector<32x32xf32>
    %251 = vector.broadcast %249 : vector<32x1xf32> to vector<32x32xf32>
    %252 = arith.mulf %251, %250 : vector<32x32xf32>
    %253 = arith.addf %248, %252 : vector<32x32xf32>
    %254 = vector.extract_strided_slice %239 {offsets = [0, 2], sizes = [32, 1], strides = [1, 1]} : vector<32x32xf32> to vector<32x1xf32>
    %255 = vector.extract_strided_slice %244 {offsets = [0, 64], sizes = [32, 32], strides = [1, 1]} : vector<32x1024xf32> to vector<32x32xf32>
    %256 = vector.broadcast %254 : vector<32x1xf32> to vector<32x32xf32>
    %257 = arith.mulf %256, %255 : vector<32x32xf32>
    %258 = arith.addf %253, %257 : vector<32x32xf32>
    %259 = vector.extract_strided_slice %239 {offsets = [0, 3], sizes = [32, 1], strides = [1, 1]} : vector<32x32xf32> to vector<32x1xf32>
    %260 = vector.extract_strided_slice %244 {offsets = [0, 96], sizes = [32, 32], strides = [1, 1]} : vector<32x1024xf32> to vector<32x32xf32>
    %261 = vector.broadcast %259 : vector<32x1xf32> to vector<32x32xf32>
    %262 = arith.mulf %261, %260 : vector<32x32xf32>
    %263 = arith.addf %258, %262 : vector<32x32xf32>
    %264 = vector.extract_strided_slice %239 {offsets = [0, 4], sizes = [32, 1], strides = [1, 1]} : vector<32x32xf32> to vector<32x1xf32>
    %265 = vector.extract_strided_slice %244 {offsets = [0, 128], sizes = [32, 32], strides = [1, 1]} : vector<32x1024xf32> to vector<32x32xf32>
    %266 = vector.broadcast %264 : vector<32x1xf32> to vector<32x32xf32>
    %267 = arith.mulf %266, %265 : vector<32x32xf32>
    %268 = arith.addf %263, %267 : vector<32x32xf32>
    %269 = vector.extract_strided_slice %239 {offsets = [0, 5], sizes = [32, 1], strides = [1, 1]} : vector<32x32xf32> to vector<32x1xf32>
    %270 = vector.extract_strided_slice %244 {offsets = [0, 160], sizes = [32, 32], strides = [1, 1]} : vector<32x1024xf32> to vector<32x32xf32>
    %271 = vector.broadcast %269 : vector<32x1xf32> to vector<32x32xf32>
    %272 = arith.mulf %271, %270 : vector<32x32xf32>
    %273 = arith.addf %268, %272 : vector<32x32xf32>
    %274 = vector.extract_strided_slice %239 {offsets = [0, 6], sizes = [32, 1], strides = [1, 1]} : vector<32x32xf32> to vector<32x1xf32>
    %275 = vector.extract_strided_slice %244 {offsets = [0, 192], sizes = [32, 32], strides = [1, 1]} : vector<32x1024xf32> to vector<32x32xf32>
    %276 = vector.broadcast %274 : vector<32x1xf32> to vector<32x32xf32>
    %277 = arith.mulf %276, %275 : vector<32x32xf32>
    %278 = arith.addf %273, %277 : vector<32x32xf32>
    %279 = vector.extract_strided_slice %239 {offsets = [0, 7], sizes = [32, 1], strides = [1, 1]} : vector<32x32xf32> to vector<32x1xf32>
    %280 = vector.extract_strided_slice %244 {offsets = [0, 224], sizes = [32, 32], strides = [1, 1]} : vector<32x1024xf32> to vector<32x32xf32>
    %281 = vector.broadcast %279 : vector<32x1xf32> to vector<32x32xf32>
    %282 = arith.mulf %281, %280 : vector<32x32xf32>
    %283 = arith.addf %278, %282 : vector<32x32xf32>
    %284 = vector.extract_strided_slice %239 {offsets = [0, 8], sizes = [32, 1], strides = [1, 1]} : vector<32x32xf32> to vector<32x1xf32>
    %285 = vector.extract_strided_slice %244 {offsets = [0, 256], sizes = [32, 32], strides = [1, 1]} : vector<32x1024xf32> to vector<32x32xf32>
    %286 = vector.broadcast %284 : vector<32x1xf32> to vector<32x32xf32>
    %287 = arith.mulf %286, %285 : vector<32x32xf32>
    %288 = arith.addf %283, %287 : vector<32x32xf32>
    %289 = vector.extract_strided_slice %239 {offsets = [0, 9], sizes = [32, 1], strides = [1, 1]} : vector<32x32xf32> to vector<32x1xf32>
    %290 = vector.extract_strided_slice %244 {offsets = [0, 288], sizes = [32, 32], strides = [1, 1]} : vector<32x1024xf32> to vector<32x32xf32>
    %291 = vector.broadcast %289 : vector<32x1xf32> to vector<32x32xf32>
    %292 = arith.mulf %291, %290 : vector<32x32xf32>
    %293 = arith.addf %288, %292 : vector<32x32xf32>
    %294 = vector.extract_strided_slice %239 {offsets = [0, 10], sizes = [32, 1], strides = [1, 1]} : vector<32x32xf32> to vector<32x1xf32>
    %295 = vector.extract_strided_slice %244 {offsets = [0, 320], sizes = [32, 32], strides = [1, 1]} : vector<32x1024xf32> to vector<32x32xf32>
    %296 = vector.broadcast %294 : vector<32x1xf32> to vector<32x32xf32>
    %297 = arith.mulf %296, %295 : vector<32x32xf32>
    %298 = arith.addf %293, %297 : vector<32x32xf32>
    %299 = vector.extract_strided_slice %239 {offsets = [0, 11], sizes = [32, 1], strides = [1, 1]} : vector<32x32xf32> to vector<32x1xf32>
    %300 = vector.extract_strided_slice %244 {offsets = [0, 352], sizes = [32, 32], strides = [1, 1]} : vector<32x1024xf32> to vector<32x32xf32>
    %301 = vector.broadcast %299 : vector<32x1xf32> to vector<32x32xf32>
    %302 = arith.mulf %301, %300 : vector<32x32xf32>
    %303 = arith.addf %298, %302 : vector<32x32xf32>
    %304 = vector.extract_strided_slice %239 {offsets = [0, 12], sizes = [32, 1], strides = [1, 1]} : vector<32x32xf32> to vector<32x1xf32>
    %305 = vector.extract_strided_slice %244 {offsets = [0, 384], sizes = [32, 32], strides = [1, 1]} : vector<32x1024xf32> to vector<32x32xf32>
    %306 = vector.broadcast %304 : vector<32x1xf32> to vector<32x32xf32>
    %307 = arith.mulf %306, %305 : vector<32x32xf32>
    %308 = arith.addf %303, %307 : vector<32x32xf32>
    %309 = vector.extract_strided_slice %239 {offsets = [0, 13], sizes = [32, 1], strides = [1, 1]} : vector<32x32xf32> to vector<32x1xf32>
    %310 = vector.extract_strided_slice %244 {offsets = [0, 416], sizes = [32, 32], strides = [1, 1]} : vector<32x1024xf32> to vector<32x32xf32>
    %311 = vector.broadcast %309 : vector<32x1xf32> to vector<32x32xf32>
    %312 = arith.mulf %311, %310 : vector<32x32xf32>
    %313 = arith.addf %308, %312 : vector<32x32xf32>
    %314 = vector.extract_strided_slice %239 {offsets = [0, 14], sizes = [32, 1], strides = [1, 1]} : vector<32x32xf32> to vector<32x1xf32>
    %315 = vector.extract_strided_slice %244 {offsets = [0, 448], sizes = [32, 32], strides = [1, 1]} : vector<32x1024xf32> to vector<32x32xf32>
    %316 = vector.broadcast %314 : vector<32x1xf32> to vector<32x32xf32>
    %317 = arith.mulf %316, %315 : vector<32x32xf32>
    %318 = arith.addf %313, %317 : vector<32x32xf32>
    %319 = vector.extract_strided_slice %239 {offsets = [0, 15], sizes = [32, 1], strides = [1, 1]} : vector<32x32xf32> to vector<32x1xf32>
    %320 = vector.extract_strided_slice %244 {offsets = [0, 480], sizes = [32, 32], strides = [1, 1]} : vector<32x1024xf32> to vector<32x32xf32>
    %321 = vector.broadcast %319 : vector<32x1xf32> to vector<32x32xf32>
    %322 = arith.mulf %321, %320 : vector<32x32xf32>
    %323 = arith.addf %318, %322 : vector<32x32xf32>
    %324 = vector.extract_strided_slice %239 {offsets = [0, 16], sizes = [32, 1], strides = [1, 1]} : vector<32x32xf32> to vector<32x1xf32>
    %325 = vector.extract_strided_slice %244 {offsets = [0, 512], sizes = [32, 32], strides = [1, 1]} : vector<32x1024xf32> to vector<32x32xf32>
    %326 = vector.broadcast %324 : vector<32x1xf32> to vector<32x32xf32>
    %327 = arith.mulf %326, %325 : vector<32x32xf32>
    %328 = arith.addf %323, %327 : vector<32x32xf32>
    %329 = vector.extract_strided_slice %239 {offsets = [0, 17], sizes = [32, 1], strides = [1, 1]} : vector<32x32xf32> to vector<32x1xf32>
    %330 = vector.extract_strided_slice %244 {offsets = [0, 544], sizes = [32, 32], strides = [1, 1]} : vector<32x1024xf32> to vector<32x32xf32>
    %331 = vector.broadcast %329 : vector<32x1xf32> to vector<32x32xf32>
    %332 = arith.mulf %331, %330 : vector<32x32xf32>
    %333 = arith.addf %328, %332 : vector<32x32xf32>
    %334 = vector.extract_strided_slice %239 {offsets = [0, 18], sizes = [32, 1], strides = [1, 1]} : vector<32x32xf32> to vector<32x1xf32>
    %335 = vector.extract_strided_slice %244 {offsets = [0, 576], sizes = [32, 32], strides = [1, 1]} : vector<32x1024xf32> to vector<32x32xf32>
    %336 = vector.broadcast %334 : vector<32x1xf32> to vector<32x32xf32>
    %337 = arith.mulf %336, %335 : vector<32x32xf32>
    %338 = arith.addf %333, %337 : vector<32x32xf32>
    %339 = vector.extract_strided_slice %239 {offsets = [0, 19], sizes = [32, 1], strides = [1, 1]} : vector<32x32xf32> to vector<32x1xf32>
    %340 = vector.extract_strided_slice %244 {offsets = [0, 608], sizes = [32, 32], strides = [1, 1]} : vector<32x1024xf32> to vector<32x32xf32>
    %341 = vector.broadcast %339 : vector<32x1xf32> to vector<32x32xf32>
    %342 = arith.mulf %341, %340 : vector<32x32xf32>
    %343 = arith.addf %338, %342 : vector<32x32xf32>
    %344 = vector.extract_strided_slice %239 {offsets = [0, 20], sizes = [32, 1], strides = [1, 1]} : vector<32x32xf32> to vector<32x1xf32>
    %345 = vector.extract_strided_slice %244 {offsets = [0, 640], sizes = [32, 32], strides = [1, 1]} : vector<32x1024xf32> to vector<32x32xf32>
    %346 = vector.broadcast %344 : vector<32x1xf32> to vector<32x32xf32>
    %347 = arith.mulf %346, %345 : vector<32x32xf32>
    %348 = arith.addf %343, %347 : vector<32x32xf32>
    %349 = vector.extract_strided_slice %239 {offsets = [0, 21], sizes = [32, 1], strides = [1, 1]} : vector<32x32xf32> to vector<32x1xf32>
    %350 = vector.extract_strided_slice %244 {offsets = [0, 672], sizes = [32, 32], strides = [1, 1]} : vector<32x1024xf32> to vector<32x32xf32>
    %351 = vector.broadcast %349 : vector<32x1xf32> to vector<32x32xf32>
    %352 = arith.mulf %351, %350 : vector<32x32xf32>
    %353 = arith.addf %348, %352 : vector<32x32xf32>
    %354 = vector.extract_strided_slice %239 {offsets = [0, 22], sizes = [32, 1], strides = [1, 1]} : vector<32x32xf32> to vector<32x1xf32>
    %355 = vector.extract_strided_slice %244 {offsets = [0, 704], sizes = [32, 32], strides = [1, 1]} : vector<32x1024xf32> to vector<32x32xf32>
    %356 = vector.broadcast %354 : vector<32x1xf32> to vector<32x32xf32>
    %357 = arith.mulf %356, %355 : vector<32x32xf32>
    %358 = arith.addf %353, %357 : vector<32x32xf32>
    %359 = vector.extract_strided_slice %239 {offsets = [0, 23], sizes = [32, 1], strides = [1, 1]} : vector<32x32xf32> to vector<32x1xf32>
    %360 = vector.extract_strided_slice %244 {offsets = [0, 736], sizes = [32, 32], strides = [1, 1]} : vector<32x1024xf32> to vector<32x32xf32>
    %361 = vector.broadcast %359 : vector<32x1xf32> to vector<32x32xf32>
    %362 = arith.mulf %361, %360 : vector<32x32xf32>
    %363 = arith.addf %358, %362 : vector<32x32xf32>
    %364 = vector.extract_strided_slice %239 {offsets = [0, 24], sizes = [32, 1], strides = [1, 1]} : vector<32x32xf32> to vector<32x1xf32>
    %365 = vector.extract_strided_slice %244 {offsets = [0, 768], sizes = [32, 32], strides = [1, 1]} : vector<32x1024xf32> to vector<32x32xf32>
    %366 = vector.broadcast %364 : vector<32x1xf32> to vector<32x32xf32>
    %367 = arith.mulf %366, %365 : vector<32x32xf32>
    %368 = arith.addf %363, %367 : vector<32x32xf32>
    %369 = vector.extract_strided_slice %239 {offsets = [0, 25], sizes = [32, 1], strides = [1, 1]} : vector<32x32xf32> to vector<32x1xf32>
    %370 = vector.extract_strided_slice %244 {offsets = [0, 800], sizes = [32, 32], strides = [1, 1]} : vector<32x1024xf32> to vector<32x32xf32>
    %371 = vector.broadcast %369 : vector<32x1xf32> to vector<32x32xf32>
    %372 = arith.mulf %371, %370 : vector<32x32xf32>
    %373 = arith.addf %368, %372 : vector<32x32xf32>
    %374 = vector.extract_strided_slice %239 {offsets = [0, 26], sizes = [32, 1], strides = [1, 1]} : vector<32x32xf32> to vector<32x1xf32>
    %375 = vector.extract_strided_slice %244 {offsets = [0, 832], sizes = [32, 32], strides = [1, 1]} : vector<32x1024xf32> to vector<32x32xf32>
    %376 = vector.broadcast %374 : vector<32x1xf32> to vector<32x32xf32>
    %377 = arith.mulf %376, %375 : vector<32x32xf32>
    %378 = arith.addf %373, %377 : vector<32x32xf32>
    %379 = vector.extract_strided_slice %239 {offsets = [0, 27], sizes = [32, 1], strides = [1, 1]} : vector<32x32xf32> to vector<32x1xf32>
    %380 = vector.extract_strided_slice %244 {offsets = [0, 864], sizes = [32, 32], strides = [1, 1]} : vector<32x1024xf32> to vector<32x32xf32>
    %381 = vector.broadcast %379 : vector<32x1xf32> to vector<32x32xf32>
    %382 = arith.mulf %381, %380 : vector<32x32xf32>
    %383 = arith.addf %378, %382 : vector<32x32xf32>
    %384 = vector.extract_strided_slice %239 {offsets = [0, 28], sizes = [32, 1], strides = [1, 1]} : vector<32x32xf32> to vector<32x1xf32>
    %385 = vector.extract_strided_slice %244 {offsets = [0, 896], sizes = [32, 32], strides = [1, 1]} : vector<32x1024xf32> to vector<32x32xf32>
    %386 = vector.broadcast %384 : vector<32x1xf32> to vector<32x32xf32>
    %387 = arith.mulf %386, %385 : vector<32x32xf32>
    %388 = arith.addf %383, %387 : vector<32x32xf32>
    %389 = vector.extract_strided_slice %239 {offsets = [0, 29], sizes = [32, 1], strides = [1, 1]} : vector<32x32xf32> to vector<32x1xf32>
    %390 = vector.extract_strided_slice %244 {offsets = [0, 928], sizes = [32, 32], strides = [1, 1]} : vector<32x1024xf32> to vector<32x32xf32>
    %391 = vector.broadcast %389 : vector<32x1xf32> to vector<32x32xf32>
    %392 = arith.mulf %391, %390 : vector<32x32xf32>
    %393 = arith.addf %388, %392 : vector<32x32xf32>
    %394 = vector.extract_strided_slice %239 {offsets = [0, 30], sizes = [32, 1], strides = [1, 1]} : vector<32x32xf32> to vector<32x1xf32>
    %395 = vector.extract_strided_slice %244 {offsets = [0, 960], sizes = [32, 32], strides = [1, 1]} : vector<32x1024xf32> to vector<32x32xf32>
    %396 = vector.broadcast %394 : vector<32x1xf32> to vector<32x32xf32>
    %397 = arith.mulf %396, %395 : vector<32x32xf32>
    %398 = arith.addf %393, %397 : vector<32x32xf32>
    %399 = vector.extract_strided_slice %239 {offsets = [0, 31], sizes = [32, 1], strides = [1, 1]} : vector<32x32xf32> to vector<32x1xf32>
    %400 = vector.extract_strided_slice %244 {offsets = [0, 992], sizes = [32, 32], strides = [1, 1]} : vector<32x1024xf32> to vector<32x32xf32>
    %401 = vector.broadcast %399 : vector<32x1xf32> to vector<32x32xf32>
    %402 = arith.mulf %401, %400 : vector<32x32xf32>
    %403 = arith.addf %398, %402 : vector<32x32xf32>
    %c0_57 = arith.constant 0 : index
    %c0_58 = arith.constant 0 : index
    %404 = vector.load %arg3[%c0_57, %c0_58] : memref<16x32xbf16, #tpu.memory_space<vmem>>, vector<16x32xbf16>
    %405 = arith.truncf %403 : vector<32x32xf32> to vector<32x32xbf16>
    %cst_59 = arith.constant dense<0.000000e+00> : vector<16x32xf32>
    %406 = tpu.matmul %404, %405, %cst_59 {dimension_numbers = #tpu.dot_dimension_numbers<[1], [0], [0], [1], [0, 0, 1, 1], [], []>} : vector<16x32xbf16>, vector<32x32xbf16>, vector<16x32xf32> -> vector<16x32xf32>
    %407 = vector.broadcast %29 : vector<16x1xf32> to vector<16x32xf32>
    %408 = arith.mulf %406, %407 : vector<16x32xf32>
    %409 = arith.addf %408, %240 : vector<16x32xf32>
    %410 = vector.broadcast %24 : vector<1x32xf32> to vector<16x32xf32>
    %411 = arith.addf %409, %410 : vector<16x32xf32>
    %cst_60 = arith.constant 0.000000e+00 : f32
    %412 = vector.broadcast %cst_60 : f32 to vector<16x32xf32>
    %413 = arith.maximumf %411, %412 : vector<16x32xf32>
    %414 = arith.truncf %413 : vector<16x32xf32> to vector<16x32xbf16>
    %cst_61 = arith.constant dense<0.000000e+00> : vector<16x96xf32>
    %415 = tpu.matmul %414, %25, %cst_61 {dimension_numbers = #tpu.dot_dimension_numbers<[1], [0], [0], [1], [0, 0, 1, 1], [], []>} : vector<16x32xbf16>, vector<32x96xbf16>, vector<16x96xf32> -> vector<16x96xf32>
    %416 = vector.broadcast %26 : vector<1x96xf32> to vector<16x96xf32>
    %417 = arith.addf %415, %416 : vector<16x96xf32>
    %418 = vector.extract_strided_slice %417 {offsets = [0, 0], sizes = [16, 32], strides = [1, 1]} : vector<16x96xf32> to vector<16x32xf32>
    %419 = vector.extract_strided_slice %243 {offsets = [0, 0], sizes = [16, 32], strides = [1, 1]} : vector<16x96xf32> to vector<16x32xf32>
    %420 = arith.addf %418, %419 : vector<16x32xf32>
    %421 = arith.negf %420 : vector<16x32xf32>
    %422 = math.exp %421 : vector<16x32xf32>
    %cst_62 = arith.constant 1.000000e+00 : f32
    %423 = vector.broadcast %cst_62 : f32 to vector<16x32xf32>
    %424 = arith.addf %423, %422 : vector<16x32xf32>
    %425 = arith.divf %423, %424 : vector<16x32xf32>
    %426 = vector.extract_strided_slice %417 {offsets = [0, 32], sizes = [16, 32], strides = [1, 1]} : vector<16x96xf32> to vector<16x32xf32>
    %427 = vector.extract_strided_slice %243 {offsets = [0, 32], sizes = [16, 32], strides = [1, 1]} : vector<16x96xf32> to vector<16x32xf32>
    %428 = arith.addf %426, %427 : vector<16x32xf32>
    %429 = arith.negf %428 : vector<16x32xf32>
    %430 = math.exp %429 : vector<16x32xf32>
    %cst_63 = arith.constant 1.000000e+00 : f32
    %431 = vector.broadcast %cst_63 : f32 to vector<16x32xf32>
    %432 = arith.addf %431, %430 : vector<16x32xf32>
    %433 = arith.divf %431, %432 : vector<16x32xf32>
    %434 = vector.extract_strided_slice %417 {offsets = [0, 64], sizes = [16, 32], strides = [1, 1]} : vector<16x96xf32> to vector<16x32xf32>
    %435 = vector.extract_strided_slice %243 {offsets = [0, 64], sizes = [16, 32], strides = [1, 1]} : vector<16x96xf32> to vector<16x32xf32>
    %436 = arith.mulf %425, %435 : vector<16x32xf32>
    %437 = arith.addf %434, %436 : vector<16x32xf32>
    %438 = math.tanh %437 : vector<16x32xf32>
    %cst_64 = arith.constant 1.000000e+00 : f32
    %439 = vector.broadcast %cst_64 : f32 to vector<16x32xf32>
    %440 = arith.subf %439, %433 : vector<16x32xf32>
    %441 = arith.mulf %440, %438 : vector<16x32xf32>
    %442 = arith.mulf %433, %236 : vector<16x32xf32>
    %443 = arith.addf %441, %442 : vector<16x32xf32>
    %c2_i32 = arith.constant 2 : i32
    %444 = arith.truncf %443 : vector<16x32xf32> to vector<16x32xbf16>
    %c0_65 = arith.constant 0 : index
    %c0_66 = arith.constant 0 : index
    %445 = vector.load %arg2[%c0_65, %c0_66] : memref<32x16xbf16, #tpu.memory_space<vmem>>, vector<32x16xbf16>
    %cst_67 = arith.constant dense<0.000000e+00> : vector<32x32xf32>
    %446 = tpu.matmul %445, %444, %cst_67 {dimension_numbers = #tpu.dot_dimension_numbers<[1], [0], [0], [1], [0, 0, 1, 1], [], []>} : vector<32x16xbf16>, vector<16x32xbf16>, vector<32x32xf32> -> vector<32x32xf32>
    %cst_68 = arith.constant dense<0.000000e+00> : vector<16x32xf32>
    %447 = tpu.matmul %444, %23, %cst_68 {dimension_numbers = #tpu.dot_dimension_numbers<[1], [0], [0], [1], [0, 0, 1, 1], [], []>} : vector<16x32xbf16>, vector<32x32xbf16>, vector<16x32xf32> -> vector<16x32xf32>
    %cst_69 = arith.constant dense<0.000000e+00> : vector<16x96xf32>
    %448 = tpu.matmul %444, %27, %cst_69 {dimension_numbers = #tpu.dot_dimension_numbers<[1], [0], [0], [1], [0, 0, 1, 1], [], []>} : vector<16x32xbf16>, vector<32x96xbf16>, vector<16x96xf32> -> vector<16x96xf32>
    %449 = vector.broadcast %28 : vector<1x96xf32> to vector<16x96xf32>
    %450 = arith.addf %448, %449 : vector<16x96xf32>
    %c0_70 = arith.constant 0 : index
    %c0_71 = arith.constant 0 : index
    %451 = vector.load %arg24[%c0_70, %c0_71] : memref<32x1024xf32, #tpu.memory_space<vmem>>, vector<32x1024xf32>
    %452 = vector.extract_strided_slice %446 {offsets = [0, 0], sizes = [32, 1], strides = [1, 1]} : vector<32x32xf32> to vector<32x1xf32>
    %453 = vector.extract_strided_slice %451 {offsets = [0, 0], sizes = [32, 32], strides = [1, 1]} : vector<32x1024xf32> to vector<32x32xf32>
    %454 = vector.broadcast %452 : vector<32x1xf32> to vector<32x32xf32>
    %455 = arith.mulf %454, %453 : vector<32x32xf32>
    %456 = vector.extract_strided_slice %446 {offsets = [0, 1], sizes = [32, 1], strides = [1, 1]} : vector<32x32xf32> to vector<32x1xf32>
    %457 = vector.extract_strided_slice %451 {offsets = [0, 32], sizes = [32, 32], strides = [1, 1]} : vector<32x1024xf32> to vector<32x32xf32>
    %458 = vector.broadcast %456 : vector<32x1xf32> to vector<32x32xf32>
    %459 = arith.mulf %458, %457 : vector<32x32xf32>
    %460 = arith.addf %455, %459 : vector<32x32xf32>
    %461 = vector.extract_strided_slice %446 {offsets = [0, 2], sizes = [32, 1], strides = [1, 1]} : vector<32x32xf32> to vector<32x1xf32>
    %462 = vector.extract_strided_slice %451 {offsets = [0, 64], sizes = [32, 32], strides = [1, 1]} : vector<32x1024xf32> to vector<32x32xf32>
    %463 = vector.broadcast %461 : vector<32x1xf32> to vector<32x32xf32>
    %464 = arith.mulf %463, %462 : vector<32x32xf32>
    %465 = arith.addf %460, %464 : vector<32x32xf32>
    %466 = vector.extract_strided_slice %446 {offsets = [0, 3], sizes = [32, 1], strides = [1, 1]} : vector<32x32xf32> to vector<32x1xf32>
    %467 = vector.extract_strided_slice %451 {offsets = [0, 96], sizes = [32, 32], strides = [1, 1]} : vector<32x1024xf32> to vector<32x32xf32>
    %468 = vector.broadcast %466 : vector<32x1xf32> to vector<32x32xf32>
    %469 = arith.mulf %468, %467 : vector<32x32xf32>
    %470 = arith.addf %465, %469 : vector<32x32xf32>
    %471 = vector.extract_strided_slice %446 {offsets = [0, 4], sizes = [32, 1], strides = [1, 1]} : vector<32x32xf32> to vector<32x1xf32>
    %472 = vector.extract_strided_slice %451 {offsets = [0, 128], sizes = [32, 32], strides = [1, 1]} : vector<32x1024xf32> to vector<32x32xf32>
    %473 = vector.broadcast %471 : vector<32x1xf32> to vector<32x32xf32>
    %474 = arith.mulf %473, %472 : vector<32x32xf32>
    %475 = arith.addf %470, %474 : vector<32x32xf32>
    %476 = vector.extract_strided_slice %446 {offsets = [0, 5], sizes = [32, 1], strides = [1, 1]} : vector<32x32xf32> to vector<32x1xf32>
    %477 = vector.extract_strided_slice %451 {offsets = [0, 160], sizes = [32, 32], strides = [1, 1]} : vector<32x1024xf32> to vector<32x32xf32>
    %478 = vector.broadcast %476 : vector<32x1xf32> to vector<32x32xf32>
    %479 = arith.mulf %478, %477 : vector<32x32xf32>
    %480 = arith.addf %475, %479 : vector<32x32xf32>
    %481 = vector.extract_strided_slice %446 {offsets = [0, 6], sizes = [32, 1], strides = [1, 1]} : vector<32x32xf32> to vector<32x1xf32>
    %482 = vector.extract_strided_slice %451 {offsets = [0, 192], sizes = [32, 32], strides = [1, 1]} : vector<32x1024xf32> to vector<32x32xf32>
    %483 = vector.broadcast %481 : vector<32x1xf32> to vector<32x32xf32>
    %484 = arith.mulf %483, %482 : vector<32x32xf32>
    %485 = arith.addf %480, %484 : vector<32x32xf32>
    %486 = vector.extract_strided_slice %446 {offsets = [0, 7], sizes = [32, 1], strides = [1, 1]} : vector<32x32xf32> to vector<32x1xf32>
    %487 = vector.extract_strided_slice %451 {offsets = [0, 224], sizes = [32, 32], strides = [1, 1]} : vector<32x1024xf32> to vector<32x32xf32>
    %488 = vector.broadcast %486 : vector<32x1xf32> to vector<32x32xf32>
    %489 = arith.mulf %488, %487 : vector<32x32xf32>
    %490 = arith.addf %485, %489 : vector<32x32xf32>
    %491 = vector.extract_strided_slice %446 {offsets = [0, 8], sizes = [32, 1], strides = [1, 1]} : vector<32x32xf32> to vector<32x1xf32>
    %492 = vector.extract_strided_slice %451 {offsets = [0, 256], sizes = [32, 32], strides = [1, 1]} : vector<32x1024xf32> to vector<32x32xf32>
    %493 = vector.broadcast %491 : vector<32x1xf32> to vector<32x32xf32>
    %494 = arith.mulf %493, %492 : vector<32x32xf32>
    %495 = arith.addf %490, %494 : vector<32x32xf32>
    %496 = vector.extract_strided_slice %446 {offsets = [0, 9], sizes = [32, 1], strides = [1, 1]} : vector<32x32xf32> to vector<32x1xf32>
    %497 = vector.extract_strided_slice %451 {offsets = [0, 288], sizes = [32, 32], strides = [1, 1]} : vector<32x1024xf32> to vector<32x32xf32>
    %498 = vector.broadcast %496 : vector<32x1xf32> to vector<32x32xf32>
    %499 = arith.mulf %498, %497 : vector<32x32xf32>
    %500 = arith.addf %495, %499 : vector<32x32xf32>
    %501 = vector.extract_strided_slice %446 {offsets = [0, 10], sizes = [32, 1], strides = [1, 1]} : vector<32x32xf32> to vector<32x1xf32>
    %502 = vector.extract_strided_slice %451 {offsets = [0, 320], sizes = [32, 32], strides = [1, 1]} : vector<32x1024xf32> to vector<32x32xf32>
    %503 = vector.broadcast %501 : vector<32x1xf32> to vector<32x32xf32>
    %504 = arith.mulf %503, %502 : vector<32x32xf32>
    %505 = arith.addf %500, %504 : vector<32x32xf32>
    %506 = vector.extract_strided_slice %446 {offsets = [0, 11], sizes = [32, 1], strides = [1, 1]} : vector<32x32xf32> to vector<32x1xf32>
    %507 = vector.extract_strided_slice %451 {offsets = [0, 352], sizes = [32, 32], strides = [1, 1]} : vector<32x1024xf32> to vector<32x32xf32>
    %508 = vector.broadcast %506 : vector<32x1xf32> to vector<32x32xf32>
    %509 = arith.mulf %508, %507 : vector<32x32xf32>
    %510 = arith.addf %505, %509 : vector<32x32xf32>
    %511 = vector.extract_strided_slice %446 {offsets = [0, 12], sizes = [32, 1], strides = [1, 1]} : vector<32x32xf32> to vector<32x1xf32>
    %512 = vector.extract_strided_slice %451 {offsets = [0, 384], sizes = [32, 32], strides = [1, 1]} : vector<32x1024xf32> to vector<32x32xf32>
    %513 = vector.broadcast %511 : vector<32x1xf32> to vector<32x32xf32>
    %514 = arith.mulf %513, %512 : vector<32x32xf32>
    %515 = arith.addf %510, %514 : vector<32x32xf32>
    %516 = vector.extract_strided_slice %446 {offsets = [0, 13], sizes = [32, 1], strides = [1, 1]} : vector<32x32xf32> to vector<32x1xf32>
    %517 = vector.extract_strided_slice %451 {offsets = [0, 416], sizes = [32, 32], strides = [1, 1]} : vector<32x1024xf32> to vector<32x32xf32>
    %518 = vector.broadcast %516 : vector<32x1xf32> to vector<32x32xf32>
    %519 = arith.mulf %518, %517 : vector<32x32xf32>
    %520 = arith.addf %515, %519 : vector<32x32xf32>
    %521 = vector.extract_strided_slice %446 {offsets = [0, 14], sizes = [32, 1], strides = [1, 1]} : vector<32x32xf32> to vector<32x1xf32>
    %522 = vector.extract_strided_slice %451 {offsets = [0, 448], sizes = [32, 32], strides = [1, 1]} : vector<32x1024xf32> to vector<32x32xf32>
    %523 = vector.broadcast %521 : vector<32x1xf32> to vector<32x32xf32>
    %524 = arith.mulf %523, %522 : vector<32x32xf32>
    %525 = arith.addf %520, %524 : vector<32x32xf32>
    %526 = vector.extract_strided_slice %446 {offsets = [0, 15], sizes = [32, 1], strides = [1, 1]} : vector<32x32xf32> to vector<32x1xf32>
    %527 = vector.extract_strided_slice %451 {offsets = [0, 480], sizes = [32, 32], strides = [1, 1]} : vector<32x1024xf32> to vector<32x32xf32>
    %528 = vector.broadcast %526 : vector<32x1xf32> to vector<32x32xf32>
    %529 = arith.mulf %528, %527 : vector<32x32xf32>
    %530 = arith.addf %525, %529 : vector<32x32xf32>
    %531 = vector.extract_strided_slice %446 {offsets = [0, 16], sizes = [32, 1], strides = [1, 1]} : vector<32x32xf32> to vector<32x1xf32>
    %532 = vector.extract_strided_slice %451 {offsets = [0, 512], sizes = [32, 32], strides = [1, 1]} : vector<32x1024xf32> to vector<32x32xf32>
    %533 = vector.broadcast %531 : vector<32x1xf32> to vector<32x32xf32>
    %534 = arith.mulf %533, %532 : vector<32x32xf32>
    %535 = arith.addf %530, %534 : vector<32x32xf32>
    %536 = vector.extract_strided_slice %446 {offsets = [0, 17], sizes = [32, 1], strides = [1, 1]} : vector<32x32xf32> to vector<32x1xf32>
    %537 = vector.extract_strided_slice %451 {offsets = [0, 544], sizes = [32, 32], strides = [1, 1]} : vector<32x1024xf32> to vector<32x32xf32>
    %538 = vector.broadcast %536 : vector<32x1xf32> to vector<32x32xf32>
    %539 = arith.mulf %538, %537 : vector<32x32xf32>
    %540 = arith.addf %535, %539 : vector<32x32xf32>
    %541 = vector.extract_strided_slice %446 {offsets = [0, 18], sizes = [32, 1], strides = [1, 1]} : vector<32x32xf32> to vector<32x1xf32>
    %542 = vector.extract_strided_slice %451 {offsets = [0, 576], sizes = [32, 32], strides = [1, 1]} : vector<32x1024xf32> to vector<32x32xf32>
    %543 = vector.broadcast %541 : vector<32x1xf32> to vector<32x32xf32>
    %544 = arith.mulf %543, %542 : vector<32x32xf32>
    %545 = arith.addf %540, %544 : vector<32x32xf32>
    %546 = vector.extract_strided_slice %446 {offsets = [0, 19], sizes = [32, 1], strides = [1, 1]} : vector<32x32xf32> to vector<32x1xf32>
    %547 = vector.extract_strided_slice %451 {offsets = [0, 608], sizes = [32, 32], strides = [1, 1]} : vector<32x1024xf32> to vector<32x32xf32>
    %548 = vector.broadcast %546 : vector<32x1xf32> to vector<32x32xf32>
    %549 = arith.mulf %548, %547 : vector<32x32xf32>
    %550 = arith.addf %545, %549 : vector<32x32xf32>
    %551 = vector.extract_strided_slice %446 {offsets = [0, 20], sizes = [32, 1], strides = [1, 1]} : vector<32x32xf32> to vector<32x1xf32>
    %552 = vector.extract_strided_slice %451 {offsets = [0, 640], sizes = [32, 32], strides = [1, 1]} : vector<32x1024xf32> to vector<32x32xf32>
    %553 = vector.broadcast %551 : vector<32x1xf32> to vector<32x32xf32>
    %554 = arith.mulf %553, %552 : vector<32x32xf32>
    %555 = arith.addf %550, %554 : vector<32x32xf32>
    %556 = vector.extract_strided_slice %446 {offsets = [0, 21], sizes = [32, 1], strides = [1, 1]} : vector<32x32xf32> to vector<32x1xf32>
    %557 = vector.extract_strided_slice %451 {offsets = [0, 672], sizes = [32, 32], strides = [1, 1]} : vector<32x1024xf32> to vector<32x32xf32>
    %558 = vector.broadcast %556 : vector<32x1xf32> to vector<32x32xf32>
    %559 = arith.mulf %558, %557 : vector<32x32xf32>
    %560 = arith.addf %555, %559 : vector<32x32xf32>
    %561 = vector.extract_strided_slice %446 {offsets = [0, 22], sizes = [32, 1], strides = [1, 1]} : vector<32x32xf32> to vector<32x1xf32>
    %562 = vector.extract_strided_slice %451 {offsets = [0, 704], sizes = [32, 32], strides = [1, 1]} : vector<32x1024xf32> to vector<32x32xf32>
    %563 = vector.broadcast %561 : vector<32x1xf32> to vector<32x32xf32>
    %564 = arith.mulf %563, %562 : vector<32x32xf32>
    %565 = arith.addf %560, %564 : vector<32x32xf32>
    %566 = vector.extract_strided_slice %446 {offsets = [0, 23], sizes = [32, 1], strides = [1, 1]} : vector<32x32xf32> to vector<32x1xf32>
    %567 = vector.extract_strided_slice %451 {offsets = [0, 736], sizes = [32, 32], strides = [1, 1]} : vector<32x1024xf32> to vector<32x32xf32>
    %568 = vector.broadcast %566 : vector<32x1xf32> to vector<32x32xf32>
    %569 = arith.mulf %568, %567 : vector<32x32xf32>
    %570 = arith.addf %565, %569 : vector<32x32xf32>
    %571 = vector.extract_strided_slice %446 {offsets = [0, 24], sizes = [32, 1], strides = [1, 1]} : vector<32x32xf32> to vector<32x1xf32>
    %572 = vector.extract_strided_slice %451 {offsets = [0, 768], sizes = [32, 32], strides = [1, 1]} : vector<32x1024xf32> to vector<32x32xf32>
    %573 = vector.broadcast %571 : vector<32x1xf32> to vector<32x32xf32>
    %574 = arith.mulf %573, %572 : vector<32x32xf32>
    %575 = arith.addf %570, %574 : vector<32x32xf32>
    %576 = vector.extract_strided_slice %446 {offsets = [0, 25], sizes = [32, 1], strides = [1, 1]} : vector<32x32xf32> to vector<32x1xf32>
    %577 = vector.extract_strided_slice %451 {offsets = [0, 800], sizes = [32, 32], strides = [1, 1]} : vector<32x1024xf32> to vector<32x32xf32>
    %578 = vector.broadcast %576 : vector<32x1xf32> to vector<32x32xf32>
    %579 = arith.mulf %578, %577 : vector<32x32xf32>
    %580 = arith.addf %575, %579 : vector<32x32xf32>
    %581 = vector.extract_strided_slice %446 {offsets = [0, 26], sizes = [32, 1], strides = [1, 1]} : vector<32x32xf32> to vector<32x1xf32>
    %582 = vector.extract_strided_slice %451 {offsets = [0, 832], sizes = [32, 32], strides = [1, 1]} : vector<32x1024xf32> to vector<32x32xf32>
    %583 = vector.broadcast %581 : vector<32x1xf32> to vector<32x32xf32>
    %584 = arith.mulf %583, %582 : vector<32x32xf32>
    %585 = arith.addf %580, %584 : vector<32x32xf32>
    %586 = vector.extract_strided_slice %446 {offsets = [0, 27], sizes = [32, 1], strides = [1, 1]} : vector<32x32xf32> to vector<32x1xf32>
    %587 = vector.extract_strided_slice %451 {offsets = [0, 864], sizes = [32, 32], strides = [1, 1]} : vector<32x1024xf32> to vector<32x32xf32>
    %588 = vector.broadcast %586 : vector<32x1xf32> to vector<32x32xf32>
    %589 = arith.mulf %588, %587 : vector<32x32xf32>
    %590 = arith.addf %585, %589 : vector<32x32xf32>
    %591 = vector.extract_strided_slice %446 {offsets = [0, 28], sizes = [32, 1], strides = [1, 1]} : vector<32x32xf32> to vector<32x1xf32>
    %592 = vector.extract_strided_slice %451 {offsets = [0, 896], sizes = [32, 32], strides = [1, 1]} : vector<32x1024xf32> to vector<32x32xf32>
    %593 = vector.broadcast %591 : vector<32x1xf32> to vector<32x32xf32>
    %594 = arith.mulf %593, %592 : vector<32x32xf32>
    %595 = arith.addf %590, %594 : vector<32x32xf32>
    %596 = vector.extract_strided_slice %446 {offsets = [0, 29], sizes = [32, 1], strides = [1, 1]} : vector<32x32xf32> to vector<32x1xf32>
    %597 = vector.extract_strided_slice %451 {offsets = [0, 928], sizes = [32, 32], strides = [1, 1]} : vector<32x1024xf32> to vector<32x32xf32>
    %598 = vector.broadcast %596 : vector<32x1xf32> to vector<32x32xf32>
    %599 = arith.mulf %598, %597 : vector<32x32xf32>
    %600 = arith.addf %595, %599 : vector<32x32xf32>
    %601 = vector.extract_strided_slice %446 {offsets = [0, 30], sizes = [32, 1], strides = [1, 1]} : vector<32x32xf32> to vector<32x1xf32>
    %602 = vector.extract_strided_slice %451 {offsets = [0, 960], sizes = [32, 32], strides = [1, 1]} : vector<32x1024xf32> to vector<32x32xf32>
    %603 = vector.broadcast %601 : vector<32x1xf32> to vector<32x32xf32>
    %604 = arith.mulf %603, %602 : vector<32x32xf32>
    %605 = arith.addf %600, %604 : vector<32x32xf32>
    %606 = vector.extract_strided_slice %446 {offsets = [0, 31], sizes = [32, 1], strides = [1, 1]} : vector<32x32xf32> to vector<32x1xf32>
    %607 = vector.extract_strided_slice %451 {offsets = [0, 992], sizes = [32, 32], strides = [1, 1]} : vector<32x1024xf32> to vector<32x32xf32>
    %608 = vector.broadcast %606 : vector<32x1xf32> to vector<32x32xf32>
    %609 = arith.mulf %608, %607 : vector<32x32xf32>
    %610 = arith.addf %605, %609 : vector<32x32xf32>
    %c0_72 = arith.constant 0 : index
    %c0_73 = arith.constant 0 : index
    %611 = vector.load %arg3[%c0_72, %c0_73] : memref<16x32xbf16, #tpu.memory_space<vmem>>, vector<16x32xbf16>
    %612 = arith.truncf %610 : vector<32x32xf32> to vector<32x32xbf16>
    %cst_74 = arith.constant dense<0.000000e+00> : vector<16x32xf32>
    %613 = tpu.matmul %611, %612, %cst_74 {dimension_numbers = #tpu.dot_dimension_numbers<[1], [0], [0], [1], [0, 0, 1, 1], [], []>} : vector<16x32xbf16>, vector<32x32xbf16>, vector<16x32xf32> -> vector<16x32xf32>
    %614 = vector.broadcast %29 : vector<16x1xf32> to vector<16x32xf32>
    %615 = arith.mulf %613, %614 : vector<16x32xf32>
    %616 = arith.addf %615, %447 : vector<16x32xf32>
    %617 = vector.broadcast %24 : vector<1x32xf32> to vector<16x32xf32>
    %618 = arith.addf %616, %617 : vector<16x32xf32>
    %cst_75 = arith.constant 0.000000e+00 : f32
    %619 = vector.broadcast %cst_75 : f32 to vector<16x32xf32>
    %620 = arith.maximumf %618, %619 : vector<16x32xf32>
    %621 = arith.truncf %620 : vector<16x32xf32> to vector<16x32xbf16>
    %cst_76 = arith.constant dense<0.000000e+00> : vector<16x96xf32>
    %622 = tpu.matmul %621, %25, %cst_76 {dimension_numbers = #tpu.dot_dimension_numbers<[1], [0], [0], [1], [0, 0, 1, 1], [], []>} : vector<16x32xbf16>, vector<32x96xbf16>, vector<16x96xf32> -> vector<16x96xf32>
    %623 = vector.broadcast %26 : vector<1x96xf32> to vector<16x96xf32>
    %624 = arith.addf %622, %623 : vector<16x96xf32>
    %625 = vector.extract_strided_slice %624 {offsets = [0, 0], sizes = [16, 32], strides = [1, 1]} : vector<16x96xf32> to vector<16x32xf32>
    %626 = vector.extract_strided_slice %450 {offsets = [0, 0], sizes = [16, 32], strides = [1, 1]} : vector<16x96xf32> to vector<16x32xf32>
    %627 = arith.addf %625, %626 : vector<16x32xf32>
    %628 = arith.negf %627 : vector<16x32xf32>
    %629 = math.exp %628 : vector<16x32xf32>
    %cst_77 = arith.constant 1.000000e+00 : f32
    %630 = vector.broadcast %cst_77 : f32 to vector<16x32xf32>
    %631 = arith.addf %630, %629 : vector<16x32xf32>
    %632 = arith.divf %630, %631 : vector<16x32xf32>
    %633 = vector.extract_strided_slice %624 {offsets = [0, 32], sizes = [16, 32], strides = [1, 1]} : vector<16x96xf32> to vector<16x32xf32>
    %634 = vector.extract_strided_slice %450 {offsets = [0, 32], sizes = [16, 32], strides = [1, 1]} : vector<16x96xf32> to vector<16x32xf32>
    %635 = arith.addf %633, %634 : vector<16x32xf32>
    %636 = arith.negf %635 : vector<16x32xf32>
    %637 = math.exp %636 : vector<16x32xf32>
    %cst_78 = arith.constant 1.000000e+00 : f32
    %638 = vector.broadcast %cst_78 : f32 to vector<16x32xf32>
    %639 = arith.addf %638, %637 : vector<16x32xf32>
    %640 = arith.divf %638, %639 : vector<16x32xf32>
    %641 = vector.extract_strided_slice %624 {offsets = [0, 64], sizes = [16, 32], strides = [1, 1]} : vector<16x96xf32> to vector<16x32xf32>
    %642 = vector.extract_strided_slice %450 {offsets = [0, 64], sizes = [16, 32], strides = [1, 1]} : vector<16x96xf32> to vector<16x32xf32>
    %643 = arith.mulf %632, %642 : vector<16x32xf32>
    %644 = arith.addf %641, %643 : vector<16x32xf32>
    %645 = math.tanh %644 : vector<16x32xf32>
    %cst_79 = arith.constant 1.000000e+00 : f32
    %646 = vector.broadcast %cst_79 : f32 to vector<16x32xf32>
    %647 = arith.subf %646, %640 : vector<16x32xf32>
    %648 = arith.mulf %647, %645 : vector<16x32xf32>
    %649 = arith.mulf %640, %443 : vector<16x32xf32>
    %650 = arith.addf %648, %649 : vector<16x32xf32>
    %c0_80 = arith.constant 0 : index
    %c0_81 = arith.constant 0 : index
    %651 = vector.load %arg5[%c0_80, %c0_81] : memref<2x16xbf16, #tpu.memory_space<vmem>>, vector<2x16xbf16>
    %652 = arith.truncf %650 : vector<16x32xf32> to vector<16x32xbf16>
    %cst_82 = arith.constant dense<0.000000e+00> : vector<2x32xf32>
    %653 = tpu.matmul %651, %652, %cst_82 {dimension_numbers = #tpu.dot_dimension_numbers<[1], [0], [0], [1], [0, 0, 1, 1], [], []>} : vector<2x16xbf16>, vector<16x32xbf16>, vector<2x32xf32> -> vector<2x32xf32>
    %c0_83 = arith.constant 0 : index
    %c0_84 = arith.constant 0 : index
    %654 = vector.load %arg6[%c0_83, %c0_84] : memref<2x1xf32, #tpu.memory_space<vmem>>, vector<2x1xf32>
    %655 = vector.broadcast %654 : vector<2x1xf32> to vector<2x32xf32>
    %656 = arith.mulf %653, %655 : vector<2x32xf32>
    %657 = arith.truncf %656 : vector<2x32xf32> to vector<2x32xbf16>
    %c0_85 = arith.constant 0 : index
    %c0_86 = arith.constant 0 : index
    %658 = vector.load %arg19[%c0_85, %c0_86] : memref<32x32xbf16, #tpu.memory_space<vmem>>, vector<32x32xbf16>
    %cst_87 = arith.constant dense<0.000000e+00> : vector<2x32xf32>
    %659 = tpu.matmul %657, %658, %cst_87 {dimension_numbers = #tpu.dot_dimension_numbers<[1], [0], [0], [1], [0, 0, 1, 1], [], []>} : vector<2x32xbf16>, vector<32x32xbf16>, vector<2x32xf32> -> vector<2x32xf32>
    %c0_88 = arith.constant 0 : index
    %c0_89 = arith.constant 0 : index
    %660 = vector.load %arg20[%c0_88, %c0_89] : memref<1x32xf32, #tpu.memory_space<vmem>>, vector<1x32xf32>
    %661 = vector.broadcast %660 : vector<1x32xf32> to vector<2x32xf32>
    %662 = arith.addf %659, %661 : vector<2x32xf32>
    %cst_90 = arith.constant 0.000000e+00 : f32
    %663 = vector.broadcast %cst_90 : f32 to vector<2x32xf32>
    %664 = arith.maximumf %662, %663 : vector<2x32xf32>
    %665 = arith.truncf %664 : vector<2x32xf32> to vector<2x32xbf16>
    %c0_91 = arith.constant 0 : index
    %c0_92 = arith.constant 0 : index
    %666 = vector.load %arg21[%c0_91, %c0_92] : memref<32x2xbf16, #tpu.memory_space<vmem>>, vector<32x2xbf16>
    %cst_93 = arith.constant dense<0.000000e+00> : vector<2x2xf32>
    %667 = tpu.matmul %665, %666, %cst_93 {dimension_numbers = #tpu.dot_dimension_numbers<[1], [0], [0], [1], [0, 0, 1, 1], [], []>} : vector<2x32xbf16>, vector<32x2xbf16>, vector<2x2xf32> -> vector<2x2xf32>
    %c0_94 = arith.constant 0 : index
    %c0_95 = arith.constant 0 : index
    %668 = vector.load %arg22[%c0_94, %c0_95] : memref<1x2xf32, #tpu.memory_space<vmem>>, vector<1x2xf32>
    %669 = vector.broadcast %668 : vector<1x2xf32> to vector<2x2xf32>
    %670 = arith.addf %667, %669 : vector<2x2xf32>
    %cst_96 = arith.constant dense<0xFF800000> : vector<2xf32>
    %671 = vector.multi_reduction <maximumf>, %670, %cst_96 [1] : vector<2x2xf32> to vector<2xf32>
    %672 = vector.shape_cast %671 : vector<2xf32> to vector<2x1xf32>
    %673 = vector.broadcast %672 : vector<2x1xf32> to vector<2x2xf32>
    %674 = arith.subf %670, %673 : vector<2x2xf32>
    %675 = math.exp %674 : vector<2x2xf32>
    %cst_97 = arith.constant dense<0.000000e+00> : vector<2xf32>
    %676 = vector.multi_reduction <add>, %675, %cst_97 [1] : vector<2x2xf32> to vector<2xf32>
    %677 = vector.shape_cast %676 : vector<2xf32> to vector<2x1xf32>
    %678 = math.log %677 : vector<2x1xf32>
    %679 = vector.broadcast %678 : vector<2x1xf32> to vector<2x2xf32>
    %680 = arith.subf %674, %679 : vector<2x2xf32>
    %c0_98 = arith.constant 0 : index
    %c0_99 = arith.constant 0 : index
    %681 = vector.load %arg23[%c0_98, %c0_99] : memref<2x2xf32, #tpu.memory_space<vmem>>, vector<2x2xf32>
    tpu.vector_store %arg23[%c0_98, %c0_99], %680 {strides = array<i32>} : memref<2x2xf32, #tpu.memory_space<vmem>>, vector<2x2xf32>,
    return
  }
}

</mosaic_0001>

<bundles_post_ra>
// kernel: tpu_custom_call.1
= control target key start
LH: loop header
LB: loop body
LE: loop exit
PB: predicated region body
PF: predicated region fallthrough
CT: control target
= control target key end

     0   :  { %s10109_s0 = inlined_call_operand.vmem [shape: bf16[16,8], index: 0, kind: input, shape index: {}]   ;;  %s10110_s1 = inlined_call_operand.vmem [shape: bf16[32,4], index: 1, kind: input, shape index: {}]   ;;  %s10111_s2 = inlined_call_operand.vmem [shape: bf16[32,16], index: 2, kind: input, shape index: {}]   ;;  %s10112_s3 = inlined_call_operand.hbm [shape: bf16[16,32], index: 3, kind: input, shape index: {}]   ;;  %s10113_s4 = inlined_call_operand.vmem [shape: f32[16,1], index: 4, kind: input, shape index: {}]   ;;  %s10114_s5 = inlined_call_operand.hbm [shape: bf16[2,16], index: 5, kind: input, shape index: {}]   ;;  %s10115_s6 = inlined_call_operand.vmem [shape: f32[2,1], index: 6, kind: input, shape index: {}]   ;;  %s10116_s7 = inlined_call_operand.hbm [shape: bf16[8,32], index: 7, kind: input, shape index: {}]   ;;  %s10117_s8 = inlined_call_operand.hbm [shape: f32[1,32], index: 8, kind: input, shape index: {}]   ;;  %s10118_s9 = inlined_call_operand.hbm [shape: bf16[4,32], index: 9, kind: input, shape index: {}]   ;;  %s10119_s10 = inlined_call_operand.hbm [shape: f32[1,32], index: 10, kind: input, shape index: {}]   ;;  %s10120_s11 = inlined_call_operand.vmem [shape: bf16[32,1024], index: 11, kind: input, shape index: {}]   ;;  %s10121_s12 = inlined_call_operand.hbm [shape: f32[1,1024], index: 12, kind: input, shape index: {}]   ;;  %s10122_s13 = inlined_call_operand.hbm [shape: bf16[32,32], index: 13, kind: input, shape index: {}]   ;;  %s10123_s14 = inlined_call_operand.hbm [shape: f32[1,32], index: 14, kind: input, shape index: {}]   ;;  %s10124_s15 = inlined_call_operand.vmem [shape: bf16[32,96], index: 15, kind: input, shape index: {}]   ;;  %s10125_s16 = inlined_call_operand.vmem [shape: f32[1,96], index: 16, kind: input, shape index: {}]   ;;  %s10126_s17 = inlined_call_operand.hbm [shape: bf16[32,96], index: 17, kind: input, shape index: {}]   ;;  %s10127_s18 = inlined_call_operand.vmem [shape: f32[1,96], index: 18, kind: input, shape index: {}]   ;;  %s10128_s19 = inlined_call_operand.vmem [shape: bf16[32,32], index: 19, kind: input, shape index: {}]   ;;  %s10129_s20 = inlined_call_operand.vmem [shape: f32[1,32], index: 20, kind: input, shape index: {}]   ;;  %s10130_s21 = inlined_call_operand.vmem [shape: bf16[32,2], index: 21, kind: input, shape index: {}]   ;;  %s10131_s22 = inlined_call_operand.vmem [shape: f32[1,2], index: 22, kind: input, shape index: {}]   ;;  %s10132_s23 = inlined_call_operand.hbm [shape: f32[2,2], index: 23, kind: output, shape index: {}]  }
   0x1   :  { %10361 = sst [smem:[#allocation101_spill]] %s10109_s0 }
   0x2   :  { %10362 = sst [smem:[#allocation102_spill]] %s10110_s1 }
   0x3   :  { %10363 = sst [smem:[#allocation103_spill]] %s10111_s2 }
   0x4   :  { %10364 = sst [smem:[#allocation104_spill]] %s10112_s3 }
   0x5   :  { %10365 = sst [smem:[#allocation105_spill]] %s10113_s4 }
   0x6   :  { %10366 = sst [smem:[#allocation106_spill]] %s10114_s5 }
   0x7   :  { %10367 = sst [smem:[#allocation107_spill]] %s10115_s6 }
   0x8   :  { %10368 = sst [smem:[#allocation108_spill]] %s10116_s7 }
   0x9   :  { %28 = vsyncpa [#allocation4], 0 }
   0xa   :  { %29 = vsyncpa [#allocation7], 0 }
   0xb   :  { %30 = vsyncpa [#allocation10], 0 }
   0xc   :  { %31 = vsyncpa [#allocation13], 0 }
   0xd   :  { %32 = vsyncpa [#allocation16], 0 }
   0xe   :  { %33 = vsyncpa [#allocation19], 0 }
   0xf   :  { %34 = vsyncpa [#allocation5], 0  ;;  %s6486_s4 = smov [#allocation6]   ;;  %s6487_s24 = smov [#allocation9]  }
  0x10   :  { %s61_s30 = sshll.u32 %s6486_s4, 4  ;;  %s83_s25 = sshll.u32 %s6487_s24, 4  ;;  %s62_s30 = int_to_ptr.vmem [resolvable:$true] %s61_s30  ;;  %s84_s25 = int_to_ptr.vmem [resolvable:$true] %s83_s25 }
  0x11   :  { %s10369_s26 = sld [smem:[#allocation106_spill]] }
  0x17   :  { %s6230_s2 = scalar_lea.hbm %s10369_s26, 16 }
  0x18   :  { %p6231_p0 = scmp.ne.s32.totalorder %s10369_s26, %s6230_s2  ;;  %p6234_p1 = scmp.lt.u32.totalorder %s6230_s2, %s10369_s26 }
  0x1a   :  { %p6236_p2 = pnand %p6234_p1, %p6231_p0 }
  0x1c   :  { %6239 = shalt.err (!%p6236_p2)
}
  0x1d   :  { %s6240_s29 = scalar_lea.vmem %s62_s30, 16  ;;  %s6244_s3 = scalar_lea.vmem %s62_s30, 32 }
  0x1e   :  { %p6241_p3 = scmp.ne.s32.totalorder %s62_s30, %s6240_s29  ;;  %p6245_p4 = scmp.lt.s32.totalorder %s62_s30, %s62_s30 }
  0x1f   :  { %p6246_p5 = scmp.lt.s32.totalorder %s6244_s3, %s6240_s29 }
  0x21   :  { %p6247_p6 = por %p6246_p5, %p6245_p4 }
  0x23   :  { %p6248_p7 = pnand %p6247_p6, %p6241_p3 }
  0x25   :  { %6251 = shalt.err (!%p6248_p7)
}
  0x26   :  { %64 = dma.hbm_to_vmem [thread:$0]  %s10369_s26, 16, %s62_s30, [#allocation7]  }
  0x27   :  { %s6252_s1 = scalar_lea.hbm %s10117_s8, 16 }
  0x28   :  { %p6253_p8 = scmp.ne.s32.totalorder %s10117_s8, %s6252_s1  ;;  %p6256_p9 = scmp.lt.u32.totalorder %s6252_s1, %s10117_s8 }
  0x2a   :  { %p6258_p10 = pnand %p6256_p9, %p6253_p8 }
  0x2c   :  { %6261 = shalt.err (!%p6258_p10)
}
  0x2d   :  { %s6262_s28 = scalar_lea.vmem %s84_s25, 16  ;;  %s6266_s29 = scalar_lea.vmem %s84_s25, 32 }
  0x2e   :  { %p6263_p11 = scmp.ne.s32.totalorder %s84_s25, %s6262_s28  ;;  %p6267_p12 = scmp.lt.s32.totalorder %s84_s25, %s84_s25 }
  0x2f   :  { %p6268_p13 = scmp.lt.s32.totalorder %s6266_s29, %s6262_s28 }
  0x31   :  { %p6269_p0 = por %p6268_p13, %p6267_p12 }
  0x33   :  { %p6270_p1 = pnand %p6269_p0, %p6263_p11 }
  0x35   :  { %6273 = shalt.err (!%p6270_p1)
}
  0x36   :  { %86 = dma.hbm_to_vmem [thread:$0]  %s10117_s8, 16, %s84_s25, [#allocation10]  }
  0x37   :  { %s6488_s3 = smov [#allocation12]   ;;  %s6274_s5 = scalar_lea.hbm %s10119_s10, 16 }
  0x38   :  { %s103_s0 = sshll.u32 %s6488_s3, 4  ;;  %p6275_p2 = scmp.ne.s32.totalorder %s10119_s10, %s6274_s5  ;;  %s104_s0 = int_to_ptr.vmem [resolvable:$true] %s103_s0 }
  0x39   :  { %p6278_p3 = scmp.lt.u32.totalorder %s6274_s5, %s10119_s10 }
  0x3b   :  { %p6280_p4 = pnand %p6278_p3, %p6275_p2 }
  0x3d   :  { %6283 = shalt.err (!%p6280_p4)
}
  0x3e   :  { %s6284_s7 = scalar_lea.vmem %s104_s0, 16  ;;  %s6288_s8 = scalar_lea.vmem %s104_s0, 32 }
  0x3f   :  { %p6285_p5 = scmp.ne.s32.totalorder %s104_s0, %s6284_s7  ;;  %p6289_p6 = scmp.lt.s32.totalorder %s104_s0, %s104_s0 }
  0x40   :  { %p6290_p7 = scmp.lt.s32.totalorder %s6288_s8, %s6284_s7 }
  0x42   :  { %p6291_p8 = por %p6290_p7, %p6289_p6 }
  0x44   :  { %p6292_p9 = pnand %p6291_p8, %p6285_p5 }
  0x46   :  { %6295 = shalt.err (!%p6292_p9)
}
  0x47   :  { %106 = dma.hbm_to_vmem [thread:$0]  %s10119_s10, 16, %s104_s0, [#allocation13]  }
  0x48   :  { %s6489_s29 = smov [#allocation15]   ;;  %s6490_s26 = smov [#allocation3]  }
  0x49   :  { %s124_s30 = sshll.u32 %s6489_s29, 4  ;;  %s46_s3 = sshll.u32 %s6490_s26, 4  ;;  %s125_s30 = int_to_ptr.vmem [resolvable:$true] %s124_s30  ;;  %s47_s3 = int_to_ptr.vmem [resolvable:$true] %s46_s3 }
  0x4a   :  { %s6296_s5 = scalar_lea.hbm %s10122_s13, 256 }
  0x4b   :  { %p6297_p10 = scmp.ne.s32.totalorder %s10122_s13, %s6296_s5  ;;  %p6300_p11 = scmp.lt.u32.totalorder %s6296_s5, %s10122_s13 }
  0x4d   :  { %p6302_p12 = pnand %p6300_p11, %p6297_p10 }
  0x4f   :  { %6305 = shalt.err (!%p6302_p12)
}
  0x50   :  { %s6306_s10 = scalar_lea.vmem %s125_s30, 256  ;;  %p6311_p0 = scmp.lt.s32.totalorder %s125_s30, %s125_s30 }
  0x51   :  { %p6307_p13 = scmp.ne.s32.totalorder %s125_s30, %s6306_s10  ;;  %p6312_p1 = scmp.lt.s32.totalorder %s6306_s10, %s6306_s10 }
  0x53   :  { %p6313_p2 = por %p6312_p1, %p6311_p0 }
  0x55   :  { %p6314_p3 = pnand %p6313_p2, %p6307_p13 }
  0x57   :  { %6317 = shalt.err (!%p6314_p3)
}
  0x58   :  { %s6491_s0 = smov 64   ;;  %s6492_s7 = smov 4  }
  0x59   :  { %130 = dma.hbm_to_vmem [thread:$0]  %s10122_s13, 256, %s125_s30, [#allocation16], %s6491_s0, %s6491_s0, %s6492_s7  }
  0x5a   :  { %s10370_s26 = sld [smem:[#allocation104_spill]] }
  0x60   :  { %s6318_s4 = scalar_lea.hbm %s10370_s26, 128 }
  0x61   :  { %p6319_p4 = scmp.ne.s32.totalorder %s10370_s26, %s6318_s4  ;;  %p6322_p5 = scmp.lt.u32.totalorder %s6318_s4, %s10370_s26 }
  0x63   :  { %p6324_p6 = pnand %p6322_p5, %p6319_p4 }
  0x65   :  { %6327 = shalt.err (!%p6324_p6)
}
  0x66   :  { %s6328_s2 = scalar_lea.vmem %s47_s3, 128  ;;  %p6333_p8 = scmp.lt.s32.totalorder %s47_s3, %s47_s3 }
  0x67   :  { %p6329_p7 = scmp.ne.s32.totalorder %s47_s3, %s6328_s2  ;;  %p6334_p9 = scmp.lt.s32.totalorder %s6328_s2, %s6328_s2 }
  0x69   :  { %p6335_p10 = por %p6334_p9, %p6333_p8 }
  0x6b   :  { %p6336_p11 = pnand %p6335_p10, %p6329_p7 }
  0x6d   :  { %6339 = shalt.err (!%p6336_p11)
}
  0x6e   :  { %52 = dma.hbm_to_vmem [thread:$0]  %s10370_s26, 128, %s47_s3, [#allocation4], %s6491_s0, %s6491_s0, %s6492_s7  }
  0x6f   :  { %s6493_s27 = smov [#allocation8]   ;;  %s6494_s8 = smov [#allocation11]  }
  0x70   :  { %s73_s10 = sshll.u32 %s6493_s27, 4  ;;  %s93_s25 = sshll.u32 %s6494_s8, 4  ;;  %s74_s10 = int_to_ptr.vmem [resolvable:$true] %s73_s10  ;;  %s94_s25 = int_to_ptr.vmem [resolvable:$true] %s93_s25 }
  0x71   :  { %s10371_s4 = sld [smem:[#allocation108_spill]] }
  0x77   :  { %s6340_s24 = scalar_lea.hbm %s10371_s4, 64 }
  0x78   :  { %p6341_p12 = scmp.ne.s32.totalorder %s10371_s4, %s6340_s24  ;;  %p6344_p13 = scmp.lt.u32.totalorder %s6340_s24, %s10371_s4 }
  0x7a   :  { %p6346_p0 = pnand %p6344_p13, %p6341_p12 }
  0x7c   :  { %6349 = shalt.err (!%p6346_p0)
}
  0x7d   :  { %s6350_s3 = scalar_lea.vmem %s74_s10, 64  ;;  %p6355_p2 = scmp.lt.s32.totalorder %s74_s10, %s74_s10 }
  0x7e   :  { %p6351_p1 = scmp.ne.s32.totalorder %s74_s10, %s6350_s3  ;;  %p6356_p3 = scmp.lt.s32.totalorder %s6350_s3, %s6350_s3 }
  0x80   :  { %p6357_p4 = por %p6356_p3, %p6355_p2 }
  0x82   :  { %p6358_p5 = pnand %p6357_p4, %p6351_p1 }
  0x84   :  { %6361 = shalt.err (!%p6358_p5)
}
  0x85   :  { %76 = dma.hbm_to_vmem [thread:$0]  %s10371_s4, 64, %s74_s10, [#allocation7]  }
  0x86   :  { %s6362_s8 = scalar_lea.hbm %s10118_s9, 32 }
  0x87   :  { %p6363_p6 = scmp.ne.s32.totalorder %s10118_s9, %s6362_s8  ;;  %p6366_p7 = scmp.lt.u32.totalorder %s6362_s8, %s10118_s9 }
  0x89   :  { %p6368_p8 = pnand %p6366_p7, %p6363_p6 }
  0x8b   :  { %6371 = shalt.err (!%p6368_p8)
}
  0x8c   :  { %s6372_s1 = scalar_lea.vmem %s94_s25, 32  ;;  %p6377_p10 = scmp.lt.s32.totalorder %s94_s25, %s94_s25 }
  0x8d   :  { %p6373_p9 = scmp.ne.s32.totalorder %s94_s25, %s6372_s1  ;;  %p6378_p11 = scmp.lt.s32.totalorder %s6372_s1, %s6372_s1 }
  0x8f   :  { %p6379_p12 = por %p6378_p11, %p6377_p10 }
  0x91   :  { %p6380_p13 = pnand %p6379_p12, %p6373_p9 }
  0x93   :  { %6383 = shalt.err (!%p6380_p13)
}
  0x94   :  { %96 = dma.hbm_to_vmem [thread:$0]  %s10118_s9, 32, %s94_s25, [#allocation10]  }
  0x95   :  { %s6495_s6 = smov [#allocation14]   ;;  %s6496_s3 = smov [#allocation17]  }
  0x96   :  { %s115_s2 = sshll.u32 %s6495_s6, 4  ;;  %s137_s26 = sshll.u32 %s6496_s3, 4  ;;  %s116_s2 = int_to_ptr.vmem [resolvable:$true] %s115_s2  ;;  %s138_s26 = int_to_ptr.vmem [resolvable:$true] %s137_s26 }
  0x97   :  { %s6384_s27 = scalar_lea.hbm %s10121_s12, 128 }
  0x98   :  { %p6385_p0 = scmp.ne.s32.totalorder %s10121_s12, %s6384_s27  ;;  %p6388_p1 = scmp.lt.u32.totalorder %s6384_s27, %s10121_s12 }
  0x9a   :  { %p6390_p2 = pnand %p6388_p1, %p6385_p0 }
  0x9c   :  { %6393 = shalt.err (!%p6390_p2)
}
  0x9d   :  { %s6394_s9 = scalar_lea.vmem %s116_s2, 128  ;;  %p6399_p4 = scmp.lt.s32.totalorder %s116_s2, %s116_s2 }
  0x9e   :  { %p6395_p3 = scmp.ne.s32.totalorder %s116_s2, %s6394_s9  ;;  %p6400_p5 = scmp.lt.s32.totalorder %s6394_s9, %s6394_s9 }
  0xa0   :  { %p6401_p6 = por %p6400_p5, %p6399_p4 }
  0xa2   :  { %p6402_p7 = pnand %p6401_p6, %p6395_p3 }
  0xa4   :  { %6405 = shalt.err (!%p6402_p7)
}
  0xa5   :  { %118 = dma.hbm_to_vmem [thread:$0]  %s10121_s12, 128, %s116_s2, [#allocation13]  }
  0xa6   :  { %s6406_s4 = scalar_lea.hbm %s10123_s14, 16 }
  0xa7   :  { %p6407_p8 = scmp.ne.s32.totalorder %s10123_s14, %s6406_s4  ;;  %p6410_p9 = scmp.lt.u32.totalorder %s6406_s4, %s10123_s14 }
  0xa9   :  { %p6412_p10 = pnand %p6410_p9, %p6407_p8 }
  0xab   :  { %6415 = shalt.err (!%p6412_p10)
}
  0xac   :  { %s6416_s27 = scalar_lea.vmem %s138_s26, 16  ;;  %s6420_s8 = scalar_lea.vmem %s138_s26, 32 }
  0xad   :  { %p6417_p11 = scmp.ne.s32.totalorder %s138_s26, %s6416_s27  ;;  %p6421_p12 = scmp.lt.s32.totalorder %s138_s26, %s138_s26 }
  0xae   :  { %p6422_p13 = scmp.lt.s32.totalorder %s6420_s8, %s6416_s27 }
  0xb0   :  { %p6423_p0 = por %p6422_p13, %p6421_p12 }
  0xb2   :  { %p6424_p1 = pnand %p6423_p0, %p6417_p11 }
  0xb4   :  { %6427 = shalt.err (!%p6424_p1)
}
  0xb5   :  { %140 = dma.hbm_to_vmem [thread:$0]  %s10123_s14, 16, %s138_s26, [#allocation16]  }
  0xb6   :  { %s6497_s28 = smov [#allocation18]   ;;  %s6428_s25 = scalar_lea.hbm %s10126_s17, 256 }
  0xb7   :  { %s150_s29 = sshll.u32 %s6497_s28, 4  ;;  %p6429_p2 = scmp.ne.s32.totalorder %s10126_s17, %s6428_s25  ;;  %s151_s29 = int_to_ptr.vmem [resolvable:$true] %s150_s29 }
  0xb8   :  { %p6432_p3 = scmp.lt.u32.totalorder %s6428_s25, %s10126_s17 }
  0xba   :  { %p6434_p4 = pnand %p6432_p3, %p6429_p2 }
  0xbc   :  { %6437 = shalt.err (!%p6434_p4)
}
  0xbd   :  { %s6438_s6 = scalar_lea.vmem %s151_s29, 256  ;;  %p6443_p6 = scmp.lt.s32.totalorder %s151_s29, %s151_s29 }
  0xbe   :  { %p6439_p5 = scmp.ne.s32.totalorder %s151_s29, %s6438_s6  ;;  %p6444_p7 = scmp.lt.s32.totalorder %s6438_s6, %s6438_s6 }
  0xc0   :  { %p6445_p8 = por %p6444_p7, %p6443_p6 }
  0xc2   :  { %p6446_p9 = pnand %p6445_p8, %p6439_p5 }
  0xc4   :  { %6449 = shalt.err (!%p6446_p9)
}
  0xc5   :  { %156 = dma.hbm_to_vmem [thread:$0]  %s10126_s17, 256, %s151_s29, [#allocation19], %s6491_s0, %s6491_s0, %s6492_s7  }
  0xc6   :  { %6472 = dma.done.wait [#allocation4], 128  }
  0xc7   :  { %6473 = vsyncadd [#allocation4], 4294967168 }
  0xc8   :  { %6474 = dma.done.wait [#allocation7], 80  }
  0xc9   :  { %6475 = vsyncadd [#allocation7], 4294967216 }
  0xca   :  { %6476 = dma.done.wait [#allocation10], 48  }
  0xcb   :  { %6477 = vsyncadd [#allocation10], 4294967248 }
  0xcc   :  { %6478 = dma.done.wait [#allocation13], 144  }
  0xcd   :  { %6479 = vsyncadd [#allocation13], 4294967152 }
  0xce   :  { %6480 = dma.done.wait [#allocation16], 272  }
  0xcf   :  { %6481 = vsyncadd [#allocation16], 4294967024 }
  0xd0   :  { %6482 = dma.done.wait [#allocation19], 256  }
  0xd1   :  { %6483 = vsyncadd [#allocation19], 4294967040  ;;  %v10140_v0 = vmov 0.0   ;;  %vm6499_vm0 = vmmov 0   ;;  %vm293_vm1 = vcmask 1041408   ;;  %vm286_vm2 = vcmask 31744  }
  0xd2   :  { %5566 = vmatprep.subr.bf16.mxu0 %v10140_v0  ;;  %5568 = vmatprep.mubr.msk.bf16.mxu0 %vm6499_vm0, %v10140_v0  ;;  %vm217_vm3 = vcmask 1043456   ;;  %v268_v1 = vld [vmem:[#allocation11] sm:$0x3]  ;;  %s10372_s3 = sld [smem:[#allocation102_spill]]  ;;  %v200_v5 = vld [vmem:[#allocation8] sm:$0xf] }
  0xd3   :  { %5714 = vmatprep.subr.msk.bf16.mxu1 %vm293_vm1, %v268_v1  ;;  %v295_v2 = vsel %vm293_vm1, %v268_v1, 0  ;;  %vm213_vm4 = vcmask 64512   ;;  %v219_v6 = vsel %vm217_vm3, %v200_v5, 0  ;;  %s10373_s12 = sld [smem:[#allocation101_spill]]  ;;  %v352_v8 = vld [vmem:[%s10120_s11] sm:$0xff]  ;;  %v353_v10 = vld [vmem:[%s10120_s11 + $0x8] sm:$0xff] }
  0xd4   :  { %5573 = vmatpush3.bf16.msra.mxu1 %v295_v2  ;;  %5567 = vmatpush3.bf16.msra.mxu0 %v219_v6  ;;  %v356_v9 = vld [vmem:[%s10120_s11 + $0x20] sm:$0xff]  ;;  %v357_v12 = vld [vmem:[%s10120_s11 + $0x28] sm:$0xff]  ;;  %v10199_v24 = vmov 0   ;;  %v354_v25 = vld [vmem:[%s10120_s11 + $0x10] sm:$0xff]  ;;  %vm490_vm5 = vcmask 261120   ;;  %s10376_s26 = sld [smem:[#allocation103_spill]] }
  0xd5   :  { %v5440_v11 = vcombine.high %v352_v8, %v356_v9  ;;  %v5439_v13 = vcombine.low %v352_v8, %v356_v9  ;;  %v5441_v14 = vcombine.low %v353_v10, %v357_v12  ;;  %v5442_v15 = vcombine.high %v353_v10, %v357_v12  ;;  %v360_v16 = vld [vmem:[%s10120_s11 + $0x40] sm:$0xff]  ;;  %v361_v18 = vld [vmem:[%s10120_s11 + $0x48] sm:$0xff]  ;;  %v358_v26 = vld [vmem:[%s10120_s11 + $0x30] sm:$0xff]  ;;  %s6533_s13 = smov 32   ;;  %s10510_s8 = sld [smem:[#allocation105_spill]] }
  0xd6   :  { %v364_v17 = vld [vmem:[%s10120_s11 + $0x60] sm:$0xff]  ;;  %v365_v20 = vld [vmem:[%s10120_s11 + $0x68] sm:$0xff]  ;;  %v5443_v27 = vcombine.low %v354_v25, %v358_v26  ;;  %v5444_v28 = vcombine.high %v354_v25, %v358_v26  ;;  %v355_v29 = vld [vmem:[%s10120_s11 + $0x18] sm:$0xff]  ;;  %vm773_vm6 = vcmask 130048   ;;  %v10181_v9 = vmov 2   ;;  %s10977_s1 = sld [smem:[#allocation107_spill]] }
  0xd7   :  { %497 = vmatprep.subr.bf16.mxu0 %v5440_v11  ;;  %550 = vmatprep.subr.bf16.mxu1 %v5442_v15  ;;  %v5448_v19 = vcombine.high %v360_v16, %v364_v17  ;;  %v5447_v21 = vcombine.low %v360_v16, %v364_v17  ;;  %v5449_v22 = vcombine.low %v361_v18, %v365_v20  ;;  %v359_v30 = vld [vmem:[%s10120_s11 + $0x38] sm:$0xff]  ;;  %v5434_v33 = vld [vmem:[#allocation12] ss:$0 sm:$0xff]  ;;  %v5431_v37 = vld [vmem:[#allocation9] ss:$0 sm:$0xff]  ;;  %v10151_v10 = vmov 1  }
  0xd8   :  { %v6152_v3 = vld [vmem:[%s10372_s3] sm:$0xff]   ;;  %v6153_v4 = vld [vmem:[%s10372_s3 + $0x8] sm:$0xff]   ;;  %v5450_v23 = vcombine.high %v361_v18, %v365_v20  ;;  %v5446_v31 = vcombine.high %v355_v29, %v359_v30  ;;  %v5445_v32 = vcombine.low %v355_v29, %v359_v30  ;;  %v362_v51 = vld [vmem:[%s10120_s11 + $0x50] sm:$0xff]  ;;  %5765 = vset.pattern.permute.xlu1 %v10181_v9  ;;  %5764 = vset.pattern.permute.xlu0 %v10151_v10  ;;  %v370_v11 = vlaneseq  ;;  %s6532_s3 = smov 96  }
  0xd9   :  { %5574 = vmatprep.mubr.msk.bf16.mxu1 %vm286_vm2, %v6152_v3  ;;  %v6154_v7 = vld [vmem:[%s10373_s12] sm:$0xff]   ;;  %v366_v54 = vld [vmem:[%s10120_s11 + $0x70] sm:$0xff]  ;;  %v363_v55 = vld [vmem:[%s10120_s11 + $0x58] sm:$0xff]  ;;  %vm5397_vm7 = vcmask 9216  }
  0xda   :  { %5575 = vmatmul.mubr.msk.bf16.vlgmr.msra.gmra.mrb[0].mxu1 %vm286_vm2, %v6153_v4  ;;  %5569 = vmatmul.mubr.msk.bf16.vlgmr.msra.gmra.mrb[0].mxu0 %vm213_vm4, %v6154_v7  ;;  %v367_v56 = vld [vmem:[%s10120_s11 + $0x78] sm:$0xff]  ;;  %v5452_v61 = vcombine.high %v362_v51, %v366_v54  ;;  %v5451_v63 = vcombine.low %v362_v51, %v366_v54  ;;  %v6156_v4 = vld [vmem:[#allocation15 + $0x8] sm:$0xff]   ;;  %v6159_v7 = vld [vmem:[#allocation18] sm:$0xff]   ;;  %v371_v12 = vshrl.u32 %v370_v11, 7 }
  0xdb   :  { %498 = vmatpush1.bf16.msra.mxu0 %v5439_v13  ;;  %551 = vmatpush1.bf16.msra.mxu1 %v5441_v14  ;;  %v5454_v62 = vcombine.high %v363_v55, %v367_v56  ;;  %v5453_v2 = vcombine.low %v363_v55, %v367_v56  ;;  %v6155_v3 = vld [vmem:[#allocation15] sm:$0xff]   ;;  %v6158_v6 = vld [vmem:[%s10376_s26 + $0x8] sm:$0xff]   ;;  %v368_v15 = vld [vmem:[#allocation14] sm:$0xff] }
  0xdc   :  { %499 = vmatprep.subr.bf16.mxu0 %v5448_v19  ;;  %552 = vmatprep.subr.bf16.mxu1 %v5450_v23  ;;  %v6157_v5 = vld [vmem:[%s10376_s26] sm:$0xff]   ;;  %v6160_v8 = vld [vmem:[#allocation18 + $0x8] sm:$0xff]   ;;  %v376_v13 = vsub.s32 1, %v371_v12  ;;  %v384_v14 = vsub.s32 3, %v371_v12  ;;  %v372_v16 = vsub.s32 0, %v371_v12  ;;  %v380_v17 = vsub.s32 2, %v371_v12 }
  0xdd   :  { %529 = vmatprep.mubr.bf16.mxu0 %v10199_v24  ;;  %582 = vmatprep.mubr.bf16.mxu1 %v10199_v24  ;;  %v400_v55 = vsub.s32 7, %v371_v12 }
  0xde   :  { %v6896_v18 = vrot.slane %v368_v15, %v376_v13  ;;  %v6898_v19 = vrot.slane %v368_v15, %v384_v14  ;;  %v6906_v23 = vrot.slane %v368_v15, %v380_v17 }
  0xdf   :  { %500 = vmatpush1.bf16.msra.mxu0 %v5447_v21  ;;  %553 = vmatpush1.bf16.msra.mxu1 %v5449_v22  ;;  %v6904_v22 = vrot.slane %v368_v15, %v372_v16 }
  0xe0   :  { %603 = vmatprep.subr.bf16.mxu0 %v5444_v28  ;;  %656 = vmatprep.subr.bf16.mxu1 %v5446_v31 }
 0x1ad   :  { %v5576_v34 = vpop.f32.mrb[0].mxu1  ;;  %v255_v40 = vpop.f32.mrb[0].mxu0 }
 0x1ae   :  { %v340_v35 = vadd.f32 %v5576_v34, %v5434_v33  ;;  %v331_v36 = vpop.f32.mrb[1].mxu1  ;;  %v5570_v43 = vpop.f32.mrb[1].mxu0  ;;  %v6834_v45 = vadd.f32 %v5431_v37, %v255_v40 }
 0x1af   :  { %v332_v38 = vadd.f32 %v5434_v33, %v331_v36  ;;  %v5577_v39 = vpop.f32.mrb[2].mxu1  ;;  %v258_v46 = vpop.f32.mrb[2].mxu0  ;;  %v392_v43 = vsub.s32 5, %v371_v12 }
 0x1b0   :  { %v343_v41 = vadd.f32 %v5577_v39, %v5434_v33  ;;  %v334_v42 = vpop.f32.mrb[3].mxu1  ;;  %10374 = vst [vmem:[#allocation28_spill] sm:$0xff] %v6834_v45  ;;  %v348_v47 = vmax.f32 %v340_v35, 0.0  ;;  %v6836_v49 = vadd.f32 %v5431_v37, %v258_v46  ;;  %v5571_v50 = vpop.f32.mrb[3].mxu0  ;;  %v10139_v59 = vmax.f32 %v6834_v45, 0.0 }
 0x1b1   :  { %v335_v44 = vadd.f32 %v5434_v33, %v334_v42  ;;  %v346_v52 = vmax.f32 %v332_v38, 0.0  ;;  %v6946_v54 = vrot.slane %v368_v15, %v392_v43 }
 0x1b2   :  { %v349_v48 = vmax.f32 %v343_v41, 0.0  ;;  %10375 = vst [vmem:[#allocation29_spill] sm:$0xff] %v6836_v49  ;;  %v10142_v60 = vmax.f32 %v6836_v49, 0.0 }
 0x1b3   :  { %v347_v53 = vmax.f32 %v335_v44, 0.0 }
 0x1b4   :  { %v351_v57 = vpack.c.bf16 %v349_v48, %v348_v47  ;;  %v758_v1 = vpack.c.bf16 %v10142_v60, %v10139_v59  ;;  %v10145_v59 = vmov 12   ;;  %v10185_v60 = vmov 10  }
 0x1b5   :  { %v350_v58 = vpack.c.bf16 %v347_v53, %v346_v52  ;;  %v388_v52 = vsub.s32 4, %v371_v12  ;;  %v396_v53 = vsub.s32 6, %v371_v12 }
 0x1b7   :  { %5455 = vmatmul.mubr.msk.bf16.vlgmr.msra.gmra.mrb[4].mxu0 %vm490_vm5, %v350_v58  ;;  %5457 = vmatmul.mubr.msk.bf16.vlgmr.msra.gmra.mrb[4].mxu1 %vm490_vm5, %v350_v58 }
 0x1b8   :  { %604 = vmatpush1.bf16.msra.mxu0 %v5443_v27  ;;  %539 = vmatprep.mubr.bf16.mxu0 %v10199_v24 }
 0x1b9   :  { %592 = vmatprep.mubr.bf16.mxu1 %v10199_v24  ;;  %657 = vmatpush1.bf16.msra.mxu1 %v5445_v32 }
 0x1ba   :  { %605 = vmatprep.subr.bf16.mxu0 %v5452_v61  ;;  %658 = vmatprep.subr.bf16.mxu1 %v5454_v62  ;;  %v6954_v61 = vrot.slane %v368_v15, %v396_v53 }
 0x1bc   :  { %606 = vmatpush1.bf16.msra.mxu0 %v5451_v63 }
 0x1bd   :  { %659 = vmatpush1.bf16.msra.mxu1 %v5453_v2  ;;  %5578 = vmatprep.subr.bf16.mxu0 %v758_v1  ;;  %v6961_v2 = vrot.slane %v368_v15, %v400_v55 }
 0x1be   :  { %5584 = vmatprep.subr.bf16.mxu1 %v10140_v0 }
 0x1bf   :  { %5456 = vmatmul.mubr.msk.bf16.gmra.mrb[8].mxu0 %vm490_vm5, %v351_v57  ;;  %5458 = vmatmul.mubr.msk.bf16.gmra.mrb[8].mxu1 %vm490_vm5, %v351_v57  ;;  %10386 = vst [vmem:[#allocation39_spill] sm:$0xff] %v6961_v2 }
 0x1c0   :  { %635 = vmatprep.mubr.bf16.mxu0 %v10199_v24  ;;  %688 = vmatprep.mubr.bf16.mxu1 %v10199_v24 }
 0x1c7   :  { %5459 = vmatmul.mubr.msk.bf16.vlgmr.msra.gmra.mrb[12].mxu0 %vm490_vm5, %v350_v58  ;;  %5461 = vmatmul.mubr.msk.bf16.vlgmr.msra.gmra.mrb[12].mxu1 %vm490_vm5, %v350_v58  ;;  %v6952_v58 = vrot.slane %v368_v15, %v388_v52 }
 0x1c8   :  { %5579 = vmatpush3.bf16.msra.mxu0 %v758_v1  ;;  %645 = vmatprep.mubr.bf16.mxu0 %v10199_v24 }
 0x1c9   :  { %698 = vmatprep.mubr.bf16.mxu1 %v10199_v24  ;;  %5585 = vmatpush3.bf16.msra.mxu1 %v6155_v3 }
 0x1ca   :  { %5586 = vmatprep.subr.bf16.mxu1 %v10140_v0  ;;  %5592 = vmatprep.subr.bf16.mxu0 %v10140_v0 }
 0x1cd   :  { %5587 = vmatpush3.bf16.msra.mxu1 %v6156_v4 }
 0x1ce   :  { %5600 = vmatprep.subr.bf16.mxu1 %v10140_v0 }
 0x1cf   :  { %5460 = vmatmul.mubr.msk.bf16.gmra.mrb[16].mxu0 %vm490_vm5, %v351_v57  ;;  %5462 = vmatmul.mubr.msk.bf16.gmra.mrb[16].mxu1 %vm490_vm5, %v351_v57 }
 0x1d0   :  { %5580 = vmatprep.mubr.msk.bf16.mxu0 %vm773_vm6, %v6157_v5  ;;  %5588 = vmatprep.mubr.msk.bf16.mxu1 %vm6499_vm0, %v10140_v0 }
 0x1d7   :  { %5581 = vmatmul.mubr.msk.bf16.vlgmr.msra.gmra.mrb[20].mxu0 %vm773_vm6, %v6158_v6  ;;  %5589 = vmatmul.mubr.msk.bf16.vlgmr.msra.gmra.mrb[20].mxu1 %vm490_vm5, %v758_v1 }
 0x1d8   :  { %5593 = vmatpush3.bf16.msra.mxu0 %v6159_v7  ;;  %5596 = vmatprep.mubr.msk.bf16.mxu0 %vm6499_vm0, %v10140_v0 }
 0x1d9   :  { %5594 = vmatprep.subr.bf16.mxu0 %v10140_v0  ;;  %5604 = vmatprep.mubr.msk.bf16.mxu1 %vm6499_vm0, %v10140_v0 }
 0x1dc   :  { %5595 = vmatpush3.bf16.msra.mxu0 %v6160_v8 }
 0x1dd   :  { %5608 = vmatprep.subr.bf16.mxu0 %v10140_v0 }
 0x1df   :  { %5597 = vmatmul.mubr.msk.bf16.vlgmr.msra.gmra.mrb[24].mxu0 %vm490_vm5, %v758_v1 }
 0x1e0   :  { %5612 = vmatprep.mubr.msk.bf16.mxu0 %vm6499_vm0, %v10140_v0  ;;  %v10147_v0 = vmov 20  }
 0x28a   :  { %v6900_v20 = vpop.f32.mrb[4].mxu0  ;;  %v6902_v21 = vpop.f32.mrb[4].mxu1 }
 0x28b   :  { %v533_v25 = vpop.f32.mrb[5].mxu0  ;;  %v586_v26 = vpop.f32.mrb[5].mxu1 }
 0x28c   :  { %v6909_v27 = vadd.f32 %v533_v25, %v6896_v18  ;;  %v6912_v28 = vadd.f32 %v586_v26, %v6898_v19  ;;  %v535_v29 = vpop.f32.mrb[6].mxu0  ;;  %v588_v30 = vpop.f32.mrb[6].mxu1 }
 0x28d   :  { %v6915_v31 = vadd.f32 %v535_v29, %v6904_v22  ;;  %v6918_v32 = vadd.f32 %v588_v30, %v6906_v23  ;;  %v537_v33 = vpop.f32.mrb[7].mxu0  ;;  %v590_v34 = vpop.f32.mrb[7].mxu1 }
 0x28e   :  { %10377 = vst [vmem:[#allocation30_spill] sm:$0xff] %v6909_v27  ;;  %10378 = vst [vmem:[#allocation31_spill] sm:$0xff] %v6912_v28  ;;  %v6921_v35 = vadd.f32 %v537_v33, %v6896_v18  ;;  %v6924_v36 = vadd.f32 %v590_v34, %v6898_v19 }
 0x28f   :  { %10379 = vst [vmem:[#allocation32_spill] sm:$0xff] %v6915_v31  ;;  %10380 = vst [vmem:[#allocation33_spill] sm:$0xff] %v6918_v32  ;;  %v10416_v31 = vmov 14  }
 0x290   :  { %10381 = vst [vmem:[#allocation34_spill] sm:$0xff] %v6921_v35  ;;  %10382 = vst [vmem:[#allocation35_spill] sm:$0xff] %v6924_v36  ;;  %v10432_v36 = vmov 11   ;;  %v10435_v35 = vmov 13  }
 0x292   :  { %v6926_v37 = vpop.f32.mrb[8].mxu0  ;;  %v6928_v38 = vpop.f32.mrb[8].mxu1 }
 0x293   :  { %v6930_v39 = vpop.f32.mrb[9].mxu0  ;;  %v6932_v40 = vpop.f32.mrb[9].mxu1 }
 0x294   :  { %v545_v41 = vpop.f32.mrb[10].mxu0  ;;  %v598_v42 = vpop.f32.mrb[10].mxu1 }
 0x295   :  { %v6935_v44 = vadd.f32 %v545_v41, %v6904_v22  ;;  %v6938_v46 = vadd.f32 %v598_v42, %v6906_v23  ;;  %v547_v47 = vpop.f32.mrb[11].mxu0  ;;  %v600_v48 = vpop.f32.mrb[11].mxu1 }
 0x296   :  { %v6941_v50 = vadd.f32 %v547_v47, %v6896_v18  ;;  %v6944_v51 = vadd.f32 %v600_v48, %v6898_v19 }
 0x297   :  { %10383 = vst [vmem:[#allocation36_spill] sm:$0xff] %v6935_v44 }
 0x29a   :  { %v6948_v56 = vpop.f32.mrb[12].mxu0  ;;  %v6950_v57 = vpop.f32.mrb[12].mxu1 }
 0x29b   :  { %v639_v62 = vpop.f32.mrb[13].mxu0  ;;  %v6956_v63 = vpop.f32.mrb[13].mxu1 }
 0x29c   :  { %10384 = vst [vmem:[#allocation37_spill] sm:$0xff] %v6956_v63  ;;  %v6959_v1 = vadd.f32 %v639_v62, %v6946_v54  ;;  %v641_v3 = vpop.f32.mrb[14].mxu0  ;;  %v694_v4 = vpop.f32.mrb[14].mxu1  ;;  %v10430_v63 = vmov 31  }
 0x29d   :  { %v6964_v5 = vadd.f32 %v641_v3, %v6952_v58  ;;  %v6967_v6 = vadd.f32 %v694_v4, %v6954_v61  ;;  %v643_v7 = vpop.f32.mrb[15].mxu0  ;;  %v696_v8 = vpop.f32.mrb[15].mxu1  ;;  %v10153_v3 = vmov 3   ;;  %v10177_v4 = vmov 29  }
 0x29e   :  { %10385 = vst [vmem:[#allocation38_spill] sm:$0xff] %v6959_v1  ;;  %v6970_v11 = vadd.f32 %v643_v7, %v6946_v54  ;;  %v6973_v12 = vadd.f32 %v696_v8, %v6961_v2 }
 0x29f   :  { %10387 = vst [vmem:[#allocation40_spill] sm:$0xff] %v6964_v5  ;;  %10388 = vst [vmem:[#allocation41_spill] sm:$0xff] %v6967_v6  ;;  %v10412_v5 = vmov 10  }
 0x2a0   :  { %10389 = vst [vmem:[#allocation42_spill] sm:$0xff] %v6970_v11  ;;  %10390 = vst [vmem:[#allocation43_spill] sm:$0xff] %v6973_v12 }
 0x2a2   :  { %v6975_v13 = vpop.f32.mrb[16].mxu0  ;;  %v6977_v14 = vpop.f32.mrb[16].mxu1 }
 0x2a3   :  { %v6979_v15 = vpop.f32.mrb[17].mxu0  ;;  %v6981_v16 = vpop.f32.mrb[17].mxu1 }
 0x2a4   :  { %10391 = vst [vmem:[#allocation44_spill] sm:$0xff] %v6981_v16  ;;  %v651_v17 = vpop.f32.mrb[18].mxu0  ;;  %v704_v25 = vpop.f32.mrb[18].mxu1 }
 0x2a5   :  { %v6984_v26 = vadd.f32 %v651_v17, %v6952_v58  ;;  %v6987_v29 = vadd.f32 %v704_v25, %v6954_v61  ;;  %v653_v30 = vpop.f32.mrb[19].mxu0  ;;  %v706_v33 = vpop.f32.mrb[19].mxu1  ;;  %v10155_v17 = vmov 5   ;;  %v10202_v25 = vmov 30  }
 0x2a6   :  { %v6990_v34 = vadd.f32 %v653_v30, %v6946_v54  ;;  %v6993_v41 = vadd.f32 %v706_v33, %v6961_v2 }
 0x2a7   :  { %10392 = vst [vmem:[#allocation45_spill] sm:$0xff] %v6984_v26  ;;  %10393 = vst [vmem:[#allocation46_spill] sm:$0xff] %v6987_v29  ;;  %v10421_v29 = vmov 3  }
 0x2a8   :  { %10394 = vst [vmem:[#allocation47_spill] sm:$0xff] %v6990_v34  ;;  %10395 = vst [vmem:[#allocation48_spill] sm:$0xff] %v6993_v41  ;;  %v10411_v41 = vmov 20  }
 0x2aa   :  { %v6995_v42 = vpop.f32.mrb[20].mxu0  ;;  %v6997_v43 = vpop.f32.mrb[20].mxu1 }
 0x2ab   :  { %10396 = vst [vmem:[#allocation49_spill] sm:$0xff] %v6997_v43  ;;  %v5590_v47 = vpop.f32.mrb[21].mxu1  ;;  %1049 = vperm.xlu1 %5765, %v6995_v42   ;;  %1009 = vperm.xlu0 %5764, %v6995_v42   ;;  %v7001_v48 = vpop.f32.mrb[21].mxu0  ;;  %v10408_v43 = vmov 12  }
 0x2ac   :  { %v7003_v52 = vpop.f32.mrb[22].mxu0  ;;  %v7005_v53 = vpop.f32.mrb[22].mxu1  ;;  %v10183_v47 = vmov 6  }
 0x2ad   :  { %10397 = vst [vmem:[#allocation50_spill] sm:$0xff] %v7005_v53  ;;  %v7007_v55 = vpop.f32.mrb[23].mxu0  ;;  %v5591_v62 = vpop.f32.mrb[23].mxu1 }
 0x2ae   :  { %v10143_v62 = vmov 4  }
 0x2af   :  { %5766 = vset.pattern.permute.xlu1 %v10153_v3  ;;  %5785 = vset.pattern.permute.xlu0 %v10177_v4 }
 0x2b0   :  { %1089 = vperm.xlu1 %5766, %v6995_v42   ;;  %2017 = vperm.xlu0 %5785, %v6995_v42  }
 0x2b2   :  { %v7013_v7 = vpop.f32.mrb[24].mxu0 }
 0x2b3   :  { %10398 = vst [vmem:[#allocation51_spill] sm:$0xff] %v7013_v7  ;;  %v5598_v8 = vpop.f32.mrb[25].mxu0  ;;  %v10409_v7 = vmov 6  }
 0x2b4   :  { %5767 = vset.pattern.permute.xlu1 %v10155_v17  ;;  %5787 = vset.pattern.permute.xlu0 %v10202_v25  ;;  %v7017_v30 = vpop.f32.mrb[26].mxu0  ;;  %v10157_v8 = vmov 7  }
 0x2b5   :  { %10399 = vst [vmem:[#allocation52_spill] sm:$0xff] %v7017_v30  ;;  %1153 = vperm.xlu1 %5767, %v6995_v42   ;;  %2057 = vperm.xlu0 %5787, %v6995_v42   ;;  %v5599_v33 = vpop.f32.mrb[27].mxu0 }
 0x2b6   :  { %v10159_v33 = vmov 9  }
 0x2b9   :  { %5768 = vset.pattern.permute.xlu1 %v10183_v47  ;;  %5789 = vset.pattern.permute.xlu0 %v10143_v62  ;;  %v10149_v62 = vmov 28  }
 0x2ba   :  { %1193 = vperm.xlu1 %5768, %v6995_v42   ;;  %1129 = vperm.xlu0 %5789, %v6995_v42  }
 0x2be   :  { %5769 = vset.pattern.permute.xlu1 %v10157_v8  ;;  %5791 = vset.pattern.permute.xlu0 %v10145_v59  ;;  %v10161_v59 = vmov 11  }
 0x2bf   :  { %1233 = vperm.xlu1 %5769, %v6995_v42   ;;  %1417 = vperm.xlu0 %5791, %v6995_v42  }
 0x2c3   :  { %5770 = vset.pattern.permute.xlu1 %v10159_v33  ;;  %5793 = vset.pattern.permute.xlu0 %v10147_v0  ;;  %v10163_v0 = vmov 13  }
 0x2c4   :  { %1297 = vperm.xlu1 %5770, %v6995_v42   ;;  %1705 = vperm.xlu0 %5793, %v6995_v42  }
 0x2c8   :  { %5771 = vset.pattern.permute.xlu1 %v10185_v60  ;;  %5795 = vset.pattern.permute.xlu0 %v10149_v62  ;;  %v10187_v62 = vmov 14  }
 0x2c9   :  { %1337 = vperm.xlu1 %5771, %v6995_v42   ;;  %1993 = vperm.xlu0 %5795, %v6995_v42  }
 0x2cd   :  { %5772 = vset.pattern.permute.xlu1 %v10161_v59  ;;  %5796 = vset.pattern.permute.xlu0 %v10151_v10  ;;  %v10165_v10 = vmov 15  }
 0x2ce   :  { %1377 = vperm.xlu1 %5772, %v6995_v42   ;;  %1001 = vperm.xlu0 %5796, %v7001_v48  }
 0x2d2   :  { %5773 = vset.pattern.permute.xlu1 %v10163_v0  ;;  %5798 = vset.pattern.permute.xlu0 %v10153_v3  ;;  %v10167_v3 = vmov 17  }
 0x2d3   :  { %1441 = vperm.xlu1 %5773, %v6995_v42   ;;  %1081 = vperm.xlu0 %5798, %v7001_v48  }
 0x2d7   :  { %5774 = vset.pattern.permute.xlu1 %v10187_v62  ;;  %5799 = vset.pattern.permute.xlu0 %v10155_v17  ;;  %v10189_v17 = vmov 18  }
 0x2d8   :  { %1481 = vperm.xlu1 %5774, %v6995_v42   ;;  %1145 = vperm.xlu0 %5799, %v7001_v48  }
 0x2dc   :  { %5775 = vset.pattern.permute.xlu1 %v10165_v10  ;;  %5801 = vset.pattern.permute.xlu0 %v10157_v8  ;;  %v10169_v8 = vmov 19  }
 0x2dd   :  { %1521 = vperm.xlu1 %5775, %v6995_v42   ;;  %1225 = vperm.xlu0 %5801, %v7001_v48  }
 0x2e1   :  { %5776 = vset.pattern.permute.xlu1 %v10167_v3  ;;  %5802 = vset.pattern.permute.xlu0 %v10159_v33  ;;  %v10179_v33 = vmov 21  }
 0x2e2   :  { %1585 = vperm.xlu1 %5776, %v6995_v42   ;;  %1289 = vperm.xlu0 %5802, %v7001_v48  }
 0x2e6   :  { %5777 = vset.pattern.permute.xlu1 %v10189_v17  ;;  %5804 = vset.pattern.permute.xlu0 %v10161_v59  ;;  %v10191_v59 = vmov 22  }
 0x2e7   :  { %1625 = vperm.xlu1 %5777, %v6995_v42   ;;  %1369 = vperm.xlu0 %5804, %v7001_v48  }
 0x2eb   :  { %5778 = vset.pattern.permute.xlu1 %v10169_v8  ;;  %5805 = vset.pattern.permute.xlu0 %v10163_v0  ;;  %v10171_v0 = vmov 23  }
 0x2ec   :  { %1665 = vperm.xlu1 %5778, %v6995_v42   ;;  %1433 = vperm.xlu0 %5805, %v7001_v48  }
 0x2f0   :  { %5779 = vset.pattern.permute.xlu1 %v10179_v33  ;;  %5807 = vset.pattern.permute.xlu0 %v10165_v10  ;;  %v10173_v10 = vmov 25  }
 0x2f1   :  { %1729 = vperm.xlu1 %5779, %v6995_v42   ;;  %1513 = vperm.xlu0 %5807, %v7001_v48  }
 0x2f5   :  { %5780 = vset.pattern.permute.xlu1 %v10191_v59  ;;  %5808 = vset.pattern.permute.xlu0 %v10167_v3  ;;  %v10195_v3 = vmov 26  }
 0x2f6   :  { %1769 = vperm.xlu1 %5780, %v6995_v42   ;;  %1577 = vperm.xlu0 %5808, %v7001_v48  }
 0x2fa   :  { %5781 = vset.pattern.permute.xlu1 %v10171_v0  ;;  %5810 = vset.pattern.permute.xlu0 %v10169_v8  ;;  %v10175_v8 = vmov 27  }
 0x2fb   :  { %1809 = vperm.xlu1 %5781, %v6995_v42   ;;  %1657 = vperm.xlu0 %5810, %v7001_v48  }
 0x2ff   :  { %5782 = vset.pattern.permute.xlu1 %v10173_v10  ;;  %5811 = vset.pattern.permute.xlu0 %v10179_v33 }
 0x300   :  { %1873 = vperm.xlu1 %5782, %v6995_v42   ;;  %1721 = vperm.xlu0 %5811, %v7001_v48  }
 0x304   :  { %5783 = vset.pattern.permute.xlu1 %v10195_v3  ;;  %5813 = vset.pattern.permute.xlu0 %v10171_v0  ;;  %v10206_v0 = vmov 31  }
 0x305   :  { %1913 = vperm.xlu1 %5783, %v6995_v42   ;;  %1801 = vperm.xlu0 %5813, %v7001_v48  }
 0x309   :  { %5784 = vset.pattern.permute.xlu1 %v10175_v8  ;;  %5814 = vset.pattern.permute.xlu0 %v10173_v10  ;;  %v10197_v10 = vmov 8  }
 0x30a   :  { %1953 = vperm.xlu1 %5784, %v6995_v42   ;;  %1865 = vperm.xlu0 %5814, %v7001_v48  }
 0x30e   :  { %5786 = vset.pattern.permute.xlu1 %v10199_v24  ;;  %5816 = vset.pattern.permute.xlu0 %v10175_v8  ;;  %v10204_v8 = vmov 16  }
 0x30f   :  { %988 = vperm.xlu1 %5786, %v6995_v42   ;;  %1945 = vperm.xlu0 %5816, %v7001_v48  }
 0x313   :  { %5788 = vset.pattern.permute.xlu1 %v10206_v0  ;;  %5817 = vset.pattern.permute.xlu0 %v10177_v4  ;;  %v10193_v4 = vmov 24  }
 0x314   :  { %2097 = vperm.xlu1 %5788, %v6995_v42   ;;  %2009 = vperm.xlu0 %5817, %v7001_v48  }
 0x318   :  { %5790 = vset.pattern.permute.xlu1 %v10197_v10  ;;  %5822 = vset.pattern.permute.xlu0 %v10197_v10 }
 0x319   :  { %1273 = vperm.xlu1 %5790, %v6995_v42   ;;  %1265 = vperm.xlu0 %5822, %v7001_v48  }
 0x31d   :  { %5792 = vset.pattern.permute.xlu1 %v10204_v8  ;;  %5824 = vset.pattern.permute.xlu0 %v10204_v8 }
 0x31e   :  { %1561 = vperm.xlu1 %5792, %v6995_v42   ;;  %1553 = vperm.xlu0 %5824, %v7001_v48  }
 0x322   :  { %5794 = vset.pattern.permute.xlu1 %v10193_v4  ;;  %5826 = vset.pattern.permute.xlu0 %v10193_v4 }
 0x323   :  { %1849 = vperm.xlu1 %5794, %v6995_v42   ;;  %1841 = vperm.xlu0 %5826, %v7001_v48  }
 0x327   :  { %5797 = vset.pattern.permute.xlu1 %v10181_v9  ;;  %5829 = vset.pattern.permute.xlu0 %v10181_v9 }
 0x328   :  { %1041 = vperm.xlu1 %5797, %v7001_v48   ;;  %1053 = vperm.xlu0 %5829, %v7003_v52  }
 0x32a   :  { %v7113_v33 = vpop.permute.xlu1 %1049  ;;  %v7157_v4 = vpop.permute.xlu0 %1009 }
 0x32c   :  { %5800 = vset.pattern.permute.xlu1 %v10183_v47  ;;  %5832 = vset.pattern.permute.xlu0 %v10183_v47 }
 0x32d   :  { %1185 = vperm.xlu1 %5800, %v7001_v48   ;;  %1197 = vperm.xlu0 %5832, %v7003_v52  }
 0x32f   :  { %v7119_v42 = vpop.permute.xlu1 %1089 }
 0x331   :  { %5803 = vset.pattern.permute.xlu1 %v10185_v60  ;;  %5835 = vset.pattern.permute.xlu0 %v10185_v60 }
 0x332   :  { %1329 = vperm.xlu1 %5803, %v7001_v48   ;;  %1341 = vperm.xlu0 %5835, %v7003_v52  }
 0x334   :  { %v7125_v9 = vpop.permute.xlu1 %1153 }
 0x336   :  { %5806 = vset.pattern.permute.xlu1 %v10187_v62  ;;  %5838 = vset.pattern.permute.xlu0 %v10187_v62 }
 0x337   :  { %1473 = vperm.xlu1 %5806, %v7001_v48   ;;  %1485 = vperm.xlu0 %5838, %v7003_v52  }
 0x339   :  { %v7131_v47 = vpop.permute.xlu1 %1193 }
 0x33b   :  { %5809 = vset.pattern.permute.xlu1 %v10189_v17  ;;  %5841 = vset.pattern.permute.xlu0 %v10189_v17 }
 0x33c   :  { %1617 = vperm.xlu1 %5809, %v7001_v48   ;;  %1629 = vperm.xlu0 %5841, %v7003_v52  }
 0x33e   :  { %v7137_v60 = vpop.permute.xlu1 %1233 }
 0x340   :  { %5812 = vset.pattern.permute.xlu1 %v10191_v59  ;;  %5844 = vset.pattern.permute.xlu0 %v10191_v59 }
 0x341   :  { %1761 = vperm.xlu1 %5812, %v7001_v48   ;;  %1773 = vperm.xlu0 %5844, %v7003_v52  }
 0x343   :  { %v7143_v62 = vpop.permute.xlu1 %1297 }
 0x345   :  { %5815 = vset.pattern.permute.xlu1 %v10195_v3  ;;  %5847 = vset.pattern.permute.xlu0 %v10195_v3 }
 0x346   :  { %1905 = vperm.xlu1 %5815, %v7001_v48   ;;  %1917 = vperm.xlu0 %5847, %v7003_v52  }
 0x348   :  { %v7149_v17 = vpop.permute.xlu1 %1337 }
 0x34a   :  { %5818 = vset.pattern.permute.xlu1 %v10199_v24  ;;  %5854 = vset.pattern.permute.xlu0 %v10197_v10  ;;  %v10402_v10 = vmov 24   ;;  %v7167_v24 = vpop.permute.xlu0 %2017 }
 0x34b   :  { %978 = vperm.xlu1 %5818, %v7001_v48   ;;  %1277 = vperm.xlu0 %5854, %v7003_v52   ;;  %10403 = vst [vmem:[#allocation55_spill] sm:$0xff] %v7167_v24 }
 0x34d   :  { %v7155_v59 = vpop.permute.xlu1 %1377 }
 0x34e   :  { %10400 = vst [vmem:[#allocation53_spill] sm:$0xff] %v7155_v59  ;;  %v7177_v53 = vpop.permute.xlu0 %2057 }
 0x34f   :  { %5819 = vset.pattern.permute.xlu1 %v10202_v25  ;;  %5856 = vset.pattern.permute.xlu0 %v10204_v8  ;;  %v10405_v25 = vmov 4   ;;  %v10406_v8 = vmov 1   ;;  %10407 = vst [vmem:[#allocation57_spill] sm:$0xff] %v7177_v53 }
 0x350   :  { %2049 = vperm.xlu1 %5819, %v7001_v48   ;;  %1565 = vperm.xlu0 %5856, %v7003_v52  }
 0x352   :  { %v7163_v3 = vpop.permute.xlu1 %1441  ;;  %v7185_v12 = vpop.permute.xlu0 %1129 }
 0x353   :  { %10401 = vst [vmem:[#allocation54_spill] sm:$0xff] %v7163_v3  ;;  %10410 = vst [vmem:[#allocation58_spill] sm:$0xff] %v7185_v12  ;;  %v10441_v3 = vmov 19  }
 0x354   :  { %5820 = vset.pattern.permute.xlu1 %v10206_v0  ;;  %5858 = vset.pattern.permute.xlu0 %v10402_v10 }
 0x355   :  { %2089 = vperm.xlu1 %5820, %v7001_v48   ;;  %1853 = vperm.xlu0 %5858, %v7003_v52  }
 0x356   :  { %v7195_v49 = vpop.permute.xlu0 %1417 }
 0x357   :  { %v7171_v45 = vpop.permute.xlu1 %1481  ;;  %10414 = vst [vmem:[#allocation60_spill] sm:$0xff] %v7195_v49 }
 0x358   :  { %10404 = vst [vmem:[#allocation56_spill] sm:$0xff] %v7171_v45 }
 0x359   :  { %5821 = vset.pattern.permute.xlu1 %v10405_v25  ;;  %5860 = vset.pattern.permute.xlu0 %v10406_v8 }
 0x35a   :  { %1121 = vperm.xlu1 %5821, %v7001_v48   ;;  %1005 = vperm.xlu0 %5860, %v7007_v55   ;;  %v7203_v30 = vpop.permute.xlu0 %1705 }
 0x35b   :  { %10418 = vst [vmem:[#allocation62_spill] sm:$0xff] %v7203_v30 }
 0x35c   :  { %v7179_v0 = vpop.permute.xlu1 %1521 }
 0x35e   :  { %5823 = vset.pattern.permute.xlu1 %v10408_v43  ;;  %5864 = vset.pattern.permute.xlu0 %v10409_v7  ;;  %v10415_v7 = vmov 28  }
 0x35f   :  { %1409 = vperm.xlu1 %5823, %v7001_v48   ;;  %1189 = vperm.xlu0 %5864, %v7007_v55  }
 0x361   :  { %v7187_v6 = vpop.permute.xlu1 %1585 }
 0x363   :  { %5825 = vset.pattern.permute.xlu1 %v10411_v41  ;;  %5867 = vset.pattern.permute.xlu0 %v10412_v5  ;;  %v10419_v5 = vmov 18  }
 0x364   :  { %1697 = vperm.xlu1 %5825, %v7001_v48   ;;  %1333 = vperm.xlu0 %5867, %v7007_v55  }
 0x366   :  { %v7193_v32 = vpop.permute.xlu1 %1625 }
 0x367   :  { %10413 = vst [vmem:[#allocation59_spill] sm:$0xff] %v7193_v32 }
 0x368   :  { %5827 = vset.pattern.permute.xlu1 %v10415_v7  ;;  %5870 = vset.pattern.permute.xlu0 %v10416_v31  ;;  %v10422_v31 = vmov 22  }
 0x369   :  { %1985 = vperm.xlu1 %5827, %v7001_v48   ;;  %1477 = vperm.xlu0 %5870, %v7007_v55   ;;  %v7213_v48 = vpop.permute.xlu0 %1993 }
 0x36a   :  { %10423 = vst [vmem:[#allocation64_spill] sm:$0xff] %v7213_v48  ;;  %v10428_v48 = vmov 0  }
 0x36b   :  { %v7201_v12 = vpop.permute.xlu1 %1665 }
 0x36c   :  { %10417 = vst [vmem:[#allocation61_spill] sm:$0xff] %v7201_v12  ;;  %v7269_v12 = vadd.f32 %v6926_v37, %v6904_v22 }
 0x36d   :  { %5828 = vset.pattern.permute.xlu1 %v10406_v8  ;;  %5873 = vset.pattern.permute.xlu0 %v10419_v5  ;;  %v10425_v8 = vmov 5   ;;  %v10426_v5 = vmov 26   ;;  %v7223_v53 = vpop.permute.xlu0 %1001 }
 0x36e   :  { %1013 = vperm.xlu1 %5828, %v7003_v52   ;;  %1621 = vperm.xlu0 %5873, %v7007_v55   ;;  %v1018_v32 = vmul.f32 %v7157_v4, %v7269_v12 }
 0x370   :  { %v7209_v49 = vpop.permute.xlu1 %1729 }
 0x371   :  { %10420 = vst [vmem:[#allocation63_spill] sm:$0xff] %v7209_v49  ;;  %v7231_v16 = vpop.permute.xlu0 %1081 }
 0x372   :  { %5830 = vset.pattern.permute.xlu1 %v10421_v29  ;;  %5876 = vset.pattern.permute.xlu0 %v10422_v31  ;;  %v10427_v31 = vmov 7  }
 0x373   :  { %1093 = vperm.xlu1 %5830, %v7003_v52   ;;  %1765 = vperm.xlu0 %5876, %v7007_v55  }
 0x375   :  { %v7217_v30 = vpop.permute.xlu1 %1769  ;;  %v7241_v1 = vpop.permute.xlu0 %1145 }
 0x376   :  { %10424 = vst [vmem:[#allocation65_spill] sm:$0xff] %v7217_v30  ;;  %10431 = vst [vmem:[#allocation66_spill] sm:$0xff] %v7241_v1  ;;  %v10437_v30 = vmov 15  }
 0x377   :  { %5831 = vset.pattern.permute.xlu1 %v10425_v8  ;;  %5879 = vset.pattern.permute.xlu0 %v10426_v5  ;;  %v10429_v5 = vmov 9  }
 0x378   :  { %1157 = vperm.xlu1 %5831, %v7003_v52   ;;  %1909 = vperm.xlu0 %5879, %v7007_v55  }
 0x379   :  { %v7249_v27 = vpop.permute.xlu0 %1225 }
 0x37a   :  { %v7225_v24 = vpop.permute.xlu1 %1809  ;;  %10434 = vst [vmem:[#allocation68_spill] sm:$0xff] %v7249_v27  ;;  %v10439_v27 = vmov 17  }
 0x37c   :  { %5833 = vset.pattern.permute.xlu1 %v10427_v31  ;;  %5882 = vset.pattern.permute.xlu0 %v10428_v48 }
 0x37d   :  { %1237 = vperm.xlu1 %5833, %v7003_v52   ;;  %983 = vperm.xlu0 %5882, %v7007_v55   ;;  %v7259_v49 = vpop.permute.xlu0 %1289 }
 0x37f   :  { %v7233_v11 = vpop.permute.xlu1 %1873 }
 0x381   :  { %5834 = vset.pattern.permute.xlu1 %v10429_v5  ;;  %5884 = vset.pattern.permute.xlu0 %v10430_v63 }
 0x382   :  { %1301 = vperm.xlu1 %5834, %v7003_v52   ;;  %2093 = vperm.xlu0 %5884, %v7007_v55  }
 0x384   :  { %v7239_v2 = vpop.permute.xlu1 %1913 }
 0x386   :  { %5836 = vset.pattern.permute.xlu1 %v10432_v36  ;;  %5885 = vset.pattern.permute.xlu0 %v10405_v25 }
 0x387   :  { %1381 = vperm.xlu1 %5836, %v7003_v52   ;;  %1125 = vperm.xlu0 %5885, %v7007_v55  }
 0x389   :  { %v7247_v28 = vpop.permute.xlu1 %1953 }
 0x38a   :  { %10433 = vst [vmem:[#allocation67_spill] sm:$0xff] %v7247_v28 }
 0x38b   :  { %5837 = vset.pattern.permute.xlu1 %v10435_v35  ;;  %5887 = vset.pattern.permute.xlu0 %v10408_v43 }
 0x38c   :  { %1445 = vperm.xlu1 %5837, %v7003_v52   ;;  %1413 = vperm.xlu0 %5887, %v7007_v55  }
 0x38e   :  { %v7255_v1 = vpop.permute.xlu1 %988 }
 0x38f   :  { %10436 = vst [vmem:[#allocation69_spill] sm:$0xff] %v7255_v1  ;;  %v7273_v1 = vpop.permute.xlu0 %1369 }
 0x390   :  { %5839 = vset.pattern.permute.xlu1 %v10437_v30  ;;  %5889 = vset.pattern.permute.xlu0 %v10411_v41 }
 0x391   :  { %1525 = vperm.xlu1 %5839, %v7003_v52   ;;  %1701 = vperm.xlu0 %5889, %v7007_v55  }
 0x393   :  { %v7263_v28 = vpop.permute.xlu1 %2097  ;;  %v7289_v59 = vpop.permute.xlu0 %1433 }
 0x394   :  { %10438 = vst [vmem:[#allocation70_spill] sm:$0xff] %v7263_v28  ;;  %v7281_v28 = vadd.f32 %v6930_v39, %v6896_v18  ;;  %10442 = vst [vmem:[#allocation72_spill] sm:$0xff] %v7289_v59  ;;  %v7295_v18 = vadd.f32 %v6928_v38, %v6906_v23  ;;  %v10444_v39 = vmov 21  }
 0x395   :  { %5840 = vset.pattern.permute.xlu1 %v10439_v27  ;;  %5891 = vset.pattern.permute.xlu0 %v10415_v7 }
 0x396   :  { %1589 = vperm.xlu1 %5840, %v7003_v52   ;;  %1989 = vperm.xlu0 %5891, %v7007_v55   ;;  %v1242_v37 = vmul.f32 %v7137_v60, %v7281_v28  ;;  %v7304_v60 = vadd.f32 %v6932_v40, %v6898_v19 }
 0x397   :  { %v7309_v38 = vpop.permute.xlu0 %1513 }
 0x398   :  { %v7277_v45 = vpop.permute.xlu1 %1273  ;;  %10445 = vst [vmem:[#allocation74_spill] sm:$0xff] %v7304_v60  ;;  %10447 = vst [vmem:[#allocation76_spill] sm:$0xff] %v7309_v38 }
 0x399   :  { %10440 = vst [vmem:[#allocation71_spill] sm:$0xff] %v7277_v45 }
 0x39a   :  { %5842 = vset.pattern.permute.xlu1 %v10441_v3  ;;  %1028 = vrot.lane.b32.xlu0 %v1018_v32, %s6532_s3  ;;  %v1306_v32 = vmul.f32 %v7143_v62, %v7295_v18  ;;  %v7317_v62 = vadd.f32 %v6975_v13, %v6952_v58 }
 0x39b   :  { %1669 = vperm.xlu1 %5842, %v7003_v52   ;;  %5892 = vset.pattern.permute.xlu0 %v10428_v48 }
 0x39c   :  { %10449 = vst [vmem:[#allocation77_spill] sm:$0xff] %v7317_v62  ;;  %v1594_v40 = vmul.f32 %v7187_v6, %v7317_v62  ;;  %v10454_v6 = vmov 27  }
 0x39d   :  { %v7291_v4 = vpop.permute.xlu1 %1561 }
 0x39e   :  { %10443 = vst [vmem:[#allocation73_spill] sm:$0xff] %v7291_v4  ;;  %1252 = vrot.lane.b32.xlu0 %v1242_v37, %s6533_s13  ;;  %v1530_v37 = vmul.f32 %v7179_v0, %v7304_v60  ;;  %v10448_v4 = vmov 23   ;;  %v7325_v0 = vadd.f32 %v6979_v15, %v6946_v54 }
 0x39f   :  { %5843 = vset.pattern.permute.xlu1 %v10444_v39 }
 0x3a0   :  { %1733 = vperm.xlu1 %5843, %v7003_v52   ;;  %10451 = vst [vmem:[#allocation78_spill] sm:$0xff] %v7325_v0  ;;  %v1818_v13 = vmul.f32 %v7225_v24, %v7325_v0  ;;  %v10455_v24 = vmov 29  }
 0x3a2   :  { %v7306_v45 = vpop.permute.xlu1 %1849  ;;  %1316 = vrot.lane.b32.xlu0 %v1306_v32, %s6532_s3  ;;  %v1578_v32 = vpop.permute.xlu0 %1577 }
 0x3a3   :  { %10446 = vst [vmem:[#allocation75_spill] sm:$0xff] %v7306_v45  ;;  %v10450_v45 = vmov 25  }
 0x3a4   :  { %5845 = vset.pattern.permute.xlu1 %v10448_v4 }
 0x3a5   :  { %1813 = vperm.xlu1 %5845, %v7003_v52  }
 0x3a6   :  { %1540 = vrot.lane.b32.xlu0 %v1530_v37, %s6533_s13  ;;  %v7335_v37 = vadd.f32 %v6977_v14, %v6954_v61  ;;  %v1658_v59 = vpop.permute.xlu0 %1657 }
 0x3a7   :  { %v1042_v19 = vpop.permute.xlu1 %1041 }
 0x3a8   :  { %10453 = vst [vmem:[#allocation80_spill] sm:$0xff] %v7335_v37  ;;  %v1882_v54 = vmul.f32 %v7233_v11, %v7335_v37 }
 0x3a9   :  { %5846 = vset.pattern.permute.xlu1 %v10450_v45 }
 0x3aa   :  { %1877 = vperm.xlu1 %5846, %v7003_v52   ;;  %1604 = vrot.lane.b32.xlu0 %v1594_v40, %s6532_s3  ;;  %v1922_v40 = vmul.f32 %v7239_v2, %v7335_v37  ;;  %v7347_v14 = vpop.permute.xlu0 %1721 }
 0x3ab   :  { %10456 = vst [vmem:[#allocation81_spill] sm:$0xff] %v7347_v14 }
 0x3ac   :  { %v7331_v38 = vpop.permute.xlu1 %1185 }
 0x3ad   :  { %10452 = vst [vmem:[#allocation79_spill] sm:$0xff] %v7331_v38 }
 0x3ae   :  { %5848 = vset.pattern.permute.xlu1 %v10454_v6  ;;  %1828 = vrot.lane.b32.xlu0 %v1818_v13, %s6533_s13  ;;  %v7351_v13 = vadd.f32 %v6900_v20, %v6904_v22  ;;  %v7361_v2 = vpop.permute.xlu0 %1801  ;;  %v10458_v20 = vmov 30  }
 0x3af   :  { %1957 = vperm.xlu1 %5848, %v7003_v52  }
 0x3b0   :  { %10457 = vst [vmem:[#allocation82_spill] sm:$0xff] %v7351_v13  ;;  %v1016_v11 = vmul.f32 %v7223_v53, %v7351_v13  ;;  %v1056_v14 = vmul.f32 %v1042_v19, %v7351_v13  ;;  %v1096_v22 = vmul.f32 %v7231_v16, %v7351_v13 }
 0x3b1   :  { %v1330_v15 = vpop.permute.xlu1 %1329 }
 0x3b2   :  { %1892 = vrot.lane.b32.xlu0 %v1882_v54, %s6532_s3 }
 0x3b3   :  { %5849 = vset.pattern.permute.xlu1 %v10455_v24 }
 0x3b4   :  { %2021 = vperm.xlu1 %5849, %v7003_v52  }
 0x3b6   :  { %v7353_v38 = vpop.permute.xlu1 %1473  ;;  %1932 = vrot.lane.b32.xlu0 %v1922_v40, %s6491_s0  ;;  %v1866_v40 = vpop.permute.xlu0 %1865 }
 0x3b8   :  { %5850 = vset.pattern.permute.xlu1 %v10428_v48 }
 0x3b9   :  { %993 = vperm.xlu1 %5850, %v7003_v52  }
 0x3ba   :  { %1024 = vrot.lane.b32.xlu0 %v1016_v11, %s6532_s3  ;;  %v7373_v11 = vadd.f32 %v6902_v21, %v6906_v23  ;;  %v1946_v16 = vpop.permute.xlu0 %1945 }
 0x3bb   :  { %v1618_v54 = vpop.permute.xlu1 %1617 }
 0x3bc   :  { %v1304_v19 = vmul.f32 %v7259_v49, %v7373_v11  ;;  %v1344_v13 = vmul.f32 %v1330_v15, %v7373_v11  ;;  %v1384_v23 = vmul.f32 %v7273_v1, %v7373_v11 }
 0x3bd   :  { %5851 = vset.pattern.permute.xlu1 %v10458_v20 }
 0x3be   :  { %2061 = vperm.xlu1 %5851, %v7003_v52   ;;  %1064 = vrot.lane.b32.xlu0 %v1056_v14, %s6491_s0  ;;  %v7390_v49 = vpop.permute.xlu0 %2009 }
 0x3c0   :  { %v7369_v53 = vpop.permute.xlu1 %1761 }
 0x3c2   :  { %5852 = vset.pattern.permute.xlu1 %v10430_v63  ;;  %1104 = vrot.lane.b32.xlu0 %v1096_v22, %s6533_s13  ;;  %v7395_v22 = vadd.f32 %v6948_v56, %v6952_v58  ;;  %v7404_v1 = vpop.permute.xlu0 %1265 }
 0x3c3   :  { %2101 = vperm.xlu1 %5852, %v7003_v52  }
 0x3c4   :  { %10459 = vst [vmem:[#allocation83_spill] sm:$0xff] %v7395_v22  ;;  %v1672_v56 = vmul.f32 %v1658_v59, %v7395_v22 }
 0x3c5   :  { %v1906_v14 = vpop.permute.xlu1 %1905 }
 0x3c6   :  { %1312 = vrot.lane.b32.xlu0 %v1304_v19, %s6532_s3  ;;  %v1592_v19 = vmul.f32 %v1578_v32, %v7395_v22  ;;  %v7413_v58 = vpop.permute.xlu0 %1553 }
 0x3c7   :  { %5853 = vset.pattern.permute.xlu1 %v10405_v25  ;;  %10460 = vst [vmem:[#allocation84_spill] sm:$0xff] %v7413_v58  ;;  %v10481_v58 = vld [vmem:[#allocation34_spill] sm:$0xff] }
 0x3c8   :  { %1133 = vperm.xlu1 %5853, %v7003_v52  }
 0x3ca   :  { %v7384_v21 = vpop.permute.xlu1 %978  ;;  %1352 = vrot.lane.b32.xlu0 %v1344_v13, %s6491_s0  ;;  %v1632_v13 = vmul.f32 %v1618_v54, %v7395_v22  ;;  %v10462_v54 = vmov 2   ;;  %v7428_v59 = vpop.permute.xlu0 %1841 }
 0x3cb   :  { %10463 = vst [vmem:[#allocation86_spill] sm:$0xff] %v7428_v59 }
 0x3cc   :  { %5855 = vset.pattern.permute.xlu1 %v10408_v43 }
 0x3cd   :  { %1421 = vperm.xlu1 %5855, %v7003_v52  }
 0x3ce   :  { %1392 = vrot.lane.b32.xlu0 %v1384_v23, %s6533_s13  ;;  %v7419_v23 = vadd.f32 %v6950_v57, %v6954_v61 }
 0x3cf   :  { %v7398_v15 = vpop.permute.xlu1 %2049 }
 0x3d0   :  { %10461 = vst [vmem:[#allocation85_spill] sm:$0xff] %v7419_v23  ;;  %v1960_v61 = vmul.f32 %v1946_v16, %v7419_v23 }
 0x3d1   :  { %5857 = vset.pattern.permute.xlu1 %v10411_v41 }
 0x3d2   :  { %1709 = vperm.xlu1 %5857, %v7003_v52   ;;  %1600 = vrot.lane.b32.xlu0 %v1592_v19, %s6532_s3  ;;  %v1880_v19 = vmul.f32 %v1866_v40, %v7419_v23  ;;  %v1054_v40 = vpop.permute.xlu0 %1053 }
 0x3d4   :  { %v7407_v63 = vpop.permute.xlu1 %2089 }
 0x3d6   :  { %5859 = vset.pattern.permute.xlu1 %v10415_v7  ;;  %1640 = vrot.lane.b32.xlu0 %v1632_v13, %s6491_s0 }
 0x3d7   :  { %1997 = vperm.xlu1 %5859, %v7003_v52   ;;  %v1920_v52 = vmul.f32 %v1906_v14, %v7419_v23  ;;  %v10477_v23 = vld [vmem:[#allocation61_spill] sm:$0xff] }
 0x3d9   :  { %v7415_v32 = vpop.permute.xlu1 %1121 }
 0x3da   :  { %1680 = vrot.lane.b32.xlu0 %v1672_v56, %s6533_s13  ;;  %v1059_v56 = vmul.f32 %v1054_v40, %v6935_v44 }
 0x3db   :  { %5861 = vset.pattern.permute.xlu1 %v10462_v54 }
 0x3dc   :  { %1045 = vperm.xlu1 %5861, %v7007_v55  }
 0x3de   :  { %v7425_v13 = vpop.permute.xlu1 %1409  ;;  %1888 = vrot.lane.b32.xlu0 %v1880_v19, %s6532_s3 }
 0x3e0   :  { %5862 = vset.pattern.permute.xlu1 %v10421_v29 }
 0x3e1   :  { %1085 = vperm.xlu1 %5862, %v7007_v55  }
 0x3e2   :  { %1928 = vrot.lane.b32.xlu0 %v1920_v52, %s6491_s0  ;;  %v7450_v52 = vpop.permute.xlu0 %1197 }
 0x3e3   :  { %v7434_v57 = vpop.permute.xlu1 %1697 }
 0x3e4   :  { %10464 = vst [vmem:[#allocation87_spill] sm:$0xff] %v7434_v57 }
 0x3e5   :  { %5863 = vset.pattern.permute.xlu1 %v10425_v8 }
 0x3e6   :  { %1149 = vperm.xlu1 %5863, %v7007_v55   ;;  %1968 = vrot.lane.b32.xlu0 %v1960_v61, %s6533_s13 }
 0x3e8   :  { %v7441_v14 = vpop.permute.xlu1 %1985 }
 0x3e9   :  { %10465 = vst [vmem:[#allocation88_spill] sm:$0xff] %v7441_v14 }
 0x3ea   :  { %5865 = vset.pattern.permute.xlu1 %v10427_v31  ;;  %1070 = vrot.lane.b32.xlu0 %v1059_v56, %s6491_s0  ;;  %v1342_v31 = vpop.permute.xlu0 %1341 }
 0x3eb   :  { %1229 = vperm.xlu1 %5865, %v7007_v55  }
 0x3ed   :  { %v7446_v19 = vpop.permute.xlu1 %1013 }
 0x3ef   :  { %5866 = vset.pattern.permute.xlu1 %v10429_v5  ;;  %v1347_v5 = vmul.f32 %v1342_v31, %v6938_v46 }
 0x3f0   :  { %1293 = vperm.xlu1 %5866, %v7007_v55  }
 0x3f2   :  { %v1094_v16 = vpop.permute.xlu1 %1093 }
 0x3f3   :  { %v1099_v61 = vmul.f32 %v1094_v16, %v6935_v44 }
 0x3f4   :  { %5868 = vset.pattern.permute.xlu1 %v10432_v36  ;;  %v10469_v36 = vmov 16  }
 0x3f5   :  { %1373 = vperm.xlu1 %5868, %v7007_v55   ;;  %1110 = vrot.lane.b32.xlu0 %v1099_v61, %s6533_s13 }
 0x3f7   :  { %v1158_v40 = vpop.permute.xlu1 %1157 }
 0x3f8   :  { %v1163_v56 = vmul.f32 %v1158_v40, %v6941_v50  ;;  %v7470_v40 = vpop.permute.xlu0 %1485 }
 0x3f9   :  { %5869 = vset.pattern.permute.xlu1 %v10435_v35 }
 0x3fa   :  { %1437 = vperm.xlu1 %5869, %v7007_v55   ;;  %1174 = vrot.lane.b32.xlu0 %v1163_v56, %s6532_s3 }
 0x3fc   :  { %v7461_v7 = vpop.permute.xlu1 %1237 }
 0x3fe   :  { %5871 = vset.pattern.permute.xlu1 %v10437_v30  ;;  %1358 = vrot.lane.b32.xlu0 %v1347_v5, %s6491_s0  ;;  %v1630_v30 = vpop.permute.xlu0 %1629 }
 0x3ff   :  { %1517 = vperm.xlu1 %5871, %v7007_v55  }
 0x401   :  { %v7466_v16 = vpop.permute.xlu1 %1301 }
 0x403   :  { %5872 = vset.pattern.permute.xlu1 %v10439_v27  ;;  %v1635_v27 = vmul.f32 %v1630_v30, %v6984_v26 }
 0x404   :  { %1581 = vperm.xlu1 %5872, %v7007_v55  }
 0x406   :  { %v1382_v61 = vpop.permute.xlu1 %1381 }
 0x407   :  { %v1387_v56 = vmul.f32 %v1382_v61, %v6938_v46  ;;  %v7486_v61 = vpop.permute.xlu0 %1773 }
 0x408   :  { %5874 = vset.pattern.permute.xlu1 %v10441_v3 }
 0x409   :  { %1661 = vperm.xlu1 %5874, %v7007_v55   ;;  %1398 = vrot.lane.b32.xlu0 %v1387_v56, %s6533_s13 }
 0x40b   :  { %v1446_v31 = vpop.permute.xlu1 %1445 }
 0x40c   :  { %v1451_v5 = vmul.f32 %v1446_v31, %v6944_v51 }
 0x40d   :  { %5875 = vset.pattern.permute.xlu1 %v10444_v39 }
 0x40e   :  { %1725 = vperm.xlu1 %5875, %v7007_v55   ;;  %1462 = vrot.lane.b32.xlu0 %v1451_v5, %s6532_s3  ;;  %v7492_v5 = vpop.permute.xlu0 %1917 }
 0x410   :  { %v7481_v35 = vpop.permute.xlu1 %1525 }
 0x412   :  { %5877 = vset.pattern.permute.xlu1 %v10448_v4  ;;  %1646 = vrot.lane.b32.xlu0 %v1635_v27, %s6491_s0  ;;  %v7499_v39 = vpop.permute.xlu0 %1277 }
 0x413   :  { %1805 = vperm.xlu1 %5877, %v7007_v55  }
 0x415   :  { %v7488_v56 = vpop.permute.xlu1 %1589 }
 0x417   :  { %5878 = vset.pattern.permute.xlu1 %v10450_v45 }
 0x418   :  { %1869 = vperm.xlu1 %5878, %v7007_v55  }
 0x41a   :  { %v1670_v31 = vpop.permute.xlu1 %1669 }
 0x41b   :  { %v1675_v30 = vmul.f32 %v1670_v31, %v6984_v26  ;;  %v7507_v31 = vpop.permute.xlu0 %1565 }
 0x41c   :  { %5880 = vset.pattern.permute.xlu1 %v10454_v6  ;;  %10466 = vst [vmem:[#allocation89_spill] sm:$0xff] %v7507_v31  ;;  %v10467_v6 = vmov 8  }
 0x41d   :  { %1949 = vperm.xlu1 %5880, %v7007_v55   ;;  %1686 = vrot.lane.b32.xlu0 %v1675_v30, %s6533_s13 }
 0x41f   :  { %v1734_v27 = vpop.permute.xlu1 %1733 }
 0x420   :  { %v1739_v4 = vmul.f32 %v1734_v27, %v6990_v34  ;;  %v7514_v27 = vpop.permute.xlu0 %1853 }
 0x421   :  { %5881 = vset.pattern.permute.xlu1 %v10455_v24  ;;  %10468 = vst [vmem:[#allocation90_spill] sm:$0xff] %v7514_v27 }
 0x422   :  { %2013 = vperm.xlu1 %5881, %v7007_v55   ;;  %1750 = vrot.lane.b32.xlu0 %v1739_v4, %s6532_s3 }
 0x424   :  { %v7504_v45 = vpop.permute.xlu1 %1813  ;;  %v7520_v4 = vpop.permute.xlu0 %1005 }
 0x426   :  { %5883 = vset.pattern.permute.xlu1 %v10458_v20 }
 0x427   :  { %2053 = vperm.xlu1 %5883, %v7007_v55  }
 0x428   :  { %v1190_v43 = vpop.permute.xlu0 %1189 }
 0x429   :  { %v7510_v30 = vpop.permute.xlu1 %1877 }
 0x42b   :  { %5886 = vset.pattern.permute.xlu1 %v10467_v6  ;;  %v1058_v6 = vmul.f32 %v7113_v33, %v7269_v12 }
 0x42c   :  { %1269 = vperm.xlu1 %5886, %v7007_v55  }
 0x42e   :  { %v7516_v3 = vpop.permute.xlu1 %1957 }
 0x430   :  { %5888 = vset.pattern.permute.xlu1 %v10469_v36  ;;  %v1098_v36 = vmul.f32 %v7119_v42, %v7269_v12 }
 0x431   :  { %1557 = vperm.xlu1 %5888, %v7007_v55  }
 0x433   :  { %v7522_v41 = vpop.permute.xlu1 %2021 }
 0x435   :  { %5890 = vset.pattern.permute.xlu1 %v10402_v10  ;;  %v7537_v10 = vpop.permute.xlu0 %1333 }
 0x436   :  { %1845 = vperm.xlu1 %5890, %v7007_v55   ;;  %v1162_v55 = vmul.f32 %v7125_v9, %v7281_v28  ;;  %v10470_v9 = vld [vmem:[#allocation53_spill] sm:$0xff] }
 0x437   :  { %v1386_v54 = vmul.f32 %v10470_v9, %v7295_v18 }
 0x438   :  { %v7528_v8 = vpop.permute.xlu1 %993 }
 0x43a   :  { %1068 = vrot.lane.b32.xlu1 %v1058_v6, %s6491_s0  ;;  %v1202_v6 = vmul.f32 %v7131_v47, %v7281_v28  ;;  %v10472_v47 = vld [vmem:[#allocation54_spill] sm:$0xff] }
 0x43b   :  { %5893 = vset.pattern.permute.xlu1 %v10428_v48  ;;  %v1478_v48 = vpop.permute.xlu0 %1477 }
 0x43d   :  { %v7534_v29 = vpop.permute.xlu1 %2061 }
 0x43e   :  { %1108 = vrot.lane.b32.xlu1 %v1098_v36, %s6533_s13  ;;  %v1346_v36 = vmul.f32 %v7149_v17, %v7295_v18  ;;  %v10474_v17 = vld [vmem:[#allocation56_spill] sm:$0xff] }
 0x43f   :  { %v7552_v25 = vpop.permute.xlu0 %1621 }
 0x442   :  { %v7541_v33 = vpop.permute.xlu1 %2101  ;;  %1172 = vrot.lane.b32.xlu1 %v1162_v55, %s6532_s3  ;;  %v1450_v55 = vmul.f32 %v10472_v47, %v7304_v60 }
 0x446   :  { %1212 = vrot.lane.b32.xlu1 %v1202_v6, %s6491_s0  ;;  %v7561_v6 = vpop.permute.xlu0 %1765 }
 0x447   :  { %v7547_v42 = vpop.permute.xlu1 %1133 }
 0x44a   :  { %1356 = vrot.lane.b32.xlu1 %v1346_v36, %s6491_s0  ;;  %v1490_v36 = vmul.f32 %v10474_v17, %v7304_v60  ;;  %v7571_v9 = vpop.permute.xlu0 %1909  ;;  %v10479_v17 = vld [vmem:[#allocation63_spill] sm:$0xff] }
 0x44c   :  { %v7556_v20 = vpop.permute.xlu1 %1421 }
 0x44d   :  { %10471 = vst [vmem:[#allocation53_spill] sm:$0xff] %v7556_v20  ;;  %v1201_v20 = vmul.f32 %v1190_v43, %v10481_v58  ;;  %v10488_v43 = vld [vmem:[#allocation67_spill] sm:$0xff] }
 0x44e   :  { %1396 = vrot.lane.b32.xlu1 %v1386_v54, %s6533_s13  ;;  %v10476_v54 = vld [vmem:[#allocation59_spill] sm:$0xff] }
 0x44f   :  { %v1634_v59 = vmul.f32 %v10476_v54, %v7317_v62 }
 0x451   :  { %v7563_v14 = vpop.permute.xlu1 %1709 }
 0x452   :  { %10473 = vst [vmem:[#allocation54_spill] sm:$0xff] %v7563_v14  ;;  %1460 = vrot.lane.b32.xlu1 %v1450_v55, %s6532_s3  ;;  %v1674_v14 = vmul.f32 %v10477_v23, %v7317_v62  ;;  %v7580_v55 = vpop.permute.xlu0 %983  ;;  %v10482_v23 = vld [vmem:[#allocation30_spill] sm:$0xff] }
 0x453   :  { %10478 = vst [vmem:[#allocation59_spill] sm:$0xff] %v7580_v55  ;;  %v10483_v62 = vld [vmem:[#allocation66_spill] sm:$0xff]  ;;  %v10485_v55 = vld [vmem:[#allocation79_spill] sm:$0xff] }
 0x456   :  { %v7568_v27 = vpop.permute.xlu1 %1997  ;;  %1500 = vrot.lane.b32.xlu1 %v1490_v36, %s6491_s0  ;;  %v7588_v57 = vpop.permute.xlu0 %2093 }
 0x457   :  { %10475 = vst [vmem:[#allocation56_spill] sm:$0xff] %v7568_v27  ;;  %v1738_v27 = vmul.f32 %v10479_v17, %v7325_v0 }
 0x45a   :  { %1644 = vrot.lane.b32.xlu1 %v1634_v59, %s6491_s0  ;;  %v10480_v59 = vld [vmem:[#allocation65_spill] sm:$0xff]  ;;  %v7597_v17 = vpop.permute.xlu0 %1125 }
 0x45b   :  { %v7576_v47 = vpop.permute.xlu1 %1045  ;;  %v1778_v54 = vmul.f32 %v10480_v59, %v7325_v0  ;;  %10484 = vst [vmem:[#allocation61_spill] sm:$0xff] %v7597_v17  ;;  %v1200_v59 = vmul.f32 %v10485_v55, %v10482_v23  ;;  %v10489_v55 = vld [vmem:[#allocation31_spill] sm:$0xff] }
 0x45e   :  { %1684 = vrot.lane.b32.xlu1 %v1674_v14, %s6533_s13  ;;  %v1160_v14 = vmul.f32 %v10483_v62, %v10482_v23 }
 0x460   :  { %v7585_v36 = vpop.permute.xlu1 %1085 }
 0x462   :  { %1748 = vrot.lane.b32.xlu1 %v1738_v27, %s6532_s3 }
 0x465   :  { %v1150_v31 = vpop.permute.xlu1 %1149 }
 0x466   :  { %v1161_v22 = vmul.f32 %v1150_v31, %v10481_v58  ;;  %1788 = vrot.lane.b32.xlu1 %v1778_v54, %s6491_s0  ;;  %v7606_v54 = vpop.permute.xlu0 %1413 }
 0x467   :  { %10486 = vst [vmem:[#allocation63_spill] sm:$0xff] %v7606_v54  ;;  %v10492_v54 = vld [vmem:[#allocation35_spill] sm:$0xff] }
 0x468   :  { %1170 = vrot.lane.b32.xlu0 %v1161_v22, %s6532_s3  ;;  %v10487_v22 = vld [vmem:[#allocation68_spill] sm:$0xff] }
 0x469   :  { %v1240_v0 = vmul.f32 %v10487_v22, %v10482_v23  ;;  %v1488_v22 = vmul.f32 %v7353_v38, %v10489_v55 }
 0x46a   :  { %v1230_v27 = vpop.permute.xlu1 %1229  ;;  %1168 = vrot.lane.b32.xlu1 %v1160_v14, %s6532_s3  ;;  %v1962_v14 = vmul.f32 %v10488_v43, %v7335_v37  ;;  %v10494_v43 = vld [vmem:[#allocation76_spill] sm:$0xff] }
 0x46b   :  { %v1241_v31 = vmul.f32 %v1230_v27, %v10481_v58 }
 0x46c   :  { %1210 = vrot.lane.b32.xlu0 %v1201_v20, %s6491_s0  ;;  %v10490_v20 = vld [vmem:[#allocation72_spill] sm:$0xff] }
 0x46d   :  { %v1448_v17 = vmul.f32 %v10490_v20, %v10489_v55  ;;  %v1528_v20 = vmul.f32 %v10494_v43, %v10489_v55  ;;  %v10497_v43 = vld [vmem:[#allocation39_spill] sm:$0xff] }
 0x46e   :  { %1208 = vrot.lane.b32.xlu1 %v1200_v59, %s6491_s0  ;;  %v7621_v59 = vpop.permute.xlu0 %1701 }
 0x46f   :  { %v7608_v62 = vpop.permute.xlu1 %1293  ;;  %10491 = vst [vmem:[#allocation65_spill] sm:$0xff] %v7621_v59  ;;  %v10496_v59 = vld [vmem:[#allocation81_spill] sm:$0xff] }
 0x470   :  { %1250 = vrot.lane.b32.xlu0 %v1241_v31, %s6533_s13 }
 0x472   :  { %1248 = vrot.lane.b32.xlu1 %v1240_v0, %s6533_s13  ;;  %v7628_v0 = vpop.permute.xlu0 %1989 }
 0x473   :  { %10493 = vst [vmem:[#allocation66_spill] sm:$0xff] %v7628_v0 }
 0x474   :  { %v7618_v27 = vpop.permute.xlu1 %1373  ;;  %1972 = vrot.lane.b32.xlu0 %v1962_v14, %s6533_s13  ;;  %v1489_v14 = vmul.f32 %v1478_v48, %v10492_v54 }
 0x476   :  { %1456 = vrot.lane.b32.xlu1 %v1448_v17, %s6532_s3  ;;  %v10495_v17 = vld [vmem:[#allocation38_spill] sm:$0xff] }
 0x477   :  { %v1736_v38 = vmul.f32 %v10496_v59, %v10495_v17  ;;  %v1776_v48 = vmul.f32 %v7369_v53, %v10495_v17  ;;  %v1019_v53 = vmul.f32 %v7446_v19, %v6935_v44  ;;  %v1243_v19 = vmul.f32 %v7461_v7, %v6941_v50  ;;  %v10502_v7 = vld [vmem:[#allocation44_spill] sm:$0xff] }
 0x479   :  { %v1438_v31 = vpop.permute.xlu1 %1437 }
 0x47a   :  { %v1449_v58 = vmul.f32 %v1438_v31, %v10492_v54  ;;  %1496 = vrot.lane.b32.xlu1 %v1488_v22, %s6491_s0  ;;  %v7638_v31 = vpop.permute.xlu0 %1028 }
 0x47c   :  { %1458 = vrot.lane.b32.xlu0 %v1449_v58, %s6532_s3  ;;  %v10498_v58 = vld [vmem:[#allocation37_spill] sm:$0xff] }
 0x47d   :  { %v7646_v60 = vadd.f32 %v10498_v58, %v10497_v43 }
 0x47e   :  { %v1518_v37 = vpop.permute.xlu1 %1517  ;;  %1536 = vrot.lane.b32.xlu1 %v1528_v20, %s6533_s13  ;;  %v7654_v20 = vpop.permute.xlu0 %1252 }
 0x47f   :  { %v1529_v22 = vmul.f32 %v1518_v37, %v10492_v54  ;;  %10499 = vst [vmem:[#allocation79_spill] sm:$0xff] %v7646_v60  ;;  %v2024_v59 = vmul.f32 %v7390_v49, %v7646_v60  ;;  %v1816_v37 = vmul.f32 %v7361_v2, %v10495_v17  ;;  %v10500_v49 = vld [vmem:[#allocation42_spill] sm:$0xff] }
 0x480   :  { %1498 = vrot.lane.b32.xlu0 %v1489_v14, %s6491_s0  ;;  %v1777_v2 = vmul.f32 %v7561_v6, %v10500_v49 }
 0x482   :  { %1744 = vrot.lane.b32.xlu1 %v1736_v38, %s6532_s3  ;;  %v7664_v38 = vpop.permute.xlu0 %1316 }
 0x483   :  { %v7642_v0 = vpop.permute.xlu1 %1581 }
 0x484   :  { %1538 = vrot.lane.b32.xlu0 %v1529_v22, %s6533_s13 }
 0x486   :  { %1784 = vrot.lane.b32.xlu1 %v1776_v48, %s6491_s0  ;;  %v1203_v48 = vmul.f32 %v7450_v52, %v6941_v50 }
 0x488   :  { %v7658_v14 = vpop.permute.xlu1 %1661  ;;  %2032 = vrot.lane.b32.xlu0 %v2024_v59, %s6532_s3 }
 0x48a   :  { %1824 = vrot.lane.b32.xlu1 %v1816_v37, %s6533_s13  ;;  %v7674_v37 = vpop.permute.xlu0 %1540 }
 0x48d   :  { %v1726_v22 = vpop.permute.xlu1 %1725 }
 0x48e   :  { %v1737_v58 = vmul.f32 %v1726_v22, %v10500_v49  ;;  %1030 = vrot.lane.b32.xlu1 %v1019_v53, %s6532_s3  ;;  %v1307_v22 = vmul.f32 %v7466_v16, %v6938_v46  ;;  %v7686_v6 = vpop.permute.xlu0 %1604  ;;  %v10504_v16 = vld [vmem:[#allocation55_spill] sm:$0xff] }
 0x48f   :  { %10501 = vst [vmem:[#allocation68_spill] sm:$0xff] %v7686_v6 }
 0x490   :  { %1746 = vrot.lane.b32.xlu0 %v1737_v58, %s6532_s3  ;;  %v2064_v58 = vmul.f32 %v7398_v15, %v7646_v60  ;;  %v1531_v15 = vmul.f32 %v7481_v35, %v6944_v51 }
 0x492   :  { %v1806_v59 = vpop.permute.xlu1 %1805  ;;  %1214 = vrot.lane.b32.xlu1 %v1203_v48, %s6491_s0  ;;  %v7693_v48 = vadd.f32 %v10502_v7, %v10497_v43  ;;  %v10507_v7 = vld [vmem:[#allocation57_spill] sm:$0xff] }
 0x493   :  { %v1817_v53 = vmul.f32 %v1806_v59, %v10500_v49 }
 0x494   :  { %1786 = vrot.lane.b32.xlu0 %v1777_v2, %s6491_s0  ;;  %10503 = vst [vmem:[#allocation67_spill] sm:$0xff] %v7693_v48  ;;  %v1491_v2 = vmul.f32 %v7470_v40, %v6944_v51  ;;  %v2104_v40 = vmul.f32 %v7407_v63, %v7646_v60  ;;  %v10508_v63 = vld [vmem:[#allocation70_spill] sm:$0xff] }
 0x496   :  { %1254 = vrot.lane.b32.xlu1 %v1243_v19, %s6533_s13  ;;  %v2026_v19 = vmul.f32 %v10504_v16, %v7693_v48  ;;  %v1779_v16 = vmul.f32 %v7486_v61, %v6990_v34  ;;  %v756_v61 = vld [vmem:[%s10510_s8] sm:$0xff] }
 0x497   :  { %v7681_v52 = vpop.permute.xlu1 %1869 }
 0x498   :  { %1826 = vrot.lane.b32.xlu0 %v1817_v53, %s6533_s13  ;;  %v7703_v53 = vpop.permute.xlu0 %1828 }
 0x499   :  { %10505 = vst [vmem:[#allocation72_spill] sm:$0xff] %v7703_v53 }
 0x49a   :  { %1318 = vrot.lane.b32.xlu1 %v1307_v22, %s6532_s3  ;;  %v1595_v22 = vmul.f32 %v7488_v56, %v6984_v26 }
 0x49c   :  { %v7697_v59 = vpop.permute.xlu1 %1949  ;;  %2072 = vrot.lane.b32.xlu0 %v2064_v58, %s6491_s0  ;;  %v7716_v58 = vpop.permute.xlu0 %1892 }
 0x49d   :  { %10506 = vst [vmem:[#allocation76_spill] sm:$0xff] %v7716_v58 }
 0x49e   :  { %1502 = vrot.lane.b32.xlu1 %v1491_v2, %s6491_s0  ;;  %v2066_v2 = vmul.f32 %v10507_v7, %v7693_v48 }
 0x4a0   :  { %2036 = vrot.lane.b32.xlu0 %v2026_v19, %s6532_s3  ;;  %v2106_v19 = vmul.f32 %v10508_v63, %v7693_v48  ;;  %v7729_v56 = vpop.permute.xlu0 %1932  ;;  %v10513_v63 = vld [vmem:[#allocation52_spill] sm:$0xff] }
 0x4a1   :  { %v7708_v43 = vpop.permute.xlu1 %2013  ;;  %10509 = vst [vmem:[#allocation81_spill] sm:$0xff] %v7729_v56  ;;  %v10516_v48 = vld [vmem:[#allocation32_spill] sm:$0xff]  ;;  %v10517_v56 = vld [vmem:[#allocation29_spill] sm:$0xff] }
 0x4a2   :  { %1542 = vrot.lane.b32.xlu1 %v1531_v15, %s6533_s13 }
 0x4a4   :  { %2112 = vrot.lane.b32.xlu0 %v2104_v40, %s6533_s13  ;;  %v1819_v40 = vmul.f32 %v7504_v45, %v6990_v34  ;;  %v7749_v45 = vpop.permute.xlu0 %1024 }
 0x4a6   :  { %v7720_v35 = vpop.permute.xlu1 %2053  ;;  %1606 = vrot.lane.b32.xlu1 %v1595_v22, %s6532_s3  ;;  %v10511_v22 = vld [vmem:[#allocation46_spill] sm:$0xff] }
 0x4a7   :  { %v1883_v7 = vmul.f32 %v7510_v30, %v10511_v22 }
 0x4a8   :  { %2076 = vrot.lane.b32.xlu0 %v2066_v2, %s6491_s0 }
 0x4aa   :  { %1790 = vrot.lane.b32.xlu1 %v1779_v16, %s6491_s0  ;;  %v7747_v16 = vld [vmem:[%s10127_s18] ss:$0 sm:$0xff] }
 0x4ab   :  { %v7731_v15 = vpop.permute.xlu1 %1269 }
 0x4ac   :  { %2116 = vrot.lane.b32.xlu0 %v2106_v19, %s6533_s13  ;;  %v7753_v19 = vadd.f32 %v7747_v16, %v10513_v63  ;;  %v1017_v63 = vmul.f32 %v7520_v4, %v10516_v48  ;;  %v1097_v4 = vmul.f32 %v7585_v36, %v10516_v48 }
 0x4ae   :  { %1830 = vrot.lane.b32.xlu1 %v1819_v40, %s6533_s13  ;;  %10514 = vst [vmem:[#allocation37_spill] sm:$0xff] %v7753_v19  ;;  %v1923_v40 = vmul.f32 %v7492_v5, %v10511_v22  ;;  %v1057_v5 = vmul.f32 %v7576_v47, %v10516_v48  ;;  %v10519_v47 = vld [vmem:[#allocation33_spill] sm:$0xff] }
 0x4af   :  { %v1305_v60 = vmul.f32 %v7608_v62, %v10519_v47  ;;  %v1345_v36 = vmul.f32 %v7537_v10, %v10519_v47  ;;  %v10520_v62 = vld [vmem:[#allocation40_spill] sm:$0xff] }
 0x4b0   :  { %v7742_v2 = vpop.permute.xlu1 %1557  ;;  %2183 = vperm.xlu0 %5892, %v756_v61   ;;  %v7764_v61 = vpop.permute.xlu0 %1064  ;;  %v1593_v53 = vmul.f32 %v7642_v0, %v10520_v62  ;;  %v1633_v10 = vmul.f32 %v7552_v25, %v10520_v62  ;;  %v10523_v0 = vld [vmem:[#allocation48_spill] sm:$0xff] }
 0x4b1   :  { %10512 = vst [vmem:[#allocation39_spill] sm:$0xff] %v7742_v2  ;;  %v2027_v2 = vmul.f32 %v7522_v41, %v10523_v0  ;;  %v2067_v25 = vmul.f32 %v7534_v29, %v10523_v0 }
 0x4b2   :  { %1894 = vrot.lane.b32.xlu1 %v1883_v7, %s6532_s3  ;;  %v10518_v7 = vmax.f32 %v10517_v56, 0.0 }
 0x4b4   :  { %2286 = vrot.lane.b32.xlu0 %v7753_v19, %s6491_s0  ;;  %v7776_v19 = vpop.permute.xlu0 %1104 }
 0x4b5   :  { %v7760_v30 = vpop.permute.xlu1 %1845  ;;  %5915 = vset.pattern.permute.xlu0 %v10455_v24 }
 0x4b6   :  { %10515 = vst [vmem:[#allocation44_spill] sm:$0xff] %v7760_v30  ;;  %1934 = vrot.lane.b32.xlu1 %v1923_v40, %s6491_s0 }
 0x4b8   :  { %2320 = vrot.lane.b32.xlu0 %v10518_v7, %s6533_s13  ;;  %v7786_v56 = vpop.permute.xlu0 %1312 }
 0x4b9   :  { %v7771_v58 = vpop.permute.xlu1 %1068 }
 0x4ba   :  { %1026 = vrot.lane.b32.xlu1 %v1017_v63, %s6532_s3  ;;  %v1963_v63 = vmul.f32 %v7516_v3, %v10511_v22 }
 0x4bd   :  { %v7778_v24 = vpop.permute.xlu1 %1108 }
 0x4be   :  { %1066 = vrot.lane.b32.xlu1 %v1057_v5, %s6491_s0  ;;  %v7795_v5 = vpop.permute.xlu0 %1352 }
 0x4c1   :  { %v7783_v40 = vpop.permute.xlu1 %1172 }
 0x4c2   :  { %1106 = vrot.lane.b32.xlu1 %v1097_v4, %s6533_s13  ;;  %v7805_v3 = vpop.permute.xlu0 %1392 }
 0x4c5   :  { %v7790_v7 = vpop.permute.xlu1 %1212 }
 0x4c6   :  { %1974 = vrot.lane.b32.xlu1 %v1963_v63, %s6533_s13  ;;  %v1385_v63 = vmul.f32 %v7618_v27, %v10519_v47 }
 0x4c9   :  { %v7797_v30 = vpop.permute.xlu1 %1356 }
 0x4ca   :  { %1314 = vrot.lane.b32.xlu1 %v1305_v60, %s6532_s3  ;;  %v7814_v60 = vpop.permute.xlu0 %1600 }
 0x4cd   :  { %v7802_v4 = vpop.permute.xlu1 %1396 }
 0x4ce   :  { %1354 = vrot.lane.b32.xlu1 %v1345_v36, %s6491_s0  ;;  %v7824_v27 = vpop.permute.xlu0 %1640 }
 0x4d1   :  { %v7809_v22 = vpop.permute.xlu1 %1460 }
 0x4d2   :  { %1394 = vrot.lane.b32.xlu1 %v1385_v63, %s6533_s13  ;;  %v1673_v63 = vmul.f32 %v7658_v14, %v10520_v62  ;;  %v10528_v62 = vld [vmem:[#allocation41_spill] sm:$0xff] }
 0x4d3   :  { %v1921_v41 = vmul.f32 %v7571_v9, %v10528_v62  ;;  %v1961_v29 = vmul.f32 %v7697_v59, %v10528_v62 }
 0x4d5   :  { %v7816_v49 = vpop.permute.xlu1 %1500 }
 0x4d6   :  { %1602 = vrot.lane.b32.xlu1 %v1593_v53, %s6532_s3  ;;  %v7833_v53 = vpop.permute.xlu0 %1680 }
 0x4d7   :  { %10524 = vst [vmem:[#allocation70_spill] sm:$0xff] %v7833_v53 }
 0x4d9   :  { %v7821_v36 = vpop.permute.xlu1 %1644 }
 0x4da   :  { %10521 = vst [vmem:[#allocation55_spill] sm:$0xff] %v7821_v36  ;;  %1642 = vrot.lane.b32.xlu1 %v1633_v10, %s6491_s0  ;;  %v7843_v14 = vpop.permute.xlu0 %1888 }
 0x4db   :  { %10527 = vst [vmem:[#allocation91_spill] sm:$0xff] %v7843_v14 }
 0x4dd   :  { %v7828_v34 = vpop.permute.xlu1 %1684 }
 0x4de   :  { %10522 = vst [vmem:[#allocation57_spill] sm:$0xff] %v7828_v34  ;;  %1682 = vrot.lane.b32.xlu1 %v1673_v63, %s6533_s13  ;;  %v1881_v63 = vmul.f32 %v7681_v52, %v10528_v62  ;;  %v10531_v52 = vld [vmem:[#allocation43_spill] sm:$0xff] }
 0x4df   :  { %v2065_v9 = vmul.f32 %v7720_v35, %v10531_v52  ;;  %v2105_v59 = vmul.f32 %v7588_v57, %v10531_v52  ;;  %v757_v35 = vld [vmem:[%s10510_s8 + $0x8] sm:$0xff]  ;;  %v10534_v57 = vld [vmem:[#allocation51_spill] sm:$0xff] }
 0x4e1   :  { %v7835_v54 = vpop.permute.xlu1 %1748 }
 0x4e2   :  { %10525 = vst [vmem:[#allocation52_spill] sm:$0xff] %v7835_v54  ;;  %2038 = vrot.lane.b32.xlu1 %v2027_v2, %s6532_s3  ;;  %v7850_v54 = vpop.permute.xlu0 %1928 }
 0x4e3   :  { %10529 = vst [vmem:[#allocation92_spill] sm:$0xff] %v7850_v54 }
 0x4e5   :  { %v7840_v10 = vpop.permute.xlu1 %1788 }
 0x4e6   :  { %10526 = vst [vmem:[#allocation29_spill] sm:$0xff] %v7840_v10  ;;  %2078 = vrot.lane.b32.xlu1 %v2067_v25, %s6491_s0  ;;  %v7856_v14 = vpop.permute.xlu0 %1968  ;;  %v2025_v10 = vmul.f32 %v7708_v43, %v10531_v52  ;;  %v7885_v52 = vadd.f32 %v7747_v16, %v10534_v57 }
 0x4e7   :  { %10530 = vst [vmem:[#allocation93_spill] sm:$0xff] %v7856_v14  ;;  %v2107_v14 = vmul.f32 %v7541_v33, %v10523_v0 }
 0x4e8   :  { %10535 = vst [vmem:[#allocation51_spill] sm:$0xff] %v7885_v52 }
 0x4e9   :  { %v1169_v34 = vpop.permute.xlu1 %1168 }
 0x4ea   :  { %1890 = vrot.lane.b32.xlu1 %v1881_v63, %s6532_s3  ;;  %v1071_v54 = vpop.permute.xlu0 %1070 }
 0x4ed   :  { %v1209_v2 = vpop.permute.xlu1 %1208 }
 0x4ee   :  { %1930 = vrot.lane.b32.xlu1 %v1921_v41, %s6491_s0  ;;  %v1111_v43 = vpop.permute.xlu0 %1110 }
 0x4f1   :  { %v1249_v25 = vpop.permute.xlu1 %1248 }
 0x4f2   :  { %1970 = vrot.lane.b32.xlu1 %v1961_v29, %s6533_s13 }
 0x4f5   :  { %v7860_v63 = vpop.permute.xlu1 %1456 }
 0x4f6   :  { %2034 = vrot.lane.b32.xlu1 %v2025_v10, %s6532_s3 }
 0x4f9   :  { %v7865_v41 = vpop.permute.xlu1 %1496 }
 0x4fa   :  { %2074 = vrot.lane.b32.xlu1 %v2065_v9, %s6491_s0  ;;  %v1175_v9 = vpop.permute.xlu0 %1174 }
 0x4fd   :  { %v7870_v29 = vpop.permute.xlu1 %1536 }
 0x4fe   :  { %2114 = vrot.lane.b32.xlu1 %v2105_v59, %s6533_s13  ;;  %v7891_v33 = vpop.permute.xlu0 %1358 }
 0x501   :  { %v7875_v10 = vpop.permute.xlu1 %1744 }
 0x502   :  { %10532 = vst [vmem:[#allocation94_spill] sm:$0xff] %v7875_v10  ;;  %2118 = vrot.lane.b32.xlu1 %v2107_v14, %s6533_s13  ;;  %v10537_v14 = vmov 1   ;;  %v10538_v10 = vld [vmem:[#allocation82_spill] sm:$0xff]  ;;  %v7896_v6 = vpop.permute.xlu0 %1398 }
 0x503   :  { %v996_v36 = vmul.f32 %v7384_v21, %v10538_v10  ;;  %v1136_v21 = vmul.f32 %v7415_v32, %v10482_v23 }
 0x505   :  { %v7881_v62 = vpop.permute.xlu1 %1784  ;;  %v1036_v16 = vadd.f32 %v7749_v45, %v996_v36 }
 0x506   :  { %10533 = vst [vmem:[#allocation95_spill] sm:$0xff] %v7881_v62  ;;  %2188 = vperm.xlu1 %5893, %v757_v35   ;;  %v999_v35 = vmul.f32 %v7528_v8, %v6935_v44  ;;  %v7905_v53 = vpop.permute.xlu0 %1462 }
 0x509   :  { %v7887_v59 = vpop.permute.xlu1 %1824 }
 0x50a   :  { %10536 = vst [vmem:[#allocation96_spill] sm:$0xff] %v7887_v59  ;;  %2284 = vrot.lane.b32.xlu1 %v7885_v52, %s6491_s0  ;;  %v1076_v59 = vadd.f32 %v7764_v61, %v1036_v16  ;;  %v10539_v52 = vld [vmem:[#allocation69_spill] sm:$0xff]  ;;  %v1139_v16 = vmul.f32 %v7547_v42, %v6941_v50 }
 0x50b   :  { %5894 = vset.pattern.permute.xlu1 %v10537_v14  ;;  %v998_v17 = vmul.f32 %v10539_v52, %v7269_v12  ;;  %v7912_v52 = vpop.permute.xlu0 %1646 }
 0x50c   :  { %v1116_v14 = vadd.f32 %v7776_v19, %v1076_v59  ;;  %v10540_v19 = vld [vmem:[#allocation58_spill] sm:$0xff] }
 0x50d   :  { %v1031_v0 = vpop.permute.xlu1 %1030  ;;  %v1038_v10 = vadd.f32 %v7638_v31, %v998_v17  ;;  %v1138_v59 = vmul.f32 %v10540_v19, %v7281_v28 }
 0x50e   :  { %v1039_v62 = vadd.f32 %v1031_v0, %v999_v35  ;;  %v1140_v36 = vadd.f32 %v1136_v21, %v1116_v14 }
 0x50f   :  { %v1078_v45 = vadd.f32 %v7771_v58, %v1038_v10  ;;  %v7920_v58 = vpop.permute.xlu0 %1686 }
 0x510   :  { %v1079_v8 = vadd.f32 %v1071_v54, %v1039_v62  ;;  %v1180_v0 = vadd.f32 %v1169_v34, %v1140_v36  ;;  %v1280_v34 = vmul.f32 %v7404_v1, %v7373_v11  ;;  %v10541_v1 = vld [vmem:[#allocation71_spill] sm:$0xff] }
 0x511   :  { %v1215_v57 = vpop.permute.xlu1 %1214  ;;  %v1118_v61 = vadd.f32 %v7778_v24, %v1078_v45 }
 0x512   :  { %v1119_v35 = vadd.f32 %v1111_v43, %v1079_v8  ;;  %v1220_v32 = vadd.f32 %v1209_v2, %v1180_v0 }
 0x513   :  { %v1142_v54 = vadd.f32 %v1138_v59, %v1118_v61  ;;  %v7928_v42 = vpop.permute.xlu0 %1750  ;;  %v1282_v61 = vmul.f32 %v10541_v1, %v7295_v18 }
 0x514   :  { %v1260_v17 = vadd.f32 %v1249_v25, %v1220_v32  ;;  %v1143_v31 = vadd.f32 %v1139_v16, %v1119_v35 }
 0x515   :  { %v1255_v26 = vpop.permute.xlu1 %1254  ;;  %v1182_v62 = vadd.f32 %v7783_v40, %v1142_v54 }
 0x516   :  { %v1284_v43 = vadd.f32 %v1280_v34, %v1260_v17  ;;  %v1183_v10 = vadd.f32 %v1175_v9, %v1143_v31 }
 0x517   :  { %v1222_v14 = vadd.f32 %v7790_v7, %v1182_v62  ;;  %v1171_v45 = vpop.permute.xlu0 %1170  ;;  %v1283_v7 = vmul.f32 %v7499_v39, %v6938_v46  ;;  %v10542_v62 = vld [vmem:[#allocation74_spill] sm:$0xff] }
 0x518   :  { %v1324_v25 = vadd.f32 %v7786_v56, %v1284_v43  ;;  %v1223_v21 = vadd.f32 %v1215_v57, %v1183_v10 }
 0x519   :  { %v1319_v44 = vpop.permute.xlu1 %1318  ;;  %v1262_v8 = vadd.f32 %v7654_v20, %v1222_v14  ;;  %v1424_v20 = vmul.f32 %v7425_v13, %v10489_v55  ;;  %v10543_v13 = vld [vmem:[#allocation60_spill] sm:$0xff] }
 0x51a   :  { %v1364_v40 = vadd.f32 %v7795_v5, %v1324_v25  ;;  %v1263_v9 = vadd.f32 %v1255_v26, %v1223_v21  ;;  %v1426_v43 = vmul.f32 %v10543_v13, %v10542_v62  ;;  %v10545_v25 = vld [vmem:[#allocation53_spill] sm:$0xff] }
 0x51b   :  { %v1286_v0 = vadd.f32 %v1282_v61, %v1262_v8  ;;  %v1211_v19 = vpop.permute.xlu0 %1210 }
 0x51c   :  { %v1404_v56 = vadd.f32 %v7805_v3, %v1364_v40  ;;  %v1287_v57 = vadd.f32 %v1283_v7, %v1263_v9  ;;  %v10546_v40 = vld [vmem:[#allocation83_spill] sm:$0xff]  ;;  %v10547_v9 = vld [vmem:[#allocation84_spill] sm:$0xff] }
 0x51d   :  { %v7918_v23 = vpop.permute.xlu1 %1502  ;;  %v1326_v59 = vadd.f32 %v7664_v38, %v1286_v0 }
 0x51e   :  { %v1428_v32 = vadd.f32 %v1424_v20, %v1404_v56  ;;  %v1327_v5 = vadd.f32 %v1319_v44, %v1287_v57  ;;  %v10548_v56 = vld [vmem:[#allocation34_spill] sm:$0xff]  ;;  %v10549_v57 = vld [vmem:[#allocation61_spill] sm:$0xff] }
 0x51f   :  { %v1366_v26 = vadd.f32 %v7797_v30, %v1326_v59  ;;  %v1251_v54 = vpop.permute.xlu0 %1250  ;;  %v10544_v30 = vld [vmem:[#allocation59_spill] sm:$0xff]  ;;  %v1137_v20 = vmul.f32 %v10549_v57, %v10548_v56 }
 0x520   :  { %v1468_v17 = vadd.f32 %v7860_v63, %v1428_v32  ;;  %v1367_v3 = vadd.f32 %v7891_v33, %v1327_v5  ;;  %v997_v14 = vmul.f32 %v10544_v30, %v10516_v48  ;;  %v1427_v63 = vmul.f32 %v10545_v25, %v6944_v51 }
 0x521   :  { %v7924_v24 = vpop.permute.xlu1 %1542  ;;  %v1406_v31 = vadd.f32 %v7802_v4, %v1366_v26 }
 0x522   :  { %v1508_v38 = vadd.f32 %v7865_v41, %v1468_v17  ;;  %v1407_v10 = vadd.f32 %v7896_v6, %v1367_v3  ;;  %v1568_v41 = vmul.f32 %v10547_v9, %v10546_v40 }
 0x523   :  { %v7959_v44 = vpop.permute.xlu0 %1972  ;;  %v1430_v21 = vadd.f32 %v1426_v43, %v1406_v31 }
 0x524   :  { %v1548_v4 = vadd.f32 %v7870_v29, %v1508_v38  ;;  %v1431_v8 = vadd.f32 %v1427_v63, %v1407_v10  ;;  %v10550_v38 = vld [vmem:[#allocation77_spill] sm:$0xff] }
 0x525   :  { %v7930_v2 = vpop.permute.xlu1 %1606  ;;  %v1470_v6 = vadd.f32 %v7809_v22, %v1430_v21  ;;  %v10551_v10 = vld [vmem:[#allocation73_spill] sm:$0xff] }
 0x526   :  { %v1572_v59 = vadd.f32 %v1568_v41, %v1548_v4  ;;  %v1471_v32 = vadd.f32 %v7905_v53, %v1431_v8  ;;  %v1570_v30 = vmul.f32 %v10551_v10, %v10550_v38  ;;  %v1281_v53 = vmul.f32 %v7731_v15, %v10519_v47  ;;  %v10555_v41 = vld [vmem:[#allocation38_spill] sm:$0xff]  ;;  %v10557_v15 = vld [vmem:[#allocation68_spill] sm:$0xff] }
 0x527   :  { %v1459_v61 = vpop.permute.xlu0 %1458  ;;  %v1510_v26 = vadd.f32 %v7816_v49, %v1470_v6  ;;  %v10556_v6 = vld [vmem:[#allocation87_spill] sm:$0xff] }
 0x528   :  { %v1612_v31 = vadd.f32 %v7814_v60, %v1572_v59  ;;  %v10552_v60 = vld [vmem:[#allocation45_spill] sm:$0xff] }
 0x529   :  { %v7934_v36 = vpop.permute.xlu1 %1790  ;;  %v1550_v13 = vadd.f32 %v7674_v37, %v1510_v26 }
 0x52a   :  { %v1652_v49 = vadd.f32 %v7824_v27, %v1612_v31 }
 0x52b   :  { %v1499_v17 = vpop.permute.xlu0 %1498 }
 0x52d   :  { %v7941_v35 = vpop.permute.xlu1 %1830 }
 0x52f   :  { %v1539_v21 = vpop.permute.xlu0 %1538 }
 0x531   :  { %v7947_v16 = vpop.permute.xlu1 %1894 }
 0x533   :  { %v7990_v57 = vpop.permute.xlu0 %2032 }
 0x535   :  { %v7950_v39 = vpop.permute.xlu1 %1934 }
 0x539   :  { %v1027_v34 = vpop.permute.xlu1 %1026 }
 0x53a   :  { %v1037_v1 = vadd.f32 %v1027_v34, %v997_v14  ;;  %v1511_v34 = vadd.f32 %v7918_v23, %v1471_v32 }
 0x53c   :  { %v1551_v25 = vadd.f32 %v7924_v24, %v1511_v34 }
 0x53d   :  { %v1067_v33 = vpop.permute.xlu1 %1066 }
 0x53e   :  { %v1077_v7 = vadd.f32 %v1067_v33, %v1037_v1  ;;  %v10553_v33 = vld [vmem:[#allocation89_spill] sm:$0xff] }
 0x53f   :  { %v1571_v23 = vmul.f32 %v10553_v33, %v10552_v60  ;;  %v10564_v33 = vld [vmem:[#allocation62_spill] sm:$0xff] }
 0x541   :  { %v1107_v0 = vpop.permute.xlu1 %1106  ;;  %v1575_v1 = vadd.f32 %v1571_v23, %v1551_v25 }
 0x542   :  { %v1117_v5 = vadd.f32 %v1107_v0, %v1077_v7  ;;  %v1712_v7 = vmul.f32 %v10556_v6, %v10555_v41 }
 0x544   :  { %v1141_v29 = vadd.f32 %v1137_v20, %v1117_v5  ;;  %v10559_v20 = vld [vmem:[#allocation63_spill] sm:$0xff]  ;;  %v1615_v5 = vadd.f32 %v7930_v2, %v1575_v1 }
 0x545   :  { %v7973_v3 = vpop.permute.xlu1 %1974  ;;  %v10566_v2 = vld [vmem:[#allocation39_spill] sm:$0xff] }
 0x546   :  { %v1181_v22 = vadd.f32 %v1171_v45, %v1141_v29  ;;  %v1574_v45 = vadd.f32 %v1570_v30, %v1550_v13  ;;  %v10560_v29 = vld [vmem:[#allocation55_spill] sm:$0xff]  ;;  %v1655_v30 = vadd.f32 %v7912_v52, %v1615_v5  ;;  %v10572_v5 = vld [vmem:[#allocation86_spill] sm:$0xff] }
 0x548   :  { %v1221_v43 = vadd.f32 %v1211_v19, %v1181_v22  ;;  %v10554_v19 = vld [vmem:[#allocation70_spill] sm:$0xff]  ;;  %v1614_v0 = vadd.f32 %v10557_v15, %v1574_v45  ;;  %v1747_v22 = vpop.permute.xlu0 %1746  ;;  %v1695_v1 = vadd.f32 %v7920_v58, %v1655_v30 }
 0x549   :  { %v1315_v14 = vpop.permute.xlu1 %1314  ;;  %v1692_v8 = vadd.f32 %v10554_v19, %v1652_v49  ;;  %v10567_v19 = vld [vmem:[#allocation95_spill] sm:$0xff]  ;;  %v10569_v15 = vld [vmem:[#allocation54_spill] sm:$0xff] }
 0x54a   :  { %v1261_v63 = vadd.f32 %v1251_v54, %v1221_v43  ;;  %v10558_v54 = vld [vmem:[#allocation35_spill] sm:$0xff]  ;;  %v1654_v31 = vadd.f32 %v10560_v29, %v1614_v0  ;;  %v10561_v43 = vld [vmem:[#allocation94_spill] sm:$0xff]  ;;  %v10573_v29 = vld [vmem:[#allocation52_spill] sm:$0xff] }
 0x54b   :  { %v1425_v59 = vmul.f32 %v10559_v20, %v10558_v54  ;;  %v1716_v32 = vadd.f32 %v1712_v7, %v1692_v8  ;;  %v10568_v7 = vld [vmem:[#allocation47_spill] sm:$0xff] }
 0x54c   :  { %v1285_v4 = vadd.f32 %v1281_v53, %v1261_v63  ;;  %v10562_v53 = vld [vmem:[#allocation57_spill] sm:$0xff]  ;;  %v10563_v63 = vld [vmem:[#allocation78_spill] sm:$0xff]  ;;  %v1787_v6 = vpop.permute.xlu0 %1786  ;;  %v1715_v52 = vmul.f32 %v10569_v15, %v10568_v7 }
 0x54d   :  { %v1355_v37 = vpop.permute.xlu1 %1354  ;;  %v1756_v10 = vadd.f32 %v10561_v43, %v1716_v32  ;;  %v1694_v49 = vadd.f32 %v10562_v53, %v1654_v31  ;;  %v1714_v23 = vmul.f32 %v10564_v33, %v10563_v63  ;;  %v10571_v32 = vld [vmem:[#allocation85_spill] sm:$0xff] }
 0x54e   :  { %v1325_v9 = vadd.f32 %v1315_v14, %v1285_v4  ;;  %v10565_v4 = vld [vmem:[#allocation40_spill] sm:$0xff]  ;;  %v1719_v20 = vadd.f32 %v1715_v52, %v1695_v1 }
 0x54f   :  { %v1796_v8 = vadd.f32 %v10567_v19, %v1756_v10  ;;  %v10575_v10 = vld [vmem:[#allocation65_spill] sm:$0xff]  ;;  %v10579_v52 = vld [vmem:[#allocation80_spill] sm:$0xff] }
 0x550   :  { %v1365_v27 = vadd.f32 %v1355_v37, %v1325_v9  ;;  %v1569_v37 = vmul.f32 %v10566_v2, %v10565_v4  ;;  %v1827_v43 = vpop.permute.xlu0 %1826  ;;  %v1759_v53 = vadd.f32 %v7928_v42, %v1719_v20  ;;  %v10582_v42 = vld [vmem:[#allocation44_spill] sm:$0xff] }
 0x551   :  { %v1395_v24 = vpop.permute.xlu1 %1394  ;;  %v10583_v20 = vld [vmem:[#allocation92_spill] sm:$0xff] }
 0x552   :  { %v1405_v26 = vadd.f32 %v1395_v24, %v1365_v27  ;;  %v1799_v19 = vadd.f32 %v7934_v36, %v1759_v53 }
 0x554   :  { %v1429_v34 = vadd.f32 %v1425_v59, %v1405_v26  ;;  %v1856_v26 = vmul.f32 %v10572_v5, %v10571_v32  ;;  %v2073_v1 = vpop.permute.xlu0 %2072  ;;  %v1839_v5 = vadd.f32 %v7941_v35, %v1799_v19 }
 0x555   :  { %v1603_v13 = vpop.permute.xlu1 %1602 }
 0x556   :  { %v1469_v14 = vadd.f32 %v1459_v61, %v1429_v34  ;;  %v1718_v61 = vadd.f32 %v1714_v23, %v1694_v49 }
 0x558   :  { %v1509_v25 = vadd.f32 %v1499_v17, %v1469_v14  ;;  %v10570_v17 = vld [vmem:[#allocation96_spill] sm:$0xff]  ;;  %v1758_v31 = vadd.f32 %v10573_v29, %v1718_v61  ;;  %v10580_v61 = vld [vmem:[#allocation75_spill] sm:$0xff]  ;;  %v10584_v29 = vld [vmem:[#allocation46_spill] sm:$0xff] }
 0x559   :  { %v1643_v45 = vpop.permute.xlu1 %1642  ;;  %v1836_v24 = vadd.f32 %v10570_v17, %v1796_v8 }
 0x55a   :  { %v1549_v9 = vadd.f32 %v1539_v21, %v1509_v25  ;;  %v10574_v21 = vld [vmem:[#allocation42_spill] sm:$0xff]  ;;  %v10576_v25 = vld [vmem:[#allocation29_spill] sm:$0xff] }
 0x55b   :  { %v1713_v30 = vmul.f32 %v10575_v10, %v10574_v21  ;;  %v1860_v14 = vadd.f32 %v1856_v26, %v1836_v24  ;;  %v1798_v33 = vadd.f32 %v10576_v25, %v1758_v31  ;;  %v10581_v24 = vld [vmem:[#allocation41_spill] sm:$0xff]  ;;  %v10585_v31 = vld [vmem:[#allocation90_spill] sm:$0xff]  ;;  %v2037_v10 = vpop.permute.xlu0 %2036  ;;  %v10587_v25 = vld [vmem:[#allocation79_spill] sm:$0xff] }
 0x55c   :  { %v1573_v0 = vadd.f32 %v1569_v37, %v1549_v9  ;;  %v1859_v36 = vmul.f32 %v10585_v31, %v10584_v29 }
 0x55d   :  { %v1683_v27 = vpop.permute.xlu1 %1682 }
 0x55e   :  { %v1613_v59 = vadd.f32 %v1603_v13, %v1573_v0  ;;  %v10577_v13 = vld [vmem:[#allocation91_spill] sm:$0xff]  ;;  %v1858_v0 = vmul.f32 %v10580_v61, %v10579_v52  ;;  %v1863_v53 = vadd.f32 %v1859_v36, %v1839_v5  ;;  %v10591_v61 = vld [vmem:[#allocation66_spill] sm:$0xff] }
 0x55f   :  { %v1900_v37 = vadd.f32 %v10577_v13, %v1860_v14  ;;  %v10589_v13 = vld [vmem:[#allocation76_spill] sm:$0xff] }
 0x560   :  { %v1653_v34 = vadd.f32 %v1643_v45, %v1613_v59  ;;  %v10578_v45 = vld [vmem:[#allocation72_spill] sm:$0xff] }
 0x561   :  { %v2039_v58 = vpop.permute.xlu1 %2038  ;;  %v1838_v9 = vadd.f32 %v10578_v45, %v1798_v33  ;;  %v1940_v59 = vadd.f32 %v10583_v20, %v1900_v37  ;;  %v10588_v33 = vld [vmem:[#allocation88_spill] sm:$0xff] }
 0x562   :  { %v1693_v49 = vadd.f32 %v1683_v27, %v1653_v34  ;;  %v1857_v27 = vmul.f32 %v10582_v42, %v10581_v24  ;;  %v10592_v42 = vld [vmem:[#allocation81_spill] sm:$0xff]  ;;  %v10643_v24 = vmov 24  }
 0x564   :  { %v1717_v23 = vadd.f32 %v1713_v30, %v1693_v49 }
 0x565   :  { %v2079_v2 = vpop.permute.xlu1 %2078 }
 0x566   :  { %v1757_v8 = vadd.f32 %v1747_v22, %v1717_v23  ;;  %v1862_v22 = vadd.f32 %v1858_v0, %v1838_v9  ;;  %v2000_v23 = vmul.f32 %v10588_v33, %v10587_v25  ;;  %v10590_v9 = vld [vmem:[#allocation43_spill] sm:$0xff] }
 0x567   :  { %v2001_v0 = vmul.f32 %v10591_v61, %v10590_v9  ;;  %v10642_v9 = vmov 16  }
 0x568   :  { %v1797_v15 = vadd.f32 %v1787_v6, %v1757_v8  ;;  %v10586_v6 = vld [vmem:[#allocation93_spill] sm:$0xff]  ;;  %v1902_v8 = vadd.f32 %v10589_v13, %v1862_v22 }
 0x569   :  { %v1891_v17 = vpop.permute.xlu1 %1890  ;;  %v1980_v14 = vadd.f32 %v10586_v6, %v1940_v59  ;;  %v10595_v6 = vld [vmem:[#allocation48_spill] sm:$0xff] }
 0x56a   :  { %v1837_v26 = vadd.f32 %v1827_v43, %v1797_v15  ;;  %v1903_v43 = vadd.f32 %v7947_v16, %v1863_v53  ;;  %v2113_v15 = vpop.permute.xlu0 %2112  ;;  %v10593_v16 = vld [vmem:[#allocation67_spill] sm:$0xff] }
 0x56b   :  { %v2004_v35 = vadd.f32 %v2000_v23, %v1980_v14  ;;  %v10596_v14 = vld [vmem:[#allocation56_spill] sm:$0xff] }
 0x56c   :  { %v1861_v34 = vadd.f32 %v1857_v27, %v1837_v26  ;;  %v1942_v27 = vadd.f32 %v10592_v42, %v1902_v8  ;;  %v1943_v59 = vadd.f32 %v7950_v39, %v1903_v43  ;;  %v2003_v53 = vmul.f32 %v10596_v14, %v10595_v6 }
 0x56d   :  { %v1931_v30 = vpop.permute.xlu1 %1930 }
 0x56e   :  { %v1901_v49 = vadd.f32 %v1891_v17, %v1861_v34  ;;  %v2044_v17 = vadd.f32 %v7990_v57, %v2004_v35  ;;  %v1982_v26 = vadd.f32 %v7959_v44, %v1942_v27  ;;  %v1983_v31 = vadd.f32 %v7973_v3, %v1943_v59  ;;  %v2077_v36 = vpop.permute.xlu0 %2076  ;;  %v10594_v34 = vld [vmem:[#allocation64_spill] sm:$0xff] }
 0x56f   :  { %v10597_v27 = vmov 0.0  }
 0x570   :  { %v1941_v37 = vadd.f32 %v1931_v30, %v1901_v49  ;;  %v2002_v30 = vmul.f32 %v10594_v34, %v10593_v16  ;;  %v2084_v49 = vadd.f32 %v2073_v1, %v2044_v17  ;;  %v2007_v13 = vadd.f32 %v2003_v53, %v1983_v31  ;;  %v5476_v31 = vld [vmem:[#allocation17] ss:$0 sm:$0xff] }
 0x571   :  { %v1971_v45 = vpop.permute.xlu1 %1970 }
 0x572   :  { %v1981_v19 = vadd.f32 %v1971_v45, %v1941_v37  ;;  %v2006_v23 = vadd.f32 %v2002_v30, %v1982_v26  ;;  %v2124_v37 = vadd.f32 %v2113_v15, %v2084_v49  ;;  %v2047_v45 = vadd.f32 %v2039_v58, %v2007_v13  ;;  %v2117_v35 = vpop.permute.xlu0 %2116  ;;  %v6208_v58 = vld [vmem:[%s10376_s26] sm:$0xff]   ;;  %v10601_v49 = vld [vmem:[#allocation50_spill] sm:$0xff] }
 0x574   :  { %v2005_v5 = vadd.f32 %v2001_v0, %v1981_v19  ;;  %v2046_v39 = vadd.f32 %v2037_v10, %v2006_v23  ;;  %v2087_v43 = vadd.f32 %v2079_v2, %v2047_v45  ;;  %v8051_v2 = vld [vmem:[%s10124_s15] sm:$0xff]   ;;  %v8058_v10 = vld [vmem:[%s10124_s15 + $0x8] sm:$0xff]  }
 0x575   :  { %v2035_v20 = vpop.permute.xlu1 %2034  ;;  %5609 = vmatpush3.bf16.msra.mxu0 %v8051_v2  ;;  %v5477_v45 = vld [vmem:[%s10125_s16] ss:$0 sm:$0xff] }
 0x576   :  { %v2045_v33 = vadd.f32 %v2035_v20, %v2005_v5  ;;  %v2086_v3 = vadd.f32 %v2077_v36, %v2046_v39  ;;  %v6161_v20 = vld [vmem:[#allocation3] sm:$0xff]   ;;  %5610 = vmatprep.subr.bf16.mxu0 %v10597_v27  ;;  %v8062_v15 = vpop.permute.xlu0 %2183 }
 0x577   :  { %10598 = vst [vmem:[#allocation69_spill] sm:$0xff] %v8062_v15  ;;  %v6209_v39 = vld [vmem:[#allocation15] sm:$0xff]  }
 0x578   :  { %v2126_v0 = vadd.f32 %v2117_v35, %v2086_v3 }
 0x579   :  { %v2075_v22 = vpop.permute.xlu1 %2074  ;;  %5611 = vmatpush3.bf16.msra.mxu0 %v8058_v10 }
 0x57a   :  { %v2085_v57 = vadd.f32 %v2075_v22, %v2045_v33  ;;  %5622 = vmatprep.subr.bf16.mxu0 %v10597_v27  ;;  %v10600_v22 = vld [vmem:[#allocation49_spill] sm:$0xff] }
 0x57d   :  { %v2115_v8 = vpop.permute.xlu1 %2114 }
 0x57e   :  { %v2125_v44 = vadd.f32 %v2115_v8, %v2085_v57 }
 0x580   :  { %v2130_v19 = vpack.c.bf16 %v2125_v44, %v2124_v37  ;;  %v6210_v37 = vld [vmem:[#allocation15 + $0x8] sm:$0xff]  }
 0x581   :  { %v2119_v61 = vpop.permute.xlu1 %2118 }
 0x582   :  { %v2127_v42 = vadd.f32 %v2119_v61, %v2087_v43  ;;  %5601 = vmatpush3.bf16.msra.mxu1 %v2130_v19  ;;  %v10602_v19 = vld [vmem:[#allocation51_spill] sm:$0xff] }
 0x583   :  { %5602 = vmatprep.subr.bf16.mxu1 %v10597_v27 }
 0x584   :  { %v2131_v1 = vpack.c.bf16 %v2127_v42, %v2126_v0 }
 0x585   :  { %v8065_v26 = vpop.permute.xlu1 %2188 }
 0x586   :  { %5603 = vmatpush3.bf16.msra.mxu1 %v2131_v1  ;;  %10599 = vst [vmem:[#allocation58_spill] sm:$0xff] %v8065_v26 }
 0x589   :  { %5605 = vmatmul.mubr.msk.bf16.vlgmr.msra.gmra.mrb[24].mxu1 %vm490_vm5, %v6161_v20  ;;  %v10603_v20 = vld [vmem:[#allocation37_spill] sm:$0xff] }
 0x58a   :  { %5618 = vmatprep.mubr.msk.bf16.mxu1 %vm773_vm6, %v6208_v58 }
 0x65c   :  { %v2174_v17 = vpop.f32.mrb[24].mxu1 }
 0x65d   :  { %v2191_v59 = vmul.f32 %v8062_v15, %v2174_v17  ;;  %v5606_v5 = vpop.f32.mrb[25].mxu1  ;;  %v10639_v15 = vmov 0  }
 0x65e   :  { %v2177_v36 = vpop.f32.mrb[26].mxu1 }
 0x65f   :  { %v2193_v34 = vadd.f32 %v2191_v59, %v10600_v22  ;;  %v2192_v30 = vmul.f32 %v8065_v26, %v2177_v36  ;;  %v5607_v14 = vpop.f32.mrb[27].mxu1  ;;  %v10637_v26 = vmov 27  }
 0x661   :  { %v2201_v53 = vadd.f32 %v5476_v31, %v2193_v34  ;;  %v2194_v33 = vadd.f32 %v2192_v30, %v10601_v49  ;;  %v2285_v34 = vpop.permute.xlu1 %2284 }
 0x663   :  { %v2202_v23 = vadd.f32 %v5476_v31, %v2194_v33  ;;  %v2203_v13 = vmax.f32 %v2201_v53, 0.0  ;;  %v2287_v53 = vpop.permute.xlu0 %2286  ;;  %v10604_v33 = vld [vmem:[#allocation28_spill] sm:$0xff] }
 0x665   :  { %v2204_v57 = vmax.f32 %v2202_v23, 0.0  ;;  %v10605_v23 = vmax.f32 %v10604_v33, 0.0 }
 0x667   :  { %v2205_v8 = vpack.c.bf16 %v2204_v57, %v2203_v13  ;;  %v2321_v13 = vpop.permute.xlu0 %2320 }
 0x669   :  { %5613 = vmatmul.mubr.msk.bf16.vlgmr.msra.gmra.mrb[28].mxu0 %vm490_vm5, %v2205_v8 }
 0x66a   :  { %5623 = vmatpush3.bf16.msra.mxu0 %v6209_v39  ;;  %5626 = vmatprep.mubr.msk.bf16.mxu0 %vm6499_vm0, %v10597_v27 }
 0x66b   :  { %5624 = vmatprep.subr.bf16.mxu0 %v10597_v27 }
 0x66e   :  { %5625 = vmatpush3.bf16.msra.mxu0 %v6210_v37 }
 0x66f   :  { %5638 = vmatprep.subr.bf16.mxu0 %v10597_v27 }
 0x73c   :  { %v2261_v44 = vpop.f32.mrb[28].mxu0 }
 0x73d   :  { %v2262_v35 = vadd.f32 %v5477_v45, %v2261_v44  ;;  %v5614_v3 = vpop.f32.mrb[29].mxu0 }
 0x73e   :  { %v2264_v43 = vpop.f32.mrb[30].mxu0 }
 0x73f   :  { %v2268_v61 = vadd.f32 %v2262_v35, %v10602_v19  ;;  %v2265_v0 = vadd.f32 %v5477_v45, %v2264_v43  ;;  %v5615_v42 = vpop.f32.mrb[31].mxu0 }
 0x741   :  { %v5481_v1 = vmul.f32 -1.442695, %v2268_v61  ;;  %v2269_v58 = vadd.f32 %v2265_v0, %v10603_v20 }
 0x743   :  { %6168 = vpow2.f32 %v5481_v1  ;;  %v5482_v17 = vmul.f32 -1.442695, %v2269_v58 }
 0x745   :  { %6170 = vpow2.f32 %v5482_v17 }
 0x74d   :  { %v6169_v59 = vpop.eup %6168 }
 0x74e   :  { %v2276_v5 = vadd.f32 1.0, %v6169_v59 }
 0x74f   :  { %v6171_v31 = vpop.eup %6170 }
 0x750   :  { %6172 = vrcp.f32 %v2276_v5  ;;  %v2277_v36 = vadd.f32 1.0, %v6171_v31  ;;  %v6211_v31 = vld [vmem:[%s10376_s26 + $0x8] sm:$0xff]  }
 0x752   :  { %6174 = vrcp.f32 %v2277_v36  ;;  %v6212_v36 = vld [vmem:[#allocation18] sm:$0xff]  }
 0x75a   :  { %v6173_v22 = vpop.eup %6172 }
 0x75b   :  { %v2290_v30 = vmul.f32 %v6173_v22, %v2285_v34  ;;  %v2304_v43 = vsub.f32 1.0, %v6173_v22 }
 0x75c   :  { %v6175_v14 = vpop.eup %6174 }
 0x75d   :  { %2294 = vrot.lane.b32.xlu1 %v2290_v30, %s6491_s0  ;;  %v2291_v49 = vmul.f32 %v6175_v14, %v2287_v53  ;;  %v2305_v42 = vsub.f32 1.0, %v6175_v14  ;;  %v2325_v58 = vmul.f32 %v6175_v14, %v2321_v13  ;;  %v10611_v13 = vmov 2  }
 0x75f   :  { %2296 = vrot.lane.b32.xlu0 %v2291_v49, %s6491_s0 }
 0x761   :  { %2318 = vrot.lane.b32.xlu1 %v10605_v23, %s6533_s13 }
 0x7cf   :  { %v2295_v57 = vpop.permute.xlu1 %2294 }
 0x7d0   :  { %v2300_v8 = vadd.f32 %v2295_v57, %v2262_v35 }
 0x7d1   :  { %v2297_v39 = vpop.permute.xlu0 %2296 }
 0x7d2   :  { %6176 = vtanh.f32 %v2300_v8  ;;  %v2301_v37 = vadd.f32 %v2297_v39, %v2265_v0  ;;  %v10613_v39 = vmov 4  }
 0x7d3   :  { %v2319_v3 = vpop.permute.xlu1 %2318 }
 0x7d4   :  { %6178 = vtanh.f32 %v2301_v37  ;;  %v2324_v20 = vmul.f32 %v6173_v22, %v2319_v3  ;;  %v6213_v22 = vld [vmem:[#allocation18 + $0x8] sm:$0xff]   ;;  %v10614_v37 = vmov 3   ;;  %v10616_v3 = vmov 12  }
 0x7dc   :  { %v6177_v45 = vpop.eup %6176 }
 0x7dd   :  { %2308 = vrot.lane.b32.xlu1 %v6177_v45, %s6532_s3 }
 0x7de   :  { %v6179_v44 = vpop.eup %6178 }
 0x7df   :  { %2310 = vrot.lane.b32.xlu0 %v6179_v44, %s6532_s3 }
 0x84f   :  { %v2309_v19 = vpop.permute.xlu1 %2308 }
 0x850   :  { %v2314_v61 = vmul.f32 %v2309_v19, %v2304_v43  ;;  %v10617_v43 = vmov 5   ;;  %v10618_v19 = vmov 20  }
 0x851   :  { %v2311_v1 = vpop.permute.xlu0 %2310 }
 0x852   :  { %v2315_v17 = vmul.f32 %v2311_v1, %v2305_v42  ;;  %v8087_v35 = vadd.f32 %v2324_v20, %v2314_v61  ;;  %v10619_v61 = vmov 6   ;;  %v10620_v42 = vmov 28  }
 0x853   :  { %v10621_v1 = vmov 7   ;;  %v10622_v20 = vmov 1  }
 0x854   :  { %10606 = vst [vmem:[#allocation71_spill] sm:$0xff] %v8087_v35  ;;  %v8089_v59 = vadd.f32 %v2325_v58, %v2315_v17  ;;  %v10623_v58 = vmov 9   ;;  %v10624_v17 = vmov 10  }
 0x856   :  { %10607 = vst [vmem:[#allocation60_spill] sm:$0xff] %v8089_v59  ;;  %v2328_v0 = vpack.c.bf16 %v8089_v59, %v8087_v35  ;;  %v10634_v59 = vmov 23   ;;  %v10635_v35 = vmov 25  }
 0x858   :  { %2330 = vrot.lane.b32.xlu1 %v2328_v0, %s6532_s3  ;;  %v10625_v0 = vmov 11  }
 0x8ca   :  { %v2331_v5 = vpop.permute.xlu1 %2330 }
 0x8cb   :  { %5616 = vmatprep.subr.bf16.mxu1 %v2331_v5  ;;  %5627 = vmatmul.mubr.msk.bf16.vlgmr.msra.gmra.mrb[32].mxu0 %vm490_vm5, %v2331_v5 }
 0x8cc   :  { %5617 = vmatpush3.bf16.msra.mxu1 %v2331_v5  ;;  %5642 = vmatprep.mubr.msk.bf16.mxu0 %vm6499_vm0, %v10597_v27 }
 0x8cd   :  { %5630 = vmatprep.subr.bf16.mxu1 %v10597_v27 }
 0x8cf   :  { %5619 = vmatmul.mubr.msk.bf16.vlgmr.msra.gmra.mrb[28].mxu1 %vm773_vm6, %v6211_v31  ;;  %v10627_v31 = vmov 14  }
 0x8d0   :  { %5631 = vmatpush3.bf16.msra.mxu1 %v6212_v36  ;;  %5634 = vmatprep.mubr.msk.bf16.mxu1 %vm6499_vm0, %v10597_v27  ;;  %v10628_v36 = vmov 15  }
 0x8d1   :  { %5632 = vmatprep.subr.bf16.mxu1 %v10597_v27 }
 0x8d4   :  { %5633 = vmatpush3.bf16.msra.mxu1 %v6213_v22  ;;  %v10629_v22 = vmov 17  }
 0x8d5   :  { %5646 = vmatprep.subr.bf16.mxu1 %v10597_v27 }
 0x8d7   :  { %5635 = vmatmul.mubr.msk.bf16.vlgmr.msra.gmra.mrb[32].mxu1 %vm490_vm5, %v2331_v5  ;;  %v10626_v5 = vmov 13  }
 0x8d8   :  { %5647 = vmatpush3.bf16.msra.mxu1 %v8051_v2  ;;  %5650 = vmatprep.mubr.msk.bf16.mxu1 %vm6499_vm0, %v10597_v27 }
 0x8d9   :  { %5648 = vmatprep.subr.bf16.mxu1 %v10597_v27 }
 0x8dc   :  { %5649 = vmatpush3.bf16.msra.mxu1 %v8058_v10  ;;  %v10610_v10 = vmov 30  }
 0x8dd   :  { %5660 = vmatprep.subr.bf16.mxu1 %v10597_v27  ;;  %v10640_v27 = vmov 8  }
 0x99e   :  { %v8113_v34 = vpop.f32.mrb[32].mxu0 }
 0x99f   :  { %10608 = vst [vmem:[#allocation59_spill] sm:$0xff] %v8113_v34  ;;  %v5628_v30 = vpop.f32.mrb[33].mxu0  ;;  %v10638_v34 = vmov 29  }
 0x9a0   :  { %v8115_v14 = vpop.f32.mrb[34].mxu0  ;;  %v10630_v30 = vmov 18  }
 0x9a1   :  { %10609 = vst [vmem:[#allocation53_spill] sm:$0xff] %v8115_v14  ;;  %v5629_v53 = vpop.f32.mrb[35].mxu0  ;;  %v10636_v14 = vmov 26  }
 0x9a2   :  { %v8117_v49 = vpop.f32.mrb[28].mxu1  ;;  %v10631_v53 = vmov 19  }
 0x9a3   :  { %3508 = vperm.xlu0 %5915, %v8117_v49   ;;  %2500 = vperm.xlu1 %5894, %v8117_v49   ;;  %v8121_v2 = vpop.f32.mrb[29].mxu1 }
 0x9a4   :  { %v8123_v33 = vpop.f32.mrb[30].mxu1 }
 0x9a5   :  { %v8125_v23 = vpop.f32.mrb[31].mxu1 }
 0x9a7   :  { %5917 = vset.pattern.permute.xlu0 %v10610_v10  ;;  %5895 = vset.pattern.permute.xlu1 %v10611_v13 }
 0x9a8   :  { %3548 = vperm.xlu0 %5917, %v8117_v49   ;;  %2540 = vperm.xlu1 %5895, %v8117_v49  }
 0x9aa   :  { %v8131_v57 = vpop.f32.mrb[32].mxu1 }
 0x9ab   :  { %10612 = vst [vmem:[#allocation84_spill] sm:$0xff] %v8131_v57  ;;  %v5636_v8 = vpop.f32.mrb[33].mxu1 }
 0x9ac   :  { %5919 = vset.pattern.permute.xlu0 %v10613_v39  ;;  %5896 = vset.pattern.permute.xlu1 %v10614_v37  ;;  %v8135_v45 = vpop.f32.mrb[34].mxu1  ;;  %v10632_v8 = vmov 21  }
 0x9ad   :  { %10615 = vst [vmem:[#allocation61_spill] sm:$0xff] %v8135_v45  ;;  %2620 = vperm.xlu0 %5919, %v8117_v49   ;;  %2580 = vperm.xlu1 %5896, %v8117_v49   ;;  %v5637_v44 = vpop.f32.mrb[35].mxu1  ;;  %v10641_v45 = vmov 31  }
 0x9ae   :  { %v10633_v44 = vmov 22  }
 0x9b1   :  { %5921 = vset.pattern.permute.xlu0 %v10616_v3  ;;  %5897 = vset.pattern.permute.xlu1 %v10617_v43 }
 0x9b2   :  { %2908 = vperm.xlu0 %5921, %v8117_v49   ;;  %2644 = vperm.xlu1 %5897, %v8117_v49  }
 0x9b6   :  { %5923 = vset.pattern.permute.xlu0 %v10618_v19  ;;  %5898 = vset.pattern.permute.xlu1 %v10619_v61 }
 0x9b7   :  { %3196 = vperm.xlu0 %5923, %v8117_v49   ;;  %2684 = vperm.xlu1 %5898, %v8117_v49  }
 0x9bb   :  { %5925 = vset.pattern.permute.xlu0 %v10620_v42  ;;  %5899 = vset.pattern.permute.xlu1 %v10621_v1 }
 0x9bc   :  { %3484 = vperm.xlu0 %5925, %v8117_v49   ;;  %2724 = vperm.xlu1 %5899, %v8117_v49  }
 0x9c0   :  { %5926 = vset.pattern.permute.xlu0 %v10622_v20  ;;  %5900 = vset.pattern.permute.xlu1 %v10623_v58 }
 0x9c1   :  { %2788 = vperm.xlu1 %5900, %v8117_v49   ;;  %2492 = vperm.xlu0 %5926, %v8121_v2  }
 0x9c5   :  { %5901 = vset.pattern.permute.xlu1 %v10624_v17  ;;  %5928 = vset.pattern.permute.xlu0 %v10614_v37 }
 0x9c6   :  { %2828 = vperm.xlu1 %5901, %v8117_v49   ;;  %2572 = vperm.xlu0 %5928, %v8121_v2  }
 0x9ca   :  { %5902 = vset.pattern.permute.xlu1 %v10625_v0  ;;  %5929 = vset.pattern.permute.xlu0 %v10617_v43 }
 0x9cb   :  { %2868 = vperm.xlu1 %5902, %v8117_v49   ;;  %2636 = vperm.xlu0 %5929, %v8121_v2  }
 0x9cf   :  { %5903 = vset.pattern.permute.xlu1 %v10626_v5  ;;  %5931 = vset.pattern.permute.xlu0 %v10621_v1 }
 0x9d0   :  { %2932 = vperm.xlu1 %5903, %v8117_v49   ;;  %2716 = vperm.xlu0 %5931, %v8121_v2  }
 0x9d4   :  { %5904 = vset.pattern.permute.xlu1 %v10627_v31  ;;  %5932 = vset.pattern.permute.xlu0 %v10623_v58 }
 0x9d5   :  { %2972 = vperm.xlu1 %5904, %v8117_v49   ;;  %2780 = vperm.xlu0 %5932, %v8121_v2  }
 0x9d9   :  { %5905 = vset.pattern.permute.xlu1 %v10628_v36  ;;  %5934 = vset.pattern.permute.xlu0 %v10625_v0 }
 0x9da   :  { %3012 = vperm.xlu1 %5905, %v8117_v49   ;;  %2860 = vperm.xlu0 %5934, %v8121_v2  }
 0x9de   :  { %5906 = vset.pattern.permute.xlu1 %v10629_v22  ;;  %5935 = vset.pattern.permute.xlu0 %v10626_v5 }
 0x9df   :  { %3076 = vperm.xlu1 %5906, %v8117_v49   ;;  %2924 = vperm.xlu0 %5935, %v8121_v2  }
 0x9e3   :  { %5907 = vset.pattern.permute.xlu1 %v10630_v30  ;;  %5937 = vset.pattern.permute.xlu0 %v10628_v36 }
 0x9e4   :  { %3116 = vperm.xlu1 %5907, %v8117_v49   ;;  %3004 = vperm.xlu0 %5937, %v8121_v2  }
 0x9e8   :  { %5908 = vset.pattern.permute.xlu1 %v10631_v53  ;;  %5938 = vset.pattern.permute.xlu0 %v10629_v22 }
 0x9e9   :  { %3156 = vperm.xlu1 %5908, %v8117_v49   ;;  %3068 = vperm.xlu0 %5938, %v8121_v2  }
 0x9ed   :  { %5909 = vset.pattern.permute.xlu1 %v10632_v8  ;;  %5940 = vset.pattern.permute.xlu0 %v10631_v53 }
 0x9ee   :  { %3220 = vperm.xlu1 %5909, %v8117_v49   ;;  %3148 = vperm.xlu0 %5940, %v8121_v2  }
 0x9f2   :  { %5910 = vset.pattern.permute.xlu1 %v10633_v44  ;;  %5941 = vset.pattern.permute.xlu0 %v10632_v8 }
 0x9f3   :  { %3260 = vperm.xlu1 %5910, %v8117_v49   ;;  %3212 = vperm.xlu0 %5941, %v8121_v2  }
 0x9f7   :  { %5911 = vset.pattern.permute.xlu1 %v10634_v59  ;;  %5943 = vset.pattern.permute.xlu0 %v10634_v59 }
 0x9f8   :  { %3300 = vperm.xlu1 %5911, %v8117_v49   ;;  %3292 = vperm.xlu0 %5943, %v8121_v2  }
 0x9fc   :  { %5912 = vset.pattern.permute.xlu1 %v10635_v35  ;;  %5944 = vset.pattern.permute.xlu0 %v10635_v35 }
 0x9fd   :  { %3364 = vperm.xlu1 %5912, %v8117_v49   ;;  %3356 = vperm.xlu0 %5944, %v8121_v2  }
 0xa01   :  { %5913 = vset.pattern.permute.xlu1 %v10636_v14  ;;  %5946 = vset.pattern.permute.xlu0 %v10637_v26 }
 0xa02   :  { %3404 = vperm.xlu1 %5913, %v8117_v49   ;;  %3436 = vperm.xlu0 %5946, %v8121_v2  }
 0xa06   :  { %5914 = vset.pattern.permute.xlu1 %v10637_v26  ;;  %5947 = vset.pattern.permute.xlu0 %v10638_v34 }
 0xa07   :  { %3444 = vperm.xlu1 %5914, %v8117_v49   ;;  %3500 = vperm.xlu0 %5947, %v8121_v2  }
 0xa0b   :  { %5916 = vset.pattern.permute.xlu1 %v10639_v15  ;;  %5952 = vset.pattern.permute.xlu0 %v10640_v27 }
 0xa0c   :  { %2479 = vperm.xlu1 %5916, %v8117_v49   ;;  %2756 = vperm.xlu0 %5952, %v8121_v2  }
 0xa10   :  { %5918 = vset.pattern.permute.xlu1 %v10641_v45  ;;  %5954 = vset.pattern.permute.xlu0 %v10642_v9 }
 0xa11   :  { %3588 = vperm.xlu1 %5918, %v8117_v49   ;;  %3044 = vperm.xlu0 %5954, %v8121_v2  }
 0xa15   :  { %5920 = vset.pattern.permute.xlu1 %v10640_v27  ;;  %5956 = vset.pattern.permute.xlu0 %v10643_v24 }
 0xa16   :  { %2764 = vperm.xlu1 %5920, %v8117_v49   ;;  %3332 = vperm.xlu0 %5956, %v8121_v2  }
 0xa1a   :  { %5922 = vset.pattern.permute.xlu1 %v10642_v9  ;;  %5959 = vset.pattern.permute.xlu0 %v10611_v13 }
 0xa1b   :  { %3052 = vperm.xlu1 %5922, %v8117_v49   ;;  %2544 = vperm.xlu0 %5959, %v8123_v33  }
 0xa1f   :  { %5924 = vset.pattern.permute.xlu1 %v10643_v24  ;;  %5962 = vset.pattern.permute.xlu0 %v10619_v61 }
 0xa20   :  { %3340 = vperm.xlu1 %5924, %v8117_v49   ;;  %2688 = vperm.xlu0 %5962, %v8123_v33  }
 0xa22   :  { %v8231_v6 = vpop.permute.xlu1 %2500  ;;  %v8277_v21 = vpop.permute.xlu0 %3508 }
 0xa23   :  { %10645 = vst [vmem:[#allocation89_spill] sm:$0xff] %v8277_v21 }
 0xa24   :  { %5927 = vset.pattern.permute.xlu1 %v10611_v13  ;;  %5965 = vset.pattern.permute.xlu0 %v10624_v17 }
 0xa25   :  { %2532 = vperm.xlu1 %5927, %v8121_v2   ;;  %2832 = vperm.xlu0 %5965, %v8123_v33  }
 0xa27   :  { %v8237_v4 = vpop.permute.xlu1 %2540  ;;  %v8287_v41 = vpop.permute.xlu0 %3548 }
 0xa28   :  { %10647 = vst [vmem:[#allocation87_spill] sm:$0xff] %v8287_v41 }
 0xa29   :  { %5930 = vset.pattern.permute.xlu1 %v10619_v61  ;;  %5968 = vset.pattern.permute.xlu0 %v10627_v31 }
 0xa2a   :  { %2676 = vperm.xlu1 %5930, %v8121_v2   ;;  %2976 = vperm.xlu0 %5968, %v8123_v33  }
 0xa2c   :  { %v8243_v49 = vpop.permute.xlu1 %2580  ;;  %v8295_v21 = vpop.permute.xlu0 %2620 }
 0xa2d   :  { %10649 = vst [vmem:[#allocation63_spill] sm:$0xff] %v8295_v21 }
 0xa2e   :  { %5933 = vset.pattern.permute.xlu1 %v10624_v17  ;;  %5971 = vset.pattern.permute.xlu0 %v10630_v30 }
 0xa2f   :  { %2820 = vperm.xlu1 %5933, %v8121_v2   ;;  %3120 = vperm.xlu0 %5971, %v8123_v33  }
 0xa31   :  { %v8249_v47 = vpop.permute.xlu1 %2644  ;;  %v8305_v56 = vpop.permute.xlu0 %2908 }
 0xa32   :  { %10651 = vst [vmem:[#allocation94_spill] sm:$0xff] %v8305_v56 }
 0xa33   :  { %5936 = vset.pattern.permute.xlu1 %v10627_v31  ;;  %5974 = vset.pattern.permute.xlu0 %v10633_v44 }
 0xa34   :  { %2964 = vperm.xlu1 %5936, %v8121_v2   ;;  %3264 = vperm.xlu0 %5974, %v8123_v33  }
 0xa36   :  { %v8255_v48 = vpop.permute.xlu1 %2684  ;;  %v8313_v21 = vpop.permute.xlu0 %3196 }
 0xa37   :  { %10652 = vst [vmem:[#allocation57_spill] sm:$0xff] %v8313_v21 }
 0xa38   :  { %5939 = vset.pattern.permute.xlu1 %v10630_v30  ;;  %5977 = vset.pattern.permute.xlu0 %v10636_v14 }
 0xa39   :  { %3108 = vperm.xlu1 %5939, %v8121_v2   ;;  %3408 = vperm.xlu0 %5977, %v8123_v33  }
 0xa3b   :  { %v8261_v29 = vpop.permute.xlu1 %2724 }
 0xa3d   :  { %5942 = vset.pattern.permute.xlu1 %v10633_v44  ;;  %5984 = vset.pattern.permute.xlu0 %v10640_v27 }
 0xa3e   :  { %3252 = vperm.xlu1 %5942, %v8121_v2   ;;  %2768 = vperm.xlu0 %5984, %v8123_v33  }
 0xa40   :  { %v8267_v57 = vpop.permute.xlu1 %2788 }
 0xa42   :  { %5945 = vset.pattern.permute.xlu1 %v10636_v14  ;;  %5986 = vset.pattern.permute.xlu0 %v10642_v9 }
 0xa43   :  { %3396 = vperm.xlu1 %5945, %v8121_v2   ;;  %3056 = vperm.xlu0 %5986, %v8123_v33  }
 0xa45   :  { %v8273_v16 = vpop.permute.xlu1 %2828 }
 0xa46   :  { %10644 = vst [vmem:[#allocation73_spill] sm:$0xff] %v8273_v16 }
 0xa47   :  { %5948 = vset.pattern.permute.xlu1 %v10639_v15  ;;  %5988 = vset.pattern.permute.xlu0 %v10643_v24 }
 0xa48   :  { %2469 = vperm.xlu1 %5948, %v8121_v2   ;;  %3344 = vperm.xlu0 %5988, %v8123_v33  }
 0xa4a   :  { %v8281_v25 = vpop.permute.xlu1 %2868 }
 0xa4b   :  { %10646 = vst [vmem:[#allocation70_spill] sm:$0xff] %v8281_v25 }
 0xa4c   :  { %5949 = vset.pattern.permute.xlu1 %v10610_v10  ;;  %5991 = vset.pattern.permute.xlu0 %v10611_v13 }
 0xa4d   :  { %3540 = vperm.xlu1 %5949, %v8121_v2   ;;  %2536 = vperm.xlu0 %5991, %v8125_v23  }
 0xa4f   :  { %v8289_v54 = vpop.permute.xlu1 %2932 }
 0xa50   :  { %10648 = vst [vmem:[#allocation68_spill] sm:$0xff] %v8289_v54 }
 0xa51   :  { %5950 = vset.pattern.permute.xlu1 %v10641_v45  ;;  %5994 = vset.pattern.permute.xlu0 %v10619_v61 }
 0xa52   :  { %3580 = vperm.xlu1 %5950, %v8121_v2   ;;  %2680 = vperm.xlu0 %5994, %v8125_v23  }
 0xa54   :  { %v8297_v55 = vpop.permute.xlu1 %2972 }
 0xa55   :  { %10650 = vst [vmem:[#allocation55_spill] sm:$0xff] %v8297_v55  ;;  %v2509_v55 = vmul.f32 %v8231_v6, %v7269_v12  ;;  %v2797_v6 = vmul.f32 %v8267_v57, %v7295_v18 }
 0xa56   :  { %5951 = vset.pattern.permute.xlu1 %v10613_v39  ;;  %5997 = vset.pattern.permute.xlu0 %v10624_v17 }
 0xa57   :  { %2612 = vperm.xlu1 %5951, %v8121_v2   ;;  %2824 = vperm.xlu0 %5997, %v8125_v23  }
 0xa59   :  { %v8303_v41 = vpop.permute.xlu1 %3012 }
 0xa5b   :  { %5953 = vset.pattern.permute.xlu1 %v10616_v3  ;;  %6000 = vset.pattern.permute.xlu0 %v10627_v31  ;;  %v8323_v31 = vpop.permute.xlu0 %3484 }
 0xa5c   :  { %2900 = vperm.xlu1 %5953, %v8121_v2   ;;  %2968 = vperm.xlu0 %6000, %v8125_v23   ;;  %10654 = vst [vmem:[#allocation39_spill] sm:$0xff] %v8323_v31 }
 0xa5e   :  { %v8311_v61 = vpop.permute.xlu1 %3076 }
 0xa5f   :  { %v3085_v57 = vmul.f32 %v8311_v61, %v10550_v38 }
 0xa60   :  { %5955 = vset.pattern.permute.xlu1 %v10618_v19  ;;  %6003 = vset.pattern.permute.xlu0 %v10630_v30  ;;  %v8333_v30 = vpop.permute.xlu0 %2492 }
 0xa61   :  { %3188 = vperm.xlu1 %5955, %v8121_v2   ;;  %3112 = vperm.xlu0 %6003, %v8125_v23  }
 0xa63   :  { %v8319_v17 = vpop.permute.xlu1 %3116 }
 0xa64   :  { %10653 = vst [vmem:[#allocation62_spill] sm:$0xff] %v8319_v17 }
 0xa65   :  { %5957 = vset.pattern.permute.xlu1 %v10620_v42  ;;  %6006 = vset.pattern.permute.xlu0 %v10633_v44 }
 0xa66   :  { %3476 = vperm.xlu1 %5957, %v8121_v2   ;;  %3256 = vperm.xlu0 %6006, %v8125_v23   ;;  %v8341_v2 = vpop.permute.xlu0 %2572 }
 0xa68   :  { %v8327_v21 = vpop.permute.xlu1 %3156 }
 0xa69   :  { %10655 = vst [vmem:[#allocation95_spill] sm:$0xff] %v8327_v21 }
 0xa6a   :  { %5958 = vset.pattern.permute.xlu1 %v10622_v20  ;;  %6009 = vset.pattern.permute.xlu0 %v10636_v14  ;;  %v8349_v31 = vpop.permute.xlu0 %2636 }
 0xa6b   :  { %2504 = vperm.xlu1 %5958, %v8123_v33   ;;  %3400 = vperm.xlu0 %6009, %v8125_v23   ;;  %10658 = vst [vmem:[#allocation86_spill] sm:$0xff] %v8349_v31 }
 0xa6d   :  { %v8335_v56 = vpop.permute.xlu1 %3220 }
 0xa6e   :  { %10656 = vst [vmem:[#allocation54_spill] sm:$0xff] %v8335_v56  ;;  %v8355_v56 = vpop.permute.xlu0 %2716 }
 0xa6f   :  { %5960 = vset.pattern.permute.xlu1 %v10614_v37  ;;  %6012 = vset.pattern.permute.xlu0 %v10639_v15  ;;  %10659 = vst [vmem:[#allocation52_spill] sm:$0xff] %v8355_v56 }
 0xa70   :  { %2584 = vperm.xlu1 %5960, %v8123_v33   ;;  %2474 = vperm.xlu0 %6012, %v8125_v23  }
 0xa72   :  { %v8343_v44 = vpop.permute.xlu1 %3260  ;;  %v8363_v21 = vpop.permute.xlu0 %2780 }
 0xa73   :  { %10657 = vst [vmem:[#allocation96_spill] sm:$0xff] %v8343_v44 }
 0xa74   :  { %5961 = vset.pattern.permute.xlu1 %v10617_v43  ;;  %6014 = vset.pattern.permute.xlu0 %v10641_v45 }
 0xa75   :  { %2648 = vperm.xlu1 %5961, %v8123_v33   ;;  %3584 = vperm.xlu0 %6014, %v8125_v23  }
 0xa76   :  { %v8373_v17 = vpop.permute.xlu0 %2860 }
 0xa77   :  { %v3301_v14 = vpop.permute.xlu1 %3300 }
 0xa79   :  { %5963 = vset.pattern.permute.xlu1 %v10621_v1  ;;  %6015 = vset.pattern.permute.xlu0 %v10613_v39 }
 0xa7a   :  { %2728 = vperm.xlu1 %5963, %v8123_v33   ;;  %2616 = vperm.xlu0 %6015, %v8125_v23   ;;  %v8385_v25 = vpop.permute.xlu0 %2924 }
 0xa7c   :  { %v3365_v44 = vpop.permute.xlu1 %3364 }
 0xa7d   :  { %v3373_v61 = vmul.f32 %v3365_v44, %v10579_v52 }
 0xa7e   :  { %5964 = vset.pattern.permute.xlu1 %v10623_v58  ;;  %6017 = vset.pattern.permute.xlu0 %v10616_v3 }
 0xa7f   :  { %2792 = vperm.xlu1 %5964, %v8123_v33   ;;  %2904 = vperm.xlu0 %6017, %v8125_v23  }
 0xa81   :  { %v3405_v31 = vpop.permute.xlu1 %3404 }
 0xa83   :  { %5966 = vset.pattern.permute.xlu1 %v10625_v0  ;;  %6019 = vset.pattern.permute.xlu0 %v10618_v19 }
 0xa84   :  { %2872 = vperm.xlu1 %5966, %v8123_v33   ;;  %3192 = vperm.xlu0 %6019, %v8125_v23  }
 0xa86   :  { %v8367_v56 = vpop.permute.xlu1 %3444 }
 0xa87   :  { %10660 = vst [vmem:[#allocation65_spill] sm:$0xff] %v8367_v56  ;;  %v2733_v56 = vmul.f32 %v8261_v29, %v7281_v28  ;;  %v3021_v29 = vmul.f32 %v8303_v41, %v10542_v62  ;;  %v3309_v41 = vmul.f32 %v3301_v14, %v10563_v63 }
 0xa88   :  { %5967 = vset.pattern.permute.xlu1 %v10626_v5  ;;  %6021 = vset.pattern.permute.xlu0 %v10620_v42 }
 0xa89   :  { %2936 = vperm.xlu1 %5967, %v8123_v33   ;;  %3480 = vperm.xlu0 %6021, %v8125_v23  }
 0xa8b   :  { %v8377_v54 = vpop.permute.xlu1 %2479 }
 0xa8c   :  { %10661 = vst [vmem:[#allocation29_spill] sm:$0xff] %v8377_v54  ;;  %v8397_v54 = vpop.permute.xlu0 %3004 }
 0xa8d   :  { %5969 = vset.pattern.permute.xlu1 %v10628_v36  ;;  %2519 = vrot.lane.b32.xlu0 %v2509_v55, %s6532_s3 }
 0xa8e   :  { %3016 = vperm.xlu1 %5969, %v8123_v33   ;;  %6022 = vset.pattern.permute.xlu0 %v10622_v20 }
 0xa90   :  { %v8387_v16 = vpop.permute.xlu1 %3588 }
 0xa91   :  { %10662 = vst [vmem:[#allocation91_spill] sm:$0xff] %v8387_v16  ;;  %2743 = vrot.lane.b32.xlu0 %v2733_v56, %s6533_s13  ;;  %v3069_v16 = vpop.permute.xlu0 %3068 }
 0xa92   :  { %5970 = vset.pattern.permute.xlu1 %v10629_v22 }
 0xa93   :  { %3080 = vperm.xlu1 %5970, %v8123_v33  }
 0xa95   :  { %v8394_v55 = vpop.permute.xlu1 %2764  ;;  %2807 = vrot.lane.b32.xlu0 %v2797_v6, %s6532_s3 }
 0xa96   :  { %10663 = vst [vmem:[#allocation72_spill] sm:$0xff] %v8394_v55 }
 0xa97   :  { %5972 = vset.pattern.permute.xlu1 %v10631_v53 }
 0xa98   :  { %3160 = vperm.xlu1 %5972, %v8123_v33  }
 0xa99   :  { %3031 = vrot.lane.b32.xlu0 %v3021_v29, %s6533_s13  ;;  %v3149_v29 = vpop.permute.xlu0 %3148 }
 0xa9a   :  { %v8404_v56 = vpop.permute.xlu1 %3052 }
 0xa9b   :  { %10664 = vst [vmem:[#allocation75_spill] sm:$0xff] %v8404_v56 }
 0xa9c   :  { %5973 = vset.pattern.permute.xlu1 %v10632_v8 }
 0xa9d   :  { %3224 = vperm.xlu1 %5973, %v8123_v33   ;;  %3095 = vrot.lane.b32.xlu0 %v3085_v57, %s6532_s3  ;;  %v3413_v57 = vmul.f32 %v3405_v31, %v10579_v52  ;;  %v8422_v14 = vpop.permute.xlu0 %3212 }
 0xa9e   :  { %10666 = vst [vmem:[#allocation92_spill] sm:$0xff] %v8422_v14 }
 0xa9f   :  { %v8412_v6 = vpop.permute.xlu1 %3340 }
 0xaa0   :  { %10665 = vst [vmem:[#allocation44_spill] sm:$0xff] %v8412_v6 }
 0xaa1   :  { %5975 = vset.pattern.permute.xlu1 %v10634_v59  ;;  %3319 = vrot.lane.b32.xlu0 %v3309_v41, %s6533_s13  ;;  %v10667_v41 = vld [vmem:[#allocation82_spill] sm:$0xff]  ;;  %v8432_v44 = vpop.permute.xlu0 %3292 }
 0xaa2   :  { %3304 = vperm.xlu1 %5975, %v8123_v33   ;;  %v2507_v55 = vmul.f32 %v8333_v30, %v10667_v41  ;;  %10668 = vst [vmem:[#allocation90_spill] sm:$0xff] %v8432_v44  ;;  %v2587_v30 = vmul.f32 %v8341_v2, %v10667_v41 }
 0xaa4   :  { %v2533_v56 = vpop.permute.xlu1 %2532 }
 0xaa5   :  { %3383 = vrot.lane.b32.xlu0 %v3373_v61, %s6532_s3  ;;  %v2547_v61 = vmul.f32 %v2533_v56, %v10667_v41  ;;  %v3357_v14 = vpop.permute.xlu0 %3356 }
 0xaa6   :  { %5976 = vset.pattern.permute.xlu1 %v10635_v35 }
 0xaa7   :  { %3368 = vperm.xlu1 %5976, %v8123_v33  }
 0xaa9   :  { %v8424_v6 = vpop.permute.xlu1 %2676  ;;  %3423 = vrot.lane.b32.xlu0 %v3413_v57, %s6491_s0  ;;  %v3437_v44 = vpop.permute.xlu0 %3436 }
 0xaab   :  { %5978 = vset.pattern.permute.xlu1 %v10637_v26 }
 0xaac   :  { %3448 = vperm.xlu1 %5978, %v8123_v33  }
 0xaad   :  { %2515 = vrot.lane.b32.xlu0 %v2507_v55, %s6532_s3  ;;  %v2795_v55 = vmul.f32 %v8363_v21, %v7373_v11  ;;  %v8457_v21 = vpop.permute.xlu0 %3500 }
 0xaae   :  { %v2821_v31 = vpop.permute.xlu1 %2820 }
 0xaaf   :  { %v2835_v2 = vmul.f32 %v2821_v31, %v7373_v11  ;;  %v3083_v31 = vmul.f32 %v3069_v16, %v10546_v40  ;;  %v3163_v16 = vmul.f32 %v3149_v29, %v10546_v40 }
 0xab0   :  { %5979 = vset.pattern.permute.xlu1 %v10638_v34 }
 0xab1   :  { %3512 = vperm.xlu1 %5979, %v8123_v33   ;;  %2555 = vrot.lane.b32.xlu0 %v2547_v61, %s6491_s0 }
 0xab3   :  { %v8440_v57 = vpop.permute.xlu1 %2964 }
 0xab5   :  { %5980 = vset.pattern.permute.xlu1 %v10639_v15  ;;  %2595 = vrot.lane.b32.xlu0 %v2587_v30, %s6533_s13  ;;  %v2875_v30 = vmul.f32 %v8373_v17, %v7373_v11 }
 0xab6   :  { %2484 = vperm.xlu1 %5980, %v8123_v33  }
 0xab8   :  { %v3109_v56 = vpop.permute.xlu1 %3108 }
 0xab9   :  { %2803 = vrot.lane.b32.xlu0 %v2795_v55, %s6532_s3  ;;  %v3123_v17 = vmul.f32 %v3109_v56, %v10546_v40  ;;  %v3371_v56 = vmul.f32 %v3357_v14, %v10571_v32  ;;  %v3451_v14 = vmul.f32 %v3437_v44, %v10571_v32 }
 0xaba   :  { %5981 = vset.pattern.permute.xlu1 %v10610_v10 }
 0xabb   :  { %3552 = vperm.xlu1 %5981, %v8123_v33  }
 0xabd   :  { %v8451_v61 = vpop.permute.xlu1 %3252  ;;  %2843 = vrot.lane.b32.xlu0 %v2835_v2, %s6491_s0  ;;  %v8465_v2 = vpop.permute.xlu0 %2756 }
 0xabf   :  { %5982 = vset.pattern.permute.xlu1 %v10641_v45 }
 0xac0   :  { %3592 = vperm.xlu1 %5982, %v8123_v33  }
 0xac1   :  { %2883 = vrot.lane.b32.xlu0 %v2875_v30, %s6533_s13  ;;  %v8474_v30 = vpop.permute.xlu0 %3044 }
 0xac2   :  { %v3397_v55 = vpop.permute.xlu1 %3396  ;;  %10669 = vst [vmem:[#allocation93_spill] sm:$0xff] %v8474_v30 }
 0xac3   :  { %v3411_v29 = vmul.f32 %v3397_v55, %v10571_v32 }
 0xac4   :  { %5983 = vset.pattern.permute.xlu1 %v10613_v39 }
 0xac5   :  { %2624 = vperm.xlu1 %5983, %v8123_v33   ;;  %3091 = vrot.lane.b32.xlu0 %v3083_v31, %s6532_s3 }
 0xac7   :  { %v8468_v45 = vpop.permute.xlu1 %2469 }
 0xac9   :  { %5985 = vset.pattern.permute.xlu1 %v10616_v3  ;;  %3131 = vrot.lane.b32.xlu0 %v3123_v17, %s6491_s0  ;;  %v8485_v17 = vpop.permute.xlu0 %3332 }
 0xaca   :  { %2912 = vperm.xlu1 %5985, %v8123_v33   ;;  %10670 = vst [vmem:[#allocation88_spill] sm:$0xff] %v8485_v17 }
 0xacc   :  { %v8476_v15 = vpop.permute.xlu1 %3540 }
 0xacd   :  { %3171 = vrot.lane.b32.xlu0 %v3163_v16, %s6533_s13 }
 0xace   :  { %5987 = vset.pattern.permute.xlu1 %v10618_v19  ;;  %v2545_v19 = vpop.permute.xlu0 %2544 }
 0xacf   :  { %3200 = vperm.xlu1 %5987, %v8123_v33  }
 0xad1   :  { %v8482_v31 = vpop.permute.xlu1 %3580  ;;  %3379 = vrot.lane.b32.xlu0 %v3371_v56, %s6532_s3  ;;  %v10671_v56 = vld [vmem:[#allocation36_spill] sm:$0xff] }
 0xad2   :  { %v2550_v3 = vmul.f32 %v2545_v19, %v10671_v56 }
 0xad3   :  { %5989 = vset.pattern.permute.xlu1 %v10620_v42 }
 0xad4   :  { %3488 = vperm.xlu1 %5989, %v8123_v33  }
 0xad5   :  { %3419 = vrot.lane.b32.xlu0 %v3411_v29, %s6491_s0  ;;  %v8515_v29 = vpop.permute.xlu0 %2688 }
 0xad6   :  { %v8491_v16 = vpop.permute.xlu1 %2612 }
 0xad8   :  { %5990 = vset.pattern.permute.xlu1 %v10622_v20 }
 0xad9   :  { %3459 = vrot.lane.b32.xlu0 %v3451_v14, %s6533_s13  ;;  %2496 = vperm.xlu1 %5990, %v8125_v23  }
 0xadb   :  { %v8498_v55 = vpop.permute.xlu1 %2900 }
 0xadd   :  { %2561 = vrot.lane.b32.xlu0 %v2550_v3, %s6491_s0  ;;  %5992 = vset.pattern.permute.xlu1 %v10614_v37 }
 0xade   :  { %2576 = vperm.xlu1 %5992, %v8125_v23  }
 0xae0   :  { %v8503_v33 = vpop.permute.xlu1 %3188 }
 0xae1   :  { %10672 = vst [vmem:[#allocation76_spill] sm:$0xff] %v8503_v33 }
 0xae2   :  { %5993 = vset.pattern.permute.xlu1 %v10617_v43 }
 0xae3   :  { %2640 = vperm.xlu1 %5993, %v8125_v23  }
 0xae5   :  { %v8507_v44 = vpop.permute.xlu1 %3476 }
 0xae6   :  { %10673 = vst [vmem:[#allocation66_spill] sm:$0xff] %v8507_v44 }
 0xae7   :  { %5995 = vset.pattern.permute.xlu1 %v10621_v1  ;;  %v2833_v1 = vpop.permute.xlu0 %2832 }
 0xae8   :  { %2720 = vperm.xlu1 %5995, %v8125_v23  }
 0xaea   :  { %v8511_v19 = vpop.permute.xlu1 %2504 }
 0xaec   :  { %5996 = vset.pattern.permute.xlu1 %v10623_v58  ;;  %v2838_v58 = vmul.f32 %v2833_v1, %v6938_v46 }
 0xaed   :  { %2784 = vperm.xlu1 %5996, %v8125_v23  }
 0xaef   :  { %v2585_v3 = vpop.permute.xlu1 %2584 }
 0xaf0   :  { %v2590_v14 = vmul.f32 %v2585_v3, %v10671_v56 }
 0xaf1   :  { %5998 = vset.pattern.permute.xlu1 %v10625_v0 }
 0xaf2   :  { %2601 = vrot.lane.b32.xlu0 %v2590_v14, %s6533_s13  ;;  %2864 = vperm.xlu1 %5998, %v8125_v23  }
 0xaf4   :  { %v2649_v20 = vpop.permute.xlu1 %2648 }
 0xaf5   :  { %v2654_v42 = vmul.f32 %v2649_v20, %v6941_v50 }
 0xaf6   :  { %5999 = vset.pattern.permute.xlu1 %v10626_v5 }
 0xaf7   :  { %2665 = vrot.lane.b32.xlu0 %v2654_v42, %s6532_s3  ;;  %2928 = vperm.xlu1 %5999, %v8125_v23   ;;  %v8535_v42 = vpop.permute.xlu0 %2976 }
 0xaf9   :  { %v8526_v39 = vpop.permute.xlu1 %2728 }
 0xafb   :  { %2849 = vrot.lane.b32.xlu0 %v2838_v58, %s6491_s0  ;;  %6001 = vset.pattern.permute.xlu1 %v10628_v36  ;;  %v3121_v36 = vpop.permute.xlu0 %3120 }
 0xafc   :  { %3008 = vperm.xlu1 %6001, %v8125_v23  }
 0xafe   :  { %v8531_v3 = vpop.permute.xlu1 %2792 }
 0xb00   :  { %6002 = vset.pattern.permute.xlu1 %v10629_v22  ;;  %v3126_v22 = vmul.f32 %v3121_v36, %v10552_v60 }
 0xb01   :  { %3072 = vperm.xlu1 %6002, %v8125_v23  }
 0xb03   :  { %v2873_v20 = vpop.permute.xlu1 %2872 }
 0xb04   :  { %v2878_v14 = vmul.f32 %v2873_v20, %v6938_v46 }
 0xb05   :  { %6004 = vset.pattern.permute.xlu1 %v10631_v53 }
 0xb06   :  { %2889 = vrot.lane.b32.xlu0 %v2878_v14, %s6533_s13  ;;  %3152 = vperm.xlu1 %6004, %v8125_v23   ;;  %v8553_v14 = vpop.permute.xlu0 %3264 }
 0xb08   :  { %v2937_v1 = vpop.permute.xlu1 %2936 }
 0xb09   :  { %v2942_v58 = vmul.f32 %v2937_v1, %v6944_v51 }
 0xb0a   :  { %6005 = vset.pattern.permute.xlu1 %v10632_v8  ;;  %v8559_v36 = vpop.permute.xlu0 %3408 }
 0xb0b   :  { %2953 = vrot.lane.b32.xlu0 %v2942_v58, %s6532_s3  ;;  %3216 = vperm.xlu1 %6005, %v8125_v23  }
 0xb0d   :  { %v8546_v5 = vpop.permute.xlu1 %3016 }
 0xb0f   :  { %3137 = vrot.lane.b32.xlu0 %v3126_v22, %s6491_s0  ;;  %6007 = vset.pattern.permute.xlu1 %v10634_v59 }
 0xb10   :  { %3296 = vperm.xlu1 %6007, %v8125_v23  }
 0xb12   :  { %v8551_v20 = vpop.permute.xlu1 %3080 }
 0xb14   :  { %6008 = vset.pattern.permute.xlu1 %v10635_v35  ;;  %v8567_v35 = vpop.permute.xlu0 %2768 }
 0xb15   :  { %3360 = vperm.xlu1 %6008, %v8125_v23  }
 0xb17   :  { %v3161_v1 = vpop.permute.xlu1 %3160 }
 0xb18   :  { %v3166_v58 = vmul.f32 %v3161_v1, %v10552_v60 }
 0xb19   :  { %6010 = vset.pattern.permute.xlu1 %v10637_v26 }
 0xb1a   :  { %3177 = vrot.lane.b32.xlu0 %v3166_v58, %s6533_s13  ;;  %3440 = vperm.xlu1 %6010, %v8125_v23   ;;  %v8573_v58 = vpop.permute.xlu0 %3056 }
 0xb1b   :  { %10674 = vst [vmem:[#allocation81_spill] sm:$0xff] %v8573_v58 }
 0xb1c   :  { %v3225_v22 = vpop.permute.xlu1 %3224 }
 0xb1d   :  { %v3230_v59 = vmul.f32 %v3225_v22, %v10568_v7 }
 0xb1e   :  { %6011 = vset.pattern.permute.xlu1 %v10638_v34  ;;  %v10676_v34 = vld [vmem:[#allocation73_spill] sm:$0xff] }
 0xb1f   :  { %3241 = vrot.lane.b32.xlu0 %v3230_v59, %s6532_s3  ;;  %3504 = vperm.xlu1 %6011, %v8125_v23   ;;  %v8581_v59 = vpop.permute.xlu0 %3344 }
 0xb20   :  { %10675 = vst [vmem:[#allocation64_spill] sm:$0xff] %v8581_v59 }
 0xb21   :  { %v8569_v1 = vpop.permute.xlu1 %3304 }
 0xb23   :  { %6013 = vset.pattern.permute.xlu1 %v10610_v10  ;;  %v8587_v53 = vpop.permute.xlu0 %2536 }
 0xb24   :  { %3544 = vperm.xlu1 %6013, %v8125_v23  }
 0xb26   :  { %v8575_v26 = vpop.permute.xlu1 %3368 }
 0xb27   :  { %v2681_v10 = vpop.permute.xlu0 %2680 }
 0xb28   :  { %6016 = vset.pattern.permute.xlu1 %v10640_v27  ;;  %v2549_v27 = vmul.f32 %v8237_v4, %v7269_v12 }
 0xb29   :  { %2760 = vperm.xlu1 %6016, %v8125_v23  }
 0xb2b   :  { %v8579_v22 = vpop.permute.xlu1 %3448 }
 0xb2d   :  { %6018 = vset.pattern.permute.xlu1 %v10642_v9  ;;  %v2589_v9 = vmul.f32 %v8243_v49, %v7269_v12 }
 0xb2e   :  { %3048 = vperm.xlu1 %6018, %v8125_v23  }
 0xb30   :  { %v8585_v8 = vpop.permute.xlu1 %3512 }
 0xb32   :  { %6020 = vset.pattern.permute.xlu1 %v10643_v24  ;;  %v8604_v24 = vpop.permute.xlu0 %2824 }
 0xb33   :  { %3336 = vperm.xlu1 %6020, %v8125_v23   ;;  %v2653_v23 = vmul.f32 %v8249_v47, %v7281_v28  ;;  %v10677_v47 = vld [vmem:[#allocation70_spill] sm:$0xff] }
 0xb34   :  { %v2877_v37 = vmul.f32 %v10677_v47, %v7295_v18  ;;  %v10683_v47 = vld [vmem:[#allocation62_spill] sm:$0xff] }
 0xb35   :  { %v8593_v0 = vpop.permute.xlu1 %2484  ;;  %v3125_v33 = vmul.f32 %v10683_v47, %v10550_v38  ;;  %v10687_v47 = vld [vmem:[#allocation96_spill] sm:$0xff] }
 0xb36   :  { %v3269_v30 = vmul.f32 %v10687_v47, %v10563_v63 }
 0xb37   :  { %2559 = vrot.lane.b32.xlu1 %v2549_v27, %s6491_s0  ;;  %v2693_v27 = vmul.f32 %v8255_v48, %v7281_v28  ;;  %v10679_v48 = vld [vmem:[#allocation68_spill] sm:$0xff] }
 0xb38   :  { %6023 = vset.pattern.permute.xlu1 %v10611_v13  ;;  %v2969_v13 = vpop.permute.xlu0 %2968 }
 0xb3a   :  { %v8599_v43 = vpop.permute.xlu1 %3552 }
 0xb3b   :  { %2599 = vrot.lane.b32.xlu1 %v2589_v9, %s6533_s13  ;;  %v2837_v9 = vmul.f32 %v10676_v34, %v7295_v18  ;;  %v10681_v34 = vld [vmem:[#allocation55_spill] sm:$0xff] }
 0xb3c   :  { %v8621_v59 = vpop.permute.xlu0 %3112 }
 0xb3f   :  { %v8606_v4 = vpop.permute.xlu1 %3592  ;;  %2663 = vrot.lane.b32.xlu1 %v2653_v23, %s6532_s3  ;;  %v2941_v23 = vmul.f32 %v10679_v48, %v10542_v62 }
 0xb40   :  { %v8629_v17 = vpop.permute.xlu0 %3256 }
 0xb43   :  { %2703 = vrot.lane.b32.xlu1 %v2693_v27, %s6491_s0 }
 0xb44   :  { %v8612_v49 = vpop.permute.xlu1 %2624 }
 0xb47   :  { %2847 = vrot.lane.b32.xlu1 %v2837_v9, %s6491_s0  ;;  %v2981_v9 = vmul.f32 %v10681_v34, %v10542_v62  ;;  %v10686_v34 = vld [vmem:[#allocation54_spill] sm:$0xff] }
 0xb49   :  { %v8619_v44 = vpop.permute.xlu1 %2912 }
 0xb4a   :  { %10678 = vst [vmem:[#allocation56_spill] sm:$0xff] %v8619_v44  ;;  %v10688_v44 = vld [vmem:[#allocation34_spill] sm:$0xff] }
 0xb4b   :  { %2887 = vrot.lane.b32.xlu1 %v2877_v37, %s6533_s13  ;;  %v8638_v37 = vpop.permute.xlu0 %3400 }
 0xb4e   :  { %v8626_v27 = vpop.permute.xlu1 %3200 }
 0xb4f   :  { %10680 = vst [vmem:[#allocation49_spill] sm:$0xff] %v8626_v27  ;;  %2951 = vrot.lane.b32.xlu1 %v2941_v23, %s6532_s3  ;;  %v10684_v23 = vld [vmem:[#allocation95_spill] sm:$0xff]  ;;  %v8646_v58 = vpop.permute.xlu0 %2474 }
 0xb50   :  { %v3165_v27 = vmul.f32 %v10684_v23, %v10550_v38  ;;  %10685 = vst [vmem:[#allocation51_spill] sm:$0xff] %v8646_v58  ;;  %v10690_v23 = vld [vmem:[#allocation86_spill] sm:$0xff] }
 0xb53   :  { %v8633_v32 = vpop.permute.xlu1 %3488  ;;  %2991 = vrot.lane.b32.xlu1 %v2981_v9, %s6491_s0 }
 0xb54   :  { %10682 = vst [vmem:[#allocation50_spill] sm:$0xff] %v8633_v32  ;;  %v3229_v32 = vmul.f32 %v10686_v34, %v10563_v63  ;;  %v2692_v34 = vmul.f32 %v2681_v10, %v10688_v44  ;;  %v10694_v10 = vld [vmem:[#allocation65_spill] sm:$0xff] }
 0xb55   :  { %v3453_v63 = vmul.f32 %v10694_v10, %v10579_v52  ;;  %v10700_v52 = vld [vmem:[#allocation92_spill] sm:$0xff] }
 0xb57   :  { %3135 = vrot.lane.b32.xlu1 %v3125_v33, %s6491_s0  ;;  %v8655_v33 = vpop.permute.xlu0 %3584 }
 0xb58   :  { %v8641_v48 = vpop.permute.xlu1 %2496 }
 0xb5b   :  { %3175 = vrot.lane.b32.xlu1 %v3165_v27, %s6533_s13  ;;  %v10689_v27 = vld [vmem:[#allocation30_spill] sm:$0xff]  ;;  %v8664_v58 = vpop.permute.xlu0 %2616 }
 0xb5c   :  { %v2651_v38 = vmul.f32 %v10690_v23, %v10689_v27  ;;  %10691 = vst [vmem:[#allocation37_spill] sm:$0xff] %v8664_v58  ;;  %v2691_v47 = vmul.f32 %v8424_v6, %v10689_v27  ;;  %v10695_v6 = vld [vmem:[#allocation31_spill] sm:$0xff] }
 0xb5d   :  { %v8650_v9 = vpop.permute.xlu1 %2576 }
 0xb5f   :  { %3239 = vrot.lane.b32.xlu1 %v3229_v32, %s6532_s3 }
 0xb62   :  { %v2641_v40 = vpop.permute.xlu1 %2640 }
 0xb63   :  { %v2652_v62 = vmul.f32 %v2641_v40, %v10688_v44  ;;  %3279 = vrot.lane.b32.xlu1 %v3269_v30, %s6491_s0 }
 0xb65   :  { %2661 = vrot.lane.b32.xlu0 %v2652_v62, %s6532_s3  ;;  %v10692_v62 = vld [vmem:[#allocation52_spill] sm:$0xff] }
 0xb66   :  { %v2731_v23 = vmul.f32 %v10692_v62, %v10689_v27 }
 0xb67   :  { %2659 = vrot.lane.b32.xlu1 %v2651_v38, %s6532_s3  ;;  %v2721_v32 = vpop.permute.xlu1 %2720  ;;  %v8676_v38 = vpop.permute.xlu0 %2904 }
 0xb68   :  { %v2732_v40 = vmul.f32 %v2721_v32, %v10688_v44  ;;  %10693 = vst [vmem:[#allocation28_spill] sm:$0xff] %v8676_v38  ;;  %v10697_v38 = vld [vmem:[#allocation35_spill] sm:$0xff] }
 0xb69   :  { %2701 = vrot.lane.b32.xlu0 %v2692_v34, %s6491_s0  ;;  %v2939_v34 = vmul.f32 %v8385_v25, %v10695_v6  ;;  %v2980_v25 = vmul.f32 %v2969_v13, %v10697_v38  ;;  %v10701_v13 = vld [vmem:[#allocation79_spill] sm:$0xff] }
 0xb6b   :  { %2699 = vrot.lane.b32.xlu1 %v2691_v47, %s6491_s0  ;;  %v8687_v47 = vpop.permute.xlu0 %3192 }
 0xb6c   :  { %v8671_v30 = vpop.permute.xlu1 %2784  ;;  %10696 = vst [vmem:[#allocation73_spill] sm:$0xff] %v8687_v47 }
 0xb6d   :  { %2741 = vrot.lane.b32.xlu0 %v2732_v40, %s6533_s13  ;;  %v2979_v40 = vmul.f32 %v8440_v57, %v10695_v6 }
 0xb6f   :  { %2739 = vrot.lane.b32.xlu1 %v2731_v23, %s6533_s13  ;;  %v3019_v23 = vmul.f32 %v8397_v54, %v10695_v6 }
 0xb71   :  { %3463 = vrot.lane.b32.xlu0 %v3453_v63, %s6533_s13  ;;  %v8684_v32 = vpop.permute.xlu1 %2864  ;;  %v8696_v63 = vpop.permute.xlu0 %3480 }
 0xb72   :  { %10698 = vst [vmem:[#allocation70_spill] sm:$0xff] %v8696_v63  ;;  %v10703_v63 = vld [vmem:[#allocation42_spill] sm:$0xff] }
 0xb73   :  { %2947 = vrot.lane.b32.xlu1 %v2939_v34, %s6532_s3  ;;  %v10699_v34 = vld [vmem:[#allocation38_spill] sm:$0xff] }
 0xb74   :  { %v3227_v57 = vmul.f32 %v10700_v52, %v10699_v34  ;;  %v10702_v52 = vld [vmem:[#allocation90_spill] sm:$0xff] }
 0xb76   :  { %v2929_v62 = vpop.permute.xlu1 %2928 }
 0xb77   :  { %v2940_v58 = vmul.f32 %v2929_v62, %v10697_v38  ;;  %2987 = vrot.lane.b32.xlu1 %v2979_v40, %s6491_s0  ;;  %v8705_v40 = vpop.permute.xlu0 %2519 }
 0xb79   :  { %2949 = vrot.lane.b32.xlu0 %v2940_v58, %s6532_s3  ;;  %v3267_v58 = vmul.f32 %v8451_v61, %v10699_v34  ;;  %v2510_v61 = vmul.f32 %v8511_v19, %v10671_v56  ;;  %v2734_v19 = vmul.f32 %v8526_v39, %v6941_v50 }
 0xb7b   :  { %3027 = vrot.lane.b32.xlu1 %v3019_v23, %s6533_s13  ;;  %v3009_v10 = vpop.permute.xlu1 %3008  ;;  %v3515_v23 = vmul.f32 %v8457_v21, %v10701_v13 }
 0xb7c   :  { %v3020_v62 = vmul.f32 %v3009_v10, %v10697_v38 }
 0xb7d   :  { %2989 = vrot.lane.b32.xlu0 %v2980_v25, %s6491_s0  ;;  %v3307_v25 = vmul.f32 %v10702_v52, %v10699_v34 }
 0xb7f   :  { %3235 = vrot.lane.b32.xlu1 %v3227_v57, %s6532_s3  ;;  %v8720_v57 = vpop.permute.xlu0 %2743 }
 0xb80   :  { %v8707_v54 = vpop.permute.xlu1 %3072 }
 0xb81   :  { %3029 = vrot.lane.b32.xlu0 %v3020_v62, %s6533_s13 }
 0xb83   :  { %3275 = vrot.lane.b32.xlu1 %v3267_v58, %s6491_s0  ;;  %v8727_v21 = vpop.permute.xlu0 %2807  ;;  %v2694_v58 = vmul.f32 %v8515_v29, %v6941_v50 }
 0xb85   :  { %3523 = vrot.lane.b32.xlu0 %v3515_v23, %s6532_s3  ;;  %v8718_v10 = vpop.permute.xlu1 %3152  ;;  %v3268_v23 = vmul.f32 %v8629_v17, %v10703_v63  ;;  %v3555_v17 = vmul.f32 %v8476_v15, %v10701_v13 }
 0xb87   :  { %3315 = vrot.lane.b32.xlu1 %v3307_v25, %s6533_s13  ;;  %v8738_v25 = vpop.permute.xlu0 %3031 }
 0xb8a   :  { %v3217_v62 = vpop.permute.xlu1 %3216 }
 0xb8b   :  { %v3228_v47 = vmul.f32 %v3217_v62, %v10703_v63  ;;  %2521 = vrot.lane.b32.xlu1 %v2510_v61, %s6532_s3  ;;  %v8750_v39 = vpop.permute.xlu0 %3095  ;;  %v2982_v62 = vmul.f32 %v8535_v42, %v6944_v51  ;;  %v3595_v42 = vmul.f32 %v8482_v31, %v10701_v13  ;;  %v10710_v31 = vld [vmem:[#allocation91_spill] sm:$0xff] }
 0xb8c   :  { %10704 = vst [vmem:[#allocation68_spill] sm:$0xff] %v8750_v39 }
 0xb8d   :  { %3237 = vrot.lane.b32.xlu0 %v3228_v47, %s6532_s3  ;;  %v2798_v47 = vmul.f32 %v8531_v3, %v6938_v46  ;;  %v3022_v3 = vmul.f32 %v8546_v5, %v6944_v51 }
 0xb8f   :  { %2705 = vrot.lane.b32.xlu1 %v2694_v58, %s6491_s0  ;;  %v3297_v52 = vpop.permute.xlu1 %3296  ;;  %v8763_v15 = vpop.permute.xlu0 %3319 }
 0xb90   :  { %v3308_v61 = vmul.f32 %v3297_v52, %v10703_v63  ;;  %v10706_v52 = vld [vmem:[#allocation89_spill] sm:$0xff]  ;;  %10707 = vst [vmem:[#allocation55_spill] sm:$0xff] %v8763_v15 }
 0xb91   :  { %3277 = vrot.lane.b32.xlu0 %v3268_v23, %s6491_s0  ;;  %v10705_v23 = vld [vmem:[#allocation67_spill] sm:$0xff] }
 0xb93   :  { %2745 = vrot.lane.b32.xlu1 %v2734_v19, %s6533_s13  ;;  %v3517_v19 = vmul.f32 %v10706_v52, %v10705_v23  ;;  %v8778_v52 = vpop.permute.xlu0 %3383 }
 0xb94   :  { %v8742_v29 = vpop.permute.xlu1 %3360  ;;  %10709 = vst [vmem:[#allocation62_spill] sm:$0xff] %v8778_v52 }
 0xb95   :  { %3317 = vrot.lane.b32.xlu0 %v3308_v61, %s6533_s13 }
 0xb97   :  { %2809 = vrot.lane.b32.xlu1 %v2798_v47, %s6532_s3  ;;  %v3086_v47 = vmul.f32 %v8551_v20, %v10552_v60 }
 0xb99   :  { %3563 = vrot.lane.b32.xlu0 %v3555_v17, %s6491_s0  ;;  %v8755_v58 = vpop.permute.xlu1 %3440  ;;  %v10708_v17 = vld [vmem:[#allocation87_spill] sm:$0xff] }
 0xb9b   :  { %2993 = vrot.lane.b32.xlu1 %v2982_v62, %s6491_s0  ;;  %v3557_v62 = vmul.f32 %v10708_v17, %v10705_v23  ;;  %v10712_v17 = vld [vmem:[#allocation84_spill] sm:$0xff] }
 0xb9d   :  { %3527 = vrot.lane.b32.xlu0 %v3517_v19, %s6532_s3  ;;  %v3270_v19 = vmul.f32 %v8553_v14, %v10568_v7  ;;  %v8796_v14 = vld [vmem:[%s10127_s18] ss:$0 sm:$0xff] }
 0xb9e   :  { %v8765_v61 = vpop.permute.xlu1 %3504 }
 0xb9f   :  { %3033 = vrot.lane.b32.xlu1 %v3022_v3, %s6533_s13  ;;  %v3597_v3 = vmul.f32 %v10710_v31, %v10705_v23 }
 0xba1   :  { %3603 = vrot.lane.b32.xlu0 %v3595_v42, %s6533_s13  ;;  %v3310_v42 = vmul.f32 %v8569_v1, %v10568_v7 }
 0xba3   :  { %3097 = vrot.lane.b32.xlu1 %v3086_v47, %s6532_s3  ;;  %v8776_v5 = vpop.permute.xlu1 %3544  ;;  %v8791_v47 = vpop.permute.xlu0 %3423 }
 0xba4   :  { %10711 = vst [vmem:[#allocation95_spill] sm:$0xff] %v8791_v47 }
 0xba5   :  { %3567 = vrot.lane.b32.xlu0 %v3557_v62, %s6491_s0  ;;  %v8800_v62 = vadd.f32 %v8796_v14, %v10712_v17 }
 0xba7   :  { %3281 = vrot.lane.b32.xlu1 %v3270_v19, %s6491_s0  ;;  %10713 = vst [vmem:[#allocation54_spill] sm:$0xff] %v8800_v62  ;;  %v10714_v19 = vld [vmem:[#allocation46_spill] sm:$0xff]  ;;  %v8810_v1 = vpop.permute.xlu0 %2515 }
 0xba8   :  { %v8786_v20 = vpop.permute.xlu1 %2760  ;;  %v3374_v31 = vmul.f32 %v8575_v26, %v10714_v19 }
 0xba9   :  { %3607 = vrot.lane.b32.xlu0 %v3597_v3, %s6533_s13  ;;  %v3414_v3 = vmul.f32 %v8559_v36, %v10714_v19 }
 0xbab   :  { %3321 = vrot.lane.b32.xlu1 %v3310_v42, %s6533_s13  ;;  %v10717_v42 = vld [vmem:[#allocation32_spill] sm:$0xff]  ;;  %v8819_v26 = vpop.permute.xlu0 %2555 }
 0xbac   :  { %v2508_v17 = vmul.f32 %v8641_v48, %v10717_v42  ;;  %v3454_v48 = vmul.f32 %v8579_v22, %v10714_v19 }
 0xbad   :  { %v8805_v23 = vpop.permute.xlu1 %3048  ;;  %3731 = vrot.lane.b32.xlu0 %v8800_v62, %s6491_s0 }
 0xbae   :  { %10715 = vst [vmem:[#allocation96_spill] sm:$0xff] %v8805_v23 }
 0xbaf   :  { %3385 = vrot.lane.b32.xlu1 %v3374_v31, %s6532_s3  ;;  %v2548_v31 = vmul.f32 %v8587_v53, %v10717_v42  ;;  %v8829_v36 = vpop.permute.xlu0 %2595  ;;  %v10718_v53 = vld [vmem:[#allocation33_spill] sm:$0xff] }
 0xbb0   :  { %v2876_v22 = vmul.f32 %v8684_v32, %v10718_v53 }
 0xbb2   :  { %v8814_v47 = vpop.permute.xlu1 %3336 }
 0xbb3   :  { %10716 = vst [vmem:[#allocation86_spill] sm:$0xff] %v8814_v47  ;;  %3425 = vrot.lane.b32.xlu1 %v3414_v3, %s6491_s0  ;;  %v2588_v3 = vmul.f32 %v8650_v9, %v10717_v42 }
 0xbb6   :  { %v8821_v52 = vpop.permute.xlu1 %2559 }
 0xbb7   :  { %2517 = vrot.lane.b32.xlu1 %v2508_v17, %s6532_s3  ;;  %v8838_v17 = vpop.permute.xlu0 %2803 }
 0xbba   :  { %v8826_v62 = vpop.permute.xlu1 %2599 }
 0xbbb   :  { %2557 = vrot.lane.b32.xlu1 %v2548_v31, %s6491_s0  ;;  %v2796_v31 = vmul.f32 %v8671_v30, %v10718_v53  ;;  %v8848_v9 = vpop.permute.xlu0 %2843  ;;  %v10719_v30 = vld [vmem:[#allocation40_spill] sm:$0xff] }
 0xbbc   :  { %v3164_v32 = vmul.f32 %v8718_v10, %v10719_v30  ;;  %v10727_v10 = vld [vmem:[#allocation41_spill] sm:$0xff] }
 0xbbe   :  { %v8833_v13 = vpop.permute.xlu1 %2663 }
 0xbbf   :  { %2597 = vrot.lane.b32.xlu1 %v2588_v3, %s6533_s13  ;;  %v2836_v3 = vmul.f32 %v8604_v24, %v10718_v53 }
 0xbc2   :  { %v8840_v47 = vpop.permute.xlu1 %2703 }
 0xbc3   :  { %3465 = vrot.lane.b32.xlu1 %v3454_v48, %s6533_s13  ;;  %v8857_v48 = vpop.permute.xlu0 %2883 }
 0xbc6   :  { %v8845_v15 = vpop.permute.xlu1 %2847 }
 0xbc7   :  { %2805 = vrot.lane.b32.xlu1 %v2796_v31, %s6532_s3  ;;  %v3084_v31 = vmul.f32 %v8707_v54, %v10719_v30  ;;  %v8867_v24 = vpop.permute.xlu0 %3091  ;;  %v10723_v54 = vld [vmem:[#allocation48_spill] sm:$0xff] }
 0xbca   :  { %v8852_v63 = vpop.permute.xlu1 %2887 }
 0xbcb   :  { %2845 = vrot.lane.b32.xlu1 %v2836_v3, %s6491_s0  ;;  %v3124_v3 = vmul.f32 %v8621_v59, %v10719_v30  ;;  %v3372_v30 = vmul.f32 %v8742_v29, %v10727_v10  ;;  %v10730_v29 = vld [vmem:[#allocation43_spill] sm:$0xff] }
 0xbce   :  { %v8859_v19 = vpop.permute.xlu1 %2951 }
 0xbcf   :  { %2885 = vrot.lane.b32.xlu1 %v2876_v22, %s6533_s13  ;;  %v8876_v22 = vpop.permute.xlu0 %3131 }
 0xbd0   :  { %10721 = vst [vmem:[#allocation65_spill] sm:$0xff] %v8876_v22 }
 0xbd2   :  { %v8864_v7 = vpop.permute.xlu1 %2991 }
 0xbd3   :  { %3093 = vrot.lane.b32.xlu1 %v3084_v31, %s6532_s3  ;;  %v3518_v31 = vmul.f32 %v8585_v8, %v10723_v54  ;;  %v8886_v59 = vpop.permute.xlu0 %3171  ;;  %v3412_v8 = vmul.f32 %v8638_v37, %v10727_v10  ;;  %v3556_v37 = vmul.f32 %v8776_v5, %v10730_v29  ;;  %v10733_v5 = vld [vmem:[#allocation61_spill] sm:$0xff] }
 0xbd4   :  { %10725 = vst [vmem:[#allocation89_spill] sm:$0xff] %v8886_v59 }
 0xbd6   :  { %v8871_v23 = vpop.permute.xlu1 %3135 }
 0xbd7   :  { %10720 = vst [vmem:[#allocation52_spill] sm:$0xff] %v8871_v23  ;;  %3133 = vrot.lane.b32.xlu1 %v3124_v3, %s6491_s0  ;;  %v3558_v3 = vmul.f32 %v8599_v43, %v10723_v54  ;;  %v3452_v43 = vmul.f32 %v8755_v58, %v10727_v10  ;;  %v8930_v10 = vadd.f32 %v8796_v14, %v10733_v5 }
 0xbd8   :  { %v2490_v14 = vmul.f32 %v8593_v0, %v10671_v56 }
 0xbd9   :  { %10734 = vst [vmem:[#allocation61_spill] sm:$0xff] %v8930_v10 }
 0xbda   :  { %v8878_v38 = vpop.permute.xlu1 %3175 }
 0xbdb   :  { %10722 = vst [vmem:[#allocation92_spill] sm:$0xff] %v8878_v38  ;;  %3173 = vrot.lane.b32.xlu1 %v3164_v32, %s6533_s13  ;;  %v8895_v32 = vpop.permute.xlu0 %3379 }
 0xbdc   :  { %10728 = vst [vmem:[#allocation91_spill] sm:$0xff] %v8895_v32  ;;  %v3516_v32 = vmul.f32 %v8765_v61, %v10730_v29 }
 0xbde   :  { %v8883_v39 = vpop.permute.xlu1 %3239 }
 0xbdf   :  { %10724 = vst [vmem:[#allocation90_spill] sm:$0xff] %v8883_v39  ;;  %3529 = vrot.lane.b32.xlu1 %v3518_v31, %s6532_s3  ;;  %v8901_v39 = vpop.permute.xlu0 %3419 }
 0xbe0   :  { %10729 = vst [vmem:[#allocation84_spill] sm:$0xff] %v8901_v39 }
 0xbe2   :  { %v8890_v23 = vpop.permute.xlu1 %3279 }
 0xbe3   :  { %10726 = vst [vmem:[#allocation87_spill] sm:$0xff] %v8890_v23  ;;  %3569 = vrot.lane.b32.xlu1 %v3558_v3, %s6491_s0  ;;  %v8908_v23 = vpop.permute.xlu0 %3459 }
 0xbe4   :  { %10731 = vst [vmem:[#allocation97_spill] sm:$0xff] %v8908_v23  ;;  %v3598_v23 = vmul.f32 %v8606_v4, %v10723_v54  ;;  %v2487_v4 = vmul.f32 %v8468_v45, %v10667_v41  ;;  %v2627_v45 = vmul.f32 %v8491_v16, %v10689_v27 }
 0xbe6   :  { %v2660_v38 = vpop.permute.xlu1 %2659 }
 0xbe7   :  { %3381 = vrot.lane.b32.xlu1 %v3372_v30, %s6532_s3  ;;  %v2562_v58 = vpop.permute.xlu0 %2561 }
 0xbea   :  { %v2700_v31 = vpop.permute.xlu1 %2699 }
 0xbeb   :  { %3421 = vrot.lane.b32.xlu1 %v3412_v8, %s6491_s0  ;;  %v2602_v61 = vpop.permute.xlu0 %2601 }
 0xbee   :  { %v2740_v3 = vpop.permute.xlu1 %2739 }
 0xbef   :  { %3461 = vrot.lane.b32.xlu1 %v3452_v43, %s6533_s13  ;;  %v3596_v43 = vmul.f32 %v8655_v33, %v10730_v29 }
 0xbf2   :  { %v8910_v30 = vpop.permute.xlu1 %2947 }
 0xbf3   :  { %3525 = vrot.lane.b32.xlu1 %v3516_v32, %s6532_s3 }
 0xbf6   :  { %v8915_v8 = vpop.permute.xlu1 %2987 }
 0xbf7   :  { %3565 = vrot.lane.b32.xlu1 %v3556_v37, %s6491_s0  ;;  %v2666_v37 = vpop.permute.xlu0 %2665 }
 0xbfa   :  { %v8920_v39 = vpop.permute.xlu1 %3027 }
 0xbfb   :  { %3605 = vrot.lane.b32.xlu1 %v3596_v43, %s6533_s13  ;;  %v2850_v43 = vpop.permute.xlu0 %2849 }
 0xbfe   :  { %v8925_v32 = vpop.permute.xlu1 %3235 }
 0xbff   :  { %10732 = vst [vmem:[#allocation98_spill] sm:$0xff] %v8925_v32  ;;  %3609 = vrot.lane.b32.xlu1 %v3598_v23, %s6533_s13  ;;  %v8940_v54 = vpop.permute.xlu0 %2889  ;;  %v2527_v23 = vadd.f32 %v8810_v1, %v2487_v4 }
 0xc02   :  { %v8932_v34 = vpop.permute.xlu1 %3275 }
 0xc03   :  { %10735 = vst [vmem:[#allocation99_spill] sm:$0xff] %v8932_v34  ;;  %3733 = vrot.lane.b32.xlu1 %v8930_v10, %s6491_s0  ;;  %v2567_v34 = vadd.f32 %v8819_v26, %v2527_v23  ;;  %v10737_v10 = vld [vmem:[#allocation29_spill] sm:$0xff]  ;;  %v8949_v60 = vpop.permute.xlu0 %2953 }
 0xc04   :  { %v2489_v59 = vmul.f32 %v10737_v10, %v7269_v12 }
 0xc06   :  { %v8936_v33 = vpop.permute.xlu1 %3315  ;;  %v2529_v1 = vadd.f32 %v8705_v40, %v2489_v59 }
 0xc07   :  { %10736 = vst [vmem:[#allocation100_spill] sm:$0xff] %v8936_v33  ;;  %v2607_v33 = vadd.f32 %v8829_v36, %v2567_v34  ;;  %v8956_v10 = vpop.permute.xlu0 %3137  ;;  %v10738_v34 = vld [vmem:[#allocation63_spill] sm:$0xff] }
 0xc08   :  { %v2569_v0 = vadd.f32 %v8821_v52, %v2529_v1  ;;  %v2629_v36 = vmul.f32 %v10738_v34, %v7281_v28 }
 0xc09   :  { %v2631_v56 = vadd.f32 %v2627_v45, %v2607_v33 }
 0xc0a   :  { %v2522_v29 = vpop.permute.xlu1 %2521  ;;  %v2609_v26 = vadd.f32 %v8826_v62, %v2569_v0 }
 0xc0b   :  { %v2530_v32 = vadd.f32 %v2522_v29, %v2490_v14  ;;  %v2671_v29 = vadd.f32 %v2660_v38, %v2631_v56  ;;  %v2630_v14 = vmul.f32 %v8612_v49, %v6941_v50  ;;  %v2771_v56 = vmul.f32 %v8465_v2, %v7373_v11  ;;  %v10739_v2 = vld [vmem:[#allocation72_spill] sm:$0xff] }
 0xc0c   :  { %v2633_v40 = vadd.f32 %v2629_v36, %v2609_v26  ;;  %v2773_v26 = vmul.f32 %v10739_v2, %v7295_v18 }
 0xc0d   :  { %v2570_v4 = vadd.f32 %v2562_v58, %v2530_v32  ;;  %v2711_v16 = vadd.f32 %v2700_v31, %v2671_v29  ;;  %v8964_v58 = vpop.permute.xlu0 %3177 }
 0xc0e   :  { %v2706_v5 = vpop.permute.xlu1 %2705  ;;  %v2673_v62 = vadd.f32 %v8833_v13, %v2633_v40 }
 0xc0f   :  { %v2610_v23 = vadd.f32 %v2602_v61, %v2570_v4  ;;  %v2751_v59 = vadd.f32 %v2740_v3, %v2711_v16 }
 0xc10   :  { %v2713_v33 = vadd.f32 %v8840_v47, %v2673_v62  ;;  %v2774_v47 = vmul.f32 %v8567_v35, %v6938_v46  ;;  %v10740_v62 = vld [vmem:[#allocation74_spill] sm:$0xff] }
 0xc11   :  { %v2634_v52 = vadd.f32 %v2630_v14, %v2610_v23  ;;  %v2775_v61 = vadd.f32 %v2771_v56, %v2751_v59  ;;  %v8972_v49 = vpop.permute.xlu0 %3241 }
 0xc12   :  { %v2746_v22 = vpop.permute.xlu1 %2745  ;;  %v2753_v1 = vadd.f32 %v8720_v57, %v2713_v33  ;;  %v2915_v57 = vmul.f32 %v8498_v55, %v10695_v6 }
 0xc13   :  { %v2674_v32 = vadd.f32 %v2666_v37, %v2634_v52  ;;  %v2815_v3 = vadd.f32 %v8838_v17, %v2775_v61  ;;  %v10741_v61 = vld [vmem:[#allocation94_spill] sm:$0xff] }
 0xc14   :  { %v2777_v29 = vadd.f32 %v2773_v26, %v2753_v1  ;;  %v2917_v55 = vmul.f32 %v10741_v61, %v10740_v62 }
 0xc15   :  { %v2714_v45 = vadd.f32 %v2706_v5, %v2674_v32  ;;  %v2662_v4 = vpop.permute.xlu0 %2661  ;;  %v2855_v13 = vadd.f32 %v8848_v9, %v2815_v3  ;;  %v10743_v3 = vld [vmem:[#allocation56_spill] sm:$0xff] }
 0xc16   :  { %v2810_v41 = vpop.permute.xlu1 %2809  ;;  %v2817_v36 = vadd.f32 %v8727_v21, %v2777_v29 }
 0xc17   :  { %v2754_v37 = vadd.f32 %v2746_v22, %v2714_v45  ;;  %v2895_v17 = vadd.f32 %v8857_v48, %v2855_v13  ;;  %v2918_v45 = vmul.f32 %v10743_v3, %v6944_v51  ;;  %v10744_v13 = vld [vmem:[#allocation83_spill] sm:$0xff] }
 0xc18   :  { %v2857_v22 = vadd.f32 %v8845_v15, %v2817_v36 }
 0xc19   :  { %v2778_v5 = vadd.f32 %v2774_v47, %v2754_v37  ;;  %v2702_v34 = vpop.permute.xlu0 %2701  ;;  %v2919_v16 = vadd.f32 %v2915_v57, %v2895_v17  ;;  %v10745_v37 = vld [vmem:[#allocation93_spill] sm:$0xff] }
 0xc1a   :  { %v8962_v27 = vpop.permute.xlu1 %2993  ;;  %v2897_v48 = vadd.f32 %v8852_v63, %v2857_v22  ;;  %v10746_v17 = vld [vmem:[#allocation37_spill] sm:$0xff] }
 0xc1b   :  { %v2818_v9 = vadd.f32 %v2810_v41, %v2778_v5  ;;  %v2959_v59 = vadd.f32 %v8910_v30, %v2919_v16  ;;  %v10742_v41 = vld [vmem:[#allocation51_spill] sm:$0xff]  ;;  %v2628_v5 = vmul.f32 %v10746_v17, %v10688_v44 }
 0xc1c   :  { %v2488_v15 = vmul.f32 %v10742_v41, %v10717_v42  ;;  %v2921_v30 = vadd.f32 %v2917_v55, %v2897_v48  ;;  %v10747_v55 = vld [vmem:[#allocation77_spill] sm:$0xff] }
 0xc1d   :  { %v2742_v40 = vpop.permute.xlu0 %2741  ;;  %v2858_v52 = vadd.f32 %v2850_v43, %v2818_v9  ;;  %v2999_v21 = vadd.f32 %v8915_v8, %v2959_v59  ;;  %v3059_v8 = vmul.f32 %v10745_v37, %v10744_v13 }
 0xc1e   :  { %v8968_v38 = vpop.permute.xlu1 %3033 }
 0xc1f   :  { %v2898_v32 = vadd.f32 %v8940_v54, %v2858_v52  ;;  %v3039_v63 = vadd.f32 %v8920_v39, %v2999_v21  ;;  %v2961_v54 = vadd.f32 %v8859_v19, %v2921_v30  ;;  %v10748_v21 = vld [vmem:[#allocation75_spill] sm:$0xff] }
 0xc21   :  { %v9002_v33 = vpop.permute.xlu0 %3463  ;;  %v2922_v1 = vadd.f32 %v2918_v45, %v2898_v32  ;;  %v3063_v57 = vadd.f32 %v3059_v8, %v3039_v63  ;;  %v3001_v9 = vadd.f32 %v8864_v7, %v2961_v54  ;;  %v3061_v32 = vmul.f32 %v10748_v21, %v10747_v55  ;;  %v10749_v7 = vld [vmem:[#allocation65_spill] sm:$0xff]  ;;  %v10753_v8 = vld [vmem:[#allocation38_spill] sm:$0xff]  ;;  %v10754_v54 = vld [vmem:[#allocation76_spill] sm:$0xff] }
 0xc22   :  { %v8974_v31 = vpop.permute.xlu1 %3097  ;;  %v10759_v21 = vld [vmem:[#allocation98_spill] sm:$0xff] }
 0xc23   :  { %v2962_v36 = vadd.f32 %v8949_v60, %v2922_v1  ;;  %v3103_v52 = vadd.f32 %v8867_v24, %v3063_v57  ;;  %v2772_v60 = vmul.f32 %v8786_v20, %v10718_v53  ;;  %v10750_v24 = vld [vmem:[#allocation45_spill] sm:$0xff]  ;;  %v10755_v20 = vld [vmem:[#allocation68_spill] sm:$0xff] }
 0xc24   :  { %v10757_v57 = vld [vmem:[#allocation28_spill] sm:$0xff] }
 0xc25   :  { %v2950_v26 = vpop.permute.xlu0 %2949  ;;  %v3002_v48 = vadd.f32 %v8962_v27, %v2962_v36 }
 0xc26   :  { %v8978_v0 = vpop.permute.xlu1 %3281 }
 0xc27   :  { %v3042_v3 = vadd.f32 %v8968_v38, %v3002_v48 }
 0xc29   :  { %v2990_v22 = vpop.permute.xlu0 %2989 }
 0xc2a   :  { %v8985_v23 = vpop.permute.xlu1 %3321 }
 0xc2d   :  { %v3030_v30 = vpop.permute.xlu0 %3029 }
 0xc2e   :  { %v8991_v14 = vpop.permute.xlu1 %3385 }
 0xc32   :  { %v8994_v35 = vpop.permute.xlu1 %3425 }
 0xc36   :  { %v2518_v56 = vpop.permute.xlu1 %2517 }
 0xc37   :  { %v2528_v2 = vadd.f32 %v2518_v56, %v2488_v15  ;;  %v3041_v56 = vadd.f32 %v8738_v25, %v3001_v9  ;;  %v3143_v15 = vadd.f32 %v10749_v7, %v3103_v52  ;;  %v10758_v52 = vld [vmem:[#allocation52_spill] sm:$0xff] }
 0xc38   :  { %v10760_v7 = vld [vmem:[#allocation92_spill] sm:$0xff] }
 0xc3a   :  { %v2558_v43 = vpop.permute.xlu1 %2557 }
 0xc3b   :  { %v2568_v47 = vadd.f32 %v2558_v43, %v2528_v2  ;;  %v10751_v43 = vld [vmem:[#allocation81_spill] sm:$0xff] }
 0xc3c   :  { %v3062_v27 = vmul.f32 %v10751_v43, %v10750_v24  ;;  %v10762_v43 = vld [vmem:[#allocation57_spill] sm:$0xff] }
 0xc3e   :  { %v2598_v29 = vpop.permute.xlu1 %2597  ;;  %v3066_v2 = vadd.f32 %v3062_v27, %v3042_v3 }
 0xc3f   :  { %v2608_v16 = vadd.f32 %v2598_v29, %v2568_v47  ;;  %v3203_v47 = vmul.f32 %v10754_v54, %v10753_v8 }
 0xc40   :  { %v3106_v9 = vadd.f32 %v8974_v31, %v3066_v2  ;;  %v10764_v31 = vld [vmem:[#allocation96_spill] sm:$0xff] }
 0xc41   :  { %v2632_v39 = vadd.f32 %v2628_v5, %v2608_v16  ;;  %v9033_v5 = vpop.permute.xlu0 %3523 }
 0xc42   :  { %v9016_v59 = vpop.permute.xlu1 %3465 }
 0xc43   :  { %v2672_v19 = vadd.f32 %v2662_v4, %v2632_v39  ;;  %v3065_v4 = vadd.f32 %v3061_v32, %v3041_v56 }
 0xc45   :  { %v2712_v61 = vadd.f32 %v2702_v34, %v2672_v19  ;;  %v10752_v34 = vld [vmem:[#allocation89_spill] sm:$0xff]  ;;  %v3105_v29 = vadd.f32 %v10755_v20, %v3065_v4  ;;  %v3238_v56 = vpop.permute.xlu0 %3237 }
 0xc46   :  { %v2806_v41 = vpop.permute.xlu1 %2805  ;;  %v3183_v1 = vadd.f32 %v10752_v34, %v3143_v15  ;;  %v10765_v34 = vld [vmem:[#allocation99_spill] sm:$0xff]  ;;  %v10767_v20 = vld [vmem:[#allocation49_spill] sm:$0xff] }
 0xc47   :  { %v2752_v45 = vadd.f32 %v2742_v40, %v2712_v61  ;;  %v10756_v40 = vld [vmem:[#allocation35_spill] sm:$0xff]  ;;  %v3145_v48 = vadd.f32 %v10758_v52, %v3105_v29  ;;  %v10771_v52 = vld [vmem:[#allocation90_spill] sm:$0xff] }
 0xc48   :  { %v2916_v36 = vmul.f32 %v10757_v57, %v10756_v40  ;;  %v3207_v16 = vadd.f32 %v3203_v47, %v3183_v1  ;;  %v10766_v47 = vld [vmem:[#allocation47_spill] sm:$0xff] }
 0xc49   :  { %v2776_v63 = vadd.f32 %v2772_v60, %v2752_v45  ;;  %v3185_v15 = vadd.f32 %v10760_v7, %v3145_v48  ;;  %v10761_v45 = vld [vmem:[#allocation78_spill] sm:$0xff]  ;;  %v3278_v54 = vpop.permute.xlu0 %3277 }
 0xc4a   :  { %v2846_v25 = vpop.permute.xlu1 %2845  ;;  %v3247_v32 = vadd.f32 %v10759_v21, %v3207_v16  ;;  %v3205_v27 = vmul.f32 %v10762_v43, %v10761_v45  ;;  %v10769_v16 = vld [vmem:[#allocation85_spill] sm:$0xff] }
 0xc4b   :  { %v2816_v37 = vadd.f32 %v2806_v41, %v2776_v63  ;;  %v3146_v41 = vadd.f32 %v8956_v10, %v3106_v9  ;;  %v10763_v63 = vld [vmem:[#allocation40_spill] sm:$0xff]  ;;  %v3206_v10 = vmul.f32 %v10767_v20, %v10766_v47 }
 0xc4c   :  { %v3287_v1 = vadd.f32 %v10765_v34, %v3247_v32  ;;  %v10770_v9 = vld [vmem:[#allocation88_spill] sm:$0xff]  ;;  %v10773_v32 = vld [vmem:[#allocation73_spill] sm:$0xff] }
 0xc4d   :  { %v2856_v17 = vadd.f32 %v2846_v25, %v2816_v37  ;;  %v3060_v25 = vmul.f32 %v10764_v31, %v10763_v63  ;;  %v3186_v2 = vadd.f32 %v8964_v58, %v3146_v41  ;;  %v3318_v21 = vpop.permute.xlu0 %3317 }
 0xc4e   :  { %v2886_v38 = vpop.permute.xlu1 %2885 }
 0xc4f   :  { %v2896_v39 = vadd.f32 %v2886_v38, %v2856_v17  ;;  %v3210_v57 = vadd.f32 %v3206_v10, %v3186_v2  ;;  %v10777_v10 = vld [vmem:[#allocation80_spill] sm:$0xff] }
 0xc51   :  { %v2920_v19 = vadd.f32 %v2916_v36, %v2896_v39  ;;  %v3347_v39 = vmul.f32 %v10770_v9, %v10769_v16  ;;  %v3250_v7 = vadd.f32 %v8972_v49, %v3210_v57  ;;  %v3564_v2 = vpop.permute.xlu0 %3563  ;;  %v10780_v49 = vld [vmem:[#allocation86_spill] sm:$0xff]  ;;  %v10781_v57 = vld [vmem:[#allocation84_spill] sm:$0xff] }
 0xc52   :  { %v3094_v61 = vpop.permute.xlu1 %3093 }
 0xc53   :  { %v2960_v60 = vadd.f32 %v2950_v26, %v2920_v19  ;;  %v3209_v26 = vadd.f32 %v3205_v27, %v3185_v15  ;;  %v3290_v34 = vadd.f32 %v8978_v0, %v3250_v7 }
 0xc55   :  { %v3000_v3 = vadd.f32 %v2990_v22, %v2960_v60  ;;  %v10768_v22 = vld [vmem:[#allocation100_spill] sm:$0xff]  ;;  %v3249_v48 = vadd.f32 %v10771_v52, %v3209_v26  ;;  %v3330_v9 = vadd.f32 %v8985_v23, %v3290_v34  ;;  %v10782_v52 = vld [vmem:[#allocation46_spill] sm:$0xff] }
 0xc56   :  { %v3134_v4 = vpop.permute.xlu1 %3133  ;;  %v3327_v38 = vadd.f32 %v10768_v22, %v3287_v1  ;;  %v10778_v26 = vld [vmem:[#allocation44_spill] sm:$0xff] }
 0xc57   :  { %v3040_v37 = vadd.f32 %v3030_v30, %v3000_v3  ;;  %v10772_v30 = vld [vmem:[#allocation42_spill] sm:$0xff]  ;;  %v10774_v3 = vld [vmem:[#allocation87_spill] sm:$0xff] }
 0xc58   :  { %v3204_v41 = vmul.f32 %v10773_v32, %v10772_v30  ;;  %v3351_v60 = vadd.f32 %v3347_v39, %v3327_v38  ;;  %v3289_v43 = vadd.f32 %v10774_v3, %v3249_v48  ;;  %v10779_v38 = vld [vmem:[#allocation41_spill] sm:$0xff]  ;;  %v10783_v48 = vld [vmem:[#allocation64_spill] sm:$0xff]  ;;  %v3528_v32 = vpop.permute.xlu0 %3527  ;;  %v10785_v3 = vld [vmem:[#allocation79_spill] sm:$0xff] }
 0xc59   :  { %v3064_v29 = vadd.f32 %v3060_v25, %v3040_v37  ;;  %v3350_v0 = vmul.f32 %v10783_v48, %v10782_v52 }
 0xc5a   :  { %v3174_v17 = vpop.permute.xlu1 %3173 }
 0xc5b   :  { %v3104_v36 = vadd.f32 %v3094_v61, %v3064_v29  ;;  %v10775_v61 = vld [vmem:[#allocation91_spill] sm:$0xff]  ;;  %v3349_v29 = vmul.f32 %v10778_v26, %v10777_v10  ;;  %v3354_v7 = vadd.f32 %v3350_v0, %v3330_v9  ;;  %v10789_v26 = vld [vmem:[#allocation70_spill] sm:$0xff] }
 0xc5c   :  { %v3391_v25 = vadd.f32 %v10775_v61, %v3351_v60  ;;  %v10787_v61 = vld [vmem:[#allocation62_spill] sm:$0xff] }
 0xc5d   :  { %v3144_v19 = vadd.f32 %v3134_v4, %v3104_v36  ;;  %v10776_v4 = vld [vmem:[#allocation55_spill] sm:$0xff] }
 0xc5e   :  { %v3530_v58 = vpop.permute.xlu1 %3529  ;;  %v3329_v37 = vadd.f32 %v10776_v4, %v3289_v43  ;;  %v3431_v36 = vadd.f32 %v10781_v57, %v3391_v25  ;;  %v10786_v43 = vld [vmem:[#allocation66_spill] sm:$0xff] }
 0xc5f   :  { %v3184_v15 = vadd.f32 %v3174_v17, %v3144_v19  ;;  %v3348_v17 = vmul.f32 %v10780_v49, %v10779_v38  ;;  %v10790_v49 = vld [vmem:[#allocation95_spill] sm:$0xff]  ;;  %v10841_v38 = vmov 1  }
 0xc61   :  { %v3208_v27 = vadd.f32 %v3204_v41, %v3184_v15 }
 0xc62   :  { %v3570_v31 = vpop.permute.xlu1 %3569 }
 0xc63   :  { %v3248_v1 = vadd.f32 %v3238_v56, %v3208_v27  ;;  %v3353_v56 = vadd.f32 %v3349_v29, %v3329_v37  ;;  %v3491_v27 = vmul.f32 %v10786_v43, %v10785_v3  ;;  %v10788_v37 = vld [vmem:[#allocation43_spill] sm:$0xff] }
 0xc64   :  { %v3492_v29 = vmul.f32 %v10789_v26, %v10788_v37  ;;  %v10840_v37 = vmov 2  }
 0xc65   :  { %v3288_v20 = vadd.f32 %v3278_v54, %v3248_v1  ;;  %v10784_v54 = vld [vmem:[#allocation97_spill] sm:$0xff]  ;;  %v3393_v1 = vadd.f32 %v10787_v61, %v3353_v56 }
 0xc66   :  { %v3382_v22 = vpop.permute.xlu1 %3381  ;;  %v3471_v60 = vadd.f32 %v10784_v54, %v3431_v36  ;;  %v10793_v54 = vld [vmem:[#allocation48_spill] sm:$0xff] }
 0xc67   :  { %v3328_v39 = vadd.f32 %v3318_v21, %v3288_v20  ;;  %v3394_v21 = vadd.f32 %v8991_v14, %v3354_v7  ;;  %v3604_v20 = vpop.permute.xlu0 %3603  ;;  %v10791_v14 = vld [vmem:[#allocation67_spill] sm:$0xff] }
 0xc68   :  { %v3495_v23 = vadd.f32 %v3491_v27, %v3471_v60  ;;  %v10794_v60 = vld [vmem:[#allocation50_spill] sm:$0xff] }
 0xc69   :  { %v3352_v19 = vadd.f32 %v3348_v17, %v3328_v39  ;;  %v3433_v17 = vadd.f32 %v10790_v49, %v3393_v1  ;;  %v3434_v36 = vadd.f32 %v8994_v35, %v3394_v21  ;;  %v3494_v7 = vmul.f32 %v10794_v60, %v10793_v54  ;;  %v10799_v60 = vld [vmem:[#allocation53_spill] sm:$0xff] }
 0xc6a   :  { %v3422_v41 = vpop.permute.xlu1 %3421 }
 0xc6b   :  { %v3392_v15 = vadd.f32 %v3382_v22, %v3352_v19  ;;  %v3535_v22 = vadd.f32 %v9033_v5, %v3495_v23  ;;  %v3473_v39 = vadd.f32 %v9002_v33, %v3433_v17  ;;  %v3474_v48 = vadd.f32 %v9016_v59, %v3434_v36  ;;  %v3568_v0 = vpop.permute.xlu0 %3567  ;;  %v10792_v19 = vld [vmem:[#allocation39_spill] sm:$0xff] }
 0xc6c   :  { %v10795_v17 = vmov 0.0  }
 0xc6d   :  { %v3432_v25 = vadd.f32 %v3422_v41, %v3392_v15  ;;  %v3493_v41 = vmul.f32 %v10792_v19, %v10791_v14  ;;  %v3575_v15 = vadd.f32 %v3564_v2, %v3535_v22  ;;  %v3498_v61 = vadd.f32 %v3494_v7, %v3474_v48  ;;  %v10798_v48 = vld [vmem:[#allocation58_spill] sm:$0xff]  ;;  %v6217_v19 = vld [vmem:[#allocation17] ss:$0 sm:$0xff] }
 0xc6e   :  { %v3462_v4 = vpop.permute.xlu1 %3461 }
 0xc6f   :  { %v3472_v34 = vadd.f32 %v3462_v4, %v3432_v25  ;;  %v3497_v27 = vadd.f32 %v3493_v41, %v3473_v39  ;;  %v3615_v25 = vadd.f32 %v3604_v20, %v3575_v15  ;;  %v3538_v4 = vadd.f32 %v3530_v58, %v3498_v61  ;;  %v3608_v23 = vpop.permute.xlu0 %3607  ;;  %v6216_v58 = vld [vmem:[%s10376_s26] sm:$0xff]  }
 0xc71   :  { %v3496_v9 = vadd.f32 %v3492_v29, %v3472_v34  ;;  %v3537_v35 = vadd.f32 %v3528_v32, %v3497_v27  ;;  %v3578_v21 = vadd.f32 %v3570_v31, %v3538_v4  ;;  %v10796_v31 = vld [vmem:[#allocation69_spill] sm:$0xff] }
 0xc72   :  { %v3526_v57 = vpop.permute.xlu1 %3525 }
 0xc73   :  { %v3536_v43 = vadd.f32 %v3526_v57, %v3496_v9  ;;  %v3577_v59 = vadd.f32 %v3568_v0, %v3537_v35  ;;  %v6215_v57 = vld [vmem:[#allocation3] sm:$0xff]   ;;  %v10797_v9 = vld [vmem:[#allocation59_spill] sm:$0xff] }
 0xc75   :  { %v3617_v29 = vadd.f32 %v3608_v23, %v3577_v59  ;;  %v10800_v59 = vld [vmem:[#allocation54_spill] sm:$0xff] }
 0xc76   :  { %v3566_v56 = vpop.permute.xlu1 %3565 }
 0xc77   :  { %v3576_v5 = vadd.f32 %v3566_v56, %v3536_v43 }
 0xc7a   :  { %v3606_v1 = vpop.permute.xlu1 %3605 }
 0xc7b   :  { %v3616_v33 = vadd.f32 %v3606_v1, %v3576_v5  ;;  %v6218_v5 = vld [vmem:[#allocation15] sm:$0xff]   ;;  %v6219_v1 = vld [vmem:[#allocation15 + $0x8] sm:$0xff]  }
 0xc7d   :  { %v3619_v34 = vpack.c.bf16 %v3616_v33, %v3615_v25  ;;  %v6220_v25 = vld [vmem:[%s10125_s16] ss:$0 sm:$0xff] }
 0xc7e   :  { %v3610_v26 = vpop.permute.xlu1 %3609 }
 0xc7f   :  { %v3618_v49 = vadd.f32 %v3610_v26, %v3578_v21  ;;  %5639 = vmatpush3.bf16.msra.mxu0 %v3619_v34 }
 0xc80   :  { %5640 = vmatprep.subr.bf16.mxu0 %v10795_v17 }
 0xc81   :  { %v3620_v2 = vpack.c.bf16 %v3618_v49, %v3617_v29  ;;  %v10801_v49 = vld [vmem:[#allocation61_spill] sm:$0xff] }
 0xc83   :  { %5641 = vmatpush3.bf16.msra.mxu0 %v3620_v2 }
 0xc86   :  { %5643 = vmatmul.mubr.msk.bf16.vlgmr.msra.gmra.mrb[36].mxu0 %vm490_vm5, %v6215_v57 }
 0xc87   :  { %5656 = vmatprep.mubr.msk.bf16.mxu0 %vm773_vm6, %v6216_v58 }
 0xd59   :  { %v3655_v32 = vpop.f32.mrb[36].mxu0 }
 0xd5a   :  { %v3662_v20 = vmul.f32 %v3655_v32, %v10796_v31  ;;  %v5644_v22 = vpop.f32.mrb[37].mxu0  ;;  %v10837_v31 = vmov 8  }
 0xd5b   :  { %v3658_v36 = vpop.f32.mrb[38].mxu0 }
 0xd5c   :  { %v3664_v39 = vadd.f32 %v3662_v20, %v10797_v9  ;;  %v3663_v0 = vmul.f32 %v3658_v36, %v10798_v48  ;;  %v5645_v56 = vpop.f32.mrb[39].mxu0  ;;  %v3732_v9 = vpop.permute.xlu0 %3731  ;;  %v10835_v48 = vmov 0  }
 0xd5d   :  { %v3734_v56 = vpop.permute.xlu1 %3733 }
 0xd5e   :  { %v3666_v41 = vadd.f32 %v6217_v19, %v3664_v39  ;;  %v3665_v7 = vadd.f32 %v3663_v0, %v10799_v60 }
 0xd60   :  { %v3667_v15 = vadd.f32 %v6217_v19, %v3665_v7  ;;  %v3668_v43 = vmax.f32 %v3666_v41, 0.0 }
 0xd62   :  { %v3669_v27 = vmax.f32 %v3667_v15, 0.0 }
 0xd64   :  { %v3670_v61 = vpack.c.bf16 %v3669_v27, %v3668_v43 }
 0xd66   :  { %5651 = vmatmul.mubr.msk.bf16.vlgmr.msra.gmra.mrb[36].mxu1 %vm490_vm5, %v3670_v61 }
 0xd67   :  { %5661 = vmatpush3.bf16.msra.mxu1 %v6218_v5  ;;  %5664 = vmatprep.mubr.msk.bf16.mxu1 %vm6499_vm0, %v10795_v17 }
 0xd68   :  { %5662 = vmatprep.subr.bf16.mxu1 %v10795_v17 }
 0xd6b   :  { %5663 = vmatpush3.bf16.msra.mxu1 %v6219_v1 }
 0xd6c   :  { %5676 = vmatprep.subr.bf16.mxu1 %v10795_v17 }
 0xe39   :  { %v3708_v35 = vpop.f32.mrb[36].mxu1 }
 0xe3a   :  { %v3709_v4 = vadd.f32 %v6220_v25, %v3708_v35  ;;  %v5652_v33 = vpop.f32.mrb[37].mxu1 }
 0xe3b   :  { %v3711_v23 = vpop.f32.mrb[38].mxu1  ;;  %v10802_v33 = vld [vmem:[#allocation71_spill] sm:$0xff] }
 0xe3c   :  { %v3715_v21 = vadd.f32 %v3709_v4, %v10800_v59  ;;  %v3712_v34 = vadd.f32 %v6220_v25, %v3711_v23  ;;  %v5653_v26 = vpop.f32.mrb[39].mxu1  ;;  %v10803_v59 = vld [vmem:[#allocation60_spill] sm:$0xff] }
 0xe3e   :  { %v5489_v29 = vmul.f32 -1.442695, %v3715_v21  ;;  %v3716_v2 = vadd.f32 %v3712_v34, %v10801_v49 }
 0xe40   :  { %6180 = vpow2.f32 %v5489_v29  ;;  %v5490_v57 = vmul.f32 -1.442695, %v3716_v2  ;;  %v6221_v2 = vld [vmem:[%s10376_s26 + $0x8] sm:$0xff]  }
 0xe42   :  { %6182 = vpow2.f32 %v5490_v57  ;;  %v6222_v57 = vld [vmem:[#allocation18] sm:$0xff]  }
 0xe4a   :  { %v6181_v58 = vpop.eup %6180 }
 0xe4b   :  { %v3723_v32 = vadd.f32 1.0, %v6181_v58  ;;  %v6223_v58 = vld [vmem:[#allocation18 + $0x8] sm:$0xff]  }
 0xe4c   :  { %v6183_v20 = vpop.eup %6182 }
 0xe4d   :  { %6184 = vrcp.f32 %v3723_v32  ;;  %v3724_v22 = vadd.f32 1.0, %v6183_v20  ;;  %v6224_v32 = vld [vmem:[%s10124_s15] sm:$0xff]   ;;  %v6225_v20 = vld [vmem:[%s10124_s15 + $0x8] sm:$0xff]  }
 0xe4f   :  { %6186 = vrcp.f32 %v3724_v22 }
 0xe57   :  { %v6185_v36 = vpop.eup %6184 }
 0xe58   :  { %v3737_v39 = vmul.f32 %v6185_v36, %v3732_v9  ;;  %v3751_v61 = vsub.f32 1.0, %v6185_v36  ;;  %v3763_v23 = vmul.f32 %v6185_v36, %v10802_v33  ;;  %v10816_v33 = vmov 7  }
 0xe59   :  { %v6187_v0 = vpop.eup %6186 }
 0xe5a   :  { %3741 = vrot.lane.b32.xlu0 %v3737_v39, %s6491_s0  ;;  %v3738_v19 = vmul.f32 %v6187_v0, %v3734_v56  ;;  %v3752_v35 = vsub.f32 1.0, %v6187_v0  ;;  %v3764_v21 = vmul.f32 %v6187_v0, %v10803_v59  ;;  %v10818_v59 = vmov 9  }
 0xe5c   :  { %3743 = vrot.lane.b32.xlu1 %v3738_v19, %s6491_s0 }
 0xecc   :  { %v3742_v41 = vpop.permute.xlu0 %3741 }
 0xecd   :  { %v3747_v60 = vadd.f32 %v3742_v41, %v3709_v4 }
 0xece   :  { %v3744_v7 = vpop.permute.xlu1 %3743 }
 0xecf   :  { %6188 = vtanh.f32 %v3747_v60  ;;  %v3748_v15 = vadd.f32 %v3744_v7, %v3712_v34  ;;  %v10808_v60 = vmov 3   ;;  %v10809_v7 = vmov 29  }
 0xed1   :  { %6190 = vtanh.f32 %v3748_v15 }
 0xed9   :  { %v6189_v43 = vpop.eup %6188 }
 0xeda   :  { %3755 = vrot.lane.b32.xlu0 %v6189_v43, %s6532_s3 }
 0xedb   :  { %v6191_v27 = vpop.eup %6190 }
 0xedc   :  { %3757 = vrot.lane.b32.xlu1 %v6191_v27, %s6532_s3  ;;  %v10811_v27 = vmov 5  }
 0xf4c   :  { %v3756_v5 = vpop.permute.xlu0 %3755 }
 0xf4d   :  { %v3761_v1 = vmul.f32 %v3756_v5, %v3751_v61  ;;  %v10812_v61 = vmov 30  }
 0xf4e   :  { %v3758_v25 = vpop.permute.xlu1 %3757 }
 0xf4f   :  { %v3762_v4 = vmul.f32 %v3758_v25, %v3752_v35  ;;  %v9111_v26 = vadd.f32 %v3763_v23, %v3761_v1  ;;  %v10814_v35 = vmov 6   ;;  %v10815_v25 = vmov 4  }
 0xf50   :  { %v10817_v23 = vmov 12  }
 0xf51   :  { %10804 = vst [vmem:[#allocation29_spill] sm:$0xff] %v9111_v26  ;;  %v9113_v34 = vadd.f32 %v3764_v21, %v3762_v4  ;;  %v10819_v21 = vmov 20   ;;  %v10820_v4 = vmov 10  }
 0xf53   :  { %10805 = vst [vmem:[#allocation63_spill] sm:$0xff] %v9113_v34  ;;  %v3767_v29 = vpack.c.bf16 %v9113_v34, %v9111_v26  ;;  %v10832_v34 = vmov 25   ;;  %v10833_v26 = vmov 26  }
 0xf55   :  { %3769 = vrot.lane.b32.xlu0 %v3767_v29, %s6532_s3  ;;  %v10821_v29 = vmov 28  }
 0xfc7   :  { %v3770_v49 = vpop.permute.xlu0 %3769 }
 0xfc8   :  { %5654 = vmatprep.subr.bf16.mxu0 %v3770_v49  ;;  %5665 = vmatmul.mubr.msk.bf16.vlgmr.msra.gmra.mrb[40].mxu1 %vm490_vm5, %v3770_v49 }
 0xfc9   :  { %5655 = vmatpush3.bf16.msra.mxu0 %v3770_v49  ;;  %5680 = vmatprep.mubr.msk.bf16.mxu1 %vm6499_vm0, %v10795_v17 }
 0xfca   :  { %5668 = vmatprep.subr.bf16.mxu0 %v10795_v17 }
 0xfcc   :  { %5657 = vmatmul.mubr.msk.bf16.vlgmr.msra.gmra.mrb[40].mxu0 %vm773_vm6, %v6221_v2  ;;  %v10823_v2 = vmov 13  }
 0xfcd   :  { %5669 = vmatpush3.bf16.msra.mxu0 %v6222_v57  ;;  %5672 = vmatprep.mubr.msk.bf16.mxu0 %vm6499_vm0, %v10795_v17  ;;  %v10824_v57 = vmov 14  }
 0xfce   :  { %5670 = vmatprep.subr.bf16.mxu0 %v10795_v17 }
 0xfd1   :  { %5671 = vmatpush3.bf16.msra.mxu0 %v6223_v58  ;;  %v10825_v58 = vmov 15  }
 0xfd2   :  { %5684 = vmatprep.subr.bf16.mxu0 %v10795_v17 }
 0xfd4   :  { %5673 = vmatmul.mubr.msk.bf16.vlgmr.msra.gmra.mrb[44].mxu0 %vm490_vm5, %v3770_v49  ;;  %v10822_v49 = vmov 11  }
 0xfd5   :  { %5685 = vmatpush3.bf16.msra.mxu0 %v6224_v32  ;;  %5688 = vmatprep.mubr.msk.bf16.mxu0 %vm6499_vm0, %v10795_v17  ;;  %v10826_v32 = vmov 17  }
 0xfd6   :  { %5686 = vmatprep.subr.bf16.mxu0 %v10795_v17 }
 0xfd9   :  { %5687 = vmatpush3.bf16.msra.mxu0 %v6225_v20  ;;  %v10827_v20 = vmov 18  }
 0xfda   :  { %5698 = vmatprep.subr.bf16.mxu0 %v10795_v17  ;;  %v10838_v17 = vmov 16  }
0x109b   :  { %v9141_v22 = vpop.f32.mrb[40].mxu1 }
0x109c   :  { %10806 = vst [vmem:[#allocation72_spill] sm:$0xff] %v9141_v22  ;;  %v5666_v36 = vpop.f32.mrb[41].mxu1  ;;  %v10836_v22 = vmov 31  }
0x109d   :  { %v9143_v9 = vpop.f32.mrb[42].mxu1  ;;  %v10828_v36 = vmov 19  }
0x109e   :  { %10807 = vst [vmem:[#allocation74_spill] sm:$0xff] %v9143_v9  ;;  %v5667_v39 = vpop.f32.mrb[43].mxu1  ;;  %v10834_v9 = vmov 27  }
0x109f   :  { %v9145_v0 = vpop.f32.mrb[40].mxu0  ;;  %v10829_v39 = vmov 21  }
0x10a0   :  { %3979 = vperm.xlu1 %6023, %v9145_v0   ;;  %3939 = vperm.xlu0 %6022, %v9145_v0   ;;  %v9149_v56 = vpop.f32.mrb[41].mxu0 }
0x10a1   :  { %v9151_v19 = vpop.f32.mrb[42].mxu0 }
0x10a2   :  { %v9153_v41 = vpop.f32.mrb[43].mxu0 }
0x10a4   :  { %6024 = vset.pattern.permute.xlu1 %v10808_v60  ;;  %6043 = vset.pattern.permute.xlu0 %v10809_v7 }
0x10a5   :  { %4019 = vperm.xlu1 %6024, %v9145_v0   ;;  %4947 = vperm.xlu0 %6043, %v9145_v0  }
0x10a7   :  { %v9159_v15 = vpop.f32.mrb[44].mxu0 }
0x10a8   :  { %10810 = vst [vmem:[#allocation94_spill] sm:$0xff] %v9159_v15  ;;  %v5674_v43 = vpop.f32.mrb[45].mxu0 }
0x10a9   :  { %6025 = vset.pattern.permute.xlu1 %v10811_v27  ;;  %6045 = vset.pattern.permute.xlu0 %v10812_v61  ;;  %v9163_v5 = vpop.f32.mrb[46].mxu0  ;;  %v10830_v43 = vmov 22  }
0x10aa   :  { %10813 = vst [vmem:[#allocation51_spill] sm:$0xff] %v9163_v5  ;;  %4083 = vperm.xlu1 %6025, %v9145_v0   ;;  %4987 = vperm.xlu0 %6045, %v9145_v0   ;;  %v5675_v1 = vpop.f32.mrb[47].mxu0  ;;  %v10839_v5 = vmov 24  }
0x10ab   :  { %v10831_v1 = vmov 23  }
0x10ae   :  { %6026 = vset.pattern.permute.xlu1 %v10814_v35  ;;  %6047 = vset.pattern.permute.xlu0 %v10815_v25 }
0x10af   :  { %4123 = vperm.xlu1 %6026, %v9145_v0   ;;  %4059 = vperm.xlu0 %6047, %v9145_v0  }
0x10b3   :  { %6027 = vset.pattern.permute.xlu1 %v10816_v33  ;;  %6049 = vset.pattern.permute.xlu0 %v10817_v23 }
0x10b4   :  { %4163 = vperm.xlu1 %6027, %v9145_v0   ;;  %4347 = vperm.xlu0 %6049, %v9145_v0  }
0x10b8   :  { %6028 = vset.pattern.permute.xlu1 %v10818_v59  ;;  %6051 = vset.pattern.permute.xlu0 %v10819_v21 }
0x10b9   :  { %4227 = vperm.xlu1 %6028, %v9145_v0   ;;  %4635 = vperm.xlu0 %6051, %v9145_v0  }
0x10bd   :  { %6029 = vset.pattern.permute.xlu1 %v10820_v4  ;;  %6053 = vset.pattern.permute.xlu0 %v10821_v29 }
0x10be   :  { %4267 = vperm.xlu1 %6029, %v9145_v0   ;;  %4923 = vperm.xlu0 %6053, %v9145_v0  }
0x10c2   :  { %6030 = vset.pattern.permute.xlu1 %v10822_v49  ;;  %6056 = vset.pattern.permute.xlu0 %v10808_v60 }
0x10c3   :  { %4307 = vperm.xlu1 %6030, %v9145_v0   ;;  %4011 = vperm.xlu0 %6056, %v9149_v56  }
0x10c7   :  { %6031 = vset.pattern.permute.xlu1 %v10823_v2  ;;  %6057 = vset.pattern.permute.xlu0 %v10811_v27 }
0x10c8   :  { %4371 = vperm.xlu1 %6031, %v9145_v0   ;;  %4075 = vperm.xlu0 %6057, %v9149_v56  }
0x10cc   :  { %6032 = vset.pattern.permute.xlu1 %v10824_v57  ;;  %6059 = vset.pattern.permute.xlu0 %v10816_v33 }
0x10cd   :  { %4411 = vperm.xlu1 %6032, %v9145_v0   ;;  %4155 = vperm.xlu0 %6059, %v9149_v56  }
0x10d1   :  { %6033 = vset.pattern.permute.xlu1 %v10825_v58  ;;  %6060 = vset.pattern.permute.xlu0 %v10818_v59 }
0x10d2   :  { %4451 = vperm.xlu1 %6033, %v9145_v0   ;;  %4219 = vperm.xlu0 %6060, %v9149_v56  }
0x10d6   :  { %6034 = vset.pattern.permute.xlu1 %v10826_v32  ;;  %6062 = vset.pattern.permute.xlu0 %v10822_v49 }
0x10d7   :  { %4515 = vperm.xlu1 %6034, %v9145_v0   ;;  %4299 = vperm.xlu0 %6062, %v9149_v56  }
0x10db   :  { %6035 = vset.pattern.permute.xlu1 %v10827_v20  ;;  %6063 = vset.pattern.permute.xlu0 %v10823_v2 }
0x10dc   :  { %4555 = vperm.xlu1 %6035, %v9145_v0   ;;  %4363 = vperm.xlu0 %6063, %v9149_v56  }
0x10e0   :  { %6036 = vset.pattern.permute.xlu1 %v10828_v36  ;;  %6065 = vset.pattern.permute.xlu0 %v10825_v58 }
0x10e1   :  { %4595 = vperm.xlu1 %6036, %v9145_v0   ;;  %4443 = vperm.xlu0 %6065, %v9149_v56  }
0x10e5   :  { %6037 = vset.pattern.permute.xlu1 %v10829_v39  ;;  %6066 = vset.pattern.permute.xlu0 %v10826_v32 }
0x10e6   :  { %4659 = vperm.xlu1 %6037, %v9145_v0   ;;  %4507 = vperm.xlu0 %6066, %v9149_v56  }
0x10ea   :  { %6038 = vset.pattern.permute.xlu1 %v10830_v43  ;;  %6068 = vset.pattern.permute.xlu0 %v10828_v36 }
0x10eb   :  { %4699 = vperm.xlu1 %6038, %v9145_v0   ;;  %4587 = vperm.xlu0 %6068, %v9149_v56  }
0x10ef   :  { %6039 = vset.pattern.permute.xlu1 %v10831_v1  ;;  %6069 = vset.pattern.permute.xlu0 %v10829_v39 }
0x10f0   :  { %4739 = vperm.xlu1 %6039, %v9145_v0   ;;  %4651 = vperm.xlu0 %6069, %v9149_v56  }
0x10f4   :  { %6040 = vset.pattern.permute.xlu1 %v10832_v34  ;;  %6071 = vset.pattern.permute.xlu0 %v10831_v1 }
0x10f5   :  { %4803 = vperm.xlu1 %6040, %v9145_v0   ;;  %4731 = vperm.xlu0 %6071, %v9149_v56  }
0x10f9   :  { %6041 = vset.pattern.permute.xlu1 %v10833_v26  ;;  %6072 = vset.pattern.permute.xlu0 %v10832_v34 }
0x10fa   :  { %4843 = vperm.xlu1 %6041, %v9145_v0   ;;  %4795 = vperm.xlu0 %6072, %v9149_v56  }
0x10fe   :  { %6042 = vset.pattern.permute.xlu1 %v10834_v9  ;;  %6074 = vset.pattern.permute.xlu0 %v10834_v9 }
0x10ff   :  { %4883 = vperm.xlu1 %6042, %v9145_v0   ;;  %4875 = vperm.xlu0 %6074, %v9149_v56  }
0x1103   :  { %6044 = vset.pattern.permute.xlu1 %v10835_v48  ;;  %6075 = vset.pattern.permute.xlu0 %v10809_v7 }
0x1104   :  { %3918 = vperm.xlu1 %6044, %v9145_v0   ;;  %4939 = vperm.xlu0 %6075, %v9149_v56  }
0x1108   :  { %6046 = vset.pattern.permute.xlu1 %v10836_v22  ;;  %6080 = vset.pattern.permute.xlu0 %v10837_v31 }
0x1109   :  { %5027 = vperm.xlu1 %6046, %v9145_v0   ;;  %4195 = vperm.xlu0 %6080, %v9149_v56  }
0x110d   :  { %6048 = vset.pattern.permute.xlu1 %v10837_v31  ;;  %6082 = vset.pattern.permute.xlu0 %v10838_v17 }
0x110e   :  { %4203 = vperm.xlu1 %6048, %v9145_v0   ;;  %4483 = vperm.xlu0 %6082, %v9149_v56  }
0x1112   :  { %6050 = vset.pattern.permute.xlu1 %v10838_v17  ;;  %6084 = vset.pattern.permute.xlu0 %v10839_v5 }
0x1113   :  { %4491 = vperm.xlu1 %6050, %v9145_v0   ;;  %4771 = vperm.xlu0 %6084, %v9149_v56  }
0x1117   :  { %6052 = vset.pattern.permute.xlu1 %v10839_v5  ;;  %6087 = vset.pattern.permute.xlu0 %v10840_v37 }
0x1118   :  { %4779 = vperm.xlu1 %6052, %v9145_v0   ;;  %3983 = vperm.xlu0 %6087, %v9151_v19  }
0x111c   :  { %6054 = vset.pattern.permute.xlu1 %v10841_v38  ;;  %6090 = vset.pattern.permute.xlu0 %v10814_v35 }
0x111d   :  { %3931 = vperm.xlu1 %6054, %v9149_v56   ;;  %4127 = vperm.xlu0 %6090, %v9151_v19  }
0x111f   :  { %v9259_v54 = vpop.permute.xlu1 %3979  ;;  %v9261_v63 = vpop.permute.xlu0 %3939 }
0x1121   :  { %6055 = vset.pattern.permute.xlu1 %v10840_v37  ;;  %6093 = vset.pattern.permute.xlu0 %v10820_v4 }
0x1122   :  { %3971 = vperm.xlu1 %6055, %v9149_v56   ;;  %4271 = vperm.xlu0 %6093, %v9151_v19  }
0x1124   :  { %v9267_v0 = vpop.permute.xlu1 %4019  ;;  %v9269_v53 = vpop.permute.xlu0 %4947 }
0x1125   :  { %10842 = vst [vmem:[#allocation56_spill] sm:$0xff] %v9267_v0  ;;  %10843 = vst [vmem:[#allocation83_spill] sm:$0xff] %v9269_v53 }
0x1126   :  { %6058 = vset.pattern.permute.xlu1 %v10814_v35  ;;  %6096 = vset.pattern.permute.xlu0 %v10824_v57 }
0x1127   :  { %4115 = vperm.xlu1 %6058, %v9149_v56   ;;  %4415 = vperm.xlu0 %6096, %v9151_v19  }
0x1129   :  { %v9275_v42 = vpop.permute.xlu1 %4083  ;;  %v9277_v52 = vpop.permute.xlu0 %4987 }
0x112a   :  { %10844 = vst [vmem:[#allocation93_spill] sm:$0xff] %v9275_v42  ;;  %10845 = vst [vmem:[#allocation37_spill] sm:$0xff] %v9277_v52 }
0x112b   :  { %6061 = vset.pattern.permute.xlu1 %v10820_v4  ;;  %6099 = vset.pattern.permute.xlu0 %v10827_v20 }
0x112c   :  { %4259 = vperm.xlu1 %6061, %v9149_v56   ;;  %4559 = vperm.xlu0 %6099, %v9151_v19  }
0x112e   :  { %v9283_v15 = vpop.permute.xlu1 %4123  ;;  %v9285_v53 = vpop.permute.xlu0 %4059 }
0x112f   :  { %10846 = vst [vmem:[#allocation77_spill] sm:$0xff] %v9283_v15  ;;  %10847 = vst [vmem:[#allocation75_spill] sm:$0xff] %v9285_v53 }
0x1130   :  { %6064 = vset.pattern.permute.xlu1 %v10824_v57  ;;  %6102 = vset.pattern.permute.xlu0 %v10830_v43 }
0x1131   :  { %4403 = vperm.xlu1 %6064, %v9149_v56   ;;  %4703 = vperm.xlu0 %6102, %v9151_v19  }
0x1133   :  { %v9291_v52 = vpop.permute.xlu1 %4163  ;;  %v9293_v14 = vpop.permute.xlu0 %4347 }
0x1134   :  { %10848 = vst [vmem:[#allocation65_spill] sm:$0xff] %v9293_v14 }
0x1135   :  { %6067 = vset.pattern.permute.xlu1 %v10827_v20  ;;  %6105 = vset.pattern.permute.xlu0 %v10833_v26 }
0x1136   :  { %4547 = vperm.xlu1 %6067, %v9149_v56   ;;  %4847 = vperm.xlu0 %6105, %v9151_v19  }
0x1138   :  { %v9299_v53 = vpop.permute.xlu1 %4227  ;;  %v9301_v30 = vpop.permute.xlu0 %4635 }
0x1139   :  { %10849 = vst [vmem:[#allocation45_spill] sm:$0xff] %v9301_v30 }
0x113a   :  { %6070 = vset.pattern.permute.xlu1 %v10830_v43  ;;  %6112 = vset.pattern.permute.xlu0 %v10837_v31 }
0x113b   :  { %4691 = vperm.xlu1 %6070, %v9149_v56   ;;  %4207 = vperm.xlu0 %6112, %v9151_v19  }
0x113d   :  { %v9307_v14 = vpop.permute.xlu1 %4267  ;;  %v9309_v3 = vpop.permute.xlu0 %4923 }
0x113e   :  { %10850 = vst [vmem:[#allocation81_spill] sm:$0xff] %v9307_v14  ;;  %10851 = vst [vmem:[#allocation89_spill] sm:$0xff] %v9309_v3 }
0x113f   :  { %6073 = vset.pattern.permute.xlu1 %v10833_v26  ;;  %6114 = vset.pattern.permute.xlu0 %v10838_v17 }
0x1140   :  { %4835 = vperm.xlu1 %6073, %v9149_v56   ;;  %4495 = vperm.xlu0 %6114, %v9151_v19  }
0x1142   :  { %v9315_v30 = vpop.permute.xlu1 %4307  ;;  %v9317_v8 = vpop.permute.xlu0 %4011 }
0x1143   :  { %10852 = vst [vmem:[#allocation76_spill] sm:$0xff] %v9315_v30 }
0x1144   :  { %6076 = vset.pattern.permute.xlu1 %v10835_v48  ;;  %6116 = vset.pattern.permute.xlu0 %v10839_v5 }
0x1145   :  { %3908 = vperm.xlu1 %6076, %v9149_v56   ;;  %4783 = vperm.xlu0 %6116, %v9151_v19  }
0x1147   :  { %v9323_v3 = vpop.permute.xlu1 %4371  ;;  %v9325_v40 = vpop.permute.xlu0 %4075 }
0x1148   :  { %10853 = vst [vmem:[#allocation68_spill] sm:$0xff] %v9323_v3  ;;  %10854 = vst [vmem:[#allocation28_spill] sm:$0xff] %v9325_v40 }
0x1149   :  { %6077 = vset.pattern.permute.xlu1 %v10812_v61  ;;  %6118 = vset.pattern.permute.xlu0 %v10841_v38 }
0x114a   :  { %4979 = vperm.xlu1 %6077, %v9149_v56   ;;  %3935 = vperm.xlu0 %6118, %v9153_v41  }
0x114c   :  { %v9331_v6 = vpop.permute.xlu1 %4411  ;;  %v9333_v44 = vpop.permute.xlu0 %4155 }
0x114d   :  { %10855 = vst [vmem:[#allocation52_spill] sm:$0xff] %v9331_v6  ;;  %10856 = vst [vmem:[#allocation98_spill] sm:$0xff] %v9333_v44 }
0x114e   :  { %6078 = vset.pattern.permute.xlu1 %v10836_v22  ;;  %6122 = vset.pattern.permute.xlu0 %v10814_v35 }
0x114f   :  { %5019 = vperm.xlu1 %6078, %v9149_v56   ;;  %4119 = vperm.xlu0 %6122, %v9153_v41  }
0x1151   :  { %v9339_v40 = vpop.permute.xlu1 %4451  ;;  %v9341_v3 = vpop.permute.xlu0 %4219 }
0x1153   :  { %6079 = vset.pattern.permute.xlu1 %v10815_v25  ;;  %6125 = vset.pattern.permute.xlu0 %v10820_v4 }
0x1154   :  { %4051 = vperm.xlu1 %6079, %v9149_v56   ;;  %4263 = vperm.xlu0 %6125, %v9153_v41  }
0x1156   :  { %v9347_v44 = vpop.permute.xlu1 %4515  ;;  %v9349_v6 = vpop.permute.xlu0 %4299 }
0x1158   :  { %6081 = vset.pattern.permute.xlu1 %v10817_v23  ;;  %6128 = vset.pattern.permute.xlu0 %v10824_v57 }
0x1159   :  { %4339 = vperm.xlu1 %6081, %v9149_v56   ;;  %4407 = vperm.xlu0 %6128, %v9153_v41  }
0x115b   :  { %v9355_v35 = vpop.permute.xlu1 %4555  ;;  %v9357_v30 = vpop.permute.xlu0 %4363 }
0x115c   :  { %10857 = vst [vmem:[#allocation92_spill] sm:$0xff] %v9355_v35  ;;  %10858 = vst [vmem:[#allocation78_spill] sm:$0xff] %v9357_v30 }
0x115d   :  { %6083 = vset.pattern.permute.xlu1 %v10819_v21  ;;  %6131 = vset.pattern.permute.xlu0 %v10827_v20 }
0x115e   :  { %4627 = vperm.xlu1 %6083, %v9149_v56   ;;  %4551 = vperm.xlu0 %6131, %v9153_v41  }
0x1160   :  { %v9363_v4 = vpop.permute.xlu1 %4595  ;;  %v9365_v14 = vpop.permute.xlu0 %4443 }
0x1161   :  { %10859 = vst [vmem:[#allocation57_spill] sm:$0xff] %v9363_v4  ;;  %10860 = vst [vmem:[#allocation96_spill] sm:$0xff] %v9365_v14 }
0x1162   :  { %6085 = vset.pattern.permute.xlu1 %v10821_v29  ;;  %6134 = vset.pattern.permute.xlu0 %v10830_v43 }
0x1163   :  { %4915 = vperm.xlu1 %6085, %v9149_v56   ;;  %4695 = vperm.xlu0 %6134, %v9153_v41  }
0x1165   :  { %v9371_v57 = vpop.permute.xlu1 %4659  ;;  %v9373_v30 = vpop.permute.xlu0 %4507 }
0x1166   :  { %10861 = vst [vmem:[#allocation99_spill] sm:$0xff] %v9371_v57 }
0x1167   :  { %6086 = vset.pattern.permute.xlu1 %v10841_v38  ;;  %6137 = vset.pattern.permute.xlu0 %v10833_v26 }
0x1168   :  { %3943 = vperm.xlu1 %6086, %v9151_v19   ;;  %4839 = vperm.xlu0 %6137, %v9153_v41  }
0x116a   :  { %v9379_v20 = vpop.permute.xlu1 %4699  ;;  %v9381_v14 = vpop.permute.xlu0 %4587 }
0x116b   :  { %10862 = vst [vmem:[#allocation47_spill] sm:$0xff] %v9379_v20 }
0x116c   :  { %6088 = vset.pattern.permute.xlu1 %v10808_v60  ;;  %6140 = vset.pattern.permute.xlu0 %v10835_v48 }
0x116d   :  { %4023 = vperm.xlu1 %6088, %v9151_v19   ;;  %3913 = vperm.xlu0 %6140, %v9153_v41  }
0x116f   :  { %v4740_v56 = vpop.permute.xlu1 %4739  ;;  %v9387_v38 = vpop.permute.xlu0 %4651 }
0x1170   :  { %10863 = vst [vmem:[#allocation49_spill] sm:$0xff] %v9387_v38 }
0x1171   :  { %6089 = vset.pattern.permute.xlu1 %v10811_v27  ;;  %6142 = vset.pattern.permute.xlu0 %v10836_v22 }
0x1172   :  { %4087 = vperm.xlu1 %6089, %v9151_v19   ;;  %5023 = vperm.xlu0 %6142, %v9153_v41  }
0x1174   :  { %v4804_v26 = vpop.permute.xlu1 %4803  ;;  %v9393_v43 = vpop.permute.xlu0 %4731 }
0x1175   :  { %10864 = vst [vmem:[#allocation100_spill] sm:$0xff] %v9393_v43 }
0x1176   :  { %6091 = vset.pattern.permute.xlu1 %v10816_v33  ;;  %6143 = vset.pattern.permute.xlu0 %v10815_v25 }
0x1177   :  { %4167 = vperm.xlu1 %6091, %v9151_v19   ;;  %4055 = vperm.xlu0 %6143, %v9153_v41  }
0x1179   :  { %v4844_v38 = vpop.permute.xlu1 %4843  ;;  %v9399_v20 = vpop.permute.xlu0 %4795 }
0x117b   :  { %6092 = vset.pattern.permute.xlu1 %v10818_v59  ;;  %6145 = vset.pattern.permute.xlu0 %v10817_v23 }
0x117c   :  { %4231 = vperm.xlu1 %6092, %v9151_v19   ;;  %4343 = vperm.xlu0 %6145, %v9153_v41  }
0x117e   :  { %v9405_v43 = vpop.permute.xlu1 %4883  ;;  %v9407_v57 = vpop.permute.xlu0 %4875 }
0x117f   :  { %10865 = vst [vmem:[#allocation88_spill] sm:$0xff] %v9405_v43  ;;  %v3948_v43 = vmul.f32 %v9261_v63, %v7269_v12  ;;  %v4236_v63 = vmul.f32 %v9299_v53, %v7295_v18 }
0x1180   :  { %6094 = vset.pattern.permute.xlu1 %v10822_v49  ;;  %6147 = vset.pattern.permute.xlu0 %v10819_v21 }
0x1181   :  { %4311 = vperm.xlu1 %6094, %v9151_v19   ;;  %4631 = vperm.xlu0 %6147, %v9153_v41  }
0x1183   :  { %v9413_v4 = vpop.permute.xlu1 %3918  ;;  %v9415_v35 = vpop.permute.xlu0 %4939 }
0x1184   :  { %10866 = vst [vmem:[#allocation90_spill] sm:$0xff] %v9413_v4  ;;  %10867 = vst [vmem:[#allocation73_spill] sm:$0xff] %v9415_v35  ;;  %v4172_v4 = vmul.f32 %v9291_v52, %v7281_v28  ;;  %v4460_v52 = vmul.f32 %v9339_v40, %v10740_v62  ;;  %v4748_v40 = vmul.f32 %v4740_v56, %v10761_v45 }
0x1185   :  { %6095 = vset.pattern.permute.xlu1 %v10823_v2  ;;  %6149 = vset.pattern.permute.xlu0 %v10821_v29 }
0x1186   :  { %4375 = vperm.xlu1 %6095, %v9151_v19   ;;  %4919 = vperm.xlu0 %6149, %v9153_v41  }
0x1188   :  { %v9423_v15 = vpop.permute.xlu1 %5027  ;;  %v9425_v42 = vpop.permute.xlu0 %4195 }
0x1189   :  { %10868 = vst [vmem:[#allocation87_spill] sm:$0xff] %v9423_v15  ;;  %10869 = vst [vmem:[#allocation91_spill] sm:$0xff] %v9425_v42 }
0x118a   :  { %6097 = vset.pattern.permute.xlu1 %v10825_v58  ;;  %3958 = vrot.lane.b32.xlu0 %v3948_v43, %s6532_s3 }
0x118b   :  { %4455 = vperm.xlu1 %6097, %v9151_v19   ;;  %6151 = vset.pattern.permute.xlu0 %v10835_v48 }
0x118d   :  { %v9433_v35 = vpop.permute.xlu1 %4203  ;;  %v9435_v0 = vpop.permute.xlu0 %4483 }
0x118e   :  { %10870 = vst [vmem:[#allocation55_spill] sm:$0xff] %v9433_v35  ;;  %10871 = vst [vmem:[#allocation44_spill] sm:$0xff] %v9435_v0  ;;  %4182 = vrot.lane.b32.xlu0 %v4172_v4, %s6533_s13  ;;  %v4524_v0 = vmul.f32 %v9347_v44, %v10747_v55 }
0x118f   :  { %6098 = vset.pattern.permute.xlu1 %v10826_v32 }
0x1190   :  { %4519 = vperm.xlu1 %6098, %v9151_v19  }
0x1192   :  { %v9442_v43 = vpop.permute.xlu1 %4491  ;;  %v9444_v42 = vpop.permute.xlu0 %4771  ;;  %4246 = vrot.lane.b32.xlu0 %v4236_v63, %s6532_s3 }
0x1193   :  { %10872 = vst [vmem:[#allocation86_spill] sm:$0xff] %v9442_v43  ;;  %10873 = vst [vmem:[#allocation84_spill] sm:$0xff] %v9444_v42 }
0x1194   :  { %6100 = vset.pattern.permute.xlu1 %v10828_v36 }
0x1195   :  { %4599 = vperm.xlu1 %6100, %v9151_v19  }
0x1196   :  { %4470 = vrot.lane.b32.xlu0 %v4460_v52, %s6533_s13  ;;  %v4812_v52 = vmul.f32 %v4804_v26, %v10777_v10 }
0x1197   :  { %v9452_v4 = vpop.permute.xlu1 %4779  ;;  %v9454_v53 = vpop.permute.xlu0 %3983 }
0x1198   :  { %10874 = vst [vmem:[#allocation64_spill] sm:$0xff] %v9452_v4 }
0x1199   :  { %6101 = vset.pattern.permute.xlu1 %v10829_v39 }
0x119a   :  { %4663 = vperm.xlu1 %6101, %v9151_v19   ;;  %4534 = vrot.lane.b32.xlu0 %v4524_v0, %s6532_s3  ;;  %v4852_v0 = vmul.f32 %v4844_v38, %v10777_v10 }
0x119c   :  { %v3932_v63 = vpop.permute.xlu1 %3931  ;;  %v9462_v42 = vpop.permute.xlu0 %4127 }
0x119e   :  { %6103 = vset.pattern.permute.xlu1 %v10831_v1  ;;  %4758 = vrot.lane.b32.xlu0 %v4748_v40, %s6533_s13  ;;  %v10876_v40 = vld [vmem:[#allocation82_spill] sm:$0xff] }
0x119f   :  { %4743 = vperm.xlu1 %6103, %v9151_v19   ;;  %v3946_v35 = vmul.f32 %v3932_v63, %v10876_v40  ;;  %v4026_v63 = vmul.f32 %v9317_v8, %v10876_v40 }
0x11a1   :  { %v3972_v44 = vpop.permute.xlu1 %3971  ;;  %v9468_v4 = vpop.permute.xlu0 %4271 }
0x11a2   :  { %4822 = vrot.lane.b32.xlu0 %v4812_v52, %s6532_s3  ;;  %v3986_v38 = vmul.f32 %v3972_v44, %v10876_v40 }
0x11a3   :  { %6104 = vset.pattern.permute.xlu1 %v10832_v34 }
0x11a4   :  { %4807 = vperm.xlu1 %6104, %v9151_v19  }
0x11a6   :  { %v9474_v56 = vpop.permute.xlu1 %4115  ;;  %v9476_v43 = vpop.permute.xlu0 %4415  ;;  %4862 = vrot.lane.b32.xlu0 %v4852_v0, %s6491_s0 }
0x11a7   :  { %10875 = vst [vmem:[#allocation97_spill] sm:$0xff] %v9476_v43 }
0x11a8   :  { %6106 = vset.pattern.permute.xlu1 %v10834_v9 }
0x11a9   :  { %4887 = vperm.xlu1 %6106, %v9151_v19  }
0x11aa   :  { %3954 = vrot.lane.b32.xlu0 %v3946_v35, %s6532_s3  ;;  %v4234_v35 = vmul.f32 %v9341_v3, %v7373_v11  ;;  %v4314_v3 = vmul.f32 %v9349_v6, %v7373_v11 }
0x11ab   :  { %v4260_v26 = vpop.permute.xlu1 %4259  ;;  %v9483_v52 = vpop.permute.xlu0 %4559 }
0x11ac   :  { %v4274_v8 = vmul.f32 %v4260_v26, %v7373_v11  ;;  %v4522_v26 = vmul.f32 %v9373_v30, %v10744_v13  ;;  %v4602_v30 = vmul.f32 %v9381_v14, %v10744_v13 }
0x11ad   :  { %6107 = vset.pattern.permute.xlu1 %v10809_v7 }
0x11ae   :  { %4951 = vperm.xlu1 %6107, %v9151_v19   ;;  %3994 = vrot.lane.b32.xlu0 %v3986_v38, %s6491_s0 }
0x11b0   :  { %v9491_v0 = vpop.permute.xlu1 %4403  ;;  %v9493_v15 = vpop.permute.xlu0 %4703 }
0x11b1   :  { %10877 = vst [vmem:[#allocation66_spill] sm:$0xff] %v9493_v15 }
0x11b2   :  { %6108 = vset.pattern.permute.xlu1 %v10835_v48  ;;  %4034 = vrot.lane.b32.xlu0 %v4026_v63, %s6533_s13 }
0x11b3   :  { %3923 = vperm.xlu1 %6108, %v9151_v19  }
0x11b5   :  { %v4548_v44 = vpop.permute.xlu1 %4547  ;;  %v9500_v43 = vpop.permute.xlu0 %4847 }
0x11b6   :  { %4242 = vrot.lane.b32.xlu0 %v4234_v35, %s6532_s3  ;;  %v4562_v6 = vmul.f32 %v4548_v44, %v10744_v13  ;;  %v4810_v44 = vmul.f32 %v9399_v20, %v10769_v16  ;;  %v4890_v20 = vmul.f32 %v9407_v57, %v10769_v16 }
0x11b7   :  { %6109 = vset.pattern.permute.xlu1 %v10812_v61 }
0x11b8   :  { %4991 = vperm.xlu1 %6109, %v9151_v19  }
0x11ba   :  { %v9506_v38 = vpop.permute.xlu1 %4691  ;;  %v9508_v15 = vpop.permute.xlu0 %4207  ;;  %4282 = vrot.lane.b32.xlu0 %v4274_v8, %s6491_s0 }
0x11bb   :  { %10878 = vst [vmem:[#allocation62_spill] sm:$0xff] %v9508_v15  ;;  %v10908_v15 = vld [vmem:[#allocation30_spill] sm:$0xff] }
0x11bc   :  { %6110 = vset.pattern.permute.xlu1 %v10836_v22 }
0x11bd   :  { %5031 = vperm.xlu1 %6110, %v9151_v19  }
0x11be   :  { %4322 = vrot.lane.b32.xlu0 %v4314_v3, %s6533_s13 }
0x11bf   :  { %v4836_v63 = vpop.permute.xlu1 %4835  ;;  %v9516_v35 = vpop.permute.xlu0 %4495 }
0x11c0   :  { %10879 = vst [vmem:[#allocation70_spill] sm:$0xff] %v9516_v35  ;;  %v4850_v14 = vmul.f32 %v4836_v63, %v10769_v16  ;;  %v10881_v63 = vld [vmem:[#allocation36_spill] sm:$0xff] }
0x11c1   :  { %6111 = vset.pattern.permute.xlu1 %v10815_v25 }
0x11c2   :  { %4063 = vperm.xlu1 %6111, %v9151_v19   ;;  %4530 = vrot.lane.b32.xlu0 %v4522_v26, %s6532_s3 }
0x11c4   :  { %v9524_v8 = vpop.permute.xlu1 %3908  ;;  %v9526_v22 = vpop.permute.xlu0 %4783 }
0x11c5   :  { %10880 = vst [vmem:[#allocation95_spill] sm:$0xff] %v9526_v22 }
0x11c6   :  { %6113 = vset.pattern.permute.xlu1 %v10817_v23  ;;  %4570 = vrot.lane.b32.xlu0 %v4562_v6, %s6491_s0 }
0x11c7   :  { %4351 = vperm.xlu1 %6113, %v9151_v19  }
0x11c9   :  { %v9533_v25 = vpop.permute.xlu1 %4979  ;;  %v9535_v3 = vpop.permute.xlu0 %3935 }
0x11ca   :  { %4610 = vrot.lane.b32.xlu0 %v4602_v30, %s6533_s13 }
0x11cb   :  { %6115 = vset.pattern.permute.xlu1 %v10819_v21 }
0x11cc   :  { %4639 = vperm.xlu1 %6115, %v9151_v19  }
0x11ce   :  { %v9542_v23 = vpop.permute.xlu1 %5019  ;;  %4818 = vrot.lane.b32.xlu0 %v4810_v44, %s6532_s3  ;;  %v9545_v26 = vpop.permute.xlu0 %4119 }
0x11d0   :  { %6117 = vset.pattern.permute.xlu1 %v10821_v29  ;;  %v3989_v29 = vmul.f32 %v9454_v53, %v10881_v63 }
0x11d1   :  { %4927 = vperm.xlu1 %6117, %v9151_v19  }
0x11d2   :  { %4858 = vrot.lane.b32.xlu0 %v4850_v14, %s6491_s0 }
0x11d3   :  { %v9551_v21 = vpop.permute.xlu1 %4051  ;;  %v9553_v6 = vpop.permute.xlu0 %4263 }
0x11d5   :  { %6119 = vset.pattern.permute.xlu1 %v10840_v37 }
0x11d6   :  { %3975 = vperm.xlu1 %6119, %v9153_v41   ;;  %4898 = vrot.lane.b32.xlu0 %v4890_v20, %s6533_s13 }
0x11d8   :  { %v9562_v30 = vpop.permute.xlu1 %4339  ;;  %v9564_v19 = vpop.permute.xlu0 %4407 }
0x11da   :  { %6120 = vset.pattern.permute.xlu1 %v10808_v60  ;;  %4000 = vrot.lane.b32.xlu0 %v3989_v29, %s6491_s0 }
0x11db   :  { %4015 = vperm.xlu1 %6120, %v9153_v41  }
0x11dd   :  { %v9569_v57 = vpop.permute.xlu1 %4627  ;;  %v9571_v37 = vpop.permute.xlu0 %4551 }
0x11df   :  { %6121 = vset.pattern.permute.xlu1 %v10811_v27 }
0x11e0   :  { %4079 = vperm.xlu1 %6121, %v9153_v41  }
0x11e2   :  { %v9575_v44 = vpop.permute.xlu1 %4915  ;;  %v9577_v53 = vpop.permute.xlu0 %4695 }
0x11e3   :  { %10882 = vst [vmem:[#allocation39_spill] sm:$0xff] %v9575_v44 }
0x11e4   :  { %6123 = vset.pattern.permute.xlu1 %v10816_v33 }
0x11e5   :  { %4159 = vperm.xlu1 %6123, %v9153_v41  }
0x11e7   :  { %v9581_v60 = vpop.permute.xlu1 %3943  ;;  %v9583_v14 = vpop.permute.xlu0 %4839 }
0x11e9   :  { %6124 = vset.pattern.permute.xlu1 %v10818_v59  ;;  %v4277_v59 = vmul.f32 %v9468_v4, %v6938_v46 }
0x11ea   :  { %4223 = vperm.xlu1 %6124, %v9153_v41  }
0x11ec   :  { %v4024_v20 = vpop.permute.xlu1 %4023  ;;  %v9587_v27 = vpop.permute.xlu0 %3913 }
0x11ed   :  { %10883 = vst [vmem:[#allocation50_spill] sm:$0xff] %v9587_v27  ;;  %v4029_v29 = vmul.f32 %v4024_v20, %v10881_v63 }
0x11ee   :  { %6126 = vset.pattern.permute.xlu1 %v10822_v49 }
0x11ef   :  { %4303 = vperm.xlu1 %6126, %v9153_v41   ;;  %4040 = vrot.lane.b32.xlu0 %v4029_v29, %s6533_s13 }
0x11f1   :  { %v4088_v33 = vpop.permute.xlu1 %4087  ;;  %v9593_v44 = vpop.permute.xlu0 %5023 }
0x11f2   :  { %v4093_v16 = vmul.f32 %v4088_v33, %v6941_v50 }
0x11f3   :  { %6127 = vset.pattern.permute.xlu1 %v10823_v2 }
0x11f4   :  { %4367 = vperm.xlu1 %6127, %v9153_v41   ;;  %4104 = vrot.lane.b32.xlu0 %v4093_v16, %s6532_s3 }
0x11f6   :  { %v9601_v20 = vpop.permute.xlu1 %4167  ;;  %v9603_v49 = vpop.permute.xlu0 %4055 }
0x11f7   :  { %10884 = vst [vmem:[#allocation59_spill] sm:$0xff] %v9603_v49 }
0x11f8   :  { %6129 = vset.pattern.permute.xlu1 %v10825_v58  ;;  %4288 = vrot.lane.b32.xlu0 %v4277_v59, %s6491_s0 }
0x11f9   :  { %4447 = vperm.xlu1 %6129, %v9153_v41  }
0x11fb   :  { %v9608_v29 = vpop.permute.xlu1 %4231  ;;  %v9610_v2 = vpop.permute.xlu0 %4343 }
0x11fc   :  { %10885 = vst [vmem:[#allocation53_spill] sm:$0xff] %v9610_v2 }
0x11fd   :  { %6130 = vset.pattern.permute.xlu1 %v10826_v32 }
0x11fe   :  { %4511 = vperm.xlu1 %6130, %v9153_v41  }
0x1200   :  { %v4312_v16 = vpop.permute.xlu1 %4311  ;;  %v9614_v4 = vpop.permute.xlu0 %4631 }
0x1201   :  { %10886 = vst [vmem:[#allocation54_spill] sm:$0xff] %v9614_v4  ;;  %v4317_v33 = vmul.f32 %v4312_v16, %v6938_v46 }
0x1202   :  { %6132 = vset.pattern.permute.xlu1 %v10828_v36  ;;  %v4565_v36 = vmul.f32 %v9483_v52, %v10750_v24 }
0x1203   :  { %4591 = vperm.xlu1 %6132, %v9153_v41   ;;  %4328 = vrot.lane.b32.xlu0 %v4317_v33, %s6533_s13 }
0x1205   :  { %v4376_v58 = vpop.permute.xlu1 %4375  ;;  %v9620_v59 = vpop.permute.xlu0 %4919 }
0x1206   :  { %10887 = vst [vmem:[#allocation61_spill] sm:$0xff] %v9620_v59  ;;  %v4381_v2 = vmul.f32 %v4376_v58, %v6944_v51 }
0x1207   :  { %6133 = vset.pattern.permute.xlu1 %v10829_v39 }
0x1208   :  { %4655 = vperm.xlu1 %6133, %v9153_v41   ;;  %4392 = vrot.lane.b32.xlu0 %v4381_v2, %s6532_s3 }
0x1209   :  { %v9626_v32 = vpop.permute.xlu0 %3958 }
0x120a   :  { %v9630_v16 = vpop.permute.xlu1 %4455 }
0x120c   :  { %6135 = vset.pattern.permute.xlu1 %v10831_v1  ;;  %4576 = vrot.lane.b32.xlu0 %v4565_v36, %s6491_s0 }
0x120d   :  { %4735 = vperm.xlu1 %6135, %v9153_v41   ;;  %v9635_v33 = vpop.permute.xlu0 %4182 }
0x120f   :  { %v9637_v39 = vpop.permute.xlu1 %4519 }
0x1211   :  { %6136 = vset.pattern.permute.xlu1 %v10832_v34  ;;  %v9640_v2 = vpop.permute.xlu0 %4246 }
0x1212   :  { %4799 = vperm.xlu1 %6136, %v9153_v41  }
0x1214   :  { %v4600_v58 = vpop.permute.xlu1 %4599 }
0x1215   :  { %v4605_v52 = vmul.f32 %v4600_v58, %v10750_v24  ;;  %v9644_v59 = vpop.permute.xlu0 %4470 }
0x1216   :  { %6138 = vset.pattern.permute.xlu1 %v10834_v9 }
0x1217   :  { %4879 = vperm.xlu1 %6138, %v9153_v41   ;;  %4616 = vrot.lane.b32.xlu0 %v4605_v52, %s6533_s13 }
0x1219   :  { %v4664_v1 = vpop.permute.xlu1 %4663  ;;  %v9649_v36 = vpop.permute.xlu0 %4534 }
0x121a   :  { %v4669_v34 = vmul.f32 %v4664_v1, %v10766_v47 }
0x121b   :  { %6139 = vset.pattern.permute.xlu1 %v10809_v7 }
0x121c   :  { %4943 = vperm.xlu1 %6139, %v9153_v41   ;;  %4680 = vrot.lane.b32.xlu0 %v4669_v34, %s6532_s3 }
0x121d   :  { %v9655_v58 = vpop.permute.xlu0 %4758 }
0x121e   :  { %10888 = vst [vmem:[#allocation71_spill] sm:$0xff] %v9655_v58  ;;  %v9657_v4 = vpop.permute.xlu1 %4743  ;;  %v3926_v58 = vmul.f32 %v9524_v8, %v10876_v40 }
0x1220   :  { %6141 = vset.pattern.permute.xlu1 %v10812_v61 }
0x1221   :  { %4983 = vperm.xlu1 %6141, %v9153_v41   ;;  %v9661_v9 = vpop.permute.xlu0 %4822 }
0x1222   :  { %10889 = vst [vmem:[#allocation60_spill] sm:$0xff] %v9661_v9 }
0x1223   :  { %v9663_v52 = vpop.permute.xlu1 %4807 }
0x1225   :  { %6144 = vset.pattern.permute.xlu1 %v10837_v31  ;;  %v9666_v1 = vpop.permute.xlu0 %4862 }
0x1226   :  { %10890 = vst [vmem:[#allocation82_spill] sm:$0xff] %v9666_v1  ;;  %4199 = vperm.xlu1 %6144, %v9153_v41   ;;  %v3988_v1 = vmul.f32 %v9259_v54, %v7269_v12  ;;  %v10894_v54 = vld [vmem:[#allocation77_spill] sm:$0xff] }
0x1228   :  { %v9669_v7 = vpop.permute.xlu1 %4887 }
0x1229   :  { %v3955_v34 = vpop.permute.xlu0 %3954 }
0x122a   :  { %6146 = vset.pattern.permute.xlu1 %v10838_v17  ;;  %v3966_v61 = vadd.f32 %v3955_v34, %v3926_v58  ;;  %v10892_v17 = vld [vmem:[#allocation56_spill] sm:$0xff] }
0x122b   :  { %4487 = vperm.xlu1 %6146, %v9153_v41   ;;  %v4028_v8 = vmul.f32 %v10892_v17, %v7269_v12 }
0x122d   :  { %v9675_v9 = vpop.permute.xlu1 %4951  ;;  %v3995_v49 = vpop.permute.xlu0 %3994 }
0x122e   :  { %v4006_v27 = vadd.f32 %v3995_v49, %v3966_v61  ;;  %v10897_v61 = vld [vmem:[#allocation76_spill] sm:$0xff] }
0x122f   :  { %6148 = vset.pattern.permute.xlu1 %v10839_v5 }
0x1230   :  { %4775 = vperm.xlu1 %6148, %v9153_v41   ;;  %v10893_v41 = vld [vmem:[#allocation93_spill] sm:$0xff] }
0x1231   :  { %v4035_v31 = vpop.permute.xlu0 %4034  ;;  %v4092_v5 = vmul.f32 %v10893_v41, %v7281_v28 }
0x1232   :  { %v9681_v22 = vadd.f32 %v4035_v31, %v4006_v27  ;;  %v9683_v40 = vpop.permute.xlu1 %3923  ;;  %v4132_v27 = vmul.f32 %v10894_v54, %v7281_v28  ;;  %v4316_v31 = vmul.f32 %v10897_v61, %v7295_v18  ;;  %v10901_v54 = vld [vmem:[#allocation52_spill] sm:$0xff] }
0x1233   :  { %10891 = vst [vmem:[#allocation36_spill] sm:$0xff] %v9683_v40 }
0x1234   :  { %3998 = vrot.lane.b32.xlu1 %v3988_v1, %s6491_s0  ;;  %v10896_v1 = vld [vmem:[#allocation81_spill] sm:$0xff] }
0x1235   :  { %6150 = vset.pattern.permute.xlu1 %v10835_v48  ;;  %v4276_v34 = vmul.f32 %v10896_v1, %v7295_v18 }
0x1237   :  { %v9689_v49 = vpop.permute.xlu1 %4991 }
0x1238   :  { %4038 = vrot.lane.b32.xlu1 %v4028_v8, %s6533_s13  ;;  %v10899_v8 = vld [vmem:[#allocation68_spill] sm:$0xff] }
0x1239   :  { %v4380_v41 = vmul.f32 %v10899_v8, %v10740_v62  ;;  %v10904_v8 = vld [vmem:[#allocation57_spill] sm:$0xff] }
0x123a   :  { %v4604_v35 = vmul.f32 %v10904_v8, %v10747_v55 }
0x123c   :  { %v9694_v58 = vpop.permute.xlu1 %5031  ;;  %4102 = vrot.lane.b32.xlu1 %v4092_v5, %s6532_s3 }
0x1240   :  { %4142 = vrot.lane.b32.xlu1 %v4132_v27, %s6491_s0  ;;  %v4420_v27 = vmul.f32 %v10901_v54, %v10740_v62 }
0x1241   :  { %v9700_v48 = vpop.permute.xlu1 %4063 }
0x1242   :  { %10895 = vst [vmem:[#allocation56_spill] sm:$0xff] %v9700_v48  ;;  %v10909_v48 = vld [vmem:[#allocation28_spill] sm:$0xff] }
0x1243   :  { %v4090_v8 = vmul.f32 %v10909_v48, %v10908_v15  ;;  %v10910_v48 = vld [vmem:[#allocation98_spill] sm:$0xff] }
0x1244   :  { %4286 = vrot.lane.b32.xlu1 %v4276_v34, %s6491_s0  ;;  %v10903_v34 = vld [vmem:[#allocation92_spill] sm:$0xff] }
0x1245   :  { %v4564_v61 = vmul.f32 %v10903_v34, %v10747_v55 }
0x1246   :  { %v9707_v17 = vpop.permute.xlu1 %4351 }
0x1247   :  { %10898 = vst [vmem:[#allocation93_spill] sm:$0xff] %v9707_v17  ;;  %v10907_v17 = vld [vmem:[#allocation34_spill] sm:$0xff] }
0x1248   :  { %4326 = vrot.lane.b32.xlu1 %v4316_v31, %s6533_s13 }
0x124b   :  { %v9712_v5 = vpop.permute.xlu1 %4639 }
0x124c   :  { %10900 = vst [vmem:[#allocation77_spill] sm:$0xff] %v9712_v5  ;;  %4390 = vrot.lane.b32.xlu1 %v4380_v41, %s6532_s3  ;;  %v10905_v41 = vld [vmem:[#allocation99_spill] sm:$0xff] }
0x124d   :  { %v4668_v5 = vmul.f32 %v10905_v41, %v10761_v45 }
0x1250   :  { %v9717_v1 = vpop.permute.xlu1 %4927  ;;  %4430 = vrot.lane.b32.xlu1 %v4420_v27, %s6491_s0  ;;  %v10906_v27 = vld [vmem:[#allocation47_spill] sm:$0xff] }
0x1251   :  { %10902 = vst [vmem:[#allocation81_spill] sm:$0xff] %v9717_v1  ;;  %v4708_v1 = vmul.f32 %v10906_v27, %v10761_v45 }
0x1254   :  { %4574 = vrot.lane.b32.xlu1 %v4564_v61, %s6491_s0 }
0x1255   :  { %v9723_v31 = vpop.permute.xlu1 %3975 }
0x1258   :  { %4614 = vrot.lane.b32.xlu1 %v4604_v35, %s6533_s13  ;;  %v4131_v35 = vmul.f32 %v9545_v26, %v10907_v17  ;;  %v10911_v26 = vld [vmem:[#allocation88_spill] sm:$0xff] }
0x125a   :  { %v9730_v54 = vpop.permute.xlu1 %4015 }
0x125c   :  { %4678 = vrot.lane.b32.xlu1 %v4668_v5, %s6532_s3  ;;  %v4130_v5 = vmul.f32 %v9474_v56, %v10908_v15  ;;  %v10913_v56 = vld [vmem:[#allocation78_spill] sm:$0xff] }
0x125f   :  { %v4080_v34 = vpop.permute.xlu1 %4079 }
0x1260   :  { %v4091_v61 = vmul.f32 %v4080_v34, %v10907_v17  ;;  %4718 = vrot.lane.b32.xlu1 %v4708_v1, %s6491_s0  ;;  %v4170_v34 = vmul.f32 %v10910_v48, %v10908_v15  ;;  %v10914_v48 = vld [vmem:[#allocation35_spill] sm:$0xff] }
0x1262   :  { %4100 = vrot.lane.b32.xlu0 %v4091_v61, %s6532_s3  ;;  %v4892_v61 = vmul.f32 %v10911_v26, %v10777_v10  ;;  %v10915_v26 = vld [vmem:[#allocation96_spill] sm:$0xff]  ;;  %v10917_v10 = vld [vmem:[#allocation49_spill] sm:$0xff] }
0x1264   :  { %4098 = vrot.lane.b32.xlu1 %v4090_v8, %s6532_s3  ;;  %v4160_v41 = vpop.permute.xlu1 %4159  ;;  %v10912_v8 = vld [vmem:[#allocation31_spill] sm:$0xff] }
0x1265   :  { %v4171_v27 = vmul.f32 %v4160_v41, %v10907_v17  ;;  %v4378_v40 = vmul.f32 %v10913_v56, %v10912_v8  ;;  %v4418_v41 = vmul.f32 %v9491_v0, %v10912_v8  ;;  %v4419_v56 = vmul.f32 %v9564_v19, %v10914_v48  ;;  %v10918_v19 = vld [vmem:[#allocation79_spill] sm:$0xff] }
0x1266   :  { %4140 = vrot.lane.b32.xlu0 %v4131_v35, %s6491_s0 }
0x1268   :  { %4138 = vrot.lane.b32.xlu1 %v4130_v5, %s6491_s0 }
0x1269   :  { %v9748_v1 = vpop.permute.xlu1 %4223 }
0x126a   :  { %4180 = vrot.lane.b32.xlu0 %v4171_v27, %s6533_s13 }
0x126c   :  { %4178 = vrot.lane.b32.xlu1 %v4170_v34, %s6533_s13  ;;  %v4458_v34 = vmul.f32 %v10915_v26, %v10912_v8 }
0x126e   :  { %v9758_v35 = vpop.permute.xlu1 %4303  ;;  %4902 = vrot.lane.b32.xlu0 %v4892_v61, %s6533_s13 }
0x1270   :  { %4386 = vrot.lane.b32.xlu1 %v4378_v40, %s6532_s3  ;;  %v10916_v40 = vld [vmem:[#allocation38_spill] sm:$0xff] }
0x1271   :  { %v4666_v17 = vmul.f32 %v10917_v10, %v10916_v40  ;;  %v10920_v10 = vld [vmem:[#allocation100_spill] sm:$0xff] }
0x1273   :  { %v4368_v5 = vpop.permute.xlu1 %4367 }
0x1274   :  { %v4379_v27 = vmul.f32 %v4368_v5, %v10914_v48  ;;  %4426 = vrot.lane.b32.xlu1 %v4418_v41, %s6491_s0  ;;  %v4706_v5 = vmul.f32 %v9506_v38, %v10916_v40 }
0x1276   :  { %4388 = vrot.lane.b32.xlu0 %v4379_v27, %s6532_s3  ;;  %v10919_v27 = vld [vmem:[#allocation73_spill] sm:$0xff] }
0x1277   :  { %v4954_v26 = vmul.f32 %v10919_v27, %v10918_v19 }
0x1278   :  { %4466 = vrot.lane.b32.xlu1 %v4458_v34, %s6533_s13  ;;  %v4448_v61 = vpop.permute.xlu1 %4447  ;;  %v4746_v34 = vmul.f32 %v10920_v10, %v10916_v40  ;;  %v4173_v10 = vmul.f32 %v9601_v20, %v6941_v50  ;;  %v10922_v20 = vld [vmem:[#allocation97_spill] sm:$0xff] }
0x1279   :  { %v4459_v0 = vmul.f32 %v4448_v61, %v10914_v48  ;;  %v10921_v61 = vld [vmem:[#allocation42_spill] sm:$0xff] }
0x127a   :  { %4428 = vrot.lane.b32.xlu0 %v4419_v56, %s6491_s0  ;;  %v4707_v27 = vmul.f32 %v9577_v53, %v10921_v61  ;;  %v4994_v53 = vmul.f32 %v9533_v25, %v10918_v19 }
0x127c   :  { %4674 = vrot.lane.b32.xlu1 %v4666_v17, %s6532_s3  ;;  %v3949_v17 = vmul.f32 %v9581_v60, %v10881_v63 }
0x127d   :  { %v9777_v41 = vpop.permute.xlu1 %4511 }
0x127e   :  { %4468 = vrot.lane.b32.xlu0 %v4459_v0, %s6533_s13 }
0x1280   :  { %4714 = vrot.lane.b32.xlu1 %v4706_v5, %s6491_s0  ;;  %v4133_v5 = vmul.f32 %v9462_v42, %v6941_v50  ;;  %v4237_v42 = vmul.f32 %v9608_v29, %v6938_v46  ;;  %v4461_v29 = vmul.f32 %v9630_v16, %v6944_v51 }
0x1282   :  { %v9787_v56 = vpop.permute.xlu1 %4591  ;;  %4962 = vrot.lane.b32.xlu0 %v4954_v26, %s6532_s3 }
0x1284   :  { %4754 = vrot.lane.b32.xlu1 %v4746_v34, %s6533_s13 }
0x1287   :  { %v4656_v38 = vpop.permute.xlu1 %4655 }
0x1288   :  { %v4667_v0 = vmul.f32 %v4656_v38, %v10921_v61  ;;  %3960 = vrot.lane.b32.xlu1 %v3949_v17, %s6532_s3  ;;  %v4421_v17 = vmul.f32 %v10922_v20, %v6944_v51 }
0x128a   :  { %4676 = vrot.lane.b32.xlu0 %v4667_v0, %s6532_s3  ;;  %v10923_v0 = vld [vmem:[#allocation67_spill] sm:$0xff] }
0x128c   :  { %4144 = vrot.lane.b32.xlu1 %v4133_v5, %s6491_s0  ;;  %v4736_v26 = vpop.permute.xlu1 %4735  ;;  %v10924_v5 = vld [vmem:[#allocation83_spill] sm:$0xff] }
0x128d   :  { %v4747_v60 = vmul.f32 %v4736_v26, %v10921_v61  ;;  %v5034_v26 = vmul.f32 %v9542_v23, %v10918_v19  ;;  %v10927_v23 = vld [vmem:[#allocation87_spill] sm:$0xff] }
0x128e   :  { %4716 = vrot.lane.b32.xlu0 %v4707_v27, %s6491_s0  ;;  %v4956_v27 = vmul.f32 %v10924_v5, %v10923_v0  ;;  %v4749_v5 = vmul.f32 %v9657_v4, %v10766_v47 }
0x1290   :  { %4184 = vrot.lane.b32.xlu1 %v4173_v10, %s6533_s13  ;;  %v4525_v10 = vmul.f32 %v9637_v39, %v10750_v24 }
0x1291   :  { %v9806_v34 = vpop.permute.xlu1 %4799 }
0x1292   :  { %4756 = vrot.lane.b32.xlu0 %v4747_v60, %s6533_s13  ;;  %v10925_v60 = vld [vmem:[#allocation37_spill] sm:$0xff] }
0x1294   :  { %4248 = vrot.lane.b32.xlu1 %v4237_v42, %s6532_s3  ;;  %v4996_v42 = vmul.f32 %v10925_v60, %v10923_v0 }
0x1296   :  { %v9816_v38 = vpop.permute.xlu1 %4879  ;;  %5002 = vrot.lane.b32.xlu0 %v4994_v53, %s6491_s0  ;;  %v10926_v53 = vld [vmem:[#allocation66_spill] sm:$0xff] }
0x1297   :  { %v4709_v20 = vmul.f32 %v10926_v53, %v10766_v47 }
0x1298   :  { %4432 = vrot.lane.b32.xlu1 %v4421_v17, %s6491_s0  ;;  %v5036_v17 = vmul.f32 %v10927_v23, %v10923_v0  ;;  %v10933_v0 = vld [vmem:[#allocation75_spill] sm:$0xff] }
0x1299   :  { %v4068_v19 = vmul.f32 %v10933_v0, %v7281_v28  ;;  %v10934_v28 = vld [vmem:[#allocation55_spill] sm:$0xff] }
0x129a   :  { %4966 = vrot.lane.b32.xlu0 %v4956_v27, %s6532_s3  ;;  %v9852_v27 = vld [vmem:[%s10127_s18] ss:$0 sm:$0xff]  ;;  %v4212_v0 = vmul.f32 %v10934_v28, %v7295_v18  ;;  %v10936_v18 = vld [vmem:[#allocation65_spill] sm:$0xff] }
0x129b   :  { %v9825_v25 = vpop.permute.xlu1 %4943 }
0x129c   :  { %4472 = vrot.lane.b32.xlu1 %v4461_v29, %s6533_s13  ;;  %v10928_v29 = vld [vmem:[#allocation94_spill] sm:$0xff] }
0x129e   :  { %5042 = vrot.lane.b32.xlu0 %v5034_v26, %s6533_s13  ;;  %v9856_v26 = vadd.f32 %v9852_v27, %v10928_v29 }
0x12a0   :  { %4536 = vrot.lane.b32.xlu1 %v4525_v10, %s6532_s3  ;;  %v9836_v16 = vpop.permute.xlu1 %4983  ;;  %10929 = vst [vmem:[#allocation76_spill] sm:$0xff] %v9856_v26  ;;  %v10930_v10 = vld [vmem:[#allocation46_spill] sm:$0xff] }
0x12a1   :  { %v4813_v60 = vmul.f32 %v9663_v52, %v10930_v10  ;;  %v4853_v4 = vmul.f32 %v9500_v43, %v10930_v10 }
0x12a2   :  { %5006 = vrot.lane.b32.xlu0 %v4996_v42, %s6491_s0 }
0x12a4   :  { %4720 = vrot.lane.b32.xlu1 %v4709_v20, %s6491_s0  ;;  %v10931_v20 = vld [vmem:[#allocation90_spill] sm:$0xff] }
0x12a5   :  { %v9844_v39 = vpop.permute.xlu1 %4199  ;;  %v3928_v23 = vmul.f32 %v10931_v20, %v7269_v12 }
0x12a6   :  { %5046 = vrot.lane.b32.xlu0 %v5036_v17, %s6533_s13  ;;  %v10932_v17 = vld [vmem:[#allocation32_spill] sm:$0xff] }
0x12a7   :  { %v3947_v52 = vmul.f32 %v9535_v3, %v10932_v17  ;;  %v3968_v29 = vadd.f32 %v9626_v32, %v3928_v23  ;;  %v4027_v12 = vmul.f32 %v9730_v54, %v10932_v17  ;;  %v4893_v32 = vmul.f32 %v9669_v7, %v10930_v10 }
0x12a8   :  { %4760 = vrot.lane.b32.xlu1 %v4749_v5, %s6533_s13 }
0x12aa   :  { %v9861_v42 = vpop.permute.xlu1 %4487  ;;  %5170 = vrot.lane.b32.xlu0 %v9856_v26, %s6491_s0 }
0x12ac   :  { %4824 = vrot.lane.b32.xlu1 %v4813_v60, %s6532_s3  ;;  %v3987_v60 = vmul.f32 %v9723_v31, %v10932_v17  ;;  %v9887_v31 = vpop.permute.xlu0 %4242 }
0x12af   :  { %v9868_v53 = vpop.permute.xlu1 %4775 }
0x12b0   :  { %4864 = vrot.lane.b32.xlu1 %v4853_v4, %s6491_s0  ;;  %v9896_v7 = vpop.permute.xlu0 %4282 }
0x12b3   :  { %v3999_v5 = vpop.permute.xlu1 %3998 }
0x12b4   :  { %3956 = vrot.lane.b32.xlu1 %v3947_v52, %s6532_s3  ;;  %v4008_v26 = vadd.f32 %v3999_v5, %v3968_v29 }
0x12b7   :  { %v4039_v43 = vpop.permute.xlu1 %4038 }
0x12b8   :  { %v4048_v4 = vadd.f32 %v4039_v43, %v4008_v26  ;;  %3996 = vrot.lane.b32.xlu1 %v3987_v60, %s6491_s0  ;;  %v10935_v26 = vld [vmem:[#allocation33_spill] sm:$0xff] }
0x12b9   :  { %v4235_v54 = vmul.f32 %v9748_v1, %v10935_v26  ;;  %v4275_v43 = vmul.f32 %v9553_v6, %v10935_v26  ;;  %v4356_v1 = vmul.f32 %v10936_v18, %v10740_v62  ;;  %v10938_v62 = vld [vmem:[#allocation86_spill] sm:$0xff] }
0x12ba   :  { %v4072_v3 = vadd.f32 %v4068_v19, %v4048_v4 }
0x12bb   :  { %v4103_v20 = vpop.permute.xlu1 %4102 }
0x12bc   :  { %4036 = vrot.lane.b32.xlu1 %v4027_v12, %s6533_s13  ;;  %v4112_v23 = vadd.f32 %v4103_v20, %v4072_v3 }
0x12bf   :  { %v4143_v52 = vpop.permute.xlu1 %4142 }
0x12c0   :  { %v4152_v5 = vadd.f32 %v4143_v52, %v4112_v23  ;;  %4904 = vrot.lane.b32.xlu1 %v4893_v32, %s6533_s13  ;;  %v4323_v32 = vpop.permute.xlu0 %4322 }
0x12c2   :  { %v4192_v19 = vadd.f32 %v9635_v33, %v4152_v5  ;;  %v4315_v33 = vmul.f32 %v9758_v35, %v10935_v26  ;;  %v10937_v5 = vld [vmem:[#allocation40_spill] sm:$0xff] }
0x12c3   :  { %v4287_v29 = vpop.permute.xlu1 %4286  ;;  %v4523_v6 = vmul.f32 %v9777_v41, %v10937_v5  ;;  %v4563_v35 = vmul.f32 %v9571_v37, %v10937_v5  ;;  %v4603_v41 = vmul.f32 %v9787_v56, %v10937_v5 }
0x12c4   :  { %v4216_v60 = vadd.f32 %v4212_v0, %v4192_v19  ;;  %4244 = vrot.lane.b32.xlu1 %v4235_v54, %s6532_s3  ;;  %v9910_v54 = vpop.permute.xlu0 %4530  ;;  %v4500_v19 = vmul.f32 %v10938_v62, %v10747_v55  ;;  %v10939_v55 = vld [vmem:[#allocation45_spill] sm:$0xff] }
0x12c5   :  { %v4644_v37 = vmul.f32 %v10939_v55, %v10761_v45  ;;  %v10941_v45 = vld [vmem:[#allocation41_spill] sm:$0xff] }
0x12c6   :  { %v4256_v4 = vadd.f32 %v9640_v2, %v4216_v60 }
0x12c7   :  { %v4327_v12 = vpop.permute.xlu1 %4326 }
0x12c8   :  { %v4296_v3 = vadd.f32 %v4287_v29, %v4256_v4  ;;  %4284 = vrot.lane.b32.xlu1 %v4275_v43, %s6491_s0 }
0x12ca   :  { %v4336_v20 = vadd.f32 %v4327_v12, %v4296_v3  ;;  %v9921_v12 = vpop.permute.xlu0 %4570 }
0x12cb   :  { %v4391_v23 = vpop.permute.xlu1 %4390 }
0x12cc   :  { %v4360_v52 = vadd.f32 %v4356_v1, %v4336_v20  ;;  %4324 = vrot.lane.b32.xlu1 %v4315_v33, %s6533_s13  ;;  %v10940_v1 = vld [vmem:[#allocation48_spill] sm:$0xff] }
0x12ce   :  { %v4400_v2 = vadd.f32 %v4391_v23, %v4360_v52  ;;  %v4611_v56 = vpop.permute.xlu0 %4610 }
0x12cf   :  { %v4431_v28 = vpop.permute.xlu1 %4430 }
0x12d0   :  { %v4440_v0 = vadd.f32 %v4431_v28, %v4400_v2  ;;  %4532 = vrot.lane.b32.xlu1 %v4523_v6, %s6532_s3  ;;  %v4066_v2 = vmul.f32 %v9551_v21, %v10908_v15 }
0x12d2   :  { %v4480_v29 = vadd.f32 %v9644_v59, %v4440_v0  ;;  %v4957_v59 = vmul.f32 %v9675_v9, %v10940_v1  ;;  %v4811_v9 = vmul.f32 %v9806_v34, %v10941_v45  ;;  %v4070_v0 = vadd.f32 %v4066_v2, %v9681_v22  ;;  %v9939_v62 = vpop.permute.xlu0 %4818  ;;  %v10942_v22 = vld [vmem:[#allocation91_spill] sm:$0xff] }
0x12d3   :  { %v4575_v60 = vpop.permute.xlu1 %4574  ;;  %v4891_v34 = vmul.f32 %v9816_v38, %v10941_v45 }
0x12d4   :  { %v4504_v43 = vadd.f32 %v4500_v19, %v4480_v29  ;;  %4572 = vrot.lane.b32.xlu1 %v4563_v35, %s6491_s0 }
0x12d6   :  { %v4544_v4 = vadd.f32 %v9649_v36, %v4504_v43  ;;  %v4997_v36 = vmul.f32 %v9689_v49, %v10940_v1  ;;  %v4851_v49 = vmul.f32 %v9583_v14, %v10941_v45  ;;  %v9945_v21 = vpop.permute.xlu0 %4858  ;;  %v4210_v43 = vmul.f32 %v10942_v22, %v7373_v11 }
0x12d7   :  { %v4615_v3 = vpop.permute.xlu1 %4614 }
0x12d8   :  { %v4584_v18 = vadd.f32 %v4575_v60, %v4544_v4  ;;  %4612 = vrot.lane.b32.xlu1 %v4603_v41, %s6533_s13  ;;  %v10943_v4 = vld [vmem:[#allocation43_spill] sm:$0xff] }
0x12d9   :  { %v4995_v38 = vmul.f32 %v9836_v16, %v10943_v4  ;;  %v5037_v16 = vmul.f32 %v9694_v58, %v10940_v1 }
0x12da   :  { %v4624_v33 = vadd.f32 %v4615_v3, %v4584_v18  ;;  %v4955_v3 = vmul.f32 %v9825_v25, %v10943_v4  ;;  %v9954_v18 = vpop.permute.xlu0 %4898 }
0x12db   :  { %v4679_v20 = vpop.permute.xlu1 %4678 }
0x12dc   :  { %v4648_v23 = vadd.f32 %v4644_v37, %v4624_v33  ;;  %4968 = vrot.lane.b32.xlu1 %v4957_v59, %s6532_s3  ;;  %v4354_v33 = vmul.f32 %v9562_v30, %v10912_v8  ;;  %v10944_v30 = vld [vmem:[#allocation44_spill] sm:$0xff] }
0x12dd   :  { %v4498_v8 = vmul.f32 %v10944_v30, %v10744_v13  ;;  %v4642_v13 = vmul.f32 %v9569_v57, %v10916_v40 }
0x12de   :  { %v4688_v52 = vadd.f32 %v4679_v20, %v4648_v23  ;;  %v4001_v25 = vpop.permute.xlu0 %4000  ;;  %v5035_v23 = vmul.f32 %v9593_v44, %v10943_v4 }
0x12df   :  { %v4719_v6 = vpop.permute.xlu1 %4718 }
0x12e0   :  { %v9933_v28 = vadd.f32 %v4719_v6, %v4688_v52  ;;  %5008 = vrot.lane.b32.xlu1 %v4997_v36, %s6491_s0 }
0x12e2   :  { %v4041_v6 = vpop.permute.xlu0 %4040 }
0x12e3   :  { %v4099_v19 = vpop.permute.xlu1 %4098 }
0x12e4   :  { %v4110_v35 = vadd.f32 %v4099_v19, %v4070_v0  ;;  %4820 = vrot.lane.b32.xlu1 %v4811_v9, %s6532_s3  ;;  %v10945_v9 = vld [vmem:[#allocation51_spill] sm:$0xff] }
0x12e5   :  { %v9974_v44 = vadd.f32 %v9852_v27, %v10945_v9 }
0x12e6   :  { %v4105_v19 = vpop.permute.xlu0 %4104 }
0x12e7   :  { %v4139_v29 = vpop.permute.xlu1 %4138 }
0x12e8   :  { %v4150_v15 = vadd.f32 %v4139_v29, %v4110_v35  ;;  %4860 = vrot.lane.b32.xlu1 %v4851_v49, %s6491_s0 }
0x12eb   :  { %v4179_v60 = vpop.permute.xlu1 %4178 }
0x12ec   :  { %v4190_v41 = vadd.f32 %v4179_v60, %v4150_v15  ;;  %4900 = vrot.lane.b32.xlu1 %v4891_v34, %s6533_s13  ;;  %v4289_v34 = vpop.permute.xlu0 %4288  ;;  %v10946_v60 = vld [vmem:[#allocation36_spill] sm:$0xff] }
0x12ed   :  { %v3929_v27 = vmul.f32 %v10946_v60, %v10881_v63 }
0x12ee   :  { %v4214_v14 = vadd.f32 %v4210_v43, %v4190_v41 }
0x12ef   :  { %v4387_v55 = vpop.permute.xlu1 %4386 }
0x12f0   :  { %v4254_v37 = vadd.f32 %v9887_v31, %v4214_v14  ;;  %4964 = vrot.lane.b32.xlu1 %v4955_v3, %s6532_s3  ;;  %v4329_v14 = vpop.permute.xlu0 %4328 }
0x12f2   :  { %v4294_v59 = vadd.f32 %v9896_v7, %v4254_v37 }
0x12f3   :  { %v4427_v11 = vpop.permute.xlu1 %4426 }
0x12f4   :  { %v4334_v20 = vadd.f32 %v4323_v32, %v4294_v59  ;;  %5004 = vrot.lane.b32.xlu1 %v4995_v38, %s6491_s0  ;;  %v10947_v38 = vld [vmem:[#allocation56_spill] sm:$0xff]  ;;  %v4393_v40 = vpop.permute.xlu0 %4392 }
0x12f6   :  { %v4358_v36 = vadd.f32 %v4354_v33, %v4334_v20 }
0x12f7   :  { %v4467_v31 = vpop.permute.xlu1 %4466 }
0x12f8   :  { %v4398_v52 = vadd.f32 %v4387_v55, %v4358_v36  ;;  %5044 = vrot.lane.b32.xlu1 %v5035_v23, %s6533_s13  ;;  %v10948_v23 = vld [vmem:[#allocation62_spill] sm:$0xff] }
0x12f9   :  { %v4213_v36 = vmul.f32 %v10948_v23, %v6938_v46  ;;  %v10950_v46 = vld [vmem:[#allocation70_spill] sm:$0xff] }
0x12fa   :  { %v4438_v7 = vadd.f32 %v4427_v11, %v4398_v52  ;;  %v4577_v52 = vpop.permute.xlu0 %4576 }
0x12fb   :  { %v4675_v2 = vpop.permute.xlu1 %4674 }
0x12fc   :  { %v4478_v32 = vadd.f32 %v4467_v31, %v4438_v7  ;;  %5048 = vrot.lane.b32.xlu1 %v5037_v16, %s6533_s13 }
0x12fe   :  { %v4502_v0 = vadd.f32 %v4498_v8, %v4478_v32  ;;  %v10949_v8 = vld [vmem:[#allocation93_spill] sm:$0xff] }
0x12ff   :  { %v4715_v35 = vpop.permute.xlu1 %4714 }
0x1300   :  { %v4542_v49 = vadd.f32 %v9910_v54, %v4502_v0  ;;  %5172 = vrot.lane.b32.xlu1 %v9974_v44, %s6491_s0 }
0x1302   :  { %v4582_v58 = vadd.f32 %v9921_v12, %v4542_v49  ;;  %v4069_v12 = vmul.f32 %v10947_v38, %v6941_v50 }
0x1303   :  { %v4755_v29 = vpop.permute.xlu1 %4754 }
0x1304   :  { %v4622_v15 = vadd.f32 %v4611_v56, %v4582_v58 }
0x1306   :  { %v4646_v22 = vadd.f32 %v4642_v13, %v4622_v15  ;;  %v4501_v13 = vmul.f32 %v10950_v46, %v10750_v24 }
0x1307   :  { %v3961_v43 = vpop.permute.xlu1 %3960 }
0x1308   :  { %v4686_v41 = vadd.f32 %v4675_v2, %v4646_v22  ;;  %v3969_v3 = vadd.f32 %v3961_v43, %v3929_v27  ;;  %v4617_v2 = vpop.permute.xlu0 %4616 }
0x130a   :  { %v4726_v54 = vadd.f32 %v4715_v35, %v4686_v41  ;;  %v4009_v55 = vadd.f32 %v4001_v25, %v3969_v3 }
0x130b   :  { %v4145_v37 = vpop.permute.xlu1 %4144 }
0x130c   :  { %v9986_v59 = vadd.f32 %v4755_v29, %v4726_v54  ;;  %v4049_v11 = vadd.f32 %v4041_v6, %v4009_v55  ;;  %v4357_v6 = vmul.f32 %v10949_v8, %v6944_v51  ;;  %v4681_v0 = vpop.permute.xlu0 %4680  ;;  %v10951_v51 = vld [vmem:[#allocation77_spill] sm:$0xff] }
0x130d   :  { %v4645_v3 = vmul.f32 %v10951_v51, %v10766_v47 }
0x130e   :  { %v4073_v57 = vadd.f32 %v4069_v12, %v4049_v11 }
0x130f   :  { %v4185_v56 = vpop.permute.xlu1 %4184 }
0x1310   :  { %v4113_v33 = vadd.f32 %v4105_v19, %v4073_v57  ;;  %v4101_v58 = vpop.permute.xlu0 %4100  ;;  %v10952_v57 = vld [vmem:[#allocation95_spill] sm:$0xff] }
0x1311   :  { %v4789_v24 = vmul.f32 %v10952_v57, %v10930_v10 }
0x1312   :  { %v4153_v20 = vadd.f32 %v4145_v37, %v4113_v33  ;;  %v10953_v33 = vld [vmem:[#allocation50_spill] sm:$0xff] }
0x1313   :  { %v4249_v63 = vpop.permute.xlu1 %4248 }
0x1314   :  { %v4193_v31 = vadd.f32 %v4185_v56, %v4153_v20  ;;  %v3927_v20 = vmul.f32 %v10953_v33, %v10932_v17  ;;  %v10959_v33 = vld [vmem:[#allocation54_spill] sm:$0xff] }
0x1316   :  { %v4217_v16 = vadd.f32 %v4213_v36, %v4193_v31 }
0x1317   :  { %v4433_v25 = vpop.permute.xlu1 %4432 }
0x1318   :  { %v4257_v7 = vadd.f32 %v4249_v63, %v4217_v16 }
0x131a   :  { %v4297_v30 = vadd.f32 %v4289_v34, %v4257_v7  ;;  %v4141_v34 = vpop.permute.xlu0 %4140  ;;  %v10954_v7 = vld [vmem:[#allocation34_spill] sm:$0xff] }
0x131b   :  { %v4473_v50 = vpop.permute.xlu1 %4472 }
0x131c   :  { %v4337_v32 = vadd.f32 %v4329_v14, %v4297_v30 }
0x131e   :  { %v4361_v9 = vadd.f32 %v4357_v6, %v4337_v32  ;;  %v4181_v55 = vpop.permute.xlu0 %4180 }
0x131f   :  { %v4537_v19 = vpop.permute.xlu1 %4536 }
0x1320   :  { %v4401_v35 = vadd.f32 %v4393_v40, %v4361_v9 }
0x1322   :  { %v4441_v49 = vadd.f32 %v4433_v25, %v4401_v35  ;;  %v9998_v56 = vpop.permute.xlu0 %4902 }
0x1323   :  { %v4721_v29 = vpop.permute.xlu1 %4720 }
0x1324   :  { %v4481_v15 = vadd.f32 %v4473_v50, %v4441_v49 }
0x1326   :  { %v4505_v60 = vadd.f32 %v4501_v13, %v4481_v15  ;;  %v4389_v31 = vpop.permute.xlu0 %4388 }
0x1327   :  { %v4761_v27 = vpop.permute.xlu1 %4760 }
0x1328   :  { %v4545_v22 = vadd.f32 %v4537_v19, %v4505_v60 }
0x132a   :  { %v4585_v43 = vadd.f32 %v4577_v52, %v4545_v22  ;;  %v4429_v8 = vpop.permute.xlu0 %4428 }
0x132b   :  { %v4825_v41 = vpop.permute.xlu1 %4824 }
0x132c   :  { %v4625_v14 = vadd.f32 %v4617_v2, %v4585_v43  ;;  %v10955_v2 = vld [vmem:[#allocation59_spill] sm:$0xff] }
0x132d   :  { %v4067_v30 = vmul.f32 %v10955_v2, %v10954_v7 }
0x132e   :  { %v4649_v54 = vadd.f32 %v4645_v3, %v4625_v14  ;;  %v4469_v35 = vpop.permute.xlu0 %4468 }
0x132f   :  { %v4865_v37 = vpop.permute.xlu1 %4864 }
0x1330   :  { %v4689_v38 = vadd.f32 %v4681_v0, %v4649_v54  ;;  %v4211_v0 = vmul.f32 %v9844_v39, %v10935_v26  ;;  %v4499_v39 = vmul.f32 %v9861_v42, %v10937_v5 }
0x1332   :  { %v4729_v12 = vadd.f32 %v4721_v29, %v4689_v38  ;;  %v4963_v15 = vpop.permute.xlu0 %4962 }
0x1333   :  { %v3957_v11 = vpop.permute.xlu1 %3956 }
0x1334   :  { %v4769_v40 = vadd.f32 %v4761_v27, %v4729_v12  ;;  %v3967_v47 = vadd.f32 %v3957_v11, %v3927_v20  ;;  %v10956_v27 = vld [vmem:[#allocation53_spill] sm:$0xff]  ;;  %v10958_v11 = vld [vmem:[#allocation84_spill] sm:$0xff]  ;;  %v4643_v20 = vmul.f32 %v10959_v33, %v10921_v61  ;;  %v4787_v61 = vmul.f32 %v9868_v53, %v10941_v45 }
0x1335   :  { %v4355_v22 = vmul.f32 %v10956_v27, %v10914_v48  ;;  %v10957_v12 = vld [vmem:[#allocation85_spill] sm:$0xff] }
0x1336   :  { %v4793_v63 = vadd.f32 %v4789_v24, %v4769_v40  ;;  %v4677_v51 = vpop.permute.xlu0 %4676  ;;  %v4786_v57 = vmul.f32 %v10958_v11, %v10957_v12  ;;  %v10966_v45 = vld [vmem:[#allocation61_spill] sm:$0xff] }
0x1337   :  { %v3997_v23 = vpop.permute.xlu1 %3996 }
0x1338   :  { %v4833_v36 = vadd.f32 %v4825_v41, %v4793_v63  ;;  %v4007_v16 = vadd.f32 %v3997_v23, %v3967_v47  ;;  %v4790_v63 = vadd.f32 %v4786_v57, %v9986_v59 }
0x133a   :  { %v10002_v52 = vadd.f32 %v4865_v37, %v4833_v36  ;;  %v4717_v54 = vpop.permute.xlu0 %4716  ;;  %v4830_v42 = vadd.f32 %v9939_v62, %v4790_v63 }
0x133b   :  { %v4037_v25 = vpop.permute.xlu1 %4036 }
0x133c   :  { %v4047_v50 = vadd.f32 %v4037_v25, %v4007_v16  ;;  %v10960_v16 = vld [vmem:[#allocation71_spill] sm:$0xff]  ;;  %v4870_v59 = vadd.f32 %v9945_v21, %v4830_v42  ;;  %v4931_v21 = vmul.f32 %v10966_v45, %v10943_v4 }
0x133d   :  { %v4768_v25 = vadd.f32 %v10960_v16, %v9933_v28  ;;  %v10964_v28 = vld [vmem:[#allocation39_spill] sm:$0xff]  ;;  %v10971_v16 = vmov 0.0  }
0x133e   :  { %v4071_v10 = vadd.f32 %v4067_v30, %v4047_v50  ;;  %v4757_v48 = vpop.permute.xlu0 %4756  ;;  %v10961_v30 = vld [vmem:[#allocation80_spill] sm:$0xff] }
0x133f   :  { %v10006_v6 = vpop.permute.xlu1 %4904  ;;  %v10962_v50 = vld [vmem:[#allocation64_spill] sm:$0xff] }
0x1340   :  { %v4111_v32 = vadd.f32 %v4101_v58, %v4071_v10  ;;  %v4788_v10 = vmul.f32 %v10962_v50, %v10961_v30  ;;  %v10973_v30 = vld [vmem:[#allocation72_spill] sm:$0xff] }
0x1342   :  { %v4151_v9 = vadd.f32 %v4141_v34, %v4111_v32  ;;  %v4792_v32 = vadd.f32 %v4788_v10, %v4768_v25  ;;  %v10972_v25 = vld [vmem:[#allocation69_spill] sm:$0xff]  ;;  %v10974_v10 = vld [vmem:[#allocation58_spill] sm:$0xff] }
0x1343   :  { %v4245_v17 = vpop.permute.xlu1 %4244 }
0x1344   :  { %v4191_v19 = vadd.f32 %v4181_v55, %v4151_v9 }
0x1346   :  { %v4215_v49 = vadd.f32 %v4211_v0, %v4191_v19  ;;  %v4910_v0 = vadd.f32 %v9954_v18, %v4870_v59 }
0x1347   :  { %v4285_v29 = vpop.permute.xlu1 %4284 }
0x1348   :  { %v4255_v46 = vadd.f32 %v4245_v17, %v4215_v49 }
0x134a   :  { %v4295_v13 = vadd.f32 %v4285_v29, %v4255_v46  ;;  %v10965_v29 = vld [vmem:[#allocation60_spill] sm:$0xff] }
0x134b   :  { %v4325_v60 = vpop.permute.xlu1 %4324  ;;  %v4832_v46 = vadd.f32 %v10965_v29, %v4792_v32 }
0x134c   :  { %v4335_v43 = vadd.f32 %v4325_v60, %v4295_v13 }
0x134e   :  { %v4359_v41 = vadd.f32 %v4355_v22, %v4335_v43  ;;  %v10967_v43 = vld [vmem:[#allocation82_spill] sm:$0xff] }
0x134f   :  { %v4533_v58 = vpop.permute.xlu1 %4532 }
0x1350   :  { %v4399_v34 = vadd.f32 %v4389_v31, %v4359_v41  ;;  %v5003_v31 = vpop.permute.xlu0 %5002  ;;  %v4872_v41 = vadd.f32 %v10967_v43, %v4832_v46 }
0x1352   :  { %v4439_v3 = vadd.f32 %v4429_v8, %v4399_v34  ;;  %v4912_v18 = vadd.f32 %v9998_v56, %v4872_v41 }
0x1353   :  { %v4573_v14 = vpop.permute.xlu1 %4572 }
0x1354   :  { %v4479_v26 = vadd.f32 %v4469_v35, %v4439_v3  ;;  %v4967_v17 = vpop.permute.xlu0 %4966  ;;  %v10963_v35 = vld [vmem:[#allocation79_spill] sm:$0xff]  ;;  %v4913_v3 = vadd.f32 %v10006_v6, %v10002_v52 }
0x1355   :  { %v4930_v49 = vmul.f32 %v10964_v28, %v10963_v35 }
0x1356   :  { %v4503_v55 = vadd.f32 %v4499_v39, %v4479_v26  ;;  %v10968_v26 = vld [vmem:[#allocation67_spill] sm:$0xff] }
0x1357   :  { %v4613_v37 = vpop.permute.xlu1 %4612  ;;  %v4934_v27 = vadd.f32 %v4930_v49, %v4910_v0  ;;  %v6229_v49 = vld [vmem:[%s10125_s16] ss:$0 sm:$0xff] }
0x1358   :  { %v4543_v38 = vadd.f32 %v4533_v58, %v4503_v55  ;;  %v5043_v53 = vpop.permute.xlu0 %5042 }
0x1359   :  { %v4974_v58 = vadd.f32 %v4963_v15, %v4934_v27 }
0x135a   :  { %v4583_v24 = vadd.f32 %v4573_v14, %v4543_v38 }
0x135b   :  { %v4969_v40 = vpop.permute.xlu1 %4968  ;;  %v5014_v12 = vadd.f32 %v5003_v31, %v4974_v58  ;;  %v6227_v31 = vld [vmem:[#allocation3] sm:$0xff]  }
0x135c   :  { %v4623_v23 = vadd.f32 %v4613_v37, %v4583_v24  ;;  %v5007_v14 = vpop.permute.xlu0 %5006  ;;  %v10970_v37 = vld [vmem:[#allocation81_spill] sm:$0xff] }
0x135d   :  { %v4933_v38 = vmul.f32 %v10970_v37, %v10940_v1  ;;  %v5054_v33 = vadd.f32 %v5043_v53, %v5014_v12 }
0x135e   :  { %v4647_v36 = vadd.f32 %v4643_v20, %v4623_v23 }
0x135f   :  { %v5009_v47 = vpop.permute.xlu1 %5008  ;;  %v4937_v57 = vadd.f32 %v4933_v38, %v4913_v3 }
0x1360   :  { %v4687_v5 = vadd.f32 %v4677_v51, %v4647_v36  ;;  %v5047_v63 = vpop.permute.xlu0 %5046 }
0x1361   :  { %v4977_v56 = vadd.f32 %v4969_v40, %v4937_v57  ;;  %v5255_v57 = vld [vmem:[%s10977_s1] sm:$0x3] }
0x1362   :  { %v4727_v7 = vadd.f32 %v4717_v54, %v4687_v5  ;;  %v10969_v54 = vld [vmem:[#allocation89_spill] sm:$0xff] }
0x1363   :  { %v4821_v2 = vpop.permute.xlu1 %4820  ;;  %v4932_v55 = vmul.f32 %v10969_v54, %v10968_v26  ;;  %v5017_v6 = vadd.f32 %v5009_v47, %v4977_v56 }
0x1364   :  { %v4767_v8 = vadd.f32 %v4757_v48, %v4727_v7  ;;  %v5171_v3 = vpop.permute.xlu0 %5170 }
0x1365   :  { %v4936_v11 = vadd.f32 %v4932_v55, %v4912_v18 }
0x1366   :  { %v4791_v9 = vadd.f32 %v4787_v61, %v4767_v8  ;;  %v6228_v8 = vld [vmem:[#allocation17] ss:$0 sm:$0xff] }
0x1367   :  { %v4861_v62 = vpop.permute.xlu1 %4860  ;;  %v4976_v48 = vadd.f32 %v4967_v17, %v4936_v11 }
0x1368   :  { %v4831_v19 = vadd.f32 %v4821_v2, %v4791_v9  ;;  %v10975_v9 = vld [vmem:[#allocation74_spill] sm:$0xff] }
0x1369   :  { %v5016_v52 = vadd.f32 %v5007_v14, %v4976_v48 }
0x136a   :  { %v4871_v13 = vadd.f32 %v4861_v62, %v4831_v19 }
0x136b   :  { %v4901_v60 = vpop.permute.xlu1 %4900  ;;  %v5056_v42 = vadd.f32 %v5047_v63, %v5016_v52  ;;  %v10979_v52 = vld [vmem:[#allocation63_spill] sm:$0xff] }
0x136c   :  { %v4911_v22 = vadd.f32 %v4901_v60, %v4871_v13  ;;  %v10976_v60 = vld [vmem:[#allocation76_spill] sm:$0xff] }
0x136e   :  { %v4935_v34 = vadd.f32 %v4931_v21, %v4911_v22 }
0x136f   :  { %v4965_v51 = vpop.permute.xlu1 %4964 }
0x1370   :  { %v4975_v4 = vadd.f32 %v4965_v51, %v4935_v34 }
0x1373   :  { %v5005_v39 = vpop.permute.xlu1 %5004 }
0x1374   :  { %v5015_v24 = vadd.f32 %v5005_v39, %v4975_v4 }
0x1377   :  { %v5045_v15 = vpop.permute.xlu1 %5044 }
0x1378   :  { %v5055_v20 = vadd.f32 %v5045_v15, %v5015_v24  ;;  %v6164_v24 = vld [vmem:[%s10128_s19] sm:$0xff]  }
0x137a   :  { %v5058_v23 = vpack.c.bf16 %v5055_v20, %v5054_v33  ;;  %v10978_v20 = vld [vmem:[#allocation29_spill] sm:$0xff] }
0x137b   :  { %v5049_v36 = vpop.permute.xlu1 %5048 }
0x137c   :  { %v5057_v5 = vadd.f32 %v5049_v36, %v5017_v6  ;;  %5677 = vmatpush3.bf16.msra.mxu1 %v5058_v23 }
0x137d   :  { %5678 = vmatprep.subr.bf16.mxu1 %v10971_v16 }
0x137e   :  { %v5059_v1 = vpack.c.bf16 %v5057_v5, %v5056_v42 }
0x137f   :  { %v5173_v26 = vpop.permute.xlu1 %5172 }
0x1380   :  { %5679 = vmatpush3.bf16.msra.mxu1 %v5059_v1 }
0x1381   :  { %5692 = vmatprep.subr.bf16.mxu1 %v10971_v16 }
0x1383   :  { %5681 = vmatmul.mubr.msk.bf16.vlgmr.msra.gmra.mrb[44].mxu1 %vm490_vm5, %v6227_v31  ;;  %v5206_v31 = vld [vmem:[#allocation6] sm:$0x1] }
0x1384   :  { %5694 = vmatprep.mubr.msk.bf16.mxu1 %vm6499_vm0, %v10971_v16 }
0x1456   :  { %v5094_v40 = vpop.f32.mrb[44].mxu1 }
0x1457   :  { %v5101_v47 = vmul.f32 %v5094_v40, %v10972_v25  ;;  %v5682_v7 = vpop.f32.mrb[45].mxu1  ;;  %v6165_v40 = vld [vmem:[%s10128_s19 + $0x8] sm:$0xff]  }
0x1458   :  { %v5097_v2 = vpop.f32.mrb[46].mxu1 }
0x1459   :  { %v5103_v50 = vadd.f32 %v5101_v47, %v10973_v30  ;;  %v5102_v61 = vmul.f32 %v5097_v2, %v10974_v10  ;;  %v5683_v59 = vpop.f32.mrb[47].mxu1 }
0x145a   :  { %v6167_v59 = vld [vmem:[%s10130_s21 + $0x8] sm:$0xff]  }
0x145b   :  { %v5105_v32 = vadd.f32 %v6228_v8, %v5103_v50  ;;  %v5104_v17 = vadd.f32 %v5102_v61, %v10975_v9  ;;  %v6166_v61 = vld [vmem:[%s10130_s21] sm:$0xff]  }
0x145d   :  { %v5106_v62 = vadd.f32 %v6228_v8, %v5104_v17  ;;  %v5107_v0 = vmax.f32 %v5105_v32, 0.0  ;;  %v5500_v8 = vld [vmem:[%s10129_s20] ss:$0 sm:$0xff]  ;;  %s6534_s20 = smov [#allocation20]  }
0x145e   :  { %s5417_s21 = sshll.u32 %s6534_s20, 4  ;;  %s5418_s21 = int_to_ptr.vmem [resolvable:$true] %s5417_s21 }
0x145f   :  { %v5108_v19 = vmax.f32 %v5106_v62, 0.0  ;;  %p6455_p11 = scmp.lt.s32.totalorder %s5418_s21, %s5418_s21 }
0x1461   :  { %v5109_v35 = vpack.c.bf16 %v5108_v19, %v5107_v0 }
0x1463   :  { %5689 = vmatmul.mubr.msk.bf16.vlgmr.msra.gmra.mrb[48].mxu0 %vm490_vm5, %v5109_v35 }
0x1464   :  { %5702 = vmatprep.mubr.msk.bf16.mxu0 %vm6499_vm0, %v10971_v16  ;;  %5699 = vmatpush3.bf16.msra.mxu0 %v6164_v24 }
0x1465   :  { %5700 = vmatprep.subr.bf16.mxu0 %v10971_v16 }
0x1468   :  { %5701 = vmatpush3.bf16.msra.mxu0 %v6165_v40 }
0x1536   :  { %v5147_v28 = vpop.f32.mrb[48].mxu0 }
0x1537   :  { %v5148_v29 = vadd.f32 %v6229_v49, %v5147_v28  ;;  %v5690_v46 = vpop.f32.mrb[49].mxu0 }
0x1538   :  { %v5150_v13 = vpop.f32.mrb[50].mxu0 }
0x1539   :  { %v5154_v27 = vadd.f32 %v5148_v29, %v10976_v60  ;;  %v5151_v22 = vadd.f32 %v6229_v49, %v5150_v13  ;;  %v5691_v53 = vpop.f32.mrb[51].mxu0 }
0x153b   :  { %v5497_v45 = vmul.f32 -1.442695, %v5154_v27  ;;  %v5155_v21 = vadd.f32 %v5151_v22, %v9974_v44 }
0x153d   :  { %6192 = vpow2.f32 %v5497_v45  ;;  %v5498_v43 = vmul.f32 -1.442695, %v5155_v21 }
0x153f   :  { %6194 = vpow2.f32 %v5498_v43 }
0x1547   :  { %v6193_v41 = vpop.eup %6192 }
0x1548   :  { %v5162_v51 = vadd.f32 1.0, %v6193_v41 }
0x1549   :  { %v6195_v58 = vpop.eup %6194 }
0x154a   :  { %6196 = vrcp.f32 %v5162_v51  ;;  %v5163_v34 = vadd.f32 1.0, %v6195_v58 }
0x154c   :  { %6198 = vrcp.f32 %v5163_v34 }
0x1554   :  { %v6197_v18 = vpop.eup %6196 }
0x1555   :  { %v5176_v14 = vmul.f32 %v6197_v18, %v5171_v3  ;;  %v5190_v11 = vsub.f32 1.0, %v6197_v18  ;;  %v5202_v63 = vmul.f32 %v6197_v18, %v10978_v20 }
0x1556   :  { %v6199_v39 = vpop.eup %6198 }
0x1557   :  { %5180 = vrot.lane.b32.xlu0 %v5176_v14, %s6491_s0  ;;  %v5177_v54 = vmul.f32 %v6199_v39, %v5173_v26  ;;  %v5191_v33 = vsub.f32 1.0, %v6199_v39  ;;  %v5203_v6 = vmul.f32 %v6199_v39, %v10979_v52 }
0x1559   :  { %5182 = vrot.lane.b32.xlu1 %v5177_v54, %s6491_s0 }
0x15c9   :  { %v5181_v44 = vpop.permute.xlu0 %5180 }
0x15ca   :  { %v5186_v55 = vadd.f32 %v5181_v44, %v5148_v29 }
0x15cb   :  { %v5183_v37 = vpop.permute.xlu1 %5182 }
0x15cc   :  { %6200 = vtanh.f32 %v5186_v55  ;;  %v5187_v38 = vadd.f32 %v5183_v37, %v5151_v22 }
0x15ce   :  { %6202 = vtanh.f32 %v5187_v38 }
0x15d6   :  { %v6201_v12 = vpop.eup %6200 }
0x15d7   :  { %5194 = vrot.lane.b32.xlu0 %v6201_v12, %s6532_s3 }
0x15d8   :  { %v6203_v4 = vpop.eup %6202 }
0x15d9   :  { %5196 = vrot.lane.b32.xlu1 %v6203_v4, %s6532_s3 }
0x15dd   :  { %5258 = vperm.xlu1 %6150, %v5255_v57  }
0x1649   :  { %v5195_v15 = vpop.permute.xlu0 %5194 }
0x164a   :  { %v5200_v48 = vmul.f32 %v5195_v15, %v5190_v11 }
0x164b   :  { %v5197_v56 = vpop.permute.xlu1 %5196 }
0x164c   :  { %v5201_v23 = vmul.f32 %v5197_v56, %v5191_v33  ;;  %v5204_v36 = vadd.f32 %v5202_v63, %v5200_v48 }
0x164e   :  { %v5205_v42 = vadd.f32 %v5203_v6, %v5201_v23 }
0x1650   :  { %v5207_v5 = vpack.c.bf16 %v5205_v42, %v5204_v36 }
0x1652   :  { %5209 = vrot.lane.b32.xlu0 %v5207_v5, %s6532_s3 }
0x165c   :  { %v5259_v25 = vpop.permute.xlu1 %5258 }
0x16c4   :  { %v5210_v1 = vpop.permute.xlu0 %5209 }
0x16c5   :  { %5693 = vmatpush3.bf16.msra.mxu1 %v5210_v1 }
0x16c6   :  { %5706 = vmatprep.subr.bf16.mxu1 %v10971_v16 }
0x16c8   :  { %5695 = vmatmul.mubr.msk.bf16.vlgmr.msra.gmra.mrb[48].mxu1 %vm773_vm6, %v5206_v31 }
0x16c9   :  { %5710 = vmatprep.mubr.msk.bf16.mxu1 %vm6499_vm0, %v10971_v16  ;;  %5707 = vmatpush3.bf16.msra.mxu1 %v6166_v61 }
0x16ca   :  { %5708 = vmatprep.subr.bf16.mxu1 %v10971_v16  ;;  %v5504_v16 = vld [vmem:[%s10131_s22] ss:$0 sm:$0xff]  ;;  %s6450_s22 = scalar_lea.vmem %s5418_s21, 32 }
0x16cb   :  { %p6451_p10 = scmp.ne.s32.totalorder %s5418_s21, %s6450_s22  ;;  %p6456_p12 = scmp.lt.s32.totalorder %s6450_s22, %s6450_s22 }
0x16cd   :  { %5709 = vmatpush3.bf16.msra.mxu1 %v6167_v59  ;;  %p6457_p13 = por %p6456_p12, %p6455_p11 }
0x16cf   :  { %p6458_p0 = pnand %p6457_p13, %p6451_p10 }
0x179b   :  { %v5249_v47 = vpop.f32.mrb[48].mxu1 }
0x179c   :  { %v5261_v7 = vmul.f32 %v5259_v25, %v5249_v47  ;;  %v5696_v2 = vpop.f32.mrb[49].mxu1 }
0x179d   :  { %v5252_v30 = vpop.f32.mrb[50].mxu1 }
0x179e   :  { %v5262_v50 = vpack.c.bf16 %v5261_v7, %v5261_v7  ;;  %v5697_v10 = vpop.f32.mrb[51].mxu1 }
0x17a0   :  { %5703 = vmatmul.mubr.msk.bf16.vlgmr.msra.gmra.mrb[52].mxu0 %vm490_vm5, %v5262_v50 }
0x1873   :  { %v5323_v32 = vpop.f32.mrb[52].mxu0 }
0x1874   :  { %v5324_v9 = vadd.f32 %v5500_v8, %v5323_v32  ;;  %v5704_v17 = vpop.f32.mrb[53].mxu0 }
0x1875   :  { %v5326_v62 = vpop.f32.mrb[54].mxu0 }
0x1876   :  { %v5329_v0 = vmax.f32 %v5324_v9, 0.0  ;;  %v5705_v19 = vpop.f32.mrb[55].mxu0 }
0x1878   :  { %v5330_v35 = vpack.c.bf16 %v5329_v0, %v5329_v0 }
0x187a   :  { %5711 = vmatmul.mubr.msk.bf16.vlgmr.msra.gmra.mrb[52].mxu1 %vm490_vm5, %v5330_v35 }
0x194d   :  { %v5391_v28 = vpop.f32.mrb[52].mxu1 }
0x194e   :  { %v5392_v49 = vadd.f32 %v5504_v16, %v5391_v28  ;;  %v5712_v29 = vpop.f32.mrb[53].mxu1 }
0x194f   :  { %v5394_v46 = vpop.f32.mrb[54].mxu1 }
0x1950   :  { %v5398_v13 = vsel %vm5397_vm7, %v5392_v49, -inf  ;;  %v5713_v60 = vpop.f32.mrb[55].mxu1 }
0x1951   :  { %5399 = vmax.xlane.f32.xlu0 %v5398_v13 }
0x19de   :  { %v5400_v27 = vpop.xlane.xlu0 %5399 }
0x19df   :  { %v5401_v22 = vsub.f32 %v5392_v49, %v5400_v27 }
0x19e1   :  { %v5402_v53 = vmul.f32 1.442695, %v5401_v22 }
0x19e3   :  { %6204 = vpow2.f32 %v5402_v53 }
0x19ed   :  { %v6205_v45 = vpop.eup %6204 }
0x19ee   :  { %v5404_v21 = vsel %vm5397_vm7, %v6205_v45, 0.0 }
0x19ef   :  { %5405 = vadd.xlane.f32.xlu1 %v5404_v21 }
0x1a7c   :  { %v5406_v43 = vpop.xlane.xlu1 %5405 }
0x1a7d   :  { %6206 = vlog2.f32 %v5406_v43 }
0x1a87   :  { %v6207_v41 = vpop.eup %6206 }
0x1a88   :  { %v5408_v51 = vmul.f32 0.6931472, %v6207_v41 }
0x1a8a   :  { %v5409_v58 = vsub.f32 %v5401_v22, %v5408_v51 }
0x1a8c   :  { %5410 = vst.msk [vmem:[#allocation20] sm:$0x3] %vm5397_vm7, %v5409_v58 }
0x1a8d   :  { %6461 = shalt.err (!%p6458_p0)
}
0x1a8e   :  { %s6462_s2 = scalar_lea.hbm %s10132_s23, 32 }
0x1a8f   :  { %p6463_p1 = scmp.ne.s32.totalorder %s10132_s23, %s6462_s2  ;;  %p6466_p2 = scmp.lt.u32.totalorder %s6462_s2, %s10132_s23 }
0x1a91   :  { %p6468_p3 = pnand %p6466_p2, %p6463_p1 }
0x1a93   :  { %6471 = shalt.err (!%p6468_p3)
}
0x1a94   :  { %5420 = dma.vmem_to_hbm [thread:$0]  %s5418_s21, 32, %s10132_s23, [#allocation5]  }
0x1a95   :  { %6484 = dma.done.wait [#allocation5], 32  }
0x1a96   :  { %6485 = vsyncadd [#allocation5], 4294967264 }
0x1a97   :  { %5424 = vsyncpa [#allocation4], 1 }
0x1a98   :  { %5425 = vsyncpa [#allocation7], 1 }
0x1a99   :  { %5426 = vsyncpa [#allocation10], 1 }
0x1a9a   :  { %5427 = vsyncpa [#allocation13], 1 }
0x1a9b   :  { %5428 = vsyncpa [#allocation16], 1 }
0x1a9c   :  { %5429 = vsyncpa [#allocation19], 1 }
0x1a9d   :  { %5430 = vsyncpa [#allocation5], 1 }

</bundles_post_ra>
